<compile_context>
chip_gen: v7x
topology: tpu7x:2x2x1
jax: 0.10.0
libtpu: 0.0.40
codegen_flags: <defaults>
</compile_context>

<pallas_src>
import jax
import jax.numpy as jnp
from jax.experimental import pallas as pl
from jax.experimental.pallas import tpu as pltpu

EPS = 1e-5   # torch.nn.InstanceNorm2d default
X0 = 8       # sublane-aligned column where the padded interior starts


def _round_up(v, m):
    return (v + m - 1) // m * m


def _pad_width(W):
    # Columns: [0, X0-2] unused, X0-1 left reflect, [X0, X0+W) interior,
    # X0+W right reflect, rest unused; rounded up to a sublane multiple.
    return _round_up(X0 + W + 1, 8)


def _strip_rows(H, W):
    """Image rows per strip so one strip of the flat (R*W, C) LHS is ~512 rows."""
    r = min(H, max(1, 512 // max(W, 1)))
    while H % r:
        r -= 1
    return r


def _y_off(s, rows):
    off = s * rows
    return pl.multiple_of(off, 8) if rows % 8 == 0 else off


def _reflect_edges(pad_ref, H, W):
    """Fill ReflectionPad2d(1) borders; assumes the interior
    pad_ref[1:H+1, X0:X0+W, :] has already been written.  Corners come out
    correctly because the column reflection runs after the row reflection."""
    pad_ref[0, pl.ds(X0, W), :] = pad_ref[2, pl.ds(X0, W), :]           # top
    pad_ref[H + 1, pl.ds(X0, W), :] = pad_ref[H - 1, pl.ds(X0, W), :]   # bottom
    pad_ref[:, X0 - 1, :] = pad_ref[:, X0 + 1, :]                       # left
    pad_ref[:, X0 + W, :] = pad_ref[:, X0 + W - 2, :]                   # right


def _conv3x3_in_stats(pad_ref, w_ref, y_ref, *, H, W, C, R):
    """3x3 VALID conv over the reflection-padded scratch, strip by strip.

    The un-normalized conv output (f32) is written to y_ref ((H*W, C)); the
    per-channel InstanceNorm statistics are accumulated in the same pass.
    Returns (mean, inv_std), each (1, C) f32.  Bias is intentionally omitted
    (cancelled by the affine=False InstanceNorm that follows).
    """
    rows = R * W
    n_strips = H // R

    def strip(s, carry):
        csum, csq = carry
        r0 = s * R
        acc = jnp.zeros((rows, C), jnp.float32)
        # 9 back-to-back MXU matmuls into one resident strip accumulator.
        for dy in range(3):
            for dx in range(3):
                lhs = pad_ref[pl.ds(r0 + dy, R), pl.ds(X0 - 1 + dx, W), :]
                acc = acc + jnp.dot(lhs.reshape(rows, C), w_ref[dy, dx],
                                    preferred_element_type=jnp.float32)
        y_ref[pl.ds(_y_off(s, rows), rows), :] = acc
        csum = csum + jnp.sum(acc, axis=0, keepdims=True)
        csq = csq + jnp.sum(acc * acc, axis=0, keepdims=True)
        return csum, csq

    zero = jnp.zeros((1, C), jnp.float32)
    csum, csq = jax.lax.fori_loop(0, n_strips, strip, (zero, zero))

    inv_n = 1.0 / float(H * W)
    mean = csum * inv_n
    var = jnp.maximum(csq * inv_n - mean * mean, 0.0)   # biased variance
    return mean, jax.lax.rsqrt(var + EPS)


def fused_resnet_block_kernel(x_ref, w1_ref, w2_ref, o_ref, pad_ref, y_ref):
    # x_ref: (1,H,W,C) f32; w*_ref: (3,3,C,C) bf16 HWIO; o_ref: (1,H,W,C) f32;
    # pad_ref: (H+2, Wp, C) bf16 VMEM scratch; y_ref: (H*W, C) f32 VMEM scratch.
    H, W, C = x_ref.shape[1], x_ref.shape[2], x_ref.shape[3]
    R = _strip_rows(H, W)
    rows = R * W
    n_strips = H // R

    # ---- stage 1: reflect_pad(x) -> conv1 -> InstanceNorm -> ReLU ----------
    pad_ref[pl.ds(1, H), pl.ds(X0, W), :] = x_ref[0].astype(jnp.bfloat16)
    _reflect_edges(pad_ref, H, W)
    mean1, inv1 = _conv3x3_in_stats(pad_ref, w1_ref, y_ref, H=H, W=W, C=C, R=R)

    # Normalize + ReLU, writing h straight back into the pad-scratch interior
    # (this *is* the reflect_pad input of stage 2).
    def norm_relu(s, carry):
        y = y_ref[pl.ds(_y_off(s, rows), rows), :]
        h = jnp.maximum((y - mean1) * inv1, 0.0)
        pad_ref[pl.ds(1 + s * R, R), pl.ds(X0, W), :] = (
            h.reshape(R, W, C).astype(jnp.bfloat16))
        return carry

    jax.lax.fori_loop(0, n_strips, norm_relu, 0)
    _reflect_edges(pad_ref, H, W)

    # ---- stage 2: conv2 -> InstanceNorm -> residual add --------------------
    mean2, inv2 = _conv3x3_in_stats(pad_ref, w2_ref, y_ref, H=H, W=W, C=C, R=R)

    def norm_residual(s, carry):
        r0 = s * R
        y = y_ref[pl.ds(_y_off(s, rows), rows), :]
        res = (y - mean2) * inv2
        o_ref[0, pl.ds(r0, R), :, :] = (
            x_ref[0, pl.ds(r0, R), :, :] + res.reshape(R, W, C))
        return carry

    jax.lax.fori_loop(0, n_strips, norm_residual, 0)


def _vmem_limit_bytes():
    try:
        kind = jax.devices()[0].device_kind.lower()
    except Exception:
        kind = ""
    if "v5" in kind or "v6" in kind:      # 128 MiB physical VMEM parts
        return 100 * 1024 * 1024
    return 48 * 1024 * 1024               # v7x (64 MiB physical) / unknown


@jax.jit
def resnet_block_forward(x_nhwc, w1, b1, w2, b2):
    """x_nhwc: (N,H,W,C) f32; w*: (3,3,C,C) HWIO; b*: (C,) (cancelled, see note)."""
    # With InstanceNorm2d(affine=False) directly after each conv, a constant
    # per-channel bias is exactly cancelled by the mean subtraction.
    del b1, b2
    N, H, W, C = x_nhwc.shape

    # Lane density: pad channels to a multiple of 128 (no-op when C%128==0,
    # e.g. the real generator's C=256).
    Cp = C if C % 128 == 0 else _round_up(C, 128)
    if Cp != C:
        x_in = jnp.pad(x_nhwc, ((0, 0), (0, 0), (0, 0), (0, Cp - C)))
        w1 = jnp.pad(w1, ((0, 0), (0, 0), (0, Cp - C), (0, Cp - C)))
        w2 = jnp.pad(w2, ((0, 0), (0, 0), (0, Cp - C), (0, Cp - C)))
    else:
        x_in = x_nhwc
    w1b = w1.astype(jnp.bfloat16)
    w2b = w2.astype(jnp.bfloat16)

    out = pl.pallas_call(
        fused_resnet_block_kernel,
        out_shape=jax.ShapeDtypeStruct((N, H, W, Cp), jnp.float32),
        grid=(N,),
        in_specs=[
            pl.BlockSpec((1, H, W, Cp), lambda n: (n, 0, 0, 0)),
            pl.BlockSpec((3, 3, Cp, Cp), lambda n: (0, 0, 0, 0)),
            pl.BlockSpec((3, 3, Cp, Cp), lambda n: (0, 0, 0, 0)),
        ],
        out_specs=pl.BlockSpec((1, H, W, Cp), lambda n: (n, 0, 0, 0)),
        scratch_shapes=[
            pltpu.VMEM((H + 2, _pad_width(W), Cp), jnp.bfloat16),
            pltpu.VMEM((H * W, Cp), jnp.float32),
        ],
        compiler_params=pltpu.CompilerParams(
            dimension_semantics=("parallel",),
            vmem_limit_bytes=_vmem_limit_bytes(),
        ),
    )(x_in, w1b, w2b)

    return out[..., :C] if Cp != C else out


if __name__ == "__main__":
    key = jax.random.PRNGKey(0)
    k1, k2, k3, k4, k5 = jax.random.split(key, 5)

    # Small shapes consistent with the module: NCHW input, dim == C
    N, C, H, W = 2, 4, 16, 16
    x_nchw = jax.random.normal(k1, (N, C, H, W), jnp.float32)

    # Synthetic parameters (PyTorch conv weight shape: (Cout, Cin, 3, 3))
    w1_oihw = 0.1 * jax.random.normal(k2, (C, C, 3, 3), jnp.float32)
    w2_oihw = 0.1 * jax.random.normal(k3, (C, C, 3, 3), jnp.float32)
    b1 = 0.1 * jax.random.normal(k4, (C,), jnp.float32)
    b2 = 0.1 * jax.random.normal(k5, (C,), jnp.float32)

    # OIHW -> HWIO for the NHWC kernel layout
    w1 = jnp.transpose(w1_oihw, (2, 3, 1, 0))
    w2 = jnp.transpose(w2_oihw, (2, 3, 1, 0))

    x_nhwc = jnp.transpose(x_nchw, (0, 2, 3, 1))
    out_nhwc = resnet_block_forward(x_nhwc, w1, b1, w2, b2)
    out_nchw = jnp.transpose(out_nhwc, (0, 3, 1, 2))
    jax.block_until_ready(out_nchw)

    # Pure-JAX reference.  It includes the conv bias (use_bias=True, as in the
    # PyTorch module) and mirrors the kernel's MXU precision (bf16 operands,
    # f32 accumulation) so the tolerance stays tight; the bias is cancelled by
    # the affine=False InstanceNorm, which this check also demonstrates.
    def ref_forward(x):
        def conv(xp, w, b):
            y = jax.lax.conv_general_dilated(
                xp.astype(jnp.bfloat16), w.astype(jnp.bfloat16),
                window_strides=(1, 1), padding="VALID",
                dimension_numbers=("NHWC", "HWIO", "NHWC"),
                preferred_element_type=jnp.float32)
            return y + b[None, None, None, :]

        def inorm(y):
            m = jnp.mean(y, axis=(1, 2), keepdims=True)
            v = jnp.mean((y - m) ** 2, axis=(1, 2), keepdims=True)
            return (y - m) * jax.lax.rsqrt(v + EPS)

        def rpad(t):
            return jnp.pad(t, ((0, 0), (1, 1), (1, 1), (0, 0)), mode="reflect")

        h_ = jnp.maximum(inorm(conv(rpad(x), w1, b1)), 0.0)
        y_ = inorm(conv(rpad(h_), w2, b2))
        return x + y_

    ref = ref_forward(x_nhwc)
    max_err = float(jnp.max(jnp.abs(out_nhwc - ref)))
    assert max_err < 2e-2, f"mismatch vs reference: {max_err}"

    print("KERNEL_OK")
</pallas_src>

<mosaic_0001>
module attributes {stable_mosaic.version = 11 : i64} {
  func.func @fused_resnet_block_kernel(%arg0: i32, %arg1: memref<1x16x16x128xf32, #tpu.memory_space<vmem>>, %arg2: memref<3x3x128x128xbf16, #tpu.memory_space<vmem>>, %arg3: memref<3x3x128x128xbf16, #tpu.memory_space<vmem>>, %arg4: memref<1x16x16x128xf32, #tpu.memory_space<vmem>>, %arg5: memref<18x32x128xbf16, #tpu.memory_space<vmem>>, %arg6: memref<256x128xf32, #tpu.memory_space<vmem>>) attributes {dimension_semantics = [#tpu.dimension_semantics<parallel>], iteration_bounds = array<i64: 2>, scalar_prefetch = 0 : i64, scratch_operands = 2 : i64, tpu.core_type = #tpu.core_type<tc>, window_params = [{transform_indices = @transform_0, window_bounds = array<i64: 1, 16, 16, 128>}, {pipeline_mode = #tpu.pipeline_mode<synchronous>, transform_indices = @transform_1, window_bounds = array<i64: 3, 3, 128, 128>}, {pipeline_mode = #tpu.pipeline_mode<synchronous>, transform_indices = @transform_2, window_bounds = array<i64: 3, 3, 128, 128>}, {transform_indices = @transform_3, window_bounds = array<i64: 1, 16, 16, 128>}]} {
    %c0 = arith.constant 0 : index
    %c0_0 = arith.constant 0 : index
    %c0_1 = arith.constant 0 : index
    %c0_2 = arith.constant 0 : index
    %0 = vector.load %arg1[%c0, %c0_0, %c0_1, %c0_2] : memref<1x16x16x128xf32, #tpu.memory_space<vmem>>, vector<1x16x16x128xf32>
    %1 = vector.shape_cast %0 : vector<1x16x16x128xf32> to vector<16x16x128xf32>
    %2 = arith.truncf %1 : vector<16x16x128xf32> to vector<16x16x128xbf16>
    %c1 = arith.constant 1 : index
    %c8 = arith.constant 8 : index
    %c0_3 = arith.constant 0 : index
    %3 = vector.load %arg5[%c1, %c8, %c0_3] : memref<18x32x128xbf16, #tpu.memory_space<vmem>>, vector<16x16x128xbf16>
    tpu.vector_store %arg5[%c1, %c8, %c0_3], %2 {strides = array<i32>} : memref<18x32x128xbf16, #tpu.memory_space<vmem>>, vector<16x16x128xbf16>,
    %c2 = arith.constant 2 : index
    %c8_4 = arith.constant 8 : index
    %c0_5 = arith.constant 0 : index
    %4 = vector.load %arg5[%c2, %c8_4, %c0_5] : memref<18x32x128xbf16, #tpu.memory_space<vmem>>, vector<1x16x128xbf16>
    %5 = vector.shape_cast %4 : vector<1x16x128xbf16> to vector<16x128xbf16>
    %c0_6 = arith.constant 0 : index
    %c8_7 = arith.constant 8 : index
    %c0_8 = arith.constant 0 : index
    %6 = vector.load %arg5[%c0_6, %c8_7, %c0_8] : memref<18x32x128xbf16, #tpu.memory_space<vmem>>, vector<1x16x128xbf16>
    %7 = vector.shape_cast %6 : vector<1x16x128xbf16> to vector<16x128xbf16>
    %8 = vector.shape_cast %5 : vector<16x128xbf16> to vector<1x16x128xbf16>
    tpu.vector_store %arg5[%c0_6, %c8_7, %c0_8], %8 {strides = array<i32>} : memref<18x32x128xbf16, #tpu.memory_space<vmem>>, vector<1x16x128xbf16>,
    %c15 = arith.constant 15 : index
    %c8_9 = arith.constant 8 : index
    %c0_10 = arith.constant 0 : index
    %9 = vector.load %arg5[%c15, %c8_9, %c0_10] : memref<18x32x128xbf16, #tpu.memory_space<vmem>>, vector<1x16x128xbf16>
    %10 = vector.shape_cast %9 : vector<1x16x128xbf16> to vector<16x128xbf16>
    %c17 = arith.constant 17 : index
    %c8_11 = arith.constant 8 : index
    %c0_12 = arith.constant 0 : index
    %11 = vector.load %arg5[%c17, %c8_11, %c0_12] : memref<18x32x128xbf16, #tpu.memory_space<vmem>>, vector<1x16x128xbf16>
    %12 = vector.shape_cast %11 : vector<1x16x128xbf16> to vector<16x128xbf16>
    %13 = vector.shape_cast %10 : vector<16x128xbf16> to vector<1x16x128xbf16>
    tpu.vector_store %arg5[%c17, %c8_11, %c0_12], %13 {strides = array<i32>} : memref<18x32x128xbf16, #tpu.memory_space<vmem>>, vector<1x16x128xbf16>,
    %c0_13 = arith.constant 0 : index
    %c9 = arith.constant 9 : index
    %c0_14 = arith.constant 0 : index
    %14 = vector.load %arg5[%c0_13, %c9, %c0_14] : memref<18x32x128xbf16, #tpu.memory_space<vmem>>, vector<18x1x128xbf16>
    %15 = vector.shape_cast %14 : vector<18x1x128xbf16> to vector<18x128xbf16>
    %c0_15 = arith.constant 0 : index
    %c7 = arith.constant 7 : index
    %c0_16 = arith.constant 0 : index
    %16 = vector.load %arg5[%c0_15, %c7, %c0_16] : memref<18x32x128xbf16, #tpu.memory_space<vmem>>, vector<18x1x128xbf16>
    %17 = vector.shape_cast %16 : vector<18x1x128xbf16> to vector<18x128xbf16>
    %18 = vector.shape_cast %15 : vector<18x128xbf16> to vector<18x1x128xbf16>
    tpu.vector_store %arg5[%c0_15, %c7, %c0_16], %18 {strides = array<i32>} : memref<18x32x128xbf16, #tpu.memory_space<vmem>>, vector<18x1x128xbf16>,
    %c0_17 = arith.constant 0 : index
    %c22 = arith.constant 22 : index
    %c0_18 = arith.constant 0 : index
    %19 = vector.load %arg5[%c0_17, %c22, %c0_18] : memref<18x32x128xbf16, #tpu.memory_space<vmem>>, vector<18x1x128xbf16>
    %20 = vector.shape_cast %19 : vector<18x1x128xbf16> to vector<18x128xbf16>
    %c0_19 = arith.constant 0 : index
    %c24 = arith.constant 24 : index
    %c0_20 = arith.constant 0 : index
    %21 = vector.load %arg5[%c0_19, %c24, %c0_20] : memref<18x32x128xbf16, #tpu.memory_space<vmem>>, vector<18x1x128xbf16>
    %22 = vector.shape_cast %21 : vector<18x1x128xbf16> to vector<18x128xbf16>
    %23 = vector.shape_cast %20 : vector<18x128xbf16> to vector<18x1x128xbf16>
    tpu.vector_store %arg5[%c0_19, %c24, %c0_20], %23 {strides = array<i32>} : memref<18x32x128xbf16, #tpu.memory_space<vmem>>, vector<18x1x128xbf16>,
    %cst = arith.constant 0.000000e+00 : f32
    %24 = vector.broadcast %cst : f32 to vector<1x128xf32>
    %c0_i32 = arith.constant 0 : i32
    %c16_i32 = arith.constant 16 : i32
    %25 = arith.muli %c0_i32, %c16_i32 : i32
    %cst_21 = arith.constant 0.000000e+00 : f32
    %26 = vector.broadcast %cst_21 : f32 to vector<256x128xf32>
    %c0_i32_22 = arith.constant 0 : i32
    %27 = arith.addi %25, %c0_i32_22 : i32
    %28 = arith.index_cast %27 : i32 to index
    %c7_23 = arith.constant 7 : index
    %c0_24 = arith.constant 0 : index
    %29 = vector.load %arg5[%28, %c7_23, %c0_24] : memref<18x32x128xbf16, #tpu.memory_space<vmem>>, vector<16x16x128xbf16>
    %30 = vector.shape_cast %29 : vector<16x16x128xbf16> to vector<256x128xbf16>
    %c0_25 = arith.constant 0 : index
    %c0_26 = arith.constant 0 : index
    %c0_27 = arith.constant 0 : index
    %c0_28 = arith.constant 0 : index
    %31 = vector.load %arg2[%c0_25, %c0_26, %c0_27, %c0_28] : memref<3x3x128x128xbf16, #tpu.memory_space<vmem>>, vector<1x1x128x128xbf16>
    %32 = vector.shape_cast %31 : vector<1x1x128x128xbf16> to vector<128x128xbf16>
    %cst_29 = arith.constant dense<0.000000e+00> : vector<256x128xf32>
    %33 = tpu.matmul %30, %32, %cst_29 {dimension_numbers = #tpu.dot_dimension_numbers<[1], [0], [0], [1], [0, 0, 1, 1], [], []>} : vector<256x128xbf16>, vector<128x128xbf16>, vector<256x128xf32> -> vector<256x128xf32>
    %34 = arith.addf %26, %33 : vector<256x128xf32>
    %c0_i32_30 = arith.constant 0 : i32
    %35 = arith.addi %25, %c0_i32_30 : i32
    %36 = arith.index_cast %35 : i32 to index
    %c8_31 = arith.constant 8 : index
    %c0_32 = arith.constant 0 : index
    %37 = vector.load %arg5[%36, %c8_31, %c0_32] : memref<18x32x128xbf16, #tpu.memory_space<vmem>>, vector<16x16x128xbf16>
    %38 = vector.shape_cast %37 : vector<16x16x128xbf16> to vector<256x128xbf16>
    %c0_33 = arith.constant 0 : index
    %c1_34 = arith.constant 1 : index
    %c0_35 = arith.constant 0 : index
    %c0_36 = arith.constant 0 : index
    %39 = vector.load %arg2[%c0_33, %c1_34, %c0_35, %c0_36] : memref<3x3x128x128xbf16, #tpu.memory_space<vmem>>, vector<1x1x128x128xbf16>
    %40 = vector.shape_cast %39 : vector<1x1x128x128xbf16> to vector<128x128xbf16>
    %cst_37 = arith.constant dense<0.000000e+00> : vector<256x128xf32>
    %41 = tpu.matmul %38, %40, %cst_37 {dimension_numbers = #tpu.dot_dimension_numbers<[1], [0], [0], [1], [0, 0, 1, 1], [], []>} : vector<256x128xbf16>, vector<128x128xbf16>, vector<256x128xf32> -> vector<256x128xf32>
    %42 = arith.addf %34, %41 : vector<256x128xf32>
    %c0_i32_38 = arith.constant 0 : i32
    %43 = arith.addi %25, %c0_i32_38 : i32
    %44 = arith.index_cast %43 : i32 to index
    %c9_39 = arith.constant 9 : index
    %c0_40 = arith.constant 0 : index
    %45 = vector.load %arg5[%44, %c9_39, %c0_40] : memref<18x32x128xbf16, #tpu.memory_space<vmem>>, vector<16x16x128xbf16>
    %46 = vector.shape_cast %45 : vector<16x16x128xbf16> to vector<256x128xbf16>
    %c0_41 = arith.constant 0 : index
    %c2_42 = arith.constant 2 : index
    %c0_43 = arith.constant 0 : index
    %c0_44 = arith.constant 0 : index
    %47 = vector.load %arg2[%c0_41, %c2_42, %c0_43, %c0_44] : memref<3x3x128x128xbf16, #tpu.memory_space<vmem>>, vector<1x1x128x128xbf16>
    %48 = vector.shape_cast %47 : vector<1x1x128x128xbf16> to vector<128x128xbf16>
    %cst_45 = arith.constant dense<0.000000e+00> : vector<256x128xf32>
    %49 = tpu.matmul %46, %48, %cst_45 {dimension_numbers = #tpu.dot_dimension_numbers<[1], [0], [0], [1], [0, 0, 1, 1], [], []>} : vector<256x128xbf16>, vector<128x128xbf16>, vector<256x128xf32> -> vector<256x128xf32>
    %50 = arith.addf %42, %49 : vector<256x128xf32>
    %c1_i32 = arith.constant 1 : i32
    %51 = arith.addi %25, %c1_i32 : i32
    %52 = arith.index_cast %51 : i32 to index
    %c7_46 = arith.constant 7 : index
    %c0_47 = arith.constant 0 : index
    %53 = vector.load %arg5[%52, %c7_46, %c0_47] : memref<18x32x128xbf16, #tpu.memory_space<vmem>>, vector<16x16x128xbf16>
    %54 = vector.shape_cast %53 : vector<16x16x128xbf16> to vector<256x128xbf16>
    %c1_48 = arith.constant 1 : index
    %c0_49 = arith.constant 0 : index
    %c0_50 = arith.constant 0 : index
    %c0_51 = arith.constant 0 : index
    %55 = vector.load %arg2[%c1_48, %c0_49, %c0_50, %c0_51] : memref<3x3x128x128xbf16, #tpu.memory_space<vmem>>, vector<1x1x128x128xbf16>
    %56 = vector.shape_cast %55 : vector<1x1x128x128xbf16> to vector<128x128xbf16>
    %cst_52 = arith.constant dense<0.000000e+00> : vector<256x128xf32>
    %57 = tpu.matmul %54, %56, %cst_52 {dimension_numbers = #tpu.dot_dimension_numbers<[1], [0], [0], [1], [0, 0, 1, 1], [], []>} : vector<256x128xbf16>, vector<128x128xbf16>, vector<256x128xf32> -> vector<256x128xf32>
    %58 = arith.addf %50, %57 : vector<256x128xf32>
    %c1_i32_53 = arith.constant 1 : i32
    %59 = arith.addi %25, %c1_i32_53 : i32
    %60 = arith.index_cast %59 : i32 to index
    %c8_54 = arith.constant 8 : index
    %c0_55 = arith.constant 0 : index
    %61 = vector.load %arg5[%60, %c8_54, %c0_55] : memref<18x32x128xbf16, #tpu.memory_space<vmem>>, vector<16x16x128xbf16>
    %62 = vector.shape_cast %61 : vector<16x16x128xbf16> to vector<256x128xbf16>
    %c1_56 = arith.constant 1 : index
    %c1_57 = arith.constant 1 : index
    %c0_58 = arith.constant 0 : index
    %c0_59 = arith.constant 0 : index
    %63 = vector.load %arg2[%c1_56, %c1_57, %c0_58, %c0_59] : memref<3x3x128x128xbf16, #tpu.memory_space<vmem>>, vector<1x1x128x128xbf16>
    %64 = vector.shape_cast %63 : vector<1x1x128x128xbf16> to vector<128x128xbf16>
    %cst_60 = arith.constant dense<0.000000e+00> : vector<256x128xf32>
    %65 = tpu.matmul %62, %64, %cst_60 {dimension_numbers = #tpu.dot_dimension_numbers<[1], [0], [0], [1], [0, 0, 1, 1], [], []>} : vector<256x128xbf16>, vector<128x128xbf16>, vector<256x128xf32> -> vector<256x128xf32>
    %66 = arith.addf %58, %65 : vector<256x128xf32>
    %c1_i32_61 = arith.constant 1 : i32
    %67 = arith.addi %25, %c1_i32_61 : i32
    %68 = arith.index_cast %67 : i32 to index
    %c9_62 = arith.constant 9 : index
    %c0_63 = arith.constant 0 : index
    %69 = vector.load %arg5[%68, %c9_62, %c0_63] : memref<18x32x128xbf16, #tpu.memory_space<vmem>>, vector<16x16x128xbf16>
    %70 = vector.shape_cast %69 : vector<16x16x128xbf16> to vector<256x128xbf16>
    %c1_64 = arith.constant 1 : index
    %c2_65 = arith.constant 2 : index
    %c0_66 = arith.constant 0 : index
    %c0_67 = arith.constant 0 : index
    %71 = vector.load %arg2[%c1_64, %c2_65, %c0_66, %c0_67] : memref<3x3x128x128xbf16, #tpu.memory_space<vmem>>, vector<1x1x128x128xbf16>
    %72 = vector.shape_cast %71 : vector<1x1x128x128xbf16> to vector<128x128xbf16>
    %cst_68 = arith.constant dense<0.000000e+00> : vector<256x128xf32>
    %73 = tpu.matmul %70, %72, %cst_68 {dimension_numbers = #tpu.dot_dimension_numbers<[1], [0], [0], [1], [0, 0, 1, 1], [], []>} : vector<256x128xbf16>, vector<128x128xbf16>, vector<256x128xf32> -> vector<256x128xf32>
    %74 = arith.addf %66, %73 : vector<256x128xf32>
    %c2_i32 = arith.constant 2 : i32
    %75 = arith.addi %25, %c2_i32 : i32
    %76 = arith.index_cast %75 : i32 to index
    %c7_69 = arith.constant 7 : index
    %c0_70 = arith.constant 0 : index
    %77 = vector.load %arg5[%76, %c7_69, %c0_70] : memref<18x32x128xbf16, #tpu.memory_space<vmem>>, vector<16x16x128xbf16>
    %78 = vector.shape_cast %77 : vector<16x16x128xbf16> to vector<256x128xbf16>
    %c2_71 = arith.constant 2 : index
    %c0_72 = arith.constant 0 : index
    %c0_73 = arith.constant 0 : index
    %c0_74 = arith.constant 0 : index
    %79 = vector.load %arg2[%c2_71, %c0_72, %c0_73, %c0_74] : memref<3x3x128x128xbf16, #tpu.memory_space<vmem>>, vector<1x1x128x128xbf16>
    %80 = vector.shape_cast %79 : vector<1x1x128x128xbf16> to vector<128x128xbf16>
    %cst_75 = arith.constant dense<0.000000e+00> : vector<256x128xf32>
    %81 = tpu.matmul %78, %80, %cst_75 {dimension_numbers = #tpu.dot_dimension_numbers<[1], [0], [0], [1], [0, 0, 1, 1], [], []>} : vector<256x128xbf16>, vector<128x128xbf16>, vector<256x128xf32> -> vector<256x128xf32>
    %82 = arith.addf %74, %81 : vector<256x128xf32>
    %c2_i32_76 = arith.constant 2 : i32
    %83 = arith.addi %25, %c2_i32_76 : i32
    %84 = arith.index_cast %83 : i32 to index
    %c8_77 = arith.constant 8 : index
    %c0_78 = arith.constant 0 : index
    %85 = vector.load %arg5[%84, %c8_77, %c0_78] : memref<18x32x128xbf16, #tpu.memory_space<vmem>>, vector<16x16x128xbf16>
    %86 = vector.shape_cast %85 : vector<16x16x128xbf16> to vector<256x128xbf16>
    %c2_79 = arith.constant 2 : index
    %c1_80 = arith.constant 1 : index
    %c0_81 = arith.constant 0 : index
    %c0_82 = arith.constant 0 : index
    %87 = vector.load %arg2[%c2_79, %c1_80, %c0_81, %c0_82] : memref<3x3x128x128xbf16, #tpu.memory_space<vmem>>, vector<1x1x128x128xbf16>
    %88 = vector.shape_cast %87 : vector<1x1x128x128xbf16> to vector<128x128xbf16>
    %cst_83 = arith.constant dense<0.000000e+00> : vector<256x128xf32>
    %89 = tpu.matmul %86, %88, %cst_83 {dimension_numbers = #tpu.dot_dimension_numbers<[1], [0], [0], [1], [0, 0, 1, 1], [], []>} : vector<256x128xbf16>, vector<128x128xbf16>, vector<256x128xf32> -> vector<256x128xf32>
    %90 = arith.addf %82, %89 : vector<256x128xf32>
    %c2_i32_84 = arith.constant 2 : i32
    %91 = arith.addi %25, %c2_i32_84 : i32
    %92 = arith.index_cast %91 : i32 to index
    %c9_85 = arith.constant 9 : index
    %c0_86 = arith.constant 0 : index
    %93 = vector.load %arg5[%92, %c9_85, %c0_86] : memref<18x32x128xbf16, #tpu.memory_space<vmem>>, vector<16x16x128xbf16>
    %94 = vector.shape_cast %93 : vector<16x16x128xbf16> to vector<256x128xbf16>
    %c2_87 = arith.constant 2 : index
    %c2_88 = arith.constant 2 : index
    %c0_89 = arith.constant 0 : index
    %c0_90 = arith.constant 0 : index
    %95 = vector.load %arg2[%c2_87, %c2_88, %c0_89, %c0_90] : memref<3x3x128x128xbf16, #tpu.memory_space<vmem>>, vector<1x1x128x128xbf16>
    %96 = vector.shape_cast %95 : vector<1x1x128x128xbf16> to vector<128x128xbf16>
    %cst_91 = arith.constant dense<0.000000e+00> : vector<256x128xf32>
    %97 = tpu.matmul %94, %96, %cst_91 {dimension_numbers = #tpu.dot_dimension_numbers<[1], [0], [0], [1], [0, 0, 1, 1], [], []>} : vector<256x128xbf16>, vector<128x128xbf16>, vector<256x128xf32> -> vector<256x128xf32>
    %98 = arith.addf %90, %97 : vector<256x128xf32>
    %c256_i32 = arith.constant 256 : i32
    %99 = arith.muli %c0_i32, %c256_i32 : i32
    %100 = tpu.assume_multiple %99, 8 : i32
    %101 = arith.index_cast %100 : i32 to index
    %c0_92 = arith.constant 0 : index
    %102 = vector.load %arg6[%101, %c0_92] : memref<256x128xf32, #tpu.memory_space<vmem>>, vector<256x128xf32>
    tpu.vector_store %arg6[%101, %c0_92], %98 {strides = array<i32>} : memref<256x128xf32, #tpu.memory_space<vmem>>, vector<256x128xf32>,
    %cst_93 = arith.constant dense<0.000000e+00> : vector<128xf32>
    %103 = vector.multi_reduction <add>, %98, %cst_93 [0] : vector<256x128xf32> to vector<128xf32>
    %104 = vector.shape_cast %103 : vector<128xf32> to vector<1x128xf32>
    %105 = arith.addf %24, %104 : vector<1x128xf32>
    %106 = arith.mulf %98, %98 : vector<256x128xf32>
    %cst_94 = arith.constant dense<0.000000e+00> : vector<128xf32>
    %107 = vector.multi_reduction <add>, %106, %cst_94 [0] : vector<256x128xf32> to vector<128xf32>
    %108 = vector.shape_cast %107 : vector<128xf32> to vector<1x128xf32>
    %109 = arith.addf %24, %108 : vector<1x128xf32>
    %c1_i32_95 = arith.constant 1 : i32
    %cst_96 = arith.constant 3.906250e-03 : f32
    %110 = vector.broadcast %cst_96 : f32 to vector<1x128xf32>
    %111 = arith.mulf %105, %110 : vector<1x128xf32>
    %cst_97 = arith.constant 3.906250e-03 : f32
    %112 = vector.broadcast %cst_97 : f32 to vector<1x128xf32>
    %113 = arith.mulf %109, %112 : vector<1x128xf32>
    %114 = arith.mulf %111, %111 : vector<1x128xf32>
    %115 = arith.subf %113, %114 : vector<1x128xf32>
    %cst_98 = arith.constant 0.000000e+00 : f32
    %116 = vector.broadcast %cst_98 : f32 to vector<1x128xf32>
    %117 = arith.maximumf %115, %116 : vector<1x128xf32>
    %cst_99 = arith.constant 9.99999974E-6 : f32
    %118 = vector.broadcast %cst_99 : f32 to vector<1x128xf32>
    %119 = arith.addf %117, %118 : vector<1x128xf32>
    %120 = math.rsqrt %119 : vector<1x128xf32>
    %c0_i32_100 = arith.constant 0 : i32
    %c256_i32_101 = arith.constant 256 : i32
    %121 = arith.muli %c0_i32_100, %c256_i32_101 : i32
    %122 = tpu.assume_multiple %121, 8 : i32
    %123 = arith.index_cast %122 : i32 to index
    %c0_102 = arith.constant 0 : index
    %124 = vector.load %arg6[%123, %c0_102] : memref<256x128xf32, #tpu.memory_space<vmem>>, vector<256x128xf32>
    %125 = vector.broadcast %111 : vector<1x128xf32> to vector<256x128xf32>
    %126 = arith.subf %124, %125 : vector<256x128xf32>
    %127 = vector.broadcast %120 : vector<1x128xf32> to vector<256x128xf32>
    %128 = arith.mulf %126, %127 : vector<256x128xf32>
    %cst_103 = arith.constant 0.000000e+00 : f32
    %129 = vector.broadcast %cst_103 : f32 to vector<256x128xf32>
    %130 = arith.maximumf %128, %129 : vector<256x128xf32>
    %131 = vector.shape_cast %130 : vector<256x128xf32> to vector<16x16x128xf32>
    %132 = arith.truncf %131 : vector<16x16x128xf32> to vector<16x16x128xbf16>
    %c16_i32_104 = arith.constant 16 : i32
    %133 = arith.muli %c0_i32_100, %c16_i32_104 : i32
    %c1_i32_105 = arith.constant 1 : i32
    %134 = arith.addi %c1_i32_105, %133 : i32
    %135 = arith.index_cast %134 : i32 to index
    %c8_106 = arith.constant 8 : index
    %c0_107 = arith.constant 0 : index
    %136 = vector.load %arg5[%135, %c8_106, %c0_107] : memref<18x32x128xbf16, #tpu.memory_space<vmem>>, vector<16x16x128xbf16>
    tpu.vector_store %arg5[%135, %c8_106, %c0_107], %132 {strides = array<i32>} : memref<18x32x128xbf16, #tpu.memory_space<vmem>>, vector<16x16x128xbf16>,
    %c1_i32_108 = arith.constant 1 : i32
    %c2_109 = arith.constant 2 : index
    %c8_110 = arith.constant 8 : index
    %c0_111 = arith.constant 0 : index
    %137 = vector.load %arg5[%c2_109, %c8_110, %c0_111] : memref<18x32x128xbf16, #tpu.memory_space<vmem>>, vector<1x16x128xbf16>
    %138 = vector.shape_cast %137 : vector<1x16x128xbf16> to vector<16x128xbf16>
    %c0_112 = arith.constant 0 : index
    %c8_113 = arith.constant 8 : index
    %c0_114 = arith.constant 0 : index
    %139 = vector.load %arg5[%c0_112, %c8_113, %c0_114] : memref<18x32x128xbf16, #tpu.memory_space<vmem>>, vector<1x16x128xbf16>
    %140 = vector.shape_cast %139 : vector<1x16x128xbf16> to vector<16x128xbf16>
    %141 = vector.shape_cast %138 : vector<16x128xbf16> to vector<1x16x128xbf16>
    tpu.vector_store %arg5[%c0_112, %c8_113, %c0_114], %141 {strides = array<i32>} : memref<18x32x128xbf16, #tpu.memory_space<vmem>>, vector<1x16x128xbf16>,
    %c15_115 = arith.constant 15 : index
    %c8_116 = arith.constant 8 : index
    %c0_117 = arith.constant 0 : index
    %142 = vector.load %arg5[%c15_115, %c8_116, %c0_117] : memref<18x32x128xbf16, #tpu.memory_space<vmem>>, vector<1x16x128xbf16>
    %143 = vector.shape_cast %142 : vector<1x16x128xbf16> to vector<16x128xbf16>
    %c17_118 = arith.constant 17 : index
    %c8_119 = arith.constant 8 : index
    %c0_120 = arith.constant 0 : index
    %144 = vector.load %arg5[%c17_118, %c8_119, %c0_120] : memref<18x32x128xbf16, #tpu.memory_space<vmem>>, vector<1x16x128xbf16>
    %145 = vector.shape_cast %144 : vector<1x16x128xbf16> to vector<16x128xbf16>
    %146 = vector.shape_cast %143 : vector<16x128xbf16> to vector<1x16x128xbf16>
    tpu.vector_store %arg5[%c17_118, %c8_119, %c0_120], %146 {strides = array<i32>} : memref<18x32x128xbf16, #tpu.memory_space<vmem>>, vector<1x16x128xbf16>,
    %c0_121 = arith.constant 0 : index
    %c9_122 = arith.constant 9 : index
    %c0_123 = arith.constant 0 : index
    %147 = vector.load %arg5[%c0_121, %c9_122, %c0_123] : memref<18x32x128xbf16, #tpu.memory_space<vmem>>, vector<18x1x128xbf16>
    %148 = vector.shape_cast %147 : vector<18x1x128xbf16> to vector<18x128xbf16>
    %c0_124 = arith.constant 0 : index
    %c7_125 = arith.constant 7 : index
    %c0_126 = arith.constant 0 : index
    %149 = vector.load %arg5[%c0_124, %c7_125, %c0_126] : memref<18x32x128xbf16, #tpu.memory_space<vmem>>, vector<18x1x128xbf16>
    %150 = vector.shape_cast %149 : vector<18x1x128xbf16> to vector<18x128xbf16>
    %151 = vector.shape_cast %148 : vector<18x128xbf16> to vector<18x1x128xbf16>
    tpu.vector_store %arg5[%c0_124, %c7_125, %c0_126], %151 {strides = array<i32>} : memref<18x32x128xbf16, #tpu.memory_space<vmem>>, vector<18x1x128xbf16>,
    %c0_127 = arith.constant 0 : index
    %c22_128 = arith.constant 22 : index
    %c0_129 = arith.constant 0 : index
    %152 = vector.load %arg5[%c0_127, %c22_128, %c0_129] : memref<18x32x128xbf16, #tpu.memory_space<vmem>>, vector<18x1x128xbf16>
    %153 = vector.shape_cast %152 : vector<18x1x128xbf16> to vector<18x128xbf16>
    %c0_130 = arith.constant 0 : index
    %c24_131 = arith.constant 24 : index
    %c0_132 = arith.constant 0 : index
    %154 = vector.load %arg5[%c0_130, %c24_131, %c0_132] : memref<18x32x128xbf16, #tpu.memory_space<vmem>>, vector<18x1x128xbf16>
    %155 = vector.shape_cast %154 : vector<18x1x128xbf16> to vector<18x128xbf16>
    %156 = vector.shape_cast %153 : vector<18x128xbf16> to vector<18x1x128xbf16>
    tpu.vector_store %arg5[%c0_130, %c24_131, %c0_132], %156 {strides = array<i32>} : memref<18x32x128xbf16, #tpu.memory_space<vmem>>, vector<18x1x128xbf16>,
    %cst_133 = arith.constant 0.000000e+00 : f32
    %157 = vector.broadcast %cst_133 : f32 to vector<1x128xf32>
    %c0_i32_134 = arith.constant 0 : i32
    %c16_i32_135 = arith.constant 16 : i32
    %158 = arith.muli %c0_i32_134, %c16_i32_135 : i32
    %cst_136 = arith.constant 0.000000e+00 : f32
    %159 = vector.broadcast %cst_136 : f32 to vector<256x128xf32>
    %c0_i32_137 = arith.constant 0 : i32
    %160 = arith.addi %158, %c0_i32_137 : i32
    %161 = arith.index_cast %160 : i32 to index
    %c7_138 = arith.constant 7 : index
    %c0_139 = arith.constant 0 : index
    %162 = vector.load %arg5[%161, %c7_138, %c0_139] : memref<18x32x128xbf16, #tpu.memory_space<vmem>>, vector<16x16x128xbf16>
    %163 = vector.shape_cast %162 : vector<16x16x128xbf16> to vector<256x128xbf16>
    %c0_140 = arith.constant 0 : index
    %c0_141 = arith.constant 0 : index
    %c0_142 = arith.constant 0 : index
    %c0_143 = arith.constant 0 : index
    %164 = vector.load %arg3[%c0_140, %c0_141, %c0_142, %c0_143] : memref<3x3x128x128xbf16, #tpu.memory_space<vmem>>, vector<1x1x128x128xbf16>
    %165 = vector.shape_cast %164 : vector<1x1x128x128xbf16> to vector<128x128xbf16>
    %cst_144 = arith.constant dense<0.000000e+00> : vector<256x128xf32>
    %166 = tpu.matmul %163, %165, %cst_144 {dimension_numbers = #tpu.dot_dimension_numbers<[1], [0], [0], [1], [0, 0, 1, 1], [], []>} : vector<256x128xbf16>, vector<128x128xbf16>, vector<256x128xf32> -> vector<256x128xf32>
    %167 = arith.addf %159, %166 : vector<256x128xf32>
    %c0_i32_145 = arith.constant 0 : i32
    %168 = arith.addi %158, %c0_i32_145 : i32
    %169 = arith.index_cast %168 : i32 to index
    %c8_146 = arith.constant 8 : index
    %c0_147 = arith.constant 0 : index
    %170 = vector.load %arg5[%169, %c8_146, %c0_147] : memref<18x32x128xbf16, #tpu.memory_space<vmem>>, vector<16x16x128xbf16>
    %171 = vector.shape_cast %170 : vector<16x16x128xbf16> to vector<256x128xbf16>
    %c0_148 = arith.constant 0 : index
    %c1_149 = arith.constant 1 : index
    %c0_150 = arith.constant 0 : index
    %c0_151 = arith.constant 0 : index
    %172 = vector.load %arg3[%c0_148, %c1_149, %c0_150, %c0_151] : memref<3x3x128x128xbf16, #tpu.memory_space<vmem>>, vector<1x1x128x128xbf16>
    %173 = vector.shape_cast %172 : vector<1x1x128x128xbf16> to vector<128x128xbf16>
    %cst_152 = arith.constant dense<0.000000e+00> : vector<256x128xf32>
    %174 = tpu.matmul %171, %173, %cst_152 {dimension_numbers = #tpu.dot_dimension_numbers<[1], [0], [0], [1], [0, 0, 1, 1], [], []>} : vector<256x128xbf16>, vector<128x128xbf16>, vector<256x128xf32> -> vector<256x128xf32>
    %175 = arith.addf %167, %174 : vector<256x128xf32>
    %c0_i32_153 = arith.constant 0 : i32
    %176 = arith.addi %158, %c0_i32_153 : i32
    %177 = arith.index_cast %176 : i32 to index
    %c9_154 = arith.constant 9 : index
    %c0_155 = arith.constant 0 : index
    %178 = vector.load %arg5[%177, %c9_154, %c0_155] : memref<18x32x128xbf16, #tpu.memory_space<vmem>>, vector<16x16x128xbf16>
    %179 = vector.shape_cast %178 : vector<16x16x128xbf16> to vector<256x128xbf16>
    %c0_156 = arith.constant 0 : index
    %c2_157 = arith.constant 2 : index
    %c0_158 = arith.constant 0 : index
    %c0_159 = arith.constant 0 : index
    %180 = vector.load %arg3[%c0_156, %c2_157, %c0_158, %c0_159] : memref<3x3x128x128xbf16, #tpu.memory_space<vmem>>, vector<1x1x128x128xbf16>
    %181 = vector.shape_cast %180 : vector<1x1x128x128xbf16> to vector<128x128xbf16>
    %cst_160 = arith.constant dense<0.000000e+00> : vector<256x128xf32>
    %182 = tpu.matmul %179, %181, %cst_160 {dimension_numbers = #tpu.dot_dimension_numbers<[1], [0], [0], [1], [0, 0, 1, 1], [], []>} : vector<256x128xbf16>, vector<128x128xbf16>, vector<256x128xf32> -> vector<256x128xf32>
    %183 = arith.addf %175, %182 : vector<256x128xf32>
    %c1_i32_161 = arith.constant 1 : i32
    %184 = arith.addi %158, %c1_i32_161 : i32
    %185 = arith.index_cast %184 : i32 to index
    %c7_162 = arith.constant 7 : index
    %c0_163 = arith.constant 0 : index
    %186 = vector.load %arg5[%185, %c7_162, %c0_163] : memref<18x32x128xbf16, #tpu.memory_space<vmem>>, vector<16x16x128xbf16>
    %187 = vector.shape_cast %186 : vector<16x16x128xbf16> to vector<256x128xbf16>
    %c1_164 = arith.constant 1 : index
    %c0_165 = arith.constant 0 : index
    %c0_166 = arith.constant 0 : index
    %c0_167 = arith.constant 0 : index
    %188 = vector.load %arg3[%c1_164, %c0_165, %c0_166, %c0_167] : memref<3x3x128x128xbf16, #tpu.memory_space<vmem>>, vector<1x1x128x128xbf16>
    %189 = vector.shape_cast %188 : vector<1x1x128x128xbf16> to vector<128x128xbf16>
    %cst_168 = arith.constant dense<0.000000e+00> : vector<256x128xf32>
    %190 = tpu.matmul %187, %189, %cst_168 {dimension_numbers = #tpu.dot_dimension_numbers<[1], [0], [0], [1], [0, 0, 1, 1], [], []>} : vector<256x128xbf16>, vector<128x128xbf16>, vector<256x128xf32> -> vector<256x128xf32>
    %191 = arith.addf %183, %190 : vector<256x128xf32>
    %c1_i32_169 = arith.constant 1 : i32
    %192 = arith.addi %158, %c1_i32_169 : i32
    %193 = arith.index_cast %192 : i32 to index
    %c8_170 = arith.constant 8 : index
    %c0_171 = arith.constant 0 : index
    %194 = vector.load %arg5[%193, %c8_170, %c0_171] : memref<18x32x128xbf16, #tpu.memory_space<vmem>>, vector<16x16x128xbf16>
    %195 = vector.shape_cast %194 : vector<16x16x128xbf16> to vector<256x128xbf16>
    %c1_172 = arith.constant 1 : index
    %c1_173 = arith.constant 1 : index
    %c0_174 = arith.constant 0 : index
    %c0_175 = arith.constant 0 : index
    %196 = vector.load %arg3[%c1_172, %c1_173, %c0_174, %c0_175] : memref<3x3x128x128xbf16, #tpu.memory_space<vmem>>, vector<1x1x128x128xbf16>
    %197 = vector.shape_cast %196 : vector<1x1x128x128xbf16> to vector<128x128xbf16>
    %cst_176 = arith.constant dense<0.000000e+00> : vector<256x128xf32>
    %198 = tpu.matmul %195, %197, %cst_176 {dimension_numbers = #tpu.dot_dimension_numbers<[1], [0], [0], [1], [0, 0, 1, 1], [], []>} : vector<256x128xbf16>, vector<128x128xbf16>, vector<256x128xf32> -> vector<256x128xf32>
    %199 = arith.addf %191, %198 : vector<256x128xf32>
    %c1_i32_177 = arith.constant 1 : i32
    %200 = arith.addi %158, %c1_i32_177 : i32
    %201 = arith.index_cast %200 : i32 to index
    %c9_178 = arith.constant 9 : index
    %c0_179 = arith.constant 0 : index
    %202 = vector.load %arg5[%201, %c9_178, %c0_179] : memref<18x32x128xbf16, #tpu.memory_space<vmem>>, vector<16x16x128xbf16>
    %203 = vector.shape_cast %202 : vector<16x16x128xbf16> to vector<256x128xbf16>
    %c1_180 = arith.constant 1 : index
    %c2_181 = arith.constant 2 : index
    %c0_182 = arith.constant 0 : index
    %c0_183 = arith.constant 0 : index
    %204 = vector.load %arg3[%c1_180, %c2_181, %c0_182, %c0_183] : memref<3x3x128x128xbf16, #tpu.memory_space<vmem>>, vector<1x1x128x128xbf16>
    %205 = vector.shape_cast %204 : vector<1x1x128x128xbf16> to vector<128x128xbf16>
    %cst_184 = arith.constant dense<0.000000e+00> : vector<256x128xf32>
    %206 = tpu.matmul %203, %205, %cst_184 {dimension_numbers = #tpu.dot_dimension_numbers<[1], [0], [0], [1], [0, 0, 1, 1], [], []>} : vector<256x128xbf16>, vector<128x128xbf16>, vector<256x128xf32> -> vector<256x128xf32>
    %207 = arith.addf %199, %206 : vector<256x128xf32>
    %c2_i32_185 = arith.constant 2 : i32
    %208 = arith.addi %158, %c2_i32_185 : i32
    %209 = arith.index_cast %208 : i32 to index
    %c7_186 = arith.constant 7 : index
    %c0_187 = arith.constant 0 : index
    %210 = vector.load %arg5[%209, %c7_186, %c0_187] : memref<18x32x128xbf16, #tpu.memory_space<vmem>>, vector<16x16x128xbf16>
    %211 = vector.shape_cast %210 : vector<16x16x128xbf16> to vector<256x128xbf16>
    %c2_188 = arith.constant 2 : index
    %c0_189 = arith.constant 0 : index
    %c0_190 = arith.constant 0 : index
    %c0_191 = arith.constant 0 : index
    %212 = vector.load %arg3[%c2_188, %c0_189, %c0_190, %c0_191] : memref<3x3x128x128xbf16, #tpu.memory_space<vmem>>, vector<1x1x128x128xbf16>
    %213 = vector.shape_cast %212 : vector<1x1x128x128xbf16> to vector<128x128xbf16>
    %cst_192 = arith.constant dense<0.000000e+00> : vector<256x128xf32>
    %214 = tpu.matmul %211, %213, %cst_192 {dimension_numbers = #tpu.dot_dimension_numbers<[1], [0], [0], [1], [0, 0, 1, 1], [], []>} : vector<256x128xbf16>, vector<128x128xbf16>, vector<256x128xf32> -> vector<256x128xf32>
    %215 = arith.addf %207, %214 : vector<256x128xf32>
    %c2_i32_193 = arith.constant 2 : i32
    %216 = arith.addi %158, %c2_i32_193 : i32
    %217 = arith.index_cast %216 : i32 to index
    %c8_194 = arith.constant 8 : index
    %c0_195 = arith.constant 0 : index
    %218 = vector.load %arg5[%217, %c8_194, %c0_195] : memref<18x32x128xbf16, #tpu.memory_space<vmem>>, vector<16x16x128xbf16>
    %219 = vector.shape_cast %218 : vector<16x16x128xbf16> to vector<256x128xbf16>
    %c2_196 = arith.constant 2 : index
    %c1_197 = arith.constant 1 : index
    %c0_198 = arith.constant 0 : index
    %c0_199 = arith.constant 0 : index
    %220 = vector.load %arg3[%c2_196, %c1_197, %c0_198, %c0_199] : memref<3x3x128x128xbf16, #tpu.memory_space<vmem>>, vector<1x1x128x128xbf16>
    %221 = vector.shape_cast %220 : vector<1x1x128x128xbf16> to vector<128x128xbf16>
    %cst_200 = arith.constant dense<0.000000e+00> : vector<256x128xf32>
    %222 = tpu.matmul %219, %221, %cst_200 {dimension_numbers = #tpu.dot_dimension_numbers<[1], [0], [0], [1], [0, 0, 1, 1], [], []>} : vector<256x128xbf16>, vector<128x128xbf16>, vector<256x128xf32> -> vector<256x128xf32>
    %223 = arith.addf %215, %222 : vector<256x128xf32>
    %c2_i32_201 = arith.constant 2 : i32
    %224 = arith.addi %158, %c2_i32_201 : i32
    %225 = arith.index_cast %224 : i32 to index
    %c9_202 = arith.constant 9 : index
    %c0_203 = arith.constant 0 : index
    %226 = vector.load %arg5[%225, %c9_202, %c0_203] : memref<18x32x128xbf16, #tpu.memory_space<vmem>>, vector<16x16x128xbf16>
    %227 = vector.shape_cast %226 : vector<16x16x128xbf16> to vector<256x128xbf16>
    %c2_204 = arith.constant 2 : index
    %c2_205 = arith.constant 2 : index
    %c0_206 = arith.constant 0 : index
    %c0_207 = arith.constant 0 : index
    %228 = vector.load %arg3[%c2_204, %c2_205, %c0_206, %c0_207] : memref<3x3x128x128xbf16, #tpu.memory_space<vmem>>, vector<1x1x128x128xbf16>
    %229 = vector.shape_cast %228 : vector<1x1x128x128xbf16> to vector<128x128xbf16>
    %cst_208 = arith.constant dense<0.000000e+00> : vector<256x128xf32>
    %230 = tpu.matmul %227, %229, %cst_208 {dimension_numbers = #tpu.dot_dimension_numbers<[1], [0], [0], [1], [0, 0, 1, 1], [], []>} : vector<256x128xbf16>, vector<128x128xbf16>, vector<256x128xf32> -> vector<256x128xf32>
    %231 = arith.addf %223, %230 : vector<256x128xf32>
    %c256_i32_209 = arith.constant 256 : i32
    %232 = arith.muli %c0_i32_134, %c256_i32_209 : i32
    %233 = tpu.assume_multiple %232, 8 : i32
    %234 = arith.index_cast %233 : i32 to index
    %c0_210 = arith.constant 0 : index
    %235 = vector.load %arg6[%234, %c0_210] : memref<256x128xf32, #tpu.memory_space<vmem>>, vector<256x128xf32>
    tpu.vector_store %arg6[%234, %c0_210], %231 {strides = array<i32>} : memref<256x128xf32, #tpu.memory_space<vmem>>, vector<256x128xf32>,
    %cst_211 = arith.constant dense<0.000000e+00> : vector<128xf32>
    %236 = vector.multi_reduction <add>, %231, %cst_211 [0] : vector<256x128xf32> to vector<128xf32>
    %237 = vector.shape_cast %236 : vector<128xf32> to vector<1x128xf32>
    %238 = arith.addf %157, %237 : vector<1x128xf32>
    %239 = arith.mulf %231, %231 : vector<256x128xf32>
    %cst_212 = arith.constant dense<0.000000e+00> : vector<128xf32>
    %240 = vector.multi_reduction <add>, %239, %cst_212 [0] : vector<256x128xf32> to vector<128xf32>
    %241 = vector.shape_cast %240 : vector<128xf32> to vector<1x128xf32>
    %242 = arith.addf %157, %241 : vector<1x128xf32>
    %c1_i32_213 = arith.constant 1 : i32
    %cst_214 = arith.constant 3.906250e-03 : f32
    %243 = vector.broadcast %cst_214 : f32 to vector<1x128xf32>
    %244 = arith.mulf %238, %243 : vector<1x128xf32>
    %cst_215 = arith.constant 3.906250e-03 : f32
    %245 = vector.broadcast %cst_215 : f32 to vector<1x128xf32>
    %246 = arith.mulf %242, %245 : vector<1x128xf32>
    %247 = arith.mulf %244, %244 : vector<1x128xf32>
    %248 = arith.subf %246, %247 : vector<1x128xf32>
    %cst_216 = arith.constant 0.000000e+00 : f32
    %249 = vector.broadcast %cst_216 : f32 to vector<1x128xf32>
    %250 = arith.maximumf %248, %249 : vector<1x128xf32>
    %cst_217 = arith.constant 9.99999974E-6 : f32
    %251 = vector.broadcast %cst_217 : f32 to vector<1x128xf32>
    %252 = arith.addf %250, %251 : vector<1x128xf32>
    %253 = math.rsqrt %252 : vector<1x128xf32>
    %c0_i32_218 = arith.constant 0 : i32
    %c16_i32_219 = arith.constant 16 : i32
    %254 = arith.muli %c0_i32_218, %c16_i32_219 : i32
    %c256_i32_220 = arith.constant 256 : i32
    %255 = arith.muli %c0_i32_218, %c256_i32_220 : i32
    %256 = tpu.assume_multiple %255, 8 : i32
    %257 = arith.index_cast %256 : i32 to index
    %c0_221 = arith.constant 0 : index
    %258 = vector.load %arg6[%257, %c0_221] : memref<256x128xf32, #tpu.memory_space<vmem>>, vector<256x128xf32>
    %259 = vector.broadcast %244 : vector<1x128xf32> to vector<256x128xf32>
    %260 = arith.subf %258, %259 : vector<256x128xf32>
    %261 = vector.broadcast %253 : vector<1x128xf32> to vector<256x128xf32>
    %262 = arith.mulf %260, %261 : vector<256x128xf32>
    %c0_222 = arith.constant 0 : index
    %263 = arith.index_cast %254 : i32 to index
    %c0_223 = arith.constant 0 : index
    %c0_224 = arith.constant 0 : index
    %264 = vector.load %arg1[%c0_222, %263, %c0_223, %c0_224] : memref<1x16x16x128xf32, #tpu.memory_space<vmem>>, vector<1x16x16x128xf32>
    %265 = vector.shape_cast %264 : vector<1x16x16x128xf32> to vector<16x16x128xf32>
    %266 = vector.shape_cast %262 : vector<256x128xf32> to vector<16x16x128xf32>
    %267 = arith.addf %265, %266 : vector<16x16x128xf32>
    %c0_225 = arith.constant 0 : index
    %268 = arith.index_cast %254 : i32 to index
    %c0_226 = arith.constant 0 : index
    %c0_227 = arith.constant 0 : index
    %269 = vector.load %arg4[%c0_225, %268, %c0_226, %c0_227] : memref<1x16x16x128xf32, #tpu.memory_space<vmem>>, vector<1x16x16x128xf32>
    %270 = vector.shape_cast %269 : vector<1x16x16x128xf32> to vector<16x16x128xf32>
    %271 = vector.shape_cast %267 : vector<16x16x128xf32> to vector<1x16x16x128xf32>
    tpu.vector_store %arg4[%c0_225, %268, %c0_226, %c0_227], %271 {strides = array<i32>} : memref<1x16x16x128xf32, #tpu.memory_space<vmem>>, vector<1x16x16x128xf32>,
    %c1_i32_228 = arith.constant 1 : i32
    return
  }
  func.func @transform_0(%arg0: i32) -> (i32, i32, i32, i32) {
    %c0_i32 = arith.constant 0 : i32
    %c0_i32_0 = arith.constant 0 : i32
    %c0_i32_1 = arith.constant 0 : i32
    %c0_i32_2 = arith.constant 0 : i32
    return %arg0, %c0_i32, %c0_i32_0, %c0_i32_1 : i32, i32, i32, i32
  }
  func.func @transform_1(%arg0: i32) -> (i32, i32, i32, i32) {
    %c0_i32 = arith.constant 0 : i32
    %c0_i32_0 = arith.constant 0 : i32
    %c0_i32_1 = arith.constant 0 : i32
    %c0_i32_2 = arith.constant 0 : i32
    %c0_i32_3 = arith.constant 0 : i32
    return %c0_i32, %c0_i32_0, %c0_i32_1, %c0_i32_2 : i32, i32, i32, i32
  }
  func.func @transform_2(%arg0: i32) -> (i32, i32, i32, i32) {
    %c0_i32 = arith.constant 0 : i32
    %c0_i32_0 = arith.constant 0 : i32
    %c0_i32_1 = arith.constant 0 : i32
    %c0_i32_2 = arith.constant 0 : i32
    %c0_i32_3 = arith.constant 0 : i32
    return %c0_i32, %c0_i32_0, %c0_i32_1, %c0_i32_2 : i32, i32, i32, i32
  }
  func.func @transform_3(%arg0: i32) -> (i32, i32, i32, i32) {
    %c0_i32 = arith.constant 0 : i32
    %c0_i32_0 = arith.constant 0 : i32
    %c0_i32_1 = arith.constant 0 : i32
    %c0_i32_2 = arith.constant 0 : i32
    return %arg0, %c0_i32, %c0_i32_0, %c0_i32_1 : i32, i32, i32, i32
  }
}

</mosaic_0001>

<bundles_post_ra>
// kernel: resnet_block_forward.1
= control target key start
LH: loop header
LB: loop body
LE: loop exit
PB: predicated region body
PF: predicated region fallthrough
CT: control target
= control target key end

     0   :  { %s12963_s12 = smov 0   ;;  %s15397_s0 = inlined_call_operand.vmem [shape: f32[2,16,16,128], index: 0, kind: input, shape index: {}]   ;;  %s15398_s1 = inlined_call_operand.vmem [shape: bf16[3,3,128,128], index: 1, kind: input, shape index: {}]   ;;  %s15399_s2 = inlined_call_operand.vmem [shape: bf16[3,3,128,128], index: 2, kind: input, shape index: {}]   ;;  %s15400_s3 = inlined_call_operand.vmem [shape: f32[2,16,16,128], index: 3, kind: output, shape index: {}]  }
   0x1 LB: > { %s10527_s13 = sadd.s32 4294967295, %s12941_s12   ;;  %p10531_p0 = scmp.ge.s32.totalorder %s12941_s12, 1  ;;  %s12941_s12 = sphi %s12963_s12, %s13_s12  }
   0x2   : > { %p137_p1 = scmp.lt.s32.totalorder %s12941_s12, 3 }
   0x4   : > { %p138_p2 = pnand %p10531_p0, %p137_p1 }
   0x6   : > { %141 = sbr.rel (%p138_p2) target bundleno = 1761 (0x6e1), region = 32 }
   0xd   : > { %v12756_v0 = vld [vmem:[%s15398_s1 + $0x40] sm:$0xff]   ;;  %p161_p3 = scmp.lt.s32.totalorder %s10527_s13, 1  ;;  %v12757_v1 = vld [vmem:[%s15398_s1 + $0x48] sm:$0xff]   ;;  %v12758_v2 = vld [vmem:[%s15398_s1 + $0x50] sm:$0xff]   ;;  %vm954_vm0 = vcmask 1043456   ;;  %vm384_vm2 = vcmask 1043459  }
   0xe   : > { %11372 = vmatprep.subr.bf16.mxu0 %v12756_v0  ;;  %v12759_v3 = vld [vmem:[%s15398_s1 + $0x58] sm:$0xff]   ;;  %v12760_v12 = vld [vmem:[%s15398_s1 + $0x60] sm:$0xff]   ;;  %v12761_v29 = vld [vmem:[%s15398_s1 + $0x68] sm:$0xff]   ;;  %vm385_vm1 = vsmask.f32 7950  ;;  %vm513_vm5 = vcmask 1044484  }
   0xf   : > { %s15408_s13 = smov (!%p161_p3, %s10527_s13), 1  ;;  %11373 = vmatpush3.bf16.msra.mxu0 %v12756_v0  ;;  %v12762_v42 = vld [vmem:[%s15398_s1 + $0x70] sm:$0xff]   ;;  %v12763_v47 = vld [vmem:[%s15398_s1 + $0x78] sm:$0xff]   ;;  %v12764_v59 = vld [vmem:[%s15398_s1] sm:$0xff]   ;;  %vm514_vm4 = vsmask.f32 4352 }
  0x10   : > { %11374 = vmatprep.subr.bf16.mxu0 %v12757_v1  ;;  %s10938_s20 = sshll.u32 %s15408_s13, 8  ;;  %vm13068_vm3 = vmand %vm384_vm2, %vm385_vm1  ;;  %vm1470_vm7 = vsmask.f32 3328 }
  0x11   : > { %s12988_s23 = scalar_lea.vmem %s15397_s0, %s10938_s20  ;;  %vm13177_vm6 = vmand %vm513_vm5, %vm514_vm4  ;;  %s15314_s5 = scalar_lea.vmem %s15400_s3, %s10938_s20 }
  0x12   : > { %v174_v4 = vld [vmem:[%s12988_s23 + $0x10] sm:$0xff]  ;;  %v175_v5 = vld [vmem:[%s12988_s23 + $0x18] sm:$0xff]  ;;  %v172_v6 = vld [vmem:[%s12988_s23] sm:$0xff] }
  0x13   : > { %11375 = vmatpush3.bf16.msra.mxu0 %v12757_v1  ;;  %v205_v7 = vpack.c.bf16 %v175_v5, %v174_v4  ;;  %v173_v8 = vld [vmem:[%s12988_s23 + $0x8] sm:$0xff]  ;;  %v176_v10 = vld [vmem:[%s12988_s23 + $0x20] sm:$0xff]  ;;  %v178_v16 = vld [vmem:[%s12988_s23 + $0x30] sm:$0xff] }
  0x14   : > { %11376 = vmatprep.subr.bf16.mxu0 %v12758_v2  ;;  %v204_v9 = vpack.c.bf16 %v173_v8, %v172_v6  ;;  %v177_v11 = vld [vmem:[%s12988_s23 + $0x28] sm:$0xff]  ;;  %v179_v17 = vld [vmem:[%s12988_s23 + $0x38] sm:$0xff]  ;;  %v180_v18 = vld [vmem:[%s12988_s23 + $0x40] sm:$0xff] }
  0x15   : > { %v237_v13 = vrot.slane %v205_v7, 4  ;;  %v206_v14 = vpack.c.bf16 %v177_v11, %v176_v10  ;;  %v207_v20 = vpack.c.bf16 %v179_v17, %v178_v16  ;;  %v181_v21 = vld [vmem:[%s12988_s23 + $0x48] sm:$0xff]  ;;  %v182_v23 = vld [vmem:[%s12988_s23 + $0x50] sm:$0xff]  ;;  %v183_v24 = vld [vmem:[%s12988_s23 + $0x58] sm:$0xff] }
  0x16   : > { %v236_v15 = vrot.slane %v204_v9, 4  ;;  %v208_v22 = vpack.c.bf16 %v181_v21, %v180_v18  ;;  %v209_v26 = vpack.c.bf16 %v183_v24, %v182_v23  ;;  %v184_v27 = vld [vmem:[%s12988_s23 + $0x60] sm:$0xff]  ;;  %v185_v28 = vld [vmem:[%s12988_s23 + $0x68] sm:$0xff]  ;;  %v186_v32 = vld [vmem:[%s12988_s23 + $0x70] sm:$0xff] }
  0x17   : > { %11377 = vmatpush3.bf16.msra.mxu0 %v12758_v2  ;;  %271 = vst [vmem:[#allocation2 + $0x28] ss:$-4 sps:$4 sm:$0xff] %v237_v13   ;;  %v238_v19 = vrot.slane %v206_v14, 4  ;;  %v239_v25 = vrot.slane %v207_v20, 4  ;;  %v210_v31 = vpack.c.bf16 %v185_v28, %v184_v27  ;;  %v187_v34 = vld [vmem:[%s12988_s23 + $0x78] sm:$0xff]  ;;  %v188_v35 = vld [vmem:[%s12988_s23 + $0x80] sm:$0xff] }
  0x18   : > { %11378 = vmatprep.subr.bf16.mxu0 %v12759_v3  ;;  %269 = vst [vmem:[#allocation2 + $0x18] ss:$-4 sps:$4 sm:$0xff] %v236_v15   ;;  %v240_v30 = vrot.slane %v208_v22, 4  ;;  %v241_v33 = vrot.slane %v209_v26, 4  ;;  %v189_v36 = vld [vmem:[%s12988_s23 + $0x88] sm:$0xff]  ;;  %v211_v38 = vpack.c.bf16 %v187_v34, %v186_v32  ;;  %v190_v40 = vld [vmem:[%s12988_s23 + $0x90] sm:$0xff] }
  0x19   : > { %273 = vst [vmem:[#allocation2 + $0x38] ss:$-4 sps:$4 sm:$0xff] %v238_v19   ;;  %275 = vst [vmem:[#allocation2 + $0x48] ss:$-4 sps:$4 sm:$0xff] %v239_v25   ;;  %v242_v37 = vrot.slane %v210_v31, 4  ;;  %v212_v39 = vpack.c.bf16 %v189_v36, %v188_v35  ;;  %v191_v41 = vld [vmem:[%s12988_s23 + $0x98] sm:$0xff] }
  0x1a   : > { %277 = vst [vmem:[#allocation2 + $0x58] ss:$-4 sps:$4 sm:$0xff] %v240_v30   ;;  %279 = vst [vmem:[#allocation2 + $0x68] ss:$-4 sps:$4 sm:$0xff] %v241_v33   ;;  %v213_v45 = vpack.c.bf16 %v191_v41, %v190_v40  ;;  %v192_v46 = vld [vmem:[%s12988_s23 + $0xa0] sm:$0xff]  ;;  %v243_v48 = vrot.slane %v211_v38, 4 }
  0x1b   : > { %11379 = vmatpush3.bf16.msra.mxu0 %v12759_v3  ;;  %281 = vst [vmem:[#allocation2 + $0x78] ss:$-4 sps:$4 sm:$0xff] %v242_v37   ;;  %v244_v49 = vrot.slane %v212_v39, 4  ;;  %v193_v53 = vld [vmem:[%s12988_s23 + $0xa8] sm:$0xff]  ;;  %v194_v3 = vld [vmem:[%s12988_s23 + $0xb0] sm:$0xff]  ;;  %v195_v4 = vld [vmem:[%s12988_s23 + $0xb8] sm:$0xff] }
  0x1c   : > { %11380 = vmatprep.subr.bf16.mxu0 %v12760_v12  ;;  %v245_v50 = vrot.slane %v213_v45, 4  ;;  %283 = vst [vmem:[#allocation2 + $0x88] ss:$-4 sps:$4 sm:$0xff] %v243_v48   ;;  %v214_v56 = vpack.c.bf16 %v193_v53, %v192_v46  ;;  %v215_v7 = vpack.c.bf16 %v195_v4, %v194_v3  ;;  %v196_v8 = vld [vmem:[%s12988_s23 + $0xc0] sm:$0xff]  ;;  %v197_v9 = vld [vmem:[%s12988_s23 + $0xc8] sm:$0xff]  ;;  %v12766_v21 = vld [vmem:[%s15398_s1 + $0x10] sm:$0xff]  }
  0x1d   : > { %285 = vst [vmem:[#allocation2 + $0x98] ss:$-4 sps:$4 sm:$0xff] %v244_v49   ;;  %v12765_v13 = vld [vmem:[%s15398_s1 + $0x8] sm:$0xff]   ;;  %v216_v14 = vpack.c.bf16 %v197_v9, %v196_v8  ;;  %v198_v22 = vld [vmem:[%s12988_s23 + $0xd0] sm:$0xff]  ;;  %v199_v25 = vld [vmem:[%s12988_s23 + $0xd8] sm:$0xff] }
  0x1e   : > { %v302_v43 = vld [vmem:[#allocation2 + $0x20] sm:$0xf0]  ;;  %v303_v44 = vld [vmem:[#allocation2 + $0x28] sm:$0xf]  ;;  %287 = vst [vmem:[#allocation2 + $0xa8] ss:$-4 sps:$4 sm:$0xff] %v245_v50   ;;  %v217_v28 = vpack.c.bf16 %v199_v25, %v198_v22 }
  0x1f   : > { %11381 = vmatpush3.bf16.msra.mxu0 %v12760_v12  ;;  %304 = vst [vmem:[#allocation2] sm:$0xf0] %v302_v43  ;;  %305 = vst [vmem:[#allocation2 + $0x8] sm:$0xf] %v303_v44  ;;  %v13026_v51 = vld [vmem:[#allocation2 + $0x18] sm:$0xf] }
  0x20   : > { %11382 = vmatprep.subr.bf16.mxu0 %v12761_v29  ;;  %v907_v52 = vld [vmem:[#allocation2 + $0x10] sm:$0xf0]  ;;  %v13029_v54 = vld [vmem:[#allocation2 + $0x28] sm:$0xf]  ;;  %v908_v55 = vld [vmem:[#allocation2 + $0x20] sm:$0xf0] }
  0x21   : > { %v958_v57 = vrot.slane %v907_v52, 4  ;;  %v959_v58 = vrot.slane %v13026_v51, 4  ;;  %v961_v62 = vrot.slane %v908_v55, 4  ;;  %v962_v63 = vrot.slane %v13029_v54, 4  ;;  %v13046_v11 = vld [vmem:[#allocation2 + $0x38] sm:$0xf] }
  0x22   : > { %v246_v2 = vrot.slane %v214_v56, 4  ;;  %v909_v12 = vld [vmem:[#allocation2 + $0x30] sm:$0xf0]  ;;  %v13051_v15 = vld [vmem:[#allocation2 + $0x48] sm:$0xf]  ;;  %v247_v17 = vrot.slane %v215_v7, 4 }
  0x23   : > { %11383 = vmatpush3.bf16.msra.mxu0 %v12761_v29  ;;  %v960_v6 = vsel %vm954_vm0, %v958_v57, %v959_v58  ;;  %v963_v10 = vsel %vm954_vm0, %v961_v62, %v962_v63  ;;  %v910_v16 = vld [vmem:[#allocation2 + $0x40] sm:$0xf0]  ;;  %v248_v18 = vrot.slane %v216_v14, 4  ;;  %v964_v19 = vrot.slane %v909_v12, 4  ;;  %v201_v27 = vld [vmem:[%s12988_s23 + $0xe8] sm:$0xff]  ;;  %v12767_v41 = vld [vmem:[%s15398_s1 + $0x18] sm:$0xff]  }
  0x24   : > { %11384 = vmatprep.subr.bf16.mxu0 %v12762_v42  ;;  %289 = vst [vmem:[#allocation2 + $0xb8] ss:$-4 sps:$4 sm:$0xff] %v246_v2   ;;  %v965_v20 = vrot.slane %v13046_v11, 4  ;;  %291 = vst [vmem:[#allocation2 + $0xc8] ss:$-4 sps:$4 sm:$0xff] %v247_v17   ;;  %v967_v23 = vrot.slane %v910_v16, 4 }
  0x25   : > { %v968_v24 = vrot.slane %v13051_v15, 4  ;;  %293 = vst [vmem:[#allocation2 + $0xd8] ss:$-4 sps:$4 sm:$0xff] %v248_v18   ;;  %v200_v26 = vld [vmem:[%s12988_s23 + $0xe0] sm:$0xff]  ;;  %v13062_v30 = vld [vmem:[#allocation2 + $0x58] sm:$0xf] }
  0x26   : > { %v13035_v60 = vld [vmem:[#allocation2 + $0x8] sm:$0xf]  ;;  %v906_v61 = vld [vmem:[#allocation2] sm:$0xf0]  ;;  %v218_v29 = vpack.c.bf16 %v201_v27, %v200_v26  ;;  %v911_v31 = vld [vmem:[#allocation2 + $0x50] sm:$0xf0]  ;;  %v966_v33 = vsel %vm954_vm0, %v964_v19, %v965_v20 }
  0x27   : > { %11385 = vmatpush3.bf16.msra.mxu0 %v12762_v42  ;;  %v955_v0 = vrot.slane %v906_v61, 4  ;;  %v956_v1 = vrot.slane %v13035_v60, 4  ;;  %v312_v32 = vld [vmem:[#allocation2] sm:$0x10]  ;;  %v13065_v34 = vld [vmem:[#allocation2 + $0x68] sm:$0xf]  ;;  %v969_v40 = vsel %vm954_vm0, %v967_v23, %v968_v24 }
  0x28   : > { %11386 = vmatprep.subr.bf16.mxu0 %v12763_v47  ;;  %v912_v35 = vld [vmem:[#allocation2 + $0x60] sm:$0xf0]  ;;  %v249_v36 = vrot.slane %v217_v28, 4  ;;  %v250_v37 = vrot.slane %v218_v29, 4  ;;  %v387_v39 = vld [vmem:[#allocation2] sm:$0x8] }
  0x29   : > { %v957_v5 = vsel %vm954_vm0, %v955_v0, %v956_v1  ;;  %v348_v42 = vrot.slane %v312_v32, 1  ;;  %v313_v43 = vld [vmem:[#allocation2 + $0x10] sm:$0x10]  ;;  %v390_v44 = vld [vmem:[#allocation2 + $0x10] sm:$0x8]  ;;  %v970_v48 = vrot.slane %v911_v31, 4 }
  0x2a   : > { %11388 = vmatprep.mubr.bf16.mxu0 %v957_v5  ;;  %295 = vst [vmem:[#allocation2 + $0xe8] ss:$-4 sps:$4 sm:$0xff] %v249_v36   ;;  %297 = vst [vmem:[#allocation2 + $0xf8] ss:$-4 sps:$4 sm:$0xff] %v250_v37   ;;  %v349_v45 = vrot.slane %v313_v43, 1  ;;  %v971_v49 = vrot.slane %v13062_v30, 4 }
  0x2b   : > { %11387 = vmatpush3.bf16.msra.mxu0 %v12763_v47  ;;  %v388_v46 = vsel %vm13068_vm3, %v348_v42, %v387_v39  ;;  %v314_v47 = vld [vmem:[#allocation2 + $0x20] sm:$0x10]  ;;  %v973_v52 = vrot.slane %v912_v35, 4  ;;  %v974_v53 = vrot.slane %v13065_v34, 4  ;;  %v393_v57 = vld [vmem:[#allocation2 + $0x20] sm:$0x8] }
  0x2c   : > { %11420 = vmatprep.subr.bf16.mxu0 %v12764_v59  ;;  %389 = vst [vmem:[#allocation2] sm:$0x8] %v388_v46  ;;  %v391_v50 = vsel %vm13068_vm3, %v349_v45, %v390_v44  ;;  %v12768_v55 = vld [vmem:[%s15398_s1 + $0x20] sm:$0xff]   ;;  %v350_v56 = vrot.slane %v314_v47, 1  ;;  %v315_v58 = vld [vmem:[#allocation2 + $0x30] sm:$0x10]  ;;  %v972_v63 = vsel %vm954_vm0, %v970_v48, %v971_v49 }
  0x2d   : > { %392 = vst [vmem:[#allocation2 + $0x10] sm:$0x8] %v391_v50  ;;  %v351_v62 = vrot.slane %v315_v58, 1  ;;  %v316_v0 = vld [vmem:[#allocation2 + $0x40] sm:$0x10]  ;;  %v975_v1 = vsel %vm954_vm0, %v973_v52, %v974_v53  ;;  %v12769_v4 = vld [vmem:[%s15398_s1 + $0x28] sm:$0xff]  }
  0x2e   : > { %11389 = vmatmul.mubr.bf16.vlgmr.msra.gmra.mrb[0].mxu0 %v960_v6  ;;  %v394_v61 = vsel %vm13068_vm3, %v350_v56, %v393_v57  ;;  %v13089_v2 = vld [vmem:[#allocation2 + $0x78] sm:$0xf]  ;;  %v913_v3 = vld [vmem:[#allocation2 + $0x70] sm:$0xf0]  ;;  %v13096_v6 = vld [vmem:[#allocation2 + $0x88] sm:$0xf] }
  0x2f   : > { %11421 = vmatpush3.bf16.msra.mxu0 %v12764_v59  ;;  %11392 = vmatprep.mubr.bf16.mxu0 %v963_v10  ;;  %v396_v59 = vld [vmem:[#allocation2 + $0x30] sm:$0x8]  ;;  %395 = vst [vmem:[#allocation2 + $0x20] sm:$0x8] %v394_v61  ;;  %v914_v7 = vld [vmem:[#allocation2 + $0x80] sm:$0xf0] }
  0x30   : > { %11422 = vmatprep.subr.bf16.mxu0 %v12765_v13  ;;  %v397_v5 = vsel %vm13068_vm3, %v351_v62, %v396_v59  ;;  %v352_v8 = vrot.slane %v316_v0, 1  ;;  %v976_v9 = vrot.slane %v913_v3, 4  ;;  %v977_v10 = vrot.slane %v13089_v2, 4  ;;  %v399_v12 = vld [vmem:[#allocation2 + $0x40] sm:$0x8]  ;;  %v12770_v16 = vld [vmem:[%s15398_s1 + $0x30] sm:$0xff]  }
  0x31   : > { %398 = vst [vmem:[#allocation2 + $0x30] sm:$0x8] %v397_v5  ;;  %v980_v14 = vrot.slane %v13096_v6, 4  ;;  %v317_v17 = vld [vmem:[#allocation2 + $0x50] sm:$0x10]  ;;  %v12771_v27 = vld [vmem:[%s15398_s1 + $0x38] sm:$0xff]  }
  0x32   : > { %v400_v18 = vsel %vm13068_vm3, %v352_v8, %v399_v12  ;;  %v402_v19 = vld [vmem:[#allocation2 + $0x50] sm:$0x8]  ;;  %v13105_v20 = vld [vmem:[#allocation2 + $0x98] sm:$0xf]  ;;  %v978_v22 = vsel %vm954_vm0, %v976_v9, %v977_v10  ;;  %v915_v23 = vld [vmem:[#allocation2 + $0x90] sm:$0xf0] }
  0x33   : > { %11423 = vmatpush3.bf16.msra.mxu0 %v12765_v13  ;;  %v979_v13 = vrot.slane %v914_v7, 4  ;;  %401 = vst [vmem:[#allocation2 + $0x40] sm:$0x8] %v400_v18  ;;  %v13108_v24 = vld [vmem:[#allocation2 + $0xa8] sm:$0xf]  ;;  %v983_v31 = vrot.slane %v13105_v20, 4 }
  0x34   : > { %11424 = vmatprep.subr.bf16.mxu0 %v12766_v21  ;;  %v916_v26 = vld [vmem:[#allocation2 + $0xa0] sm:$0xf0]  ;;  %v405_v32 = vld [vmem:[#allocation2 + $0x60] sm:$0x8]  ;;  %v982_v35 = vrot.slane %v915_v23, 4  ;;  %v986_v37 = vrot.slane %v13108_v24, 4 }
  0x35   : > { %v981_v25 = vsel %vm954_vm0, %v979_v13, %v980_v14  ;;  %v318_v29 = vld [vmem:[#allocation2 + $0x60] sm:$0x10]  ;;  %v985_v36 = vrot.slane %v916_v26, 4  ;;  %v408_v42 = vld [vmem:[#allocation2 + $0x70] sm:$0x8]  ;;  %v628_v23 = vshrl.u32 %v13026_v51, 16 }
  0x36   : > { %11393 = vmatmul.mubr.bf16.gmra.mrb[4].mxu0 %v966_v33  ;;  %v319_v33 = vld [vmem:[#allocation2 + $0x70] sm:$0x10]  ;;  %v354_v39 = vrot.slane %v318_v29, 1  ;;  %v320_v44 = vld [vmem:[#allocation2 + $0x80] sm:$0x10]  ;;  %v984_v46 = vsel %vm954_vm0, %v982_v35, %v983_v31  ;;  %v631_v35 = vshll.u32 %v13026_v51, 16 }
  0x37   : > { %11396 = vmatprep.mubr.bf16.mxu0 %v969_v40  ;;  %11425 = vmatpush3.bf16.msra.mxu0 %v12766_v21  ;;  %v353_v21 = vrot.slane %v317_v17, 1  ;;  %v13121_v40 = vld [vmem:[%s15398_s1 + $0x80] sm:$0xff]   ;;  %v356_v48 = vrot.slane %v320_v44, 1  ;;  %v321_v49 = vld [vmem:[#allocation2 + $0x90] sm:$0x10]  ;;  %v987_v50 = vsel %vm954_vm0, %v985_v36, %v986_v37 }
  0x38   : > { %11426 = vmatprep.subr.bf16.mxu0 %v12767_v41  ;;  %v406_v43 = vsel %vm13068_vm3, %v354_v39, %v405_v32  ;;  %v411_v45 = vld [vmem:[#allocation2 + $0x80] sm:$0x8]  ;;  %v13129_v52 = vld [vmem:[#allocation2 + $0xb8] sm:$0xf]  ;;  %v917_v53 = vld [vmem:[#allocation2 + $0xb0] sm:$0xf0] }
  0x39   : > { %v403_v28 = vsel %vm13068_vm3, %v353_v21, %v402_v19  ;;  %407 = vst [vmem:[#allocation2 + $0x60] sm:$0x8] %v406_v43  ;;  %v918_v56 = vld [vmem:[#allocation2 + $0xc0] sm:$0xf0]  ;;  %v412_v57 = vsel %vm13068_vm3, %v356_v48, %v411_v45  ;;  %v414_v58 = vld [vmem:[#allocation2 + $0x90] sm:$0x8] }
  0x3a   : > { %404 = vst [vmem:[#allocation2 + $0x50] sm:$0x8] %v403_v28  ;;  %413 = vst [vmem:[#allocation2 + $0x80] sm:$0x8] %v412_v57  ;;  %v357_v59 = vrot.slane %v321_v49, 1  ;;  %v988_v61 = vrot.slane %v917_v53, 4 }
  0x3b   : > { %11427 = vmatpush3.bf16.msra.mxu0 %v12767_v41  ;;  %v355_v41 = vrot.slane %v319_v33, 1  ;;  %v989_v62 = vrot.slane %v13129_v52, 4  ;;  %v991_v0 = vrot.slane %v918_v56, 4  ;;  %v323_v7 = vld [vmem:[#allocation2 + $0xb0] sm:$0x10]  ;;  %v611_v21 = vshrl.u32 %v13035_v60, 16 }
  0x3c   : > { %11428 = vmatprep.subr.bf16.mxu0 %v12768_v55  ;;  %v415_v3 = vsel %vm13068_vm3, %v357_v59, %v414_v58  ;;  %v13141_v9 = vld [vmem:[#allocation2 + $0xd8] sm:$0xf]  ;;  %v919_v10 = vld [vmem:[#allocation2 + $0xd0] sm:$0xf0]  ;;  %v13146_v14 = vld [vmem:[#allocation2 + $0xe8] sm:$0xf] }
  0x3d   : > { %v409_v47 = vsel %vm13068_vm3, %v355_v41, %v408_v42  ;;  %416 = vst [vmem:[#allocation2 + $0x90] sm:$0x8] %v415_v3  ;;  %v990_v8 = vsel %vm954_vm0, %v988_v61, %v989_v62  ;;  %v920_v17 = vld [vmem:[#allocation2 + $0xe0] sm:$0xf0]  ;;  %v359_v19 = vrot.slane %v323_v7, 1  ;;  %v995_v26 = vrot.slane %v13141_v9, 4 }
  0x3e   : > { %11397 = vmatmul.mubr.bf16.gmra.mrb[8].mxu0 %v972_v63  ;;  %410 = vst [vmem:[#allocation2 + $0x70] sm:$0x8] %v409_v47  ;;  %v322_v63 = vld [vmem:[#allocation2 + $0xa0] sm:$0x10]  ;;  %v997_v29 = vrot.slane %v920_v17, 4  ;;  %v998_v31 = vrot.slane %v13146_v14, 4 }
  0x3f   : > { %11400 = vmatprep.mubr.bf16.mxu0 %v975_v1  ;;  %11429 = vmatpush3.bf16.msra.mxu0 %v12768_v55  ;;  %v13131_v55 = vld [vmem:[#allocation2 + $0xc8] sm:$0xf]  ;;  %v358_v5 = vrot.slane %v322_v63, 1  ;;  %v570_v18 = vld [vmem:[#allocation2] sm:$0xf8]  ;;  %v613_v36 = vrot.slane %v611_v21, 3 }
  0x40   : > { %11430 = vmatprep.subr.bf16.mxu0 %v12769_v4  ;;  %v992_v1 = vrot.slane %v13131_v55, 4  ;;  %v324_v28 = vld [vmem:[#allocation2 + $0xc0] sm:$0x10]  ;;  %v603_v32 = vshrl.u32 %v570_v18, 16  ;;  %v606_v33 = vshll.u32 %v570_v18, 16  ;;  %v13156_v39 = vrot.slane %v628_v23, 3 }
  0x41   : > { %v360_v41 = vrot.slane %v324_v28, 1  ;;  %v13159_v43 = vld [vmem:[#allocation2 + $0xf8] sm:$0xf]  ;;  %v572_v44 = vld [vmem:[#allocation2 + $0x10] sm:$0xf8]  ;;  %v645_v56 = vshrl.u32 %v13029_v54, 16 }
  0x42   : > { %v993_v13 = vsel %vm954_vm0, %v991_v0, %v992_v1  ;;  %v325_v45 = vld [vmem:[#allocation2 + $0xd0] sm:$0x10]  ;;  %v605_v48 = vrot.slane %v603_v32, 3  ;;  %v608_v49 = vrot.slane %v606_v33, 4  ;;  %v574_v53 = vld [vmem:[#allocation2 + $0x20] sm:$0xf8] }
  0x43   : > { %11431 = vmatpush3.bf16.msra.mxu0 %v12769_v4  ;;  %v417_v4 = vld [vmem:[#allocation2 + $0xa0] sm:$0x8]  ;;  %v921_v47 = vld [vmem:[#allocation2 + $0xf0] sm:$0xf0]  ;;  %v648_v57 = vshll.u32 %v13029_v54, 16  ;;  %v620_v61 = vshrl.u32 %v572_v44, 16 }
  0x44   : > { %11432 = vmatprep.subr.bf16.mxu0 %v12770_v16  ;;  %v418_v12 = vsel %vm13068_vm3, %v358_v5, %v417_v4  ;;  %v426_v58 = vld [vmem:[#allocation2 + $0xd0] sm:$0x8]  ;;  %v361_v62 = vrot.slane %v325_v45, 1  ;;  %v429_v63 = vld [vmem:[#allocation2 + $0xe0] sm:$0x8]  ;;  %v1000_v0 = vrot.slane %v921_v47, 4  ;;  %v609_v5 = vor.u32 %v608_v49, %v605_v48 }
  0x45   : > { %419 = vst [vmem:[#allocation2 + $0xa0] sm:$0x8] %v418_v12  ;;  %v1001_v1 = vrot.slane %v13159_v43, 4  ;;  %v623_v3 = vshll.u32 %v572_v44, 16  ;;  %v637_v7 = vshrl.u32 %v574_v53, 16  ;;  %v633_v12 = vrot.slane %v631_v35, 4 }
  0x46   : > { %11401 = vmatmul.mubr.bf16.gmra.mrb[12].mxu0 %v978_v22  ;;  %v614_v22 = vshll.u32 %v13035_v60, 16  ;;  %v423_v60 = vld [vmem:[#allocation2 + $0xc0] sm:$0x8]  ;;  %v327_v54 = vld [vmem:[#allocation2 + $0xf0] sm:$0x10]  ;;  %v650_v21 = vrot.slane %v648_v57, 4 }
  0x47   : > { %11404 = vmatprep.mubr.bf16.mxu0 %v981_v25  ;;  %11433 = vmatpush3.bf16.msra.mxu0 %v12770_v16  ;;  %v420_v16 = vld [vmem:[#allocation2 + $0xb0] sm:$0x8]  ;;  %v994_v25 = vrot.slane %v919_v10, 4  ;;  %v424_v51 = vsel %vm13068_vm3, %v360_v41, %v423_v60  ;;  %v427_v10 = vsel %vm13068_vm3, %v361_v62, %v426_v58  ;;  %v441_v18 = vld [vmem:[#allocation2 + $0x8] sm:$0x8]  ;;  %v679_v23 = vshrl.u32 %v13051_v15, 16 }
  0x48   : > { %11434 = vmatprep.subr.bf16.mxu0 %v12771_v27  ;;  %v616_v37 = vrot.slane %v614_v22, 4  ;;  %425 = vst [vmem:[#allocation2 + $0xc0] sm:$0x8] %v424_v51  ;;  %428 = vst [vmem:[#allocation2 + $0xd0] sm:$0x8] %v427_v10  ;;  %v665_v22 = vshll.u32 %v13046_v11, 16 }
  0x49   : > { %v996_v42 = vsel %vm954_vm0, %v994_v25, %v995_v26  ;;  %v432_v25 = vld [vmem:[#allocation2 + $0xf0] sm:$0x8]  ;;  %v1002_v26 = vsel %vm954_vm0, %v1000_v0, %v1001_v1  ;;  %v363_v28 = vrot.slane %v327_v54, 1  ;;  %v639_v33 = vrot.slane %v637_v7, 3  ;;  %v442_v41 = vld [vmem:[#allocation2 + $0x18] sm:$0x8] }
  0x4a   : > { %v617_v59 = vor.u32 %v616_v37, %v613_v36  ;;  %v477_v60 = vrot.slane %v441_v18, 7  ;;  %v578_v36 = vld [vmem:[#allocation2 + $0x40] sm:$0xf8]  ;;  %v682_v44 = vshll.u32 %v13051_v15, 16  ;;  %v519_v51 = vld [vmem:[#allocation2 + $0x18] sm:$0x10] }
  0x4b   : > { %11435 = vmatpush3.bf16.msra.mxu0 %v12771_v27  ;;  %v421_v27 = vsel %vm13068_vm3, %v359_v19, %v420_v16  ;;  %v662_v16 = vshrl.u32 %v13046_v11, 16  ;;  %v622_v19 = vrot.slane %v620_v61, 3  ;;  %v576_v11 = vld [vmem:[#allocation2 + $0x30] sm:$0xf8]  ;;  %v433_v37 = vsel %vm13068_vm3, %v363_v28, %v432_v25  ;;  %v443_v0 = vld [vmem:[#allocation2 + $0x28] sm:$0x8] }
  0x4c   : > { %11468 = vmatprep.subr.bf16.mxu0 %v13121_v40  ;;  %422 = vst [vmem:[#allocation2 + $0xb0] sm:$0x8] %v421_v27  ;;  %v625_v27 = vrot.slane %v623_v3, 4  ;;  %v618_v32 = vsel %vm514_vm4, %v609_v5, %v617_v59  ;;  %434 = vst [vmem:[#allocation2 + $0xf0] sm:$0x8] %v433_v37  ;;  %v654_v48 = vshrl.u32 %v576_v11, 16 }
  0x4d   : > { %v657_v49 = vshll.u32 %v576_v11, 16  ;;  %v478_v57 = vrot.slane %v442_v41, 7  ;;  %v664_v58 = vrot.slane %v662_v16, 3  ;;  %v667_v59 = vrot.slane %v665_v22, 4  ;;  %v580_v15 = vld [vmem:[#allocation2 + $0x50] sm:$0xf8] }
  0x4e   : > { %11405 = vmatmul.mubr.bf16.gmra.mrb[16].mxu0 %v984_v46  ;;  %v999_v46 = vsel %vm954_vm0, %v997_v29, %v998_v31  ;;  %v516_v31 = vld [vmem:[#allocation2 + $0x8] sm:$0x10]  ;;  %v684_v61 = vrot.slane %v682_v44, 4  ;;  %v696_v62 = vshrl.u32 %v13062_v30, 16  ;;  %v656_v3 = vrot.slane %v654_v48, 3 }
  0x4f   : > { %11408 = vmatprep.mubr.bf16.mxu0 %v987_v50  ;;  %v326_v50 = vld [vmem:[#allocation2 + $0xe0] sm:$0x10]  ;;  %v517_v45 = vsel %vm13177_vm6, %v477_v60, %v516_v31  ;;  %v12773_v5 = vld [vmem:[%s15398_s1 + $0x88] sm:$0xff]   ;;  %v699_v7 = vshll.u32 %v13062_v30, 16  ;;  %v716_v18 = vshll.u32 %v13065_v34, 16  ;;  %v668_v30 = vor.u32 %v667_v59, %v664_v58 }
  0x50   : > { %v362_v4 = vrot.slane %v326_v50, 1  ;;  %518 = vst [vmem:[#allocation2 + $0x8] sm:$0x10] %v517_v45  ;;  %v582_v16 = vld [vmem:[#allocation2 + $0x60] sm:$0xf8] }
  0x51   : > { %v705_v31 = vshrl.u32 %v582_v16, 16  ;;  %v718_v11 = vrot.slane %v716_v18, 4  ;;  %v525_v60 = vld [vmem:[#allocation2 + $0x38] sm:$0x10]  ;;  %v584_v37 = vld [vmem:[#allocation2 + $0x70] sm:$0xf8] }
  0x52   : > { %v430_v17 = vsel %vm13068_vm3, %v362_v4, %v429_v63  ;;  %v520_v63 = vsel %vm13177_vm6, %v478_v57, %v519_v51  ;;  %v659_v4 = vrot.slane %v657_v49, 4  ;;  %v446_v45 = vld [vmem:[#allocation2 + $0x58] sm:$0x8]  ;;  %v586_v57 = vld [vmem:[#allocation2 + $0x80] sm:$0xf8]  ;;  %v722_v59 = vshrl.u32 %v584_v37, 16 }
  0x53   : > { %431 = vst [vmem:[#allocation2 + $0xe0] sm:$0x8] %v430_v17  ;;  %521 = vst [vmem:[#allocation2 + $0x18] sm:$0x10] %v520_v63  ;;  %v713_v17 = vshrl.u32 %v13065_v34, 16  ;;  %v12774_v34 = vld [vmem:[%s15398_s1 + $0x90] sm:$0xff]  }
  0x54   : > { %v660_v22 = vor.u32 %v659_v4, %v656_v3  ;;  %v12775_v49 = vld [vmem:[%s15398_s1 + $0x98] sm:$0xff]   ;;  %v447_v4 = vld [vmem:[#allocation2 + $0x68] sm:$0x8] }
  0x56   : > { %11409 = vmatmul.mubr.bf16.gmra.mrb[20].mxu0 %v990_v8  ;;  %v640_v8 = vshll.u32 %v574_v53, 16  ;;  %v671_v53 = vshrl.u32 %v578_v36, 16  ;;  %v669_v44 = vsel %vm514_vm4, %v660_v22, %v668_v30  ;;  %v483_v22 = vrot.slane %v447_v4, 7 }
  0x57   : > { %11412 = vmatprep.mubr.bf16.mxu0 %v993_v13  ;;  %v647_v13 = vrot.slane %v645_v56, 3  ;;  %v674_v56 = vshll.u32 %v578_v36, 16 }
  0x58   : > { %v642_v35 = vrot.slane %v640_v8, 4  ;;  %v673_v10 = vrot.slane %v671_v53, 3  ;;  %v730_v53 = vshrl.u32 %v13089_v2, 16 }
  0x59   : > { %v651_v47 = vor.u32 %v650_v21, %v647_v13  ;;  %v676_v54 = vrot.slane %v674_v56, 4  ;;  %v688_v13 = vshrl.u32 %v580_v15, 16  ;;  %v691_v21 = vshll.u32 %v580_v15, 16 }
  0x5a   : > { %v643_v50 = vor.u32 %v642_v35, %v639_v33  ;;  %v701_v33 = vrot.slane %v699_v7, 4  ;;  %v715_v35 = vrot.slane %v713_v17, 3  ;;  %v733_v56 = vshll.u32 %v13089_v2, 16  ;;  %v12776_v2 = vld [vmem:[%s15398_s1 + $0xa0] sm:$0xff]  }
  0x5b   : > { %v693_v36 = vrot.slane %v691_v21, 4  ;;  %v482_v15 = vrot.slane %v446_v45, 7  ;;  %v724_v17 = vrot.slane %v722_v59, 3  ;;  %v12777_v21 = vld [vmem:[%s15398_s1 + $0xa8] sm:$0xff]  }
  0x5c   : > { %v652_v8 = vsel %vm514_vm4, %v643_v50, %v651_v47  ;;  %v707_v47 = vrot.slane %v705_v31, 3  ;;  %v528_v50 = vld [vmem:[#allocation2 + $0x48] sm:$0x10]  ;;  %v719_v7 = vor.u32 %v718_v11, %v715_v35  ;;  %v767_v35 = vshll.u32 %v13105_v20, 16  ;;  %v590_v11 = vld [vmem:[#allocation2 + $0xa0] sm:$0xf8] }
  0x5e   : > { %11413 = vmatmul.mubr.bf16.gmra.mrb[24].mxu0 %v996_v42  ;;  %v634_v42 = vor.u32 %v633_v12, %v13156_v39  ;;  %v681_v39 = vrot.slane %v679_v23, 3  ;;  %v522_v12 = vld [vmem:[#allocation2 + $0x28] sm:$0x10]  ;;  %v13200_v23 = vrot.slane %v696_v62, 3  ;;  %v531_v62 = vld [vmem:[#allocation2 + $0x58] sm:$0x10] }
  0x5f   : > { %11416 = vmatprep.mubr.bf16.mxu0 %v999_v46  ;;  %v626_v46 = vor.u32 %v625_v27, %v622_v19  ;;  %v479_v19 = vrot.slane %v443_v0, 7  ;;  %v677_v27 = vor.u32 %v676_v54, %v673_v10  ;;  %v448_v10 = vld [vmem:[#allocation2 + $0x78] sm:$0x8]  ;;  %v732_v54 = vrot.slane %v730_v53, 3  ;;  %v12778_v53 = vld [vmem:[%s15398_s1 + $0xb0] sm:$0xff]  }
  0x60   : > { %v685_v28 = vor.u32 %v684_v61, %v681_v39  ;;  %v747_v39 = vshrl.u32 %v13096_v6, 16  ;;  %v750_v61 = vshll.u32 %v13096_v6, 16  ;;  %v702_v0 = vor.u32 %v701_v33, %v13200_v23 }
  0x61   : > { %v635_v1 = vsel %vm514_vm4, %v626_v46, %v634_v42  ;;  %v523_v25 = vsel %vm13177_vm6, %v479_v19, %v522_v12  ;;  %v445_v42 = vld [vmem:[#allocation2 + $0x48] sm:$0x8]  ;;  %v739_v6 = vshrl.u32 %v586_v57, 16  ;;  %v735_v12 = vrot.slane %v733_v56, 4  ;;  %v543_v56 = vld [vmem:[#allocation2 + $0x98] sm:$0x10] }
  0x62   : > { %524 = vst [vmem:[#allocation2 + $0x28] sm:$0x10] %v523_v25  ;;  %v686_v46 = vsel %vm514_vm4, %v677_v27, %v685_v28  ;;  %v481_v58 = vrot.slane %v445_v42, 7  ;;  %v749_v18 = vrot.slane %v747_v39, 3  ;;  %v752_v19 = vrot.slane %v750_v61, 4 }
  0x63   : > { %v588_v25 = vld [vmem:[#allocation2 + $0x90] sm:$0xf8]  ;;  %v537_v27 = vld [vmem:[#allocation2 + $0x78] sm:$0x10]  ;;  %v764_v33 = vshrl.u32 %v13105_v20, 16 }
  0x64   : > { %v529_v3 = vsel %vm13177_vm6, %v481_v58, %v528_v50  ;;  %v540_v42 = vld [vmem:[#allocation2 + $0x88] sm:$0x10]  ;;  %v776_v50 = vshll.u32 %v590_v11, 16  ;;  %v769_v58 = vrot.slane %v767_v35, 4 }
  0x65   : > { %530 = vst [vmem:[#allocation2 + $0x48] sm:$0x10] %v529_v3 }
  0x66   : > { %11417 = vmatmul.mubr.bf16.gmra.mrb[28].mxu0 %v1002_v26  ;;  %v444_v26 = vld [vmem:[#allocation2 + $0x38] sm:$0x8] }
  0x67   : > { %11436 = vmatprep.mubr.bf16.mxu0 %v618_v32  ;;  %v708_v32 = vshll.u32 %v582_v16, 16  ;;  %v480_v41 = vrot.slane %v444_v26, 7  ;;  %v534_v16 = vld [vmem:[#allocation2 + $0x68] sm:$0x10]  ;;  %v484_v26 = vrot.slane %v448_v10, 7  ;;  %v798_v10 = vshrl.u32 %v13129_v52, 16 }
  0x69   : > { %v710_v48 = vrot.slane %v708_v32, 4  ;;  %v526_v51 = vsel %vm13177_vm6, %v480_v41, %v525_v60  ;;  %v535_v32 = vsel %vm13177_vm6, %v483_v22, %v534_v16  ;;  %v736_v60 = vor.u32 %v735_v12, %v732_v54  ;;  %v546_v12 = vld [vmem:[#allocation2 + $0xa8] sm:$0x10] }
  0x6a   : > { %527 = vst [vmem:[#allocation2 + $0x38] sm:$0x10] %v526_v51  ;;  %536 = vst [vmem:[#allocation2 + $0x68] sm:$0x10] %v535_v32  ;;  %v538_v41 = vsel %vm13177_vm6, %v484_v26, %v537_v27  ;;  %v773_v51 = vshrl.u32 %v590_v11, 16  ;;  %v801_v54 = vshll.u32 %v13129_v52, 16 }
  0x6b   : > { %539 = vst [vmem:[#allocation2 + $0x78] sm:$0x10] %v538_v41  ;;  %v815_v16 = vshrl.u32 %v13131_v55, 16  ;;  %v452_v27 = vld [vmem:[#allocation2 + $0xb8] sm:$0x8]  ;;  %v832_v32 = vshrl.u32 %v13141_v9, 16 }
  0x6c   : > { %v775_v4 = vrot.slane %v773_v51, 3 }
  0x6e   : > { %11437 = vmatmul.mubr.bf16.vlgmr.msra.gmra.mrb[0].mxu0 %v635_v1  ;;  %v725_v1 = vshll.u32 %v584_v37, 16  ;;  %v759_v37 = vshll.u32 %v588_v25, 16 }
  0x6f   : > { %11469 = vmatpush3.bf16.msra.mxu0 %v13121_v40  ;;  %11440 = vmatprep.mubr.bf16.mxu0 %v652_v8  ;;  %v690_v40 = vrot.slane %v688_v13, 3  ;;  %v742_v8 = vshll.u32 %v586_v57, 16  ;;  %v532_v13 = vsel %vm13177_vm6, %v482_v15, %v531_v62  ;;  %v766_v57 = vrot.slane %v764_v33, 3  ;;  %v12779_v15 = vld [vmem:[%s15398_s1 + $0xb8] sm:$0xff]  }
  0x70   : > { %11470 = vmatprep.subr.bf16.mxu0 %v12773_v5  ;;  %533 = vst [vmem:[#allocation2 + $0x58] sm:$0x10] %v532_v13  ;;  %v727_v23 = vrot.slane %v725_v1, 4 }
  0x71   : > { %v694_v63 = vor.u32 %v693_v36, %v690_v40  ;;  %v744_v31 = vrot.slane %v742_v8, 4  ;;  %v449_v40 = vld [vmem:[#allocation2 + $0x88] sm:$0x8]  ;;  %v756_v36 = vshrl.u32 %v588_v25, 16  ;;  %v770_v8 = vor.u32 %v769_v58, %v766_v57 }
  0x72   : > { %v728_v45 = vor.u32 %v727_v23, %v724_v17  ;;  %v485_v20 = vrot.slane %v449_v40, 7  ;;  %v818_v17 = vshll.u32 %v13131_v55, 16  ;;  %v13258_v23 = vld [vmem:[%s15398_s1 + $0xc0] sm:$0xff]   ;;  %v800_v55 = vrot.slane %v798_v10, 3  ;;  %v549_v40 = vld [vmem:[#allocation2 + $0xb8] sm:$0x10] }
  0x73   : > { %11471 = vmatpush3.bf16.msra.mxu0 %v12773_v5  ;;  %v711_v5 = vor.u32 %v710_v48, %v707_v47  ;;  %v703_v30 = vsel %vm514_vm4, %v694_v63, %v702_v0  ;;  %v784_v47 = vshll.u32 %v13108_v24, 16  ;;  %v758_v61 = vrot.slane %v756_v36, 3  ;;  %v558_v10 = vld [vmem:[#allocation2 + $0xe8] sm:$0x10] }
  0x74   : > { %11472 = vmatprep.subr.bf16.mxu0 %v12774_v34  ;;  %v541_v59 = vsel %vm13177_vm6, %v485_v20, %v540_v42  ;;  %v737_v62 = vsel %vm514_vm4, %v728_v45, %v736_v60  ;;  %v596_v60 = vld [vmem:[#allocation2 + $0xd0] sm:$0xf8]  ;;  %v488_v36 = vrot.slane %v452_v27, 7  ;;  %v453_v45 = vld [vmem:[#allocation2 + $0xc8] sm:$0x8] }
  0x75   : > { %v720_v28 = vsel %vm514_vm4, %v711_v5, %v719_v7  ;;  %542 = vst [vmem:[#allocation2 + $0x88] sm:$0x10] %v541_v59  ;;  %v786_v0 = vrot.slane %v784_v47, 4  ;;  %v778_v5 = vrot.slane %v776_v50, 4  ;;  %v592_v7 = vld [vmem:[#allocation2 + $0xb0] sm:$0xf8] }
  0x76   : > { %11441 = vmatmul.mubr.bf16.gmra.mrb[4].mxu0 %v669_v44  ;;  %v450_v44 = vld [vmem:[#allocation2 + $0x98] sm:$0x8]  ;;  %v849_v47 = vshrl.u32 %v13146_v14, 16  ;;  %v550_v20 = vsel %vm13177_vm6, %v488_v36, %v549_v40  ;;  %v824_v51 = vshrl.u32 %v596_v60, 16  ;;  %v852_v50 = vshll.u32 %v13146_v14, 16 }
  0x77   : > { %11444 = vmatprep.mubr.bf16.mxu0 %v686_v46  ;;  %11473 = vmatpush3.bf16.msra.mxu0 %v12774_v34  ;;  %v741_v34 = vrot.slane %v739_v6, 3  ;;  %v781_v46 = vshrl.u32 %v13108_v24, 16  ;;  %v486_v39 = vrot.slane %v450_v44, 7  ;;  %v761_v24 = vrot.slane %v759_v37, 4  ;;  %v594_v6 = vld [vmem:[#allocation2 + $0xc0] sm:$0xf8] }
  0x78   : > { %11474 = vmatprep.subr.bf16.mxu0 %v12775_v49  ;;  %v807_v22 = vshrl.u32 %v594_v6, 16  ;;  %v779_v52 = vor.u32 %v778_v5, %v775_v4  ;;  %v598_v44 = vld [vmem:[#allocation2 + $0xe0] sm:$0xf8]  ;;  %551 = vst [vmem:[#allocation2 + $0xb8] sm:$0x10] %v550_v20  ;;  %v827_v57 = vshll.u32 %v596_v60, 16 }
  0x79   : > { %v745_v48 = vor.u32 %v744_v31, %v741_v34  ;;  %v783_v63 = vrot.slane %v781_v46, 3  ;;  %v544_v1 = vsel %vm13177_vm6, %v486_v39, %v543_v56  ;;  %v762_v13 = vor.u32 %v761_v24, %v758_v61  ;;  %v555_v39 = vld [vmem:[#allocation2 + $0xd8] sm:$0x10]  ;;  %v456_v5 = vld [vmem:[#allocation2 + $0xf8] sm:$0x8] }
  0x7a   : > { %545 = vst [vmem:[#allocation2 + $0x98] sm:$0x10] %v544_v1  ;;  %v817_v34 = vrot.slane %v815_v16, 3  ;;  %v820_v31 = vrot.slane %v818_v17, 4  ;;  %v809_v41 = vrot.slane %v807_v22, 3  ;;  %v835_v46 = vshll.u32 %v13141_v9, 16 }
  0x7b   : > { %11475 = vmatpush3.bf16.msra.mxu0 %v12775_v49  ;;  %v753_v49 = vor.u32 %v752_v19, %v749_v18  ;;  %v790_v19 = vshrl.u32 %v592_v7, 16  ;;  %v787_v25 = vor.u32 %v786_v0, %v783_v63  ;;  %v771_v33 = vsel %vm514_vm4, %v762_v13, %v770_v8  ;;  %v600_v13 = vld [vmem:[#allocation2 + $0xf0] sm:$0xf8]  ;;  %v561_v17 = vld [vmem:[#allocation2 + $0xf8] sm:$0x10] }
  0x7c   : > { %11476 = vmatprep.subr.bf16.mxu0 %v12776_v2  ;;  %v841_v58 = vshrl.u32 %v598_v44, 16  ;;  %v489_v59 = vrot.slane %v453_v45, 7  ;;  %v821_v61 = vor.u32 %v820_v31, %v817_v34  ;;  %v844_v24 = vshll.u32 %v598_v44, 16  ;;  %v1456_v20 = vld [vmem:[#allocation2 + $0x28] sm:$0x1f] }
  0x7d   : > { %v754_v3 = vsel %vm514_vm4, %v745_v48, %v753_v49  ;;  %v792_v35 = vrot.slane %v790_v19, 3  ;;  %v788_v37 = vsel %vm514_vm4, %v779_v52, %v787_v25  ;;  %v454_v48 = vld [vmem:[#allocation2 + $0xd8] sm:$0x8]  ;;  %v837_v63 = vrot.slane %v835_v46, 4  ;;  %v12904_v52 = vld [vmem:[#allocation2] sm:$0xf0] }
  0x7e   : > { %11445 = vmatmul.mubr.bf16.gmra.mrb[8].mxu0 %v703_v30  ;;  %v810_v30 = vshll.u32 %v594_v6, 16  ;;  %v851_v0 = vrot.slane %v849_v47, 3  ;;  %v826_v14 = vrot.slane %v824_v51, 3  ;;  %v829_v6 = vrot.slane %v827_v57, 4  ;;  %v1455_v47 = vld [vmem:[#allocation2 + $0x18] sm:$0x1f] }
  0x7f   : > { %11448 = vmatprep.mubr.bf16.mxu0 %v720_v28  ;;  %11477 = vmatpush3.bf16.msra.mxu0 %v12776_v2  ;;  %v451_v2 = vld [vmem:[#allocation2 + $0xa8] sm:$0x8]  ;;  %v803_v28 = vrot.slane %v801_v54, 4  ;;  %v843_v8 = vrot.slane %v841_v58, 3  ;;  %v866_v19 = vshrl.u32 %v13159_v43, 16  ;;  %v492_v22 = vrot.slane %v456_v5, 7 }
  0x80   : > { %11478 = vmatprep.subr.bf16.mxu0 %v12777_v21  ;;  %v487_v18 = vrot.slane %v451_v2, 7  ;;  %v812_v42 = vrot.slane %v810_v30, 4  ;;  %v455_v2 = vld [vmem:[#allocation2 + $0xe8] sm:$0x8]  ;;  %v869_v30 = vshll.u32 %v13159_v43, 16  ;;  %v1472_v25 = vshrl.u32 %v12904_v52, 16 }
  0x81   : > { %v804_v49 = vor.u32 %v803_v28, %v800_v55  ;;  %v491_v16 = vrot.slane %v455_v2, 7  ;;  %v830_v55 = vor.u32 %v829_v6, %v826_v14  ;;  %v858_v28 = vshrl.u32 %v600_v13, 16  ;;  %v12905_v51 = vld [vmem:[#allocation2 + $0x10] sm:$0xf0]  ;;  %v1457_v6 = vld [vmem:[#allocation2 + $0x38] sm:$0x1f] }
  0x82   : > { %v547_v26 = vsel %vm13177_vm6, %v487_v18, %v546_v12  ;;  %v813_v9 = vor.u32 %v812_v42, %v809_v41  ;;  %v846_v12 = vrot.slane %v844_v24, 4  ;;  %v861_v34 = vshll.u32 %v600_v13, 16 }
  0x83   : > { %11479 = vmatpush3.bf16.msra.mxu0 %v12777_v21  ;;  %v793_v21 = vshll.u32 %v592_v7, 16  ;;  %548 = vst [vmem:[#allocation2 + $0xa8] sm:$0x10] %v547_v26  ;;  %v1475_v26 = vshll.u32 %v12904_v52, 16  ;;  %v559_v27 = vsel %vm13177_vm6, %v491_v16, %v558_v10  ;;  %v562_v31 = vsel %vm13177_vm6, %v492_v22, %v561_v17  ;;  %v12908_v16 = vld [vmem:[#allocation2 + $0x40] sm:$0xf0] }
  0x84   : > { %11480 = vmatprep.subr.bf16.mxu0 %v12778_v53  ;;  %v822_v54 = vsel %vm514_vm4, %v813_v9, %v821_v61  ;;  %560 = vst [vmem:[#allocation2 + $0xe8] sm:$0x10] %v559_v27  ;;  %563 = vst [vmem:[#allocation2 + $0xf8] sm:$0x10] %v562_v31  ;;  %v868_v43 = vrot.slane %v866_v19, 3  ;;  %v1474_v60 = vrot.slane %v1472_v25, 4 }
  0x85   : > { %v795_v11 = vrot.slane %v793_v21, 4  ;;  %v1454_v21 = vld [vmem:[#allocation2 + $0x8] sm:$0x1f]  ;;  %v1477_v36 = vrot.slane %v1475_v26, 5  ;;  %v860_v41 = vrot.slane %v858_v28, 3  ;;  %v863_v42 = vrot.slane %v861_v34, 4 }
  0x86   : > { %11449 = vmatmul.mubr.bf16.gmra.mrb[12].mxu0 %v737_v62  ;;  %v834_v62 = vrot.slane %v832_v32, 3  ;;  %v847_v32 = vor.u32 %v846_v12, %v843_v8  ;;  %v1497_v57 = vshrl.u32 %v1455_v47, 16  ;;  %v1500_v58 = vshll.u32 %v1455_v47, 16  ;;  %v1458_v8 = vld [vmem:[#allocation2 + $0x48] sm:$0x1f] }
  0x87   : > { %11452 = vmatprep.mubr.bf16.mxu0 %v754_v3  ;;  %11481 = vmatpush3.bf16.msra.mxu0 %v12778_v53  ;;  %v552_v53 = vld [vmem:[#allocation2 + $0xc8] sm:$0x10]  ;;  %v796_v56 = vor.u32 %v795_v11, %v792_v35  ;;  %v854_v3 = vrot.slane %v852_v50, 4  ;;  %v1483_v35 = vshll.u32 %v1454_v21, 16  ;;  %v871_v11 = vrot.slane %v869_v30, 4 }
  0x88   : > { %11482 = vmatprep.subr.bf16.mxu0 %v12779_v15  ;;  %v553_v1 = vsel %vm13177_vm6, %v489_v59, %v552_v53  ;;  %v838_v18 = vor.u32 %v837_v63, %v834_v62  ;;  %v1489_v50 = vshrl.u32 %v12905_v51, 16  ;;  %v1492_v53 = vshll.u32 %v12905_v51, 16  ;;  %v12906_v59 = vld [vmem:[#allocation2 + $0x20] sm:$0xf0] }
  0x89   : > { %554 = vst [vmem:[#allocation2 + $0xc8] sm:$0x10] %v553_v1  ;;  %v805_v7 = vsel %vm514_vm4, %v796_v56, %v804_v49  ;;  %v855_v40 = vor.u32 %v854_v3, %v851_v0  ;;  %v1485_v46 = vrot.slane %v1483_v35, 5  ;;  %v1478_v49 = vor.u32 %v1477_v36, %v1474_v60  ;;  %v1459_v35 = vld [vmem:[#allocation2 + $0x58] sm:$0x1f] }
  0x8a   : > { %v864_v56 = vor.u32 %v863_v42, %v860_v41  ;;  %v1509_v61 = vshll.u32 %v12906_v59, 16  ;;  %v1514_v24 = vshrl.u32 %v1456_v20, 16  ;;  %v1491_v62 = vrot.slane %v1489_v50, 4  ;;  %v1460_v36 = vld [vmem:[#allocation2 + $0x68] sm:$0x1f] }
  0x8b   : > { %11483 = vmatpush3.bf16.msra.mxu0 %v12779_v15  ;;  %v490_v15 = vrot.slane %v454_v48, 7  ;;  %v856_v44 = vsel %vm514_vm4, %v847_v32, %v855_v40  ;;  %v872_v48 = vor.u32 %v871_v11, %v868_v43  ;;  %v1494_v63 = vrot.slane %v1492_v53, 5  ;;  %v12781_v40 = vld [vmem:[%s15398_s1 + $0xc8] sm:$0xff]   ;;  %v12909_v41 = vld [vmem:[#allocation2 + $0x50] sm:$0xf0] }
  0x8c   : > { %11516 = vmatprep.subr.bf16.mxu0 %v13258_v23  ;;  %v1499_v1 = vrot.slane %v1497_v57, 4  ;;  %v1502_v2 = vrot.slane %v1500_v58, 5  ;;  %v1516_v5 = vrot.slane %v1514_v24, 4  ;;  %v1540_v17 = vshrl.u32 %v12908_v16, 16  ;;  %v12782_v53 = vld [vmem:[%s15398_s1 + $0xd0] sm:$0xff]  }
  0x8d   : > { %v556_v4 = vsel %vm13177_vm6, %v490_v15, %v555_v39  ;;  %v1506_v39 = vshrl.u32 %v12906_v59, 16  ;;  %v1517_v15 = vshll.u32 %v1456_v20, 16  ;;  %v873_v0 = vsel %vm514_vm4, %v864_v56, %v872_v48 }
  0x8e   : > { %11453 = vmatmul.mubr.bf16.gmra.mrb[16].mxu0 %v771_v33  ;;  %557 = vst [vmem:[#allocation2 + $0xd8] sm:$0x10] %v556_v4  ;;  %v1480_v33 = vshrl.u32 %v1454_v21, 16  ;;  %v1511_v4 = vrot.slane %v1509_v61, 5  ;;  %v1495_v10 = vor.u32 %v1494_v63, %v1491_v62  ;;  %v1531_v19 = vshrl.u32 %v1457_v6, 16 }
  0x8f   : > { %11456 = vmatprep.mubr.bf16.mxu0 %v788_v37  ;;  %v839_v37 = vsel %vm514_vm4, %v830_v55, %v838_v18  ;;  %v1508_v14 = vrot.slane %v1506_v39, 4  ;;  %v1503_v18 = vor.u32 %v1502_v2, %v1499_v1  ;;  %v1534_v21 = vshll.u32 %v1457_v6, 16  ;;  %v1461_v1 = vld [vmem:[#allocation2 + $0x78] sm:$0x1f]  ;;  %v12911_v2 = vld [vmem:[#allocation2 + $0x70] sm:$0xf0] }
  0x90   : > { %v1482_v45 = vrot.slane %v1480_v33, 4  ;;  %v1543_v22 = vshll.u32 %v12908_v16, 16  ;;  %v1548_v25 = vshrl.u32 %v1458_v8, 16  ;;  %v1551_v26 = vshll.u32 %v1458_v8, 16 }
  0x91   : > { %v1512_v30 = vor.u32 %v1511_v4, %v1508_v14  ;;  %v1542_v28 = vrot.slane %v1540_v17, 4  ;;  %v1504_v34 = vsel %vm1470_vm7, %v1495_v10, %v1503_v18  ;;  %v1533_v31 = vrot.slane %v1531_v19, 4  ;;  %v1462_v4 = vld [vmem:[#allocation2 + $0x88] sm:$0x1f]  ;;  %v12784_v19 = vld [vmem:[%s15398_s1 + $0xe0] sm:$0xff]  }
  0x92   : > { %v1486_v9 = vor.u32 %v1485_v46, %v1482_v45  ;;  %v1536_v32 = vrot.slane %v1534_v21, 5  ;;  %v1545_v33 = vrot.slane %v1543_v22, 5  ;;  %v1550_v11 = vrot.slane %v1548_v25, 4  ;;  %v12910_v45 = vld [vmem:[#allocation2 + $0x60] sm:$0xf0] }
  0x93   : > { %v1553_v60 = vrot.slane %v1551_v26, 5  ;;  %v1557_v42 = vshrl.u32 %v12909_v41, 16  ;;  %v1574_v46 = vshrl.u32 %v12910_v45, 16  ;;  %v1565_v20 = vshrl.u32 %v1459_v35, 16  ;;  %v1463_v25 = vld [vmem:[#allocation2 + $0x98] sm:$0x1f] }
  0x94   : > { %v1487_v3 = vsel %vm1470_vm7, %v1478_v49, %v1486_v9  ;;  %v1537_v47 = vor.u32 %v1536_v32, %v1533_v31  ;;  %v1568_v48 = vshll.u32 %v1459_v35, 16  ;;  %v1577_v49 = vshll.u32 %v12910_v45, 16  ;;  %v12913_v26 = vld [vmem:[#allocation2 + $0x90] sm:$0xf0]  ;;  %v12914_v32 = vld [vmem:[#allocation2 + $0xa0] sm:$0xf0] }
  0x95   : > { %v1546_v51 = vor.u32 %v1545_v33, %v1542_v28  ;;  %v1554_v50 = vor.u32 %v1553_v60, %v1550_v11  ;;  %v1582_v56 = vshrl.u32 %v1460_v36, 16  ;;  %v1585_v57 = vshll.u32 %v1460_v36, 16  ;;  %v12785_v33 = vld [vmem:[%s15398_s1 + $0xe8] sm:$0xff]  }
  0x96   : > { %11457 = vmatmul.mubr.bf16.gmra.mrb[20].mxu0 %v805_v7  ;;  %v1519_v7 = vrot.slane %v1517_v15, 5  ;;  %v1559_v58 = vrot.slane %v1557_v42, 4  ;;  %v1576_v39 = vrot.slane %v1574_v46, 4  ;;  %v1570_v61 = vrot.slane %v1568_v48, 5  ;;  %v12783_v15 = vld [vmem:[%s15398_s1 + $0xd8] sm:$0xff]  }
  0x97   : > { %11460 = vmatprep.mubr.bf16.mxu0 %v822_v54  ;;  %v12907_v54 = vld [vmem:[#allocation2 + $0x30] sm:$0xf0]  ;;  %v1579_v24 = vrot.slane %v1577_v49, 5  ;;  %v1555_v62 = vsel %vm1470_vm7, %v1546_v51, %v1554_v50  ;;  %v1584_v63 = vrot.slane %v1582_v56, 4  ;;  %v1591_v14 = vshrl.u32 %v12911_v2, 16 }
  0x98   : > { %v1523_v12 = vshrl.u32 %v12907_v54, 16  ;;  %v1526_v13 = vshll.u32 %v12907_v54, 16  ;;  %v1520_v52 = vor.u32 %v1519_v7, %v1516_v5  ;;  %v12912_v5 = vld [vmem:[#allocation2 + $0x80] sm:$0xf0]  ;;  %v1599_v54 = vshrl.u32 %v1461_v1, 16  ;;  %v12786_v50 = vld [vmem:[%s15398_s1 + $0xf0] sm:$0xff]  }
  0x99   : > { %v1608_v7 = vshrl.u32 %v12912_v5, 16  ;;  %v1611_v6 = vshll.u32 %v12912_v5, 16  ;;  %v1616_v17 = vshrl.u32 %v1462_v4, 16  ;;  %v1619_v18 = vshll.u32 %v1462_v4, 16  ;;  %v1464_v60 = vld [vmem:[#allocation2 + $0xa8] sm:$0x1f] }
  0x9a   : > { %v1525_v27 = vrot.slane %v1523_v12, 4  ;;  %v1528_v55 = vrot.slane %v1526_v13, 5  ;;  %v1521_v43 = vsel %vm1470_vm7, %v1512_v30, %v1520_v52  ;;  %v1602_v12 = vshll.u32 %v1461_v1, 16  ;;  %v202_v1 = vld [vmem:[%s12988_s23 + $0xf0] sm:$0xff]  ;;  %v1466_v4 = vld [vmem:[#allocation2 + $0xc8] sm:$0x1f] }
  0x9b   : > { %v1580_v13 = vor.u32 %v1579_v24, %v1576_v39  ;;  %v1593_v21 = vrot.slane %v1591_v14, 4  ;;  %v1610_v30 = vrot.slane %v1608_v7, 4  ;;  %v1613_v52 = vrot.slane %v1611_v6, 5  ;;  %v1465_v39 = vld [vmem:[#allocation2 + $0xb8] sm:$0x1f] }
  0x9c   : > { %v1604_v31 = vrot.slane %v1602_v12, 5  ;;  %v1621_v11 = vrot.slane %v1619_v18, 5  ;;  %v1633_v36 = vshrl.u32 %v1463_v25, 16  ;;  %v1645_v45 = vshll.u32 %v12914_v32, 16 }
  0x9d   : > { %v1614_v42 = vor.u32 %v1613_v52, %v1610_v30  ;;  %v1650_v46 = vshrl.u32 %v1464_v60, 16  ;;  %v1667_v7 = vshrl.u32 %v1465_v39, 16  ;;  %v1670_v6 = vshll.u32 %v1465_v39, 16 }
  0x9e   : > { %11461 = vmatmul.mubr.bf16.gmra.mrb[24].mxu0 %v839_v37  ;;  %v1529_v37 = vor.u32 %v1528_v55, %v1525_v27  ;;  %v1625_v27 = vshrl.u32 %v12913_v26, 16  ;;  %v1628_v55 = vshll.u32 %v12913_v26, 16  ;;  %v1687_v18 = vshll.u32 %v1466_v4, 16  ;;  %v1467_v26 = vld [vmem:[#allocation2 + $0xd8] sm:$0x1f] }
  0x9f   : > { %11464 = vmatprep.mubr.bf16.mxu0 %v856_v44  ;;  %v1560_v44 = vshll.u32 %v12909_v41, 16 }
  0xa0   : > { %v1538_v9 = vsel %vm1470_vm7, %v1529_v37, %v1537_v47  ;;  %v1636_v37 = vshll.u32 %v1463_v25, 16  ;;  %v1653_v47 = vshll.u32 %v1464_v60, 16  ;;  %v1627_v48 = vrot.slane %v1625_v27, 4  ;;  %v12918_v27 = vld [vmem:[#allocation2 + $0xe0] sm:$0xf0] }
  0xa1   : > { %v1562_v59 = vrot.slane %v1560_v44, 5  ;;  %v1630_v49 = vrot.slane %v1628_v55, 5  ;;  %v1710_v55 = vshrl.u32 %v12918_v27, 16 }
  0xa2   : > { %v1638_v56 = vrot.slane %v1636_v37, 5  ;;  %v1689_v37 = vrot.slane %v1687_v18, 5 }
  0xa3   : > { %v1563_v8 = vor.u32 %v1562_v59, %v1559_v58 }
  0xa6   : > { %11465 = vmatmul.mubr.bf16.gmra.mrb[28].mxu0 %v873_v0  ;;  %v1587_v0 = vrot.slane %v1585_v57, 5  ;;  %v12915_v57 = vld [vmem:[#allocation2 + $0xb0] sm:$0xf0] }
  0xa7   : > { %11484 = vmatprep.mubr.bf16.mxu0 %v1487_v3  ;;  %v1594_v3 = vshll.u32 %v12911_v2, 16  ;;  %v1659_v58 = vshrl.u32 %v12915_v57, 16  ;;  %v1662_v59 = vshll.u32 %v12915_v57, 16  ;;  %v203_v2 = vld [vmem:[%s12988_s23 + $0xf8] sm:$0xff]  ;;  %v2019_v57 = vld [vmem:[#allocation2 + $0x20] sm:$0xf8] }
  0xa8   : > { %v1588_v16 = vor.u32 %v1587_v0, %v1584_v63  ;;  %v1655_v63 = vrot.slane %v1653_v47, 5  ;;  %v12787_v0 = vld [vmem:[%s15398_s1 + $0xf8] sm:$0xff]   ;;  %v219_v30 = vpack.c.bf16 %v203_v2, %v202_v1  ;;  %v2070_v1 = vshll.u32 %v2019_v57, 16 }
  0xa9   : > { %v1596_v22 = vrot.slane %v1594_v3, 5  ;;  %v1631_v3 = vor.u32 %v1630_v49, %v1627_v48  ;;  %v13321_v5 = vrot.slane %v1659_v58, 4  ;;  %v1664_v12 = vrot.slane %v1662_v59, 5 }
  0xaa   : > { %v1589_v35 = vsel %vm1470_vm7, %v1580_v13, %v1588_v16  ;;  %v1712_v48 = vrot.slane %v1710_v55, 4 }
  0xab   : > { %v1597_v41 = vor.u32 %v1596_v22, %v1593_v21  ;;  %v2017_v21 = vld [vmem:[#allocation2 + $0x10] sm:$0xf8]  ;;  %v13330_v22 = vld [vmem:[%s15398_s1 + $0x100] sm:$0xff]  }
  0xae   : > { %11485 = vmatmul.mubr.bf16.vlgmr.msra.gmra.mrb[0].mxu0 %v1504_v34  ;;  %v1601_v34 = vrot.slane %v1599_v54, 4 }
  0xaf   : > { %11517 = vmatpush3.bf16.msra.mxu0 %v13258_v23  ;;  %11488 = vmatprep.mubr.bf16.mxu0 %v1521_v43  ;;  %v1567_v23 = vrot.slane %v1565_v20, 4  ;;  %v1618_v43 = vrot.slane %v1616_v17, 4  ;;  %v1684_v17 = vshrl.u32 %v1466_v4, 16  ;;  %v13352_v4 = vld [vmem:[#allocation2 + $0x28] sm:$0xf] }
  0xb0   : > { %11518 = vmatprep.subr.bf16.mxu0 %v12781_v40  ;;  %v1605_v44 = vor.u32 %v1604_v31, %v1601_v34  ;;  %v1669_v34 = vrot.slane %v1667_v7, 4  ;;  %v1672_v31 = vrot.slane %v1670_v6, 5  ;;  %v435_v6 = vld [vmem:[#allocation2 + $0x100] sm:$0x8]  ;;  %v2075_v55 = vshrl.u32 %v13352_v4, 16 }
  0xb1   : > { %v1571_v10 = vor.u32 %v1570_v61, %v1567_v23  ;;  %v1622_v20 = vor.u32 %v1621_v11, %v1618_v43  ;;  %v12919_v43 = vld [vmem:[#allocation2 + $0xf0] sm:$0xf0] }
  0xb2   : > { %v1606_v24 = vsel %vm1470_vm7, %v1597_v41, %v1605_v44  ;;  %v1727_v11 = vshrl.u32 %v12919_v43, 16  ;;  %v1730_v60 = vshll.u32 %v12919_v43, 16  ;;  %v1701_v41 = vshrl.u32 %v1467_v26, 16 }
  0xb3   : > { %11519 = vmatpush3.bf16.msra.mxu0 %v12781_v40  ;;  %v1572_v28 = vsel %vm1470_vm7, %v1563_v8, %v1571_v10  ;;  %v1642_v40 = vshrl.u32 %v12914_v32, 16  ;;  %v1623_v14 = vsel %vm1470_vm7, %v1614_v42, %v1622_v20  ;;  %v12917_v8 = vld [vmem:[#allocation2 + $0xd0] sm:$0xf0]  ;;  %v2050_v42 = vshrl.u32 %v2017_v21, 16 }
  0xb4   : > { %11520 = vmatprep.subr.bf16.mxu0 %v12782_v53  ;;  %v1693_v10 = vshrl.u32 %v12917_v8, 16  ;;  %v1704_v20 = vshll.u32 %v1467_v26, 16 }
  0xb5   : > { %v13309_v51 = vrot.slane %v1642_v40, 4  ;;  %v13335_v40 = vld [vmem:[#allocation2 + $0x18] sm:$0xf] }
  0xb6   : > { %11489 = vmatmul.mubr.bf16.gmra.mrb[4].mxu0 %v1538_v9  ;;  %v12916_v9 = vld [vmem:[#allocation2 + $0xc0] sm:$0xf0]  ;;  %v13333_v32 = vrot.slane %v1693_v10, 4 }
  0xb7   : > { %11492 = vmatprep.mubr.bf16.mxu0 %v1555_v62  ;;  %11521 = vmatpush3.bf16.msra.mxu0 %v12782_v53  ;;  %v1635_v53 = vrot.slane %v1633_v36, 4  ;;  %v1676_v23 = vshrl.u32 %v12916_v9, 16  ;;  %v1679_v61 = vshll.u32 %v12916_v9, 16  ;;  %v1652_v62 = vrot.slane %v1650_v46, 4  ;;  %v1468_v46 = vld [vmem:[#allocation2 + $0xe8] sm:$0x1f] }
  0xb8   : > { %11522 = vmatprep.subr.bf16.mxu0 %v12783_v15  ;;  %v1686_v36 = vrot.slane %v1684_v17, 4  ;;  %v1718_v59 = vshrl.u32 %v1468_v46, 16  ;;  %v1721_v39 = vshll.u32 %v1468_v46, 16  ;;  %v1469_v9 = vld [vmem:[#allocation2 + $0xf8] sm:$0x1f] }
  0xb9   : > { %v1639_v54 = vor.u32 %v1638_v56, %v1635_v53  ;;  %v13323_v13 = vrot.slane %v1676_v23, 4  ;;  %v13325_v16 = vrot.slane %v1679_v61, 5  ;;  %v1656_v25 = vor.u32 %v1655_v63, %v1652_v62 }
  0xba   : > { %v2053_v53 = vshll.u32 %v2017_v21, 16  ;;  %v2058_v56 = vshrl.u32 %v13335_v40, 16  ;;  %v1690_v23 = vor.u32 %v1689_v37, %v1686_v36  ;;  %v1703_v61 = vrot.slane %v1701_v41, 4  ;;  %v2025_v37 = vld [vmem:[#allocation2 + $0x50] sm:$0xf8] }
  0xbb   : > { %11523 = vmatpush3.bf16.msra.mxu0 %v12783_v15  ;;  %v1647_v15 = vrot.slane %v1645_v45, 5  ;;  %v1665_v45 = vor.u32 %v1664_v12, %v13321_v5  ;;  %v1682_v58 = vor.u32 %v13325_v16, %v13323_v13  ;;  %v1706_v62 = vrot.slane %v1704_v20, 5  ;;  %v2021_v5 = vld [vmem:[#allocation2 + $0x30] sm:$0xf8]  ;;  %v13354_v12 = vld [vmem:[#allocation2 + $0x38] sm:$0xf] }
  0xbc   : > { %11524 = vmatprep.subr.bf16.mxu0 %v12784_v19  ;;  %v2061_v63 = vshll.u32 %v13335_v40, 16  ;;  %v1723_v10 = vrot.slane %v1721_v39, 5  ;;  %v2095_v43 = vshll.u32 %v13354_v12, 16  ;;  %v13371_v41 = vld [vmem:[#allocation2 + $0x58] sm:$0xf]  ;;  %v2077_v20 = vrot.slane %v2075_v55, 3 }
  0xbd   : > { %v1648_v52 = vor.u32 %v1647_v15, %v13309_v51  ;;  %v1673_v51 = vor.u32 %v1672_v31, %v1669_v34  ;;  %v13348_v15 = vrot.slane %v2050_v42, 3  ;;  %v1691_v16 = vsel %vm1470_vm7, %v1682_v58, %v1690_v23 }
  0xbe   : > { %11493 = vmatmul.mubr.bf16.gmra.mrb[8].mxu0 %v1572_v28  ;;  %v1713_v28 = vshll.u32 %v12918_v27, 16  ;;  %v1707_v18 = vor.u32 %v1706_v62, %v1703_v61  ;;  %v2063_v21 = vrot.slane %v2061_v63, 4  ;;  %v13362_v27 = vrot.slane %v2070_v1, 4  ;;  %v13383_v63 = vld [vmem:[#allocation2 + $0x68] sm:$0xf] }
  0xbf   : > { %11496 = vmatprep.mubr.bf16.mxu0 %v1589_v35  ;;  %11525 = vmatpush3.bf16.msra.mxu0 %v12784_v19  ;;  %v1696_v19 = vshll.u32 %v12917_v8, 16  ;;  %v1640_v35 = vsel %vm1470_vm7, %v1631_v3, %v1639_v54  ;;  %v1657_v44 = vsel %vm1470_vm7, %v1648_v52, %v1656_v25  ;;  %v1674_v2 = vsel %vm1470_vm7, %v1665_v45, %v1673_v51 }
  0xc0   : > { %11526 = vmatprep.subr.bf16.mxu0 %v12785_v33  ;;  %v1715_v49 = vrot.slane %v1713_v28, 5  ;;  %v1738_v3 = vshll.u32 %v1469_v9, 16  ;;  %v1720_v8 = vrot.slane %v1718_v59, 4  ;;  %v2055_v54 = vrot.slane %v2053_v53, 4 }
  0xc1   : > { %v1698_v47 = vrot.slane %v1696_v19, 5  ;;  %v2060_v19 = vrot.slane %v2058_v56, 3  ;;  %v2078_v28 = vshll.u32 %v13352_v4, 16  ;;  %v2084_v34 = vshrl.u32 %v2021_v5, 16 }
  0xc2   : > { %v1740_v25 = vrot.slane %v1738_v3, 5  ;;  %v2087_v31 = vshll.u32 %v2021_v5, 16  ;;  %v2056_v45 = vor.u32 %v2055_v54, %v13348_v15  ;;  %v2097_v58 = vrot.slane %v2095_v43, 4 }
  0xc3   : > { %11527 = vmatpush3.bf16.msra.mxu0 %v12785_v33  ;;  %v251_v33 = vrot.slane %v219_v30, 4  ;;  %v1699_v17 = vor.u32 %v1698_v47, %v13333_v32  ;;  %v1716_v32 = vor.u32 %v1715_v49, %v1712_v48  ;;  %v2064_v47 = vor.u32 %v2063_v21, %v2060_v19 }
  0xc4   : > { %11528 = vmatprep.subr.bf16.mxu0 %v12786_v50  ;;  %v2080_v48 = vrot.slane %v2078_v28, 4  ;;  %v2086_v49 = vrot.slane %v2084_v34, 3  ;;  %v2089_v51 = vrot.slane %v2087_v31, 4  ;;  %v2126_v23 = vshrl.u32 %v13371_v41, 16  ;;  %v2031_v34 = vld [vmem:[#allocation2 + $0x80] sm:$0xf8] }
  0xc5   : > { %299 = vst [vmem:[#allocation2 + $0x108] ss:$-4 sps:$4 sm:$0xff] %v251_v33   ;;  %v1724_v33 = vor.u32 %v1723_v10, %v1720_v8  ;;  %v1708_v36 = vsel %vm1470_vm7, %v1699_v17, %v1707_v18  ;;  %v2129_v61 = vshll.u32 %v13371_v41, 16  ;;  %v2065_v62 = vsel %vm514_vm4, %v2056_v45, %v2064_v47  ;;  %v13403_v45 = vld [vmem:[#allocation2 + $0x98] sm:$0xf] }
  0xc6   : > { %11497 = vmatmul.mubr.bf16.gmra.mrb[12].mxu0 %v1606_v24  ;;  %v13346_v24 = vrot.slane %v1730_v60, 5  ;;  %v13368_v60 = vld [vmem:[#allocation2 + $0x48] sm:$0xf]  ;;  %v2081_v1 = vor.u32 %v2080_v48, %v2077_v20  ;;  %v2128_v17 = vrot.slane %v2126_v23, 3  ;;  %v2143_v21 = vshrl.u32 %v13383_v63, 16 }
  0xc7   : > { %11500 = vmatprep.mubr.bf16.mxu0 %v1623_v14  ;;  %11529 = vmatpush3.bf16.msra.mxu0 %v12786_v50  ;;  %v13341_v50 = vrot.slane %v1727_v11, 4  ;;  %v1735_v14 = vshrl.u32 %v1469_v9, 16  ;;  %v2023_v11 = vld [vmem:[#allocation2 + $0x40] sm:$0xf8]  ;;  %v1725_v42 = vsel %vm1470_vm7, %v1716_v32, %v1724_v33  ;;  %v2109_v59 = vshrl.u32 %v13368_v60, 16 }
  0xc8   : > { %11530 = vmatprep.subr.bf16.mxu0 %v12787_v0  ;;  %v2101_v53 = vshrl.u32 %v2023_v11, 16  ;;  %v2104_v56 = vshll.u32 %v2023_v11, 16  ;;  %v2112_v39 = vshll.u32 %v13368_v60, 16  ;;  %v2118_v9 = vshrl.u32 %v2025_v37, 16 }
  0xc9   : > { %v1737_v52 = vrot.slane %v1735_v14, 4  ;;  %v2090_v14 = vor.u32 %v2089_v51, %v2086_v49  ;;  %v2131_v18 = vrot.slane %v2129_v61, 4  ;;  %v2197_v23 = vshll.u32 %v13403_v45, 16  ;;  %v2035_v61 = vld [vmem:[#allocation2 + $0xa0] sm:$0xf8] }
  0xca   : > { %v2103_v3 = vrot.slane %v2101_v53, 3  ;;  %v2106_v5 = vrot.slane %v2104_v56, 4  ;;  %v2114_v10 = vrot.slane %v2112_v39, 4  ;;  %v2120_v54 = vrot.slane %v2118_v9, 3 }
  0xcb   : > { %11531 = vmatpush3.bf16.msra.mxu0 %v12787_v0  ;;  %v2067_v0 = vshrl.u32 %v2019_v57, 16  ;;  %v1741_v46 = vor.u32 %v1740_v25, %v1737_v52  ;;  %v2132_v11 = vor.u32 %v2131_v18, %v2128_v17  ;;  %v2169_v53 = vshrl.u32 %v2031_v34, 16 }
  0xcc   : > { %11564 = vmatprep.subr.bf16.mxu0 %v13330_v22  ;;  %v328_v7 = vld [vmem:[#allocation2 + $0x100] sm:$0x10]  ;;  %v2107_v32 = vor.u32 %v2106_v5, %v2103_v3  ;;  %v2172_v56 = vshll.u32 %v2031_v34, 16  ;;  %v2037_v5 = vld [vmem:[#allocation2 + $0xb0] sm:$0xf8]  ;;  %v2199_v18 = vrot.slane %v2197_v23, 4 }
  0xcd   : > { %v364_v13 = vrot.slane %v328_v7, 1  ;;  %v13360_v26 = vrot.slane %v2067_v0, 3  ;;  %v2111_v7 = vrot.slane %v2109_v59, 3  ;;  %v12792_v3 = vld [vmem:[%s15398_s1 + $0x120] sm:$0xff]  }
  0xce   : > { %11501 = vmatmul.mubr.bf16.gmra.mrb[16].mxu0 %v1640_v35  ;;  %v2092_v35 = vshrl.u32 %v13354_v12, 16  ;;  %v2039_v34 = vld [vmem:[#allocation2 + $0xc0] sm:$0xf8] }
  0xcf   : > { %11504 = vmatprep.mubr.bf16.mxu0 %v1657_v44  ;;  %v436_v30 = vsel %vm13068_vm3, %v364_v13, %v435_v6  ;;  %v1733_v44 = vor.u32 %v13346_v24, %v13341_v50  ;;  %v2121_v50 = vshll.u32 %v2025_v37, 16  ;;  %v2027_v24 = vld [vmem:[#allocation2 + $0x60] sm:$0xf8]  ;;  %v2073_v0 = vor.u32 %v13362_v27, %v13360_v26  ;;  %v13387_v6 = vld [vmem:[#allocation2 + $0x78] sm:$0xf]  ;;  %v12789_v26 = vld [vmem:[%s15398_s1 + $0x108] sm:$0xff]  }
  0xd0   : > { %437 = vst [vmem:[#allocation2 + $0x100] sm:$0x8] %v436_v30  ;;  %v2094_v57 = vrot.slane %v2092_v35, 3  ;;  %v2135_v13 = vshrl.u32 %v2027_v24, 16  ;;  %v2138_v19 = vshll.u32 %v2027_v24, 16  ;;  %v2146_v30 = vshll.u32 %v13383_v63, 16 }
  0xd1   : > { %v1742_v15 = vsel %vm1470_vm7, %v1733_v44, %v1741_v46  ;;  %v2082_v27 = vsel %vm514_vm4, %v2073_v0, %v2081_v1  ;;  %v2160_v55 = vshrl.u32 %v13387_v6, 16  ;;  %v2163_v28 = vshll.u32 %v13387_v6, 16  ;;  %v13398_v35 = vld [vmem:[#allocation2 + $0x88] sm:$0xf]  ;;  %v2033_v44 = vld [vmem:[#allocation2 + $0x90] sm:$0xf8] }
  0xd2   : > { %v2098_v8 = vor.u32 %v2097_v58, %v2094_v57  ;;  %v2115_v33 = vor.u32 %v2114_v10, %v2111_v7  ;;  %v2140_v37 = vrot.slane %v2138_v19, 4  ;;  %v2145_v46 = vrot.slane %v2143_v21, 3  ;;  %v13420_v7 = vld [vmem:[#allocation2 + $0xb8] sm:$0xf] }
  0xd3   : > { %v2148_v47 = vrot.slane %v2146_v30, 4  ;;  %v2162_v49 = vrot.slane %v2160_v55, 3  ;;  %v2165_v51 = vrot.slane %v2163_v28, 4  ;;  %v2177_v57 = vshrl.u32 %v13398_v35, 16 }
  0xd4   : > { %v2099_v31 = vsel %vm514_vm4, %v2090_v14, %v2098_v8  ;;  %v2180_v58 = vshll.u32 %v13398_v35, 16  ;;  %v2186_v59 = vshrl.u32 %v2033_v44, 16  ;;  %v2189_v39 = vshll.u32 %v2033_v44, 16 }
  0xd5   : > { %v2116_v9 = vsel %vm514_vm4, %v2107_v32, %v2115_v33  ;;  %v2149_v0 = vor.u32 %v2148_v47, %v2145_v46  ;;  %v2171_v14 = vrot.slane %v2169_v53, 3  ;;  %v2174_v8 = vrot.slane %v2172_v56, 4 }
  0xd6   : > { %11505 = vmatmul.mubr.bf16.gmra.mrb[20].mxu0 %v1674_v2  ;;  %v2029_v2 = vld [vmem:[#allocation2 + $0x70] sm:$0xf8]  ;;  %v2179_v10 = vrot.slane %v2177_v57, 3  ;;  %v2203_v19 = vshrl.u32 %v2035_v61, 16  ;;  %v2206_v21 = vshll.u32 %v2035_v61, 16  ;;  %v2223_v55 = vshll.u32 %v2037_v5, 16 }
  0xd7   : > { %11508 = vmatprep.mubr.bf16.mxu0 %v1691_v16  ;;  %v2123_v16 = vrot.slane %v2121_v50, 4  ;;  %v2152_v52 = vshrl.u32 %v2029_v2, 16  ;;  %v2155_v25 = vshll.u32 %v2029_v2, 16  ;;  %v2194_v50 = vshrl.u32 %v13403_v45, 16  ;;  %v13436_v57 = vld [vmem:[#allocation2 + $0xd8] sm:$0xf] }
  0xd8   : > { %v2166_v2 = vor.u32 %v2165_v51, %v2162_v49  ;;  %v2228_v28 = vshrl.u32 %v13420_v7, 16  ;;  %v2231_v32 = vshll.u32 %v13420_v7, 16  ;;  %v2175_v33 = vor.u32 %v2174_v8, %v2171_v14  ;;  %v13452_v8 = vld [vmem:[%s15398_s1 + $0x140] sm:$0xff]  }
  0xd9   : > { %v2124_v43 = vor.u32 %v2123_v16, %v2120_v54  ;;  %v2154_v20 = vrot.slane %v2152_v52, 3  ;;  %v2157_v48 = vrot.slane %v2155_v25, 4  ;;  %v2182_v54 = vrot.slane %v2180_v58, 4 }
  0xda   : > { %v2191_v16 = vrot.slane %v2189_v39, 4  ;;  %v2196_v17 = vrot.slane %v2194_v50, 3  ;;  %v2220_v25 = vshrl.u32 %v2037_v5, 16  ;;  %v2208_v46 = vrot.slane %v2206_v21, 4  ;;  %v13447_v5 = vld [vmem:[#allocation2 + $0xe8] sm:$0xf] }
  0xdb   : > { %v2133_v24 = vsel %vm514_vm4, %v2124_v43, %v2132_v11  ;;  %v2158_v1 = vor.u32 %v2157_v48, %v2154_v20  ;;  %v2183_v43 = vor.u32 %v2182_v54, %v2179_v10  ;;  %v12794_v48 = vld [vmem:[%s15398_s1 + $0x130] sm:$0xff]   ;;  %v2225_v51 = vrot.slane %v2223_v55, 4 }
  0xdc   : > { %v2200_v44 = vor.u32 %v2199_v18, %v2196_v17  ;;  %v2222_v49 = vrot.slane %v2220_v25, 3  ;;  %v2230_v53 = vrot.slane %v2228_v28, 3  ;;  %v2237_v56 = vshrl.u32 %v2039_v34, 16  ;;  %v2045_v17 = vld [vmem:[#allocation2 + $0xf0] sm:$0xf8] }
  0xdd   : > { %v2233_v58 = vrot.slane %v2231_v32, 4  ;;  %v2184_v50 = vsel %vm514_vm4, %v2175_v33, %v2183_v43  ;;  %v2279_v55 = vshrl.u32 %v13447_v5, 16  ;;  %v2291_v33 = vshll.u32 %v2045_v17, 16 }
  0xde   : > { %11509 = vmatmul.mubr.bf16.gmra.mrb[24].mxu0 %v1708_v36  ;;  %v2137_v36 = vrot.slane %v2135_v13, 3  ;;  %v2188_v13 = vrot.slane %v2186_v59, 3  ;;  %v2240_v59 = vshll.u32 %v2039_v34, 16  ;;  %v2226_v10 = vor.u32 %v2225_v51, %v2222_v49 }
  0xdf   : > { %11512 = vmatprep.mubr.bf16.mxu0 %v1725_v42  ;;  %v12790_v42 = vld [vmem:[%s15398_s1 + $0x110] sm:$0xff]   ;;  %v2234_v54 = vor.u32 %v2233_v58, %v2230_v53  ;;  %v2282_v34 = vshll.u32 %v13447_v5, 16  ;;  %v2293_v53 = vrot.slane %v2291_v33, 4  ;;  %v13463_v58 = vld [vmem:[#allocation2 + $0x108] sm:$0xf] }
  0xe0   : > { %v2192_v11 = vor.u32 %v2191_v16, %v2188_v13  ;;  %v2242_v13 = vrot.slane %v2240_v59, 4 }
  0xe1   : > { %v2235_v32 = vsel %vm514_vm4, %v2226_v10, %v2234_v54 }
  0xe6   : > { %11513 = vmatmul.mubr.bf16.gmra.mrb[28].mxu0 %v1742_v15  ;;  %v2141_v15 = vor.u32 %v2140_v37, %v2137_v36  ;;  %v2205_v36 = vrot.slane %v2203_v19, 3  ;;  %v13431_v37 = vld [vmem:[#allocation2 + $0xc8] sm:$0xf] }
  0xe7   : > { %11532 = vmatprep.mubr.bf16.mxu0 %v2065_v62  ;;  %v13415_v62 = vld [vmem:[#allocation2 + $0xa8] sm:$0xf]  ;;  %v2245_v39 = vshrl.u32 %v13431_v37, 16 }
  0xe8   : > { %v2211_v30 = vshrl.u32 %v13415_v62, 16  ;;  %v2214_v52 = vshll.u32 %v13415_v62, 16 }
  0xe9   : > { %v2247_v16 = vrot.slane %v2245_v39, 3  ;;  %v2047_v39 = vld [vmem:[#allocation2 + $0x100] sm:$0xf8] }
  0xea   : > { %v2213_v47 = vrot.slane %v2211_v30, 3  ;;  %v2216_v20 = vrot.slane %v2214_v52, 4  ;;  %v13454_v52 = vld [vmem:[#allocation2 + $0xf8] sm:$0xf] }
  0xeb   : > { %v2296_v43 = vshrl.u32 %v13454_v52, 16  ;;  %v2299_v51 = vshll.u32 %v13454_v52, 16 }
  0xec   : > { %v2217_v14 = vor.u32 %v2216_v20, %v2213_v47  ;;  %v2281_v20 = vrot.slane %v2279_v55, 3  ;;  %v2644_v55 = vrot.slane %v13335_v40, 4 }
  0xee   : > { %11533 = vmatmul.mubr.bf16.vlgmr.msra.gmra.mrb[0].mxu0 %v2082_v27  ;;  %v2150_v27 = vsel %vm514_vm4, %v2141_v15, %v2149_v0  ;;  %v2201_v15 = vsel %vm514_vm4, %v2192_v11, %v2200_v44  ;;  %v2262_v0 = vshrl.u32 %v13436_v57, 16 }
  0xef   : > { %11565 = vmatpush3.bf16.msra.mxu0 %v13330_v22  ;;  %11536 = vmatprep.mubr.bf16.mxu0 %v2099_v31  ;;  %v12791_v22 = vld [vmem:[%s15398_s1 + $0x118] sm:$0xff]   ;;  %v2167_v31 = vsel %vm514_vm4, %v2158_v1, %v2166_v2  ;;  %v2265_v1 = vshll.u32 %v13436_v57, 16  ;;  %v2209_v2 = vor.u32 %v2208_v46, %v2205_v36 }
  0xf0   : > { %11566 = vmatprep.subr.bf16.mxu0 %v12789_v26  ;;  %v2264_v25 = vrot.slane %v2262_v0, 3 }
  0xf1   : > { %v2218_v28 = vsel %vm514_vm4, %v2209_v2, %v2217_v14  ;;  %v2305_v2 = vshrl.u32 %v2047_v39, 16  ;;  %v2308_v14 = vshll.u32 %v2047_v39, 16 }
  0xf3   : > { %11567 = vmatpush3.bf16.msra.mxu0 %v12789_v26  ;;  %v12793_v26 = vld [vmem:[%s15398_s1 + $0x128] sm:$0xff]  }
  0xf4   : > { %11568 = vmatprep.subr.bf16.mxu0 %v12790_v42 }
  0xf6   : > { %11537 = vmatmul.mubr.bf16.gmra.mrb[4].mxu0 %v2116_v9  ;;  %v12795_v9 = vld [vmem:[%s15398_s1 + $0x138] sm:$0xff]  }
  0xf7   : > { %11540 = vmatprep.mubr.bf16.mxu0 %v2133_v24  ;;  %11569 = vmatpush3.bf16.msra.mxu0 %v12790_v42  ;;  %v2041_v42 = vld [vmem:[#allocation2 + $0xd0] sm:$0xf8]  ;;  %v2043_v24 = vld [vmem:[#allocation2 + $0xe0] sm:$0xf8] }
  0xf8   : > { %11570 = vmatprep.subr.bf16.mxu0 %v12791_v22  ;;  %v2254_v23 = vshrl.u32 %v2041_v42, 16  ;;  %v2257_v61 = vshll.u32 %v2041_v42, 16  ;;  %v2271_v30 = vshrl.u32 %v2043_v24, 16 }
  0xfa   : > { %v2256_v19 = vrot.slane %v2254_v23, 3  ;;  %v2259_v21 = vrot.slane %v2257_v61, 4  ;;  %v2273_v46 = vrot.slane %v2271_v30, 3  ;;  %v2313_v61 = vshrl.u32 %v13463_v58, 16  ;;  %v13473_v30 = vld [vmem:[#allocation2 + $0x10] sm:$0xf0] }
  0xfb   : > { %11571 = vmatpush3.bf16.msra.mxu0 %v12791_v22  ;;  %v2248_v22 = vshll.u32 %v13431_v37, 16 }
  0xfc   : > { %11572 = vmatprep.subr.bf16.mxu0 %v12792_v3  ;;  %v2260_v42 = vor.u32 %v2259_v21, %v2256_v19  ;;  %v2310_v19 = vrot.slane %v2308_v14, 4 }
  0xfd   : > { %v2250_v18 = vrot.slane %v2248_v22, 4  ;;  %v457_v22 = vld [vmem:[#allocation2 + $0x108] sm:$0x8] }
  0xfe   : > { %11541 = vmatmul.mubr.bf16.gmra.mrb[8].mxu0 %v2150_v27  ;;  %v2274_v27 = vshll.u32 %v2043_v24, 16  ;;  %v493_v23 = vrot.slane %v457_v22, 7  ;;  %v2316_v24 = vshll.u32 %v13463_v58, 16  ;;  %v2662_v22 = vrot.slane %v13387_v6, 4 }
  0xff   : > { %11544 = vmatprep.mubr.bf16.mxu0 %v2167_v31  ;;  %11573 = vmatpush3.bf16.msra.mxu0 %v12792_v3  ;;  %v2239_v3 = vrot.slane %v2237_v56, 3  ;;  %v2288_v31 = vshrl.u32 %v2045_v17, 16  ;;  %v2251_v36 = vor.u32 %v2250_v18, %v2247_v16  ;;  %v2298_v56 = vrot.slane %v2296_v43, 3 }
 0x100   : > { %11574 = vmatprep.subr.bf16.mxu0 %v12793_v26  ;;  %v2276_v47 = vrot.slane %v2274_v27, 4  ;;  %v2318_v16 = vrot.slane %v2316_v24, 4  ;;  %v2307_v18 = vrot.slane %v2305_v2, 3  ;;  %v2643_v27 = vrot.slane %v13473_v30, 4  ;;  %v13527_v24 = vld [vmem:[#allocation2 + $0x90] sm:$0xf0] }
 0x101   : > { %v2243_v11 = vor.u32 %v2242_v13, %v2239_v3  ;;  %v2290_v49 = vrot.slane %v2288_v31, 3  ;;  %v2315_v13 = vrot.slane %v2313_v61, 3  ;;  %v2647_v43 = vrot.slane %v13352_v4, 4  ;;  %v12801_v61 = vld [vmem:[%s15398_s1 + $0x168] sm:$0xff]   ;;  %v12802_v2 = vld [vmem:[%s15398_s1 + $0x170] sm:$0xff]  }
 0x102   : > { %v2277_v0 = vor.u32 %v2276_v47, %v2273_v46  ;;  %v2645_v31 = vsel %vm954_vm0, %v2643_v27, %v2644_v55  ;;  %v13494_v47 = vld [vmem:[#allocation2 + $0x50] sm:$0xf0]  ;;  %v2677_v27 = vrot.slane %v13431_v37, 4 }
 0x103   : > { %11575 = vmatpush3.bf16.msra.mxu0 %v12793_v26  ;;  %v2267_v26 = vrot.slane %v2265_v1, 4  ;;  %v2252_v59 = vsel %vm514_vm4, %v2243_v11, %v2251_v36  ;;  %v2294_v10 = vor.u32 %v2293_v53, %v2290_v49  ;;  %v2650_v36 = vrot.slane %v13354_v12, 4  ;;  %v12798_v49 = vld [vmem:[%s15398_s1 + $0x150] sm:$0xff]   ;;  %v13505_v53 = vld [vmem:[#allocation2 + $0x60] sm:$0xf0] }
 0x104   : > { %11576 = vmatprep.subr.bf16.mxu0 %v12794_v48  ;;  %v2653_v12 = vrot.slane %v13368_v60, 4 }
 0x105   : > { %v2268_v44 = vor.u32 %v2267_v26, %v2264_v25  ;;  %v2311_v25 = vor.u32 %v2310_v19, %v2307_v18  ;;  %v2319_v26 = vor.u32 %v2318_v16, %v2315_v13  ;;  %v2671_v13 = vrot.slane %v13415_v62, 4  ;;  %v13552_v18 = vld [vmem:[%s15398_s1 + $0x180] sm:$0xff]   ;;  %v13559_v62 = vld [vmem:[#allocation2 + $0xd0] sm:$0xf0] }
 0x106   : > { %11545 = vmatmul.mubr.bf16.gmra.mrb[12].mxu0 %v2184_v50  ;;  %v2301_v50 = vrot.slane %v2299_v51, 4  ;;  %v2679_v55 = vrot.slane %v13559_v62, 4 }
 0x107   : > { %11548 = vmatprep.mubr.bf16.mxu0 %v2201_v15  ;;  %11577 = vmatpush3.bf16.msra.mxu0 %v12794_v48  ;;  %v2284_v48 = vrot.slane %v2282_v34, 4  ;;  %v564_v15 = vld [vmem:[#allocation2 + $0x108] sm:$0x10]  ;;  %v13478_v34 = vld [vmem:[#allocation2 + $0x20] sm:$0xf0] }
 0x108   : > { %11578 = vmatprep.subr.bf16.mxu0 %v12795_v9  ;;  %v565_v3 = vsel %vm13177_vm6, %v493_v23, %v564_v15  ;;  %v2302_v54 = vor.u32 %v2301_v50, %v2298_v56  ;;  %v2646_v33 = vrot.slane %v13478_v34, 4  ;;  %v13511_v56 = vld [vmem:[#allocation2 + $0x70] sm:$0xf0]  ;;  %v13521_v23 = vld [vmem:[#allocation2 + $0x80] sm:$0xf0]  ;;  %v2665_v15 = vrot.slane %v13398_v35, 4 }
 0x109   : > { %v2285_v1 = vor.u32 %v2284_v48, %v2281_v20  ;;  %566 = vst [vmem:[#allocation2 + $0x108] sm:$0x10] %v565_v3  ;;  %v2655_v20 = vrot.slane %v13494_v47, 4  ;;  %v2656_v48 = vrot.slane %v13371_v41, 4  ;;  %v2658_v41 = vrot.slane %v13505_v53, 4 }
 0x10a   : > { %v2303_v21 = vsel %vm514_vm4, %v2294_v10, %v2302_v54  ;;  %v2648_v40 = vsel %vm954_vm0, %v2646_v33, %v2647_v43  ;;  %v2661_v39 = vrot.slane %v13511_v56, 4  ;;  %v2664_v6 = vrot.slane %v13521_v23, 4  ;;  %v13537_v3 = vld [vmem:[#allocation2 + $0xa0] sm:$0xf0]  ;;  %v12803_v10 = vld [vmem:[%s15398_s1 + $0x178] sm:$0xff]  }
 0x10b   : > { %11579 = vmatpush3.bf16.msra.mxu0 %v12795_v9  ;;  %v2269_v9 = vsel %vm514_vm4, %v2260_v42, %v2268_v44  ;;  %v2286_v17 = vsel %vm514_vm4, %v2277_v0, %v2285_v1  ;;  %v13488_v42 = vld [vmem:[#allocation2 + $0x40] sm:$0xf0]  ;;  %v12797_v44 = vld [vmem:[%s15398_s1 + $0x148] sm:$0xff]   ;;  %v2657_v60 = vsel %vm954_vm0, %v2655_v20, %v2656_v48  ;;  %v2667_v0 = vrot.slane %v13527_v24, 4  ;;  %v13543_v54 = vld [vmem:[#allocation2 + $0xb0] sm:$0xf0] }
 0x10c   : > { %11612 = vmatprep.subr.bf16.mxu0 %v13452_v8  ;;  %v2652_v4 = vrot.slane %v13488_v42, 4  ;;  %v2668_v1 = vrot.slane %v13403_v45, 4  ;;  %v2666_v14 = vsel %vm954_vm0, %v2664_v6, %v2665_v15  ;;  %v2670_v45 = vrot.slane %v13537_v3, 4  ;;  %v308_v20 = vld [vmem:[#allocation2 + $0xf8] sm:$0xf] }
 0x10d   : > { %v2673_v16 = vrot.slane %v13543_v54, 4  ;;  %311 = vst [vmem:[#allocation2 + $0x118] sm:$0xf] %v308_v20  ;;  %v2999_v6 = vshrl.u32 %v13478_v34, 16  ;;  %v3002_v15 = vshll.u32 %v13478_v34, 16 }
 0x10e   : > { %11549 = vmatmul.mubr.bf16.gmra.mrb[16].mxu0 %v2218_v28  ;;  %v2320_v28 = vsel %vm514_vm4, %v2311_v25, %v2319_v26  ;;  %v2654_v51 = vsel %vm954_vm0, %v2652_v4, %v2653_v12  ;;  %v2669_v35 = vsel %vm954_vm0, %v2667_v0, %v2668_v1  ;;  %v2672_v19 = vsel %vm954_vm0, %v2670_v45, %v2671_v13  ;;  %v13556_v26 = vld [vmem:[#allocation2 + $0xc0] sm:$0xf0] }
 0x10f   : > { %11552 = vmatprep.mubr.bf16.mxu0 %v2235_v32  ;;  %v13481_v32 = vld [vmem:[#allocation2 + $0x30] sm:$0xf0]  ;;  %v2683_v4 = vrot.slane %v13447_v5, 4  ;;  %v2686_v12 = vrot.slane %v13454_v52, 4  ;;  %v13579_v5 = vld [vmem:[#allocation2 + $0x100] sm:$0xf0] }
 0x110   : > { %v2649_v11 = vrot.slane %v13481_v32, 4 }
 0x112   : > { %v2651_v46 = vsel %vm954_vm0, %v2649_v11, %v2650_v36  ;;  %v13567_v11 = vld [vmem:[#allocation2 + $0xe0] sm:$0xf0]  ;;  %v13569_v36 = vld [vmem:[#allocation2 + $0xf0] sm:$0xf0] }
 0x113   : > { %v2682_v37 = vrot.slane %v13567_v11, 4 }
 0x116   : > { %11553 = vmatmul.mubr.bf16.gmra.mrb[20].mxu0 %v2252_v59  ;;  %v2659_v59 = vrot.slane %v13383_v63, 4  ;;  %v2663_v63 = vsel %vm954_vm0, %v2661_v39, %v2662_v22  ;;  %v2966_v39 = vld [vmem:[#allocation2 + $0x28] sm:$0x1f] }
 0x117   : > { %11556 = vmatprep.mubr.bf16.mxu0 %v2269_v9  ;;  %v12800_v9 = vld [vmem:[%s15398_s1 + $0x160] sm:$0xff]   ;;  %v3007_v0 = vshrl.u32 %v2966_v39, 16  ;;  %v3010_v1 = vshll.u32 %v2966_v39, 16 }
 0x118   : > { %v2660_v50 = vsel %vm954_vm0, %v2658_v41, %v2659_v59  ;;  %v2684_v41 = vsel %vm954_vm0, %v2682_v37, %v2683_v4 }
 0x11e   : > { %11557 = vmatmul.mubr.bf16.gmra.mrb[24].mxu0 %v2286_v17  ;;  %v2674_v17 = vrot.slane %v13420_v7, 4  ;;  %v2676_v7 = vrot.slane %v13556_v26, 4 }
 0x11f   : > { %11560 = vmatprep.mubr.bf16.mxu0 %v2303_v21  ;;  %v307_v21 = vld [vmem:[#allocation2 + $0xf0] sm:$0xf0] }
 0x120   : > { %v2675_v25 = vsel %vm954_vm0, %v2673_v16, %v2674_v17  ;;  %310 = vst [vmem:[#allocation2 + $0x110] sm:$0xf0] %v307_v21  ;;  %v3001_v17 = vrot.slane %v2999_v6, 4  ;;  %v3012_v21 = vrot.slane %v3010_v1, 5  ;;  %v3070_v6 = vshll.u32 %v13505_v53, 16 }
 0x121   : > { %v3084_v1 = vshrl.u32 %v13511_v56, 16 }
 0x126   : > { %11561 = vmatmul.mubr.bf16.gmra.mrb[28].mxu0 %v2320_v28  ;;  %v2680_v28 = vrot.slane %v13436_v57, 4  ;;  %v2685_v57 = vrot.slane %v13569_v36, 4 }
 0x127   : > { %11580 = vmatprep.mubr.bf16.mxu0 %v2645_v31  ;;  %v2678_v31 = vsel %vm954_vm0, %v2676_v7, %v2677_v27  ;;  %v329_v33 = vld [vmem:[#allocation2 + $0x110] sm:$0x10] }
 0x128   : > { %v2681_v43 = vsel %vm954_vm0, %v2679_v55, %v2680_v28  ;;  %v2687_v59 = vsel %vm954_vm0, %v2685_v57, %v2686_v12  ;;  %v2968_v55 = vld [vmem:[#allocation2 + $0x48] sm:$0x1f]  ;;  %v3050_v57 = vshrl.u32 %v13494_v47, 16  ;;  %v3053_v12 = vshll.u32 %v13494_v47, 16  ;;  %v2971_v47 = vld [vmem:[#allocation2 + $0x78] sm:$0x1f] }
 0x12a   : > { %v3052_v39 = vrot.slane %v3050_v57, 4 }
 0x12e   : > { %11581 = vmatmul.mubr.bf16.vlgmr.msra.gmra.mrb[0].mxu0 %v2648_v40  ;;  %v365_v40 = vrot.slane %v329_v33, 1  ;;  %v3036_v33 = vshll.u32 %v13488_v42, 16 }
 0x12f   : > { %11613 = vmatpush3.bf16.msra.mxu0 %v13452_v8  ;;  %11584 = vmatprep.mubr.bf16.mxu0 %v2651_v46  ;;  %v12799_v8 = vld [vmem:[%s15398_s1 + $0x158] sm:$0xff]   ;;  %v438_v46 = vld [vmem:[#allocation2 + $0x110] sm:$0x8] }
 0x130   : > { %11614 = vmatprep.subr.bf16.mxu0 %v12797_v44  ;;  %v439_v48 = vsel %vm13068_vm3, %v365_v40, %v438_v46  ;;  %v3044_v40 = vshll.u32 %v2968_v55, 16 }
 0x131   : > { %440 = vst [vmem:[#allocation2 + $0x110] sm:$0x8] %v439_v48 }
 0x133   : > { %11615 = vmatpush3.bf16.msra.mxu0 %v12797_v44  ;;  %v2965_v44 = vld [vmem:[#allocation2 + $0x18] sm:$0x1f] }
 0x134   : > { %11616 = vmatprep.subr.bf16.mxu0 %v12798_v49 }
 0x136   : > { %11585 = vmatmul.mubr.bf16.gmra.mrb[4].mxu0 %v2654_v51  ;;  %v2985_v51 = vshll.u32 %v13473_v30, 16 }
 0x137   : > { %11588 = vmatprep.mubr.bf16.mxu0 %v2657_v60  ;;  %11617 = vmatpush3.bf16.msra.mxu0 %v12798_v49  ;;  %v2982_v49 = vshrl.u32 %v13473_v30, 16  ;;  %v2993_v60 = vshll.u32 %v2965_v44, 16  ;;  %v2689_v30 = vrot.slane %v13463_v58, 4  ;;  %v3004_v58 = vrot.slane %v3002_v15, 5 }
 0x138   : > { %11618 = vmatprep.subr.bf16.mxu0 %v12799_v8  ;;  %v2987_v22 = vrot.slane %v2985_v51, 5  ;;  %v3038_v51 = vrot.slane %v3036_v33, 5  ;;  %v2973_v33 = vld [vmem:[#allocation2 + $0x98] sm:$0x1f] }
 0x139   : > { %v2984_v52 = vrot.slane %v2982_v49, 4  ;;  %v3126_v57 = vshrl.u32 %v2973_v33, 16 }
 0x13b   : > { %11619 = vmatpush3.bf16.msra.mxu0 %v12799_v8  ;;  %v2990_v8 = vshrl.u32 %v2965_v44, 16  ;;  %v2988_v45 = vor.u32 %v2987_v22, %v2984_v52  ;;  %v3005_v44 = vor.u32 %v3004_v58, %v3001_v17  ;;  %v3055_v52 = vrot.slane %v3053_v12, 5  ;;  %v2972_v17 = vld [vmem:[#allocation2 + $0x88] sm:$0x1f] }
 0x13c   : > { %11620 = vmatprep.subr.bf16.mxu0 %v12800_v9  ;;  %v3129_v12 = vshll.u32 %v2973_v33, 16  ;;  %v3186_v33 = vshrl.u32 %v13559_v62, 16 }
 0x13e   : > { %11589 = vmatmul.mubr.bf16.gmra.mrb[8].mxu0 %v2660_v50  ;;  %v2995_v50 = vrot.slane %v2993_v60, 5  ;;  %v3046_v60 = vrot.slane %v3044_v40, 5 }
 0x13f   : > { %11592 = vmatprep.mubr.bf16.mxu0 %v2663_v63  ;;  %11621 = vmatpush3.bf16.msra.mxu0 %v12800_v9  ;;  %v2992_v9 = vrot.slane %v2990_v8, 4  ;;  %v2688_v63 = vrot.slane %v13579_v5, 4 }
 0x140   : > { %11622 = vmatprep.subr.bf16.mxu0 %v12801_v61 }
 0x141   : > { %v2996_v13 = vor.u32 %v2995_v50, %v2992_v9  ;;  %v2690_v16 = vsel %vm954_vm0, %v2688_v63, %v2689_v30  ;;  %v2970_v50 = vld [vmem:[#allocation2 + $0x68] sm:$0x1f]  ;;  %v3067_v30 = vshrl.u32 %v13505_v53, 16 }
 0x142   : > { %v3075_v15 = vshrl.u32 %v2970_v50, 16 }
 0x143   : > { %11623 = vmatpush3.bf16.msra.mxu0 %v12801_v61  ;;  %v2967_v61 = vld [vmem:[#allocation2 + $0x38] sm:$0x1f]  ;;  %v2997_v28 = vsel %vm1470_vm7, %v2988_v45, %v2996_v13  ;;  %v3092_v45 = vshrl.u32 %v2971_v47, 16  ;;  %v3095_v13 = vshll.u32 %v2971_v47, 16  ;;  %v3135_v47 = vshrl.u32 %v13537_v3, 16 }
 0x144   : > { %11624 = vmatprep.subr.bf16.mxu0 %v12802_v2  ;;  %v3077_v58 = vrot.slane %v3075_v15, 4  ;;  %v3155_v15 = vshll.u32 %v13543_v54, 16 }
 0x146   : > { %11593 = vmatmul.mubr.bf16.gmra.mrb[12].mxu0 %v2666_v14  ;;  %v3019_v14 = vshll.u32 %v13481_v32, 16 }
 0x147   : > { %11596 = vmatprep.mubr.bf16.mxu0 %v2669_v35  ;;  %11625 = vmatpush3.bf16.msra.mxu0 %v12802_v2  ;;  %v3016_v2 = vshrl.u32 %v13481_v32, 16  ;;  %v3027_v35 = vshll.u32 %v2967_v61, 16  ;;  %v3033_v32 = vshrl.u32 %v13488_v42, 16 }
 0x148   : > { %11626 = vmatprep.subr.bf16.mxu0 %v12803_v10  ;;  %v3021_v7 = vrot.slane %v3019_v14, 5  ;;  %v3056_v14 = vor.u32 %v3055_v52, %v3052_v39  ;;  %v3128_v39 = vrot.slane %v3126_v57, 4  ;;  %v2975_v52 = vld [vmem:[#allocation2 + $0xb8] sm:$0x1f] }
 0x149   : > { %v3029_v27 = vrot.slane %v3027_v35, 5  ;;  %v3035_v49 = vrot.slane %v3033_v32, 4  ;;  %v12806_v35 = vld [vmem:[%s15398_s1 + $0x190] sm:$0xff]   ;;  %v3112_v32 = vshll.u32 %v2972_v17, 16 }
 0x14b   : > { %11627 = vmatpush3.bf16.msra.mxu0 %v12803_v10  ;;  %v3024_v10 = vshrl.u32 %v2967_v61, 16  ;;  %v3039_v61 = vor.u32 %v3038_v51, %v3035_v49  ;;  %v3114_v51 = vrot.slane %v3112_v32, 5 }
 0x14c   : > { %11660 = vmatprep.subr.bf16.mxu0 %v13552_v18 }
 0x14d   : > { %v3026_v34 = vrot.slane %v3024_v10, 4 }
 0x14e   : > { %11597 = vmatmul.mubr.bf16.gmra.mrb[16].mxu0 %v2672_v19  ;;  %v3009_v19 = vrot.slane %v3007_v0, 4  ;;  %v3078_v0 = vshll.u32 %v2970_v50, 16 }
 0x14f   : > { %11600 = vmatprep.mubr.bf16.mxu0 %v2675_v25  ;;  %v3018_v25 = vrot.slane %v3016_v2, 4  ;;  %v3030_v37 = vor.u32 %v3029_v27, %v3026_v34  ;;  %v3087_v2 = vshll.u32 %v13511_v56, 16  ;;  %v3097_v34 = vrot.slane %v3095_v13, 5  ;;  %v12807_v27 = vld [vmem:[%s15398_s1 + $0x198] sm:$0xff]  }
 0x150   : > { %v3013_v46 = vor.u32 %v3012_v21, %v3009_v19  ;;  %v3080_v19 = vrot.slane %v3078_v0, 5  ;;  %v3086_v21 = vrot.slane %v3084_v1, 4  ;;  %v3160_v0 = vshrl.u32 %v2975_v52, 16 }
 0x151   : > { %v3022_v4 = vor.u32 %v3021_v7, %v3018_v25  ;;  %v3089_v25 = vrot.slane %v3087_v2, 5  ;;  %v3094_v7 = vrot.slane %v3092_v45, 4  ;;  %v3163_v1 = vshll.u32 %v2975_v52, 16 }
 0x152   : > { %v3081_v40 = vor.u32 %v3080_v19, %v3077_v58  ;;  %v2976_v19 = vld [vmem:[#allocation2 + $0xc8] sm:$0x1f]  ;;  %v3220_v52 = vshrl.u32 %v13569_v36, 16 }
 0x153   : > { %v3031_v42 = vsel %vm1470_vm7, %v3022_v4, %v3030_v37  ;;  %v3098_v4 = vor.u32 %v3097_v34, %v3094_v7  ;;  %v3121_v37 = vshll.u32 %v13527_v24, 16  ;;  %v3165_v58 = vrot.slane %v3163_v1, 5 }
 0x154   : > { %v3169_v34 = vshrl.u32 %v13556_v26, 16  ;;  %v3180_v32 = vshll.u32 %v2976_v19, 16 }
 0x156   : > { %11601 = vmatmul.mubr.bf16.gmra.mrb[20].mxu0 %v2678_v31  ;;  %v2969_v31 = vld [vmem:[#allocation2 + $0x58] sm:$0x1f] }
 0x157   : > { %11604 = vmatprep.mubr.bf16.mxu0 %v2681_v43  ;;  %v3041_v43 = vshrl.u32 %v2968_v55, 16  ;;  %v3058_v20 = vshrl.u32 %v2969_v31, 16  ;;  %v3061_v48 = vshll.u32 %v2969_v31, 16  ;;  %v3101_v55 = vshrl.u32 %v13521_v23, 16 }
 0x158   : > { %v3109_v31 = vshrl.u32 %v2972_v17, 16  ;;  %v3162_v17 = vrot.slane %v3160_v0, 4  ;;  %v3222_v0 = vrot.slane %v3220_v52, 4 }
 0x159   : > { %v3043_v8 = vrot.slane %v3041_v43, 4  ;;  %v3060_v22 = vrot.slane %v3058_v20, 4  ;;  %v3063_v9 = vrot.slane %v3061_v48, 5  ;;  %v3103_v20 = vrot.slane %v3101_v55, 4 }
 0x15a   : > { %v3111_v49 = vrot.slane %v3109_v31, 4  ;;  %v3177_v31 = vshrl.u32 %v2976_v19, 16 }
 0x15b   : > { %v3047_v63 = vor.u32 %v3046_v60, %v3043_v8  ;;  %v3064_v10 = vor.u32 %v3063_v9, %v3060_v22  ;;  %v12809_v22 = vld [vmem:[%s15398_s1 + $0x1a8] sm:$0xff]  }
 0x15c   : > { %v3115_v50 = vor.u32 %v3114_v51, %v3111_v49 }
 0x15d   : > { %v3048_v53 = vsel %vm1470_vm7, %v3039_v61, %v3047_v63  ;;  %v3065_v56 = vsel %vm1470_vm7, %v3056_v14, %v3064_v10  ;;  %v3138_v61 = vshll.u32 %v13537_v3, 16  ;;  %v12810_v10 = vld [vmem:[%s15398_s1 + $0x1b0] sm:$0xff]   ;;  %v3137_v3 = vrot.slane %v3135_v47, 4 }
 0x15e   : > { %11605 = vmatmul.mubr.bf16.gmra.mrb[24].mxu0 %v2684_v41  ;;  %v3014_v41 = vsel %vm1470_vm7, %v3005_v44, %v3013_v46  ;;  %v3090_v44 = vor.u32 %v3089_v25, %v3086_v21  ;;  %v3118_v46 = vshrl.u32 %v13527_v24, 16  ;;  %v3131_v24 = vrot.slane %v3129_v12, 5  ;;  %v12811_v21 = vld [vmem:[%s15398_s1 + $0x1b8] sm:$0xff]  }
 0x15f   : > { %11608 = vmatprep.mubr.bf16.mxu0 %v2687_v59  ;;  %v12805_v59 = vld [vmem:[%s15398_s1 + $0x188] sm:$0xff]   ;;  %v3140_v45 = vrot.slane %v3138_v61, 5  ;;  %v2977_v25 = vld [vmem:[#allocation2 + $0xd8] sm:$0x1f] }
 0x160   : > { %v3120_v60 = vrot.slane %v3118_v46, 4  ;;  %v3132_v14 = vor.u32 %v3131_v24, %v3128_v39  ;;  %v13644_v46 = vld [vmem:[%s15398_s1 + $0x1c0] sm:$0xff]  }
 0x166   : > { %11609 = vmatmul.mubr.bf16.gmra.mrb[28].mxu0 %v2690_v16  ;;  %v3069_v16 = vrot.slane %v3067_v30, 4 }
 0x167   : > { %11628 = vmatprep.mubr.bf16.mxu0 %v2997_v28  ;;  %v3104_v28 = vshll.u32 %v13521_v23, 16  ;;  %v12808_v23 = vld [vmem:[%s15398_s1 + $0x1a0] sm:$0xff]  }
 0x169   : > { %v3106_v48 = vrot.slane %v3104_v28, 5  ;;  %v3166_v28 = vor.u32 %v3165_v58, %v3162_v17 }
 0x16b   : > { %v3107_v9 = vor.u32 %v3106_v48, %v3103_v20  ;;  %v3182_v20 = vrot.slane %v3180_v32, 5  ;;  %v3188_v48 = vrot.slane %v3186_v33, 4 }
 0x16e   : > { %11629 = vmatmul.mubr.bf16.vlgmr.msra.gmra.mrb[0].mxu0 %v3014_v41  ;;  %v2974_v41 = vld [vmem:[#allocation2 + $0xa8] sm:$0x1f] }
 0x16f   : > { %11661 = vmatpush3.bf16.msra.mxu0 %v13552_v18  ;;  %11632 = vmatprep.mubr.bf16.mxu0 %v3031_v42  ;;  %v3072_v18 = vrot.slane %v3070_v6, 5  ;;  %v3099_v42 = vsel %vm1470_vm7, %v3090_v44, %v3098_v4  ;;  %v3143_v63 = vshrl.u32 %v2974_v41, 16  ;;  %v3146_v30 = vshll.u32 %v2974_v41, 16 }
 0x170   : > { %11662 = vmatprep.subr.bf16.mxu0 %v12805_v59  ;;  %v3152_v6 = vshrl.u32 %v13543_v54, 16  ;;  %v3197_v44 = vshll.u32 %v2977_v25, 16  ;;  %v3171_v4 = vrot.slane %v3169_v34, 4 }
 0x171   : > { %v3073_v43 = vor.u32 %v3072_v18, %v3069_v16  ;;  %v3145_v13 = vrot.slane %v3143_v63, 4  ;;  %v3157_v18 = vrot.slane %v3155_v15, 5 }
 0x172   : > { %v3154_v16 = vrot.slane %v3152_v6, 4  ;;  %v3199_v51 = vrot.slane %v3197_v44, 5  ;;  %v13663_v44 = vld [vmem:[#allocation2 + $0x38] sm:$0xf] }
 0x173   : > { %11663 = vmatpush3.bf16.msra.mxu0 %v12805_v59  ;;  %v3082_v8 = vsel %vm1470_vm7, %v3073_v43, %v3081_v40  ;;  %v3123_v59 = vrot.slane %v3121_v37, 5  ;;  %v3189_v43 = vshll.u32 %v13559_v62, 16  ;;  %v3194_v40 = vshrl.u32 %v2977_v25, 16  ;;  %v2978_v37 = vld [vmem:[#allocation2 + $0xe8] sm:$0x1f] }
 0x174   : > { %11664 = vmatprep.subr.bf16.mxu0 %v12806_v35  ;;  %v3158_v55 = vor.u32 %v3157_v18, %v3154_v16  ;;  %v3211_v41 = vshrl.u32 %v2978_v37, 16  ;;  %v3240_v16 = vshll.u32 %v13579_v5, 16 }
 0x175   : > { %v3124_v2 = vor.u32 %v3123_v59, %v3120_v60  ;;  %v3191_v62 = vrot.slane %v3189_v43, 5  ;;  %v3196_v49 = vrot.slane %v3194_v40, 4  ;;  %v3206_v60 = vshll.u32 %v13567_v11, 16  ;;  %v2979_v59 = vld [vmem:[#allocation2 + $0xf8] sm:$0x1f] }
 0x176   : > { %11633 = vmatmul.mubr.bf16.gmra.mrb[4].mxu0 %v3048_v53  ;;  %v3148_v53 = vrot.slane %v3146_v30, 5  ;;  %v3167_v57 = vsel %vm1470_vm7, %v3158_v55, %v3166_v28  ;;  %v3228_v47 = vshrl.u32 %v2979_v59, 16  ;;  %v3231_v61 = vshll.u32 %v2979_v59, 16  ;;  %v3529_v43 = vld [vmem:[#allocation2 + $0x30] sm:$0xf8] }
 0x177   : > { %11636 = vmatprep.mubr.bf16.mxu0 %v3065_v56  ;;  %11665 = vmatpush3.bf16.msra.mxu0 %v12806_v35  ;;  %v3116_v35 = vsel %vm1470_vm7, %v3107_v9, %v3115_v50  ;;  %v3133_v54 = vsel %vm1470_vm7, %v3124_v2, %v3132_v14  ;;  %v3141_v56 = vor.u32 %v3140_v45, %v3137_v3  ;;  %v3208_v30 = vrot.slane %v3206_v60, 5  ;;  %v2980_v2 = vld [vmem:[#allocation2 + $0x108] sm:$0x1f]  ;;  %v3527_v3 = vld [vmem:[#allocation2 + $0x20] sm:$0xf8] }
 0x178   : > { %11666 = vmatprep.subr.bf16.mxu0 %v12807_v27  ;;  %v3149_v7 = vor.u32 %v3148_v53, %v3145_v13  ;;  %v3192_v9 = vor.u32 %v3191_v62, %v3188_v48  ;;  %v3200_v50 = vor.u32 %v3199_v51, %v3196_v49  ;;  %v3213_v6 = vrot.slane %v3211_v41, 4  ;;  %v13655_v45 = vld [vmem:[#allocation2 + $0x28] sm:$0xf] }
 0x179   : > { %v3237_v53 = vshrl.u32 %v13579_v5, 16  ;;  %v3245_v18 = vshrl.u32 %v2980_v2, 16  ;;  %v3248_v17 = vshll.u32 %v2980_v2, 16  ;;  %v3560_v58 = vshrl.u32 %v3527_v3, 16 }
 0x17a   : > { %v3201_v14 = vsel %vm1470_vm7, %v3192_v9, %v3200_v50  ;;  %v3568_v19 = vshrl.u32 %v13655_v45, 16  ;;  %v3585_v62 = vshrl.u32 %v13663_v44, 16  ;;  %v3588_v49 = vshll.u32 %v13663_v44, 16  ;;  %v13673_v50 = vld [vmem:[#allocation2 + $0x58] sm:$0xf] }
 0x17b   : > { %11667 = vmatpush3.bf16.msra.mxu0 %v12807_v27  ;;  %v3172_v27 = vshll.u32 %v13556_v26, 16  ;;  %v3150_v26 = vsel %vm1470_vm7, %v3141_v56, %v3149_v7  ;;  %v3239_v34 = vrot.slane %v3237_v53, 4  ;;  %v3247_v55 = vrot.slane %v3245_v18, 4 }
 0x17c   : > { %11668 = vmatprep.subr.bf16.mxu0 %v12808_v23  ;;  %v3250_v28 = vrot.slane %v3248_v17, 5  ;;  %v3570_v5 = vrot.slane %v3568_v19, 3  ;;  %v3590_v9 = vrot.slane %v3588_v49, 4  ;;  %v3622_v2 = vshll.u32 %v13673_v50, 16  ;;  %v12813_v19 = vld [vmem:[%s15398_s1 + $0x1c8] sm:$0xff]  }
 0x17d   : > { %v3174_v12 = vrot.slane %v3172_v27, 5  ;;  %v3242_v27 = vrot.slane %v3240_v16, 5 }
 0x17e   : > { %11637 = vmatmul.mubr.bf16.gmra.mrb[8].mxu0 %v3082_v8  ;;  %v3203_v8 = vshrl.u32 %v13567_v11, 16 }
 0x17f   : > { %11640 = vmatprep.mubr.bf16.mxu0 %v3099_v42  ;;  %11669 = vmatpush3.bf16.msra.mxu0 %v12808_v23  ;;  %v3179_v23 = vrot.slane %v3177_v31, 4  ;;  %v3214_v42 = vshll.u32 %v2978_v37, 16  ;;  %v3175_v39 = vor.u32 %v3174_v12, %v3171_v4  ;;  %v3562_v31 = vrot.slane %v3560_v58, 3  ;;  %v13665_v4 = vld [vmem:[#allocation2 + $0x48] sm:$0xf] }
 0x180   : > { %11670 = vmatprep.subr.bf16.mxu0 %v12809_v22  ;;  %v3205_v63 = vrot.slane %v3203_v8, 4  ;;  %v3243_v37 = vor.u32 %v3242_v27, %v3239_v34  ;;  %v3577_v12 = vshrl.u32 %v3529_v43, 16  ;;  %v3602_v60 = vshrl.u32 %v13665_v4, 16  ;;  %v13685_v34 = vld [vmem:[#allocation2 + $0x78] sm:$0xf] }
 0x181   : > { %v3183_v24 = vor.u32 %v3182_v20, %v3179_v23  ;;  %v3216_v15 = vrot.slane %v3214_v42, 5  ;;  %v3580_v23 = vshll.u32 %v3529_v43, 16  ;;  %v3605_v41 = vshll.u32 %v13665_v4, 16 }
 0x182   : > { %v3579_v59 = vrot.slane %v3577_v12, 3 }
 0x183   : > { %11671 = vmatpush3.bf16.msra.mxu0 %v12809_v22  ;;  %v3223_v22 = vshll.u32 %v13569_v36, 16  ;;  %v3184_v11 = vsel %vm1470_vm7, %v3175_v39, %v3183_v24  ;;  %v3209_v36 = vor.u32 %v3208_v30, %v3205_v63  ;;  %v3217_v13 = vor.u32 %v3216_v15, %v3213_v6  ;;  %v3533_v39 = vld [vmem:[#allocation2 + $0x50] sm:$0xf8]  ;;  %v3535_v6 = vld [vmem:[#allocation2 + $0x60] sm:$0xf8] }
 0x184   : > { %11672 = vmatprep.subr.bf16.mxu0 %v12810_v10  ;;  %v3582_v52 = vrot.slane %v3580_v23, 4  ;;  %v3604_v63 = vrot.slane %v3602_v60, 3  ;;  %v3607_v30 = vrot.slane %v3605_v41, 4  ;;  %v3611_v15 = vshrl.u32 %v3533_v39, 16 }
 0x185   : > { %v3225_v1 = vrot.slane %v3223_v22, 5  ;;  %v3218_v7 = vsel %vm1470_vm7, %v3209_v36, %v3217_v13  ;;  %v3587_v22 = vrot.slane %v3585_v62, 3  ;;  %v12814_v62 = vld [vmem:[%s15398_s1 + $0x1d0] sm:$0xff]  }
 0x186   : > { %11641 = vmatmul.mubr.bf16.gmra.mrb[12].mxu0 %v3116_v35  ;;  %v3233_v35 = vrot.slane %v3231_v61, 5  ;;  %v3608_v13 = vor.u32 %v3607_v30, %v3604_v63  ;;  %v3613_v18 = vrot.slane %v3611_v15, 3  ;;  %v13705_v63 = vld [vmem:[#allocation2 + $0xa8] sm:$0xf] }
 0x187   : > { %11644 = vmatprep.mubr.bf16.mxu0 %v3133_v54  ;;  %11673 = vmatpush3.bf16.msra.mxu0 %v12810_v10  ;;  %v3230_v10 = vrot.slane %v3228_v47, 4  ;;  %v3563_v54 = vshll.u32 %v3527_v3, 16  ;;  %v3226_v25 = vor.u32 %v3225_v1, %v3222_v0  ;;  %v13675_v0 = vld [vmem:[#allocation2 + $0x68] sm:$0xf]  ;;  %v3619_v1 = vshrl.u32 %v13673_v50, 16 }
 0x188   : > { %11674 = vmatprep.subr.bf16.mxu0 %v12811_v21  ;;  %v3631_v3 = vshll.u32 %v3535_v6, 16  ;;  %v3636_v53 = vshrl.u32 %v13675_v0, 16  ;;  %v3639_v16 = vshll.u32 %v13675_v0, 16 }
 0x189   : > { %v3234_v56 = vor.u32 %v3233_v35, %v3230_v10  ;;  %v3565_v32 = vrot.slane %v3563_v54, 4  ;;  %v3591_v10 = vor.u32 %v3590_v9, %v3587_v22  ;;  %v3628_v35 = vshrl.u32 %v3535_v6, 16 }
 0x18a   : > { %v3621_v58 = vrot.slane %v3619_v1, 3  ;;  %v3624_v54 = vrot.slane %v3622_v2, 4 }
 0x18b   : > { %11675 = vmatpush3.bf16.msra.mxu0 %v12811_v21  ;;  %v3571_v21 = vshll.u32 %v13655_v45, 16  ;;  %v3235_v40 = vsel %vm1470_vm7, %v3226_v25, %v3234_v56  ;;  %v3566_v20 = vor.u32 %v3565_v32, %v3562_v31  ;;  %v3630_v25 = vrot.slane %v3628_v35, 3  ;;  %v3539_v31 = vld [vmem:[#allocation2 + $0x80] sm:$0xf8]  ;;  %v13688_v32 = vld [vmem:[#allocation2 + $0x88] sm:$0xf] }
 0x18c   : > { %11708 = vmatprep.subr.bf16.mxu0 %v13644_v46  ;;  %v3633_v56 = vrot.slane %v3631_v3, 4  ;;  %v3665_v12 = vshll.u32 %v3539_v31, 16  ;;  %v3670_v23 = vshrl.u32 %v13688_v32, 16  ;;  %v3673_v49 = vshll.u32 %v13688_v32, 16 }
 0x18d   : > { %v3573_v33 = vrot.slane %v3571_v21, 4  ;;  %v3704_v35 = vshrl.u32 %v13705_v63, 16 }
 0x18e   : > { %11645 = vmatmul.mubr.bf16.gmra.mrb[16].mxu0 %v3150_v26  ;;  %v3531_v26 = vld [vmem:[#allocation2 + $0x40] sm:$0xf8]  ;;  %v3675_v9 = vrot.slane %v3673_v49, 4 }
 0x18f   : > { %11648 = vmatprep.mubr.bf16.mxu0 %v3167_v57  ;;  %v3251_v57 = vor.u32 %v3250_v28, %v3247_v55  ;;  %v3574_v48 = vor.u32 %v3573_v33, %v3570_v5  ;;  %v3594_v51 = vshrl.u32 %v3531_v26, 16  ;;  %v3597_v8 = vshll.u32 %v3531_v26, 16 }
 0x190   : > { %v3638_v55 = vrot.slane %v3636_v53, 3  ;;  %v3641_v28 = vrot.slane %v3639_v16, 4  ;;  %v3656_v26 = vshll.u32 %v13685_v34, 16  ;;  %v12816_v53 = vld [vmem:[%s15398_s1 + $0x1e0] sm:$0xff]  }
 0x191   : > { %v3252_v42 = vsel %vm1470_vm7, %v3243_v37, %v3251_v57  ;;  %v3575_v24 = vsel %vm514_vm4, %v3566_v20, %v3574_v48  ;;  %v3596_v47 = vrot.slane %v3594_v51, 3  ;;  %v3599_v61 = vrot.slane %v3597_v8, 4 }
 0x192   : > { %v3625_v37 = vor.u32 %v3624_v54, %v3621_v58  ;;  %v3662_v57 = vshrl.u32 %v3539_v31, 16  ;;  %v3634_v20 = vor.u32 %v3633_v56, %v3630_v25  ;;  %v3642_v48 = vor.u32 %v3641_v28, %v3638_v55  ;;  %v3545_v54 = vld [vmem:[#allocation2 + $0xb0] sm:$0xf8]  ;;  %v3547_v28 = vld [vmem:[#allocation2 + $0xc0] sm:$0xf8] }
 0x193   : > { %v3600_v36 = vor.u32 %v3599_v61, %v3596_v47  ;;  %v3658_v41 = vrot.slane %v3656_v26, 4  ;;  %v12815_v47 = vld [vmem:[%s15398_s1 + $0x1d8] sm:$0xff]   ;;  %v3543_v61 = vld [vmem:[#allocation2 + $0xa0] sm:$0xf8]  ;;  %v13718_v31 = vld [vmem:[#allocation2 + $0xc8] sm:$0xf] }
 0x194   : > { %v3643_v22 = vsel %vm514_vm4, %v3634_v20, %v3642_v48  ;;  %v3738_v20 = vshrl.u32 %v13718_v31, 16  ;;  %v3741_v49 = vshll.u32 %v13718_v31, 16 }
 0x195   : > { %v3609_v27 = vsel %vm514_vm4, %v3600_v36, %v3608_v13  ;;  %v3707_v13 = vshll.u32 %v13705_v63, 16 }
 0x196   : > { %11649 = vmatmul.mubr.bf16.gmra.mrb[20].mxu0 %v3184_v11  ;;  %v3614_v11 = vshll.u32 %v3533_v39, 16  ;;  %v3667_v39 = vrot.slane %v3665_v12, 4  ;;  %v3730_v12 = vshrl.u32 %v3547_v28, 16 }
 0x197   : > { %11652 = vmatprep.mubr.bf16.mxu0 %v3201_v14  ;;  %v3583_v14 = vor.u32 %v3582_v52, %v3579_v59  ;;  %v3664_v59 = vrot.slane %v3662_v57, 3  ;;  %v13699_v52 = vld [vmem:[#allocation2 + $0x98] sm:$0xf]  ;;  %v3709_v55 = vrot.slane %v3707_v13, 4 }
 0x198   : > { %v3616_v17 = vrot.slane %v3614_v11, 4  ;;  %v3687_v1 = vshrl.u32 %v13699_v52, 16  ;;  %v3690_v2 = vshll.u32 %v13699_v52, 16 }
 0x199   : > { %v3592_v21 = vsel %vm514_vm4, %v3583_v14, %v3591_v10  ;;  %v3696_v14 = vshrl.u32 %v3543_v61, 16  ;;  %v3699_v10 = vshll.u32 %v3543_v61, 16  ;;  %v3668_v3 = vor.u32 %v3667_v39, %v3664_v59 }
 0x19a   : > { %v3617_v5 = vor.u32 %v3616_v17, %v3613_v18  ;;  %v3689_v58 = vrot.slane %v3687_v1, 3  ;;  %v3732_v39 = vrot.slane %v3730_v12, 3  ;;  %v3743_v61 = vrot.slane %v3741_v49, 4 }
 0x19b   : > { %v3698_v25 = vrot.slane %v3696_v14, 3  ;;  %v3701_v56 = vrot.slane %v3699_v10, 4 }
 0x19d   : > { %v3702_v48 = vor.u32 %v3701_v56, %v3698_v25 }
 0x19e   : > { %11653 = vmatmul.mubr.bf16.gmra.mrb[24].mxu0 %v3218_v7  ;;  %v3537_v7 = vld [vmem:[#allocation2 + $0x70] sm:$0xf8] }
 0x19f   : > { %11656 = vmatprep.mubr.bf16.mxu0 %v3235_v40  ;;  %v3645_v33 = vshrl.u32 %v3537_v7, 16  ;;  %v3648_v43 = vshll.u32 %v3537_v7, 16  ;;  %v3653_v40 = vshrl.u32 %v13685_v34, 16  ;;  %v3706_v7 = vrot.slane %v3704_v35, 3 }
 0x1a1   : > { %v3647_v51 = vrot.slane %v3645_v33, 3  ;;  %v3650_v8 = vrot.slane %v3648_v43, 4  ;;  %v3655_v60 = vrot.slane %v3653_v40, 3  ;;  %v3713_v33 = vshrl.u32 %v3545_v54, 16 }
 0x1a2   : > { %v3716_v43 = vshll.u32 %v3545_v54, 16 }
 0x1a3   : > { %v3651_v6 = vor.u32 %v3650_v8, %v3647_v51  ;;  %v3659_v15 = vor.u32 %v3658_v41, %v3655_v60  ;;  %v12818_v51 = vld [vmem:[%s15398_s1 + $0x1f0] sm:$0xff]   ;;  %v3715_v8 = vrot.slane %v3713_v33, 3  ;;  %v13749_v33 = vld [vmem:[#allocation2 + $0xf8] sm:$0xf] }
 0x1a4   : > { %v3718_v60 = vrot.slane %v3716_v43, 4  ;;  %v3789_v12 = vshrl.u32 %v13749_v33, 16 }
 0x1a5   : > { %v3660_v18 = vsel %vm514_vm4, %v3651_v6, %v3659_v15  ;;  %v13734_v6 = vld [vmem:[#allocation2 + $0xe8] sm:$0xf]  ;;  %v12819_v15 = vld [vmem:[%s15398_s1 + $0x1f8] sm:$0xff]  }
 0x1a6   : > { %11657 = vmatmul.mubr.bf16.gmra.mrb[28].mxu0 %v3252_v42  ;;  %v3626_v42 = vsel %vm514_vm4, %v3617_v5, %v3625_v37  ;;  %v12817_v5 = vld [vmem:[%s15398_s1 + $0x1e8] sm:$0xff]   ;;  %v3772_v13 = vshrl.u32 %v13734_v6, 16 }
 0x1a7   : > { %11676 = vmatprep.mubr.bf16.mxu0 %v3575_v24  ;;  %v3672_v24 = vrot.slane %v3670_v23, 3  ;;  %v3733_v23 = vshll.u32 %v3547_v28, 16 }
 0x1a8   : > { %v3774_v28 = vrot.slane %v3772_v13, 3 }
 0x1a9   : > { %v3676_v36 = vor.u32 %v3675_v9, %v3672_v24  ;;  %v3735_v24 = vrot.slane %v3733_v23, 4  ;;  %v13731_v9 = vld [vmem:[#allocation2 + $0xd8] sm:$0xf]  ;;  %v3792_v23 = vshll.u32 %v13749_v33, 16 }
 0x1aa   : > { %v3755_v10 = vshrl.u32 %v13731_v9, 16  ;;  %v3758_v35 = vshll.u32 %v13731_v9, 16 }
 0x1ac   : > { %v3757_v25 = vrot.slane %v3755_v10, 3  ;;  %v3760_v56 = vrot.slane %v3758_v35, 4 }
 0x1ae   : > { %11677 = vmatmul.mubr.bf16.vlgmr.msra.gmra.mrb[0].mxu0 %v3592_v21  ;;  %v3692_v21 = vrot.slane %v3690_v2, 4 }
 0x1af   : > { %11709 = vmatpush3.bf16.msra.mxu0 %v13644_v46  ;;  %11680 = vmatprep.mubr.bf16.mxu0 %v3609_v27  ;;  %v3541_v46 = vld [vmem:[#allocation2 + $0x90] sm:$0xf8]  ;;  %v3677_v27 = vsel %vm514_vm4, %v3668_v3, %v3676_v36 }
 0x1b0   : > { %11710 = vmatprep.subr.bf16.mxu0 %v12813_v19  ;;  %v3679_v30 = vshrl.u32 %v3541_v46, 16  ;;  %v3682_v11 = vshll.u32 %v3541_v46, 16  ;;  %v3693_v57 = vor.u32 %v3692_v21, %v3689_v58 }
 0x1b2   : > { %v3681_v16 = vrot.slane %v3679_v30, 3  ;;  %v3684_v17 = vrot.slane %v3682_v11, 4  ;;  %v3551_v30 = vld [vmem:[#allocation2 + $0xe0] sm:$0xf8]  ;;  %v3719_v11 = vor.u32 %v3718_v60, %v3715_v8 }
 0x1b3   : > { %11711 = vmatpush3.bf16.msra.mxu0 %v12813_v19  ;;  %v13715_v19 = vld [vmem:[#allocation2 + $0xb8] sm:$0xf]  ;;  %v3764_v3 = vshrl.u32 %v3551_v30, 16  ;;  %v3767_v36 = vshll.u32 %v3551_v30, 16 }
 0x1b4   : > { %11712 = vmatprep.subr.bf16.mxu0 %v12814_v62  ;;  %v3721_v40 = vshrl.u32 %v13715_v19, 16  ;;  %v3724_v26 = vshll.u32 %v13715_v19, 16  ;;  %v3685_v37 = vor.u32 %v3684_v17, %v3681_v16  ;;  %v3736_v16 = vor.u32 %v3735_v24, %v3732_v39  ;;  %v13746_v17 = vld [vmem:[%s15398_s1 + $0x200] sm:$0xff]  }
 0x1b5   : > { %v3794_v39 = vrot.slane %v3792_v23, 4  ;;  %v13775_v23 = vld [vmem:[#allocation2 + $0x30] sm:$0xf0] }
 0x1b6   : > { %11681 = vmatmul.mubr.bf16.gmra.mrb[4].mxu0 %v3626_v42  ;;  %v3723_v41 = vrot.slane %v3721_v40, 3  ;;  %v3726_v46 = vrot.slane %v3724_v26, 4  ;;  %v3549_v42 = vld [vmem:[#allocation2 + $0xd0] sm:$0xf8]  ;;  %v3694_v59 = vsel %vm514_vm4, %v3685_v37, %v3693_v57  ;;  %v3555_v40 = vld [vmem:[#allocation2 + $0x100] sm:$0xf8] }
 0x1b7   : > { %11684 = vmatprep.mubr.bf16.mxu0 %v3643_v22  ;;  %11713 = vmatpush3.bf16.msra.mxu0 %v12814_v62  ;;  %v3710_v62 = vor.u32 %v3709_v55, %v3706_v7  ;;  %v3740_v22 = vrot.slane %v3738_v20, 3  ;;  %v3747_v2 = vshrl.u32 %v3549_v42, 16  ;;  %v3750_v14 = vshll.u32 %v3549_v42, 16  ;;  %v3553_v7 = vld [vmem:[#allocation2 + $0xf0] sm:$0xf8] }
 0x1b8   : > { %11714 = vmatprep.subr.bf16.mxu0 %v12815_v47  ;;  %v3727_v1 = vor.u32 %v3726_v46, %v3723_v41  ;;  %v3769_v55 = vrot.slane %v3767_v36, 4  ;;  %v13753_v26 = vld [vmem:[#allocation2 + $0x108] sm:$0xf]  ;;  %v3781_v37 = vshrl.u32 %v3553_v7, 16  ;;  %v3784_v57 = vshll.u32 %v3553_v7, 16 }
 0x1b9   : > { %v3749_v54 = vrot.slane %v3747_v2, 3  ;;  %v3752_v21 = vrot.slane %v3750_v14, 4  ;;  %v3801_v8 = vshll.u32 %v3555_v40, 16  ;;  %v3806_v60 = vshrl.u32 %v13753_v26, 16  ;;  %v13761_v2 = vld [vmem:[#allocation2 + $0x118] sm:$0xf] }
 0x1ba   : > { %v3728_v58 = vsel %vm514_vm4, %v3719_v11, %v3727_v1  ;;  %v3809_v41 = vshll.u32 %v13753_v26, 16  ;;  %v3783_v46 = vrot.slane %v3781_v37, 3  ;;  %v3786_v42 = vrot.slane %v3784_v57, 4 }
 0x1bb   : > { %11715 = vmatpush3.bf16.msra.mxu0 %v12815_v47  ;;  %v3711_v47 = vsel %vm514_vm4, %v3702_v48, %v3710_v62  ;;  %v3753_v20 = vor.u32 %v3752_v21, %v3749_v54  ;;  %v3761_v48 = vor.u32 %v3760_v56, %v3757_v25  ;;  %v3808_v11 = vrot.slane %v3806_v60, 3  ;;  %v13785_v60 = vld [vmem:[#allocation2 + $0x50] sm:$0xf0] }
 0x1bc   : > { %11716 = vmatprep.subr.bf16.mxu0 %v12816_v53  ;;  %v3811_v1 = vrot.slane %v3809_v41, 4  ;;  %v3787_v14 = vor.u32 %v3786_v42, %v3783_v46  ;;  %v3823_v13 = vshrl.u32 %v13761_v2, 16  ;;  %v4154_v37 = vrot.slane %v13655_v45, 4  ;;  %v12821_v41 = vld [vmem:[%s15398_s1 + $0x208] sm:$0xff]   ;;  %v13790_v46 = vld [vmem:[#allocation2 + $0x60] sm:$0xf0] }
 0x1bd   : > { %v3762_v24 = vsel %vm514_vm4, %v3753_v20, %v3761_v48  ;;  %v13777_v20 = vld [vmem:[#allocation2 + $0x40] sm:$0xf0]  ;;  %v4156_v48 = vrot.slane %v13775_v23, 4  ;;  %v4165_v42 = vrot.slane %v13790_v46, 4 }
 0x1be   : > { %11685 = vmatmul.mubr.bf16.gmra.mrb[8].mxu0 %v3660_v18  ;;  %v3744_v18 = vor.u32 %v3743_v61, %v3740_v22  ;;  %v458_v61 = vld [vmem:[#allocation2 + $0x118] sm:$0x8]  ;;  %v3825_v7 = vrot.slane %v3823_v13, 3  ;;  %v4178_v13 = vrot.slane %v13705_v63, 4 }
 0x1bf   : > { %11688 = vmatprep.mubr.bf16.mxu0 %v3677_v27  ;;  %11717 = vmatpush3.bf16.msra.mxu0 %v12816_v53  ;;  %v3775_v53 = vshll.u32 %v13734_v6, 16  ;;  %v3766_v27 = vrot.slane %v3764_v3, 3  ;;  %v494_v35 = vrot.slane %v458_v61, 7  ;;  %v4169_v61 = vrot.slane %v13685_v34, 4  ;;  %v12825_v34 = vld [vmem:[%s15398_s1 + $0x228] sm:$0xff]  }
 0x1c0   : > { %11718 = vmatprep.subr.bf16.mxu0 %v12817_v5  ;;  %v3745_v43 = vsel %vm514_vm4, %v3736_v16, %v3744_v18  ;;  %v567_v16 = vld [vmem:[#allocation2 + $0x118] sm:$0x10] }
 0x1c1   : > { %v3770_v62 = vor.u32 %v3769_v55, %v3766_v27  ;;  %v568_v21 = vsel %vm13177_vm6, %v494_v35, %v567_v16  ;;  %v13823_v35 = vld [vmem:[#allocation2 + $0xa0] sm:$0xf0] }
 0x1c2   : > { %569 = vst [vmem:[#allocation2 + $0x118] sm:$0x10] %v568_v21  ;;  %v4181_v21 = vrot.slane %v13715_v19, 4  ;;  %v4187_v19 = vrot.slane %v13731_v9, 4 }
 0x1c3   : > { %11719 = vmatpush3.bf16.msra.mxu0 %v12817_v5  ;;  %v3777_v5 = vrot.slane %v3775_v53, 4  ;;  %v3826_v53 = vshll.u32 %v13761_v2, 16 }
 0x1c4   : > { %11720 = vmatprep.subr.bf16.mxu0 %v12818_v51 }
 0x1c5   : > { %v3778_v49 = vor.u32 %v3777_v5, %v3774_v28  ;;  %v3828_v27 = vrot.slane %v3826_v53, 4  ;;  %v13769_v28 = vld [vmem:[#allocation2 + $0x20] sm:$0xf0]  ;;  %v12826_v53 = vld [vmem:[%s15398_s1 + $0x230] sm:$0xff]  }
 0x1c6   : > { %11689 = vmatmul.mubr.bf16.gmra.mrb[12].mxu0 %v3694_v59  ;;  %v3791_v59 = vrot.slane %v3789_v12, 3  ;;  %v4492_v9 = vshrl.u32 %v13769_v28, 16 }
 0x1c7   : > { %11692 = vmatprep.mubr.bf16.mxu0 %v3711_v47  ;;  %11721 = vmatpush3.bf16.msra.mxu0 %v12818_v51  ;;  %v3798_v51 = vshrl.u32 %v3555_v40, 16  ;;  %v3779_v22 = vsel %vm514_vm4, %v3770_v62, %v3778_v49  ;;  %v3557_v47 = vld [vmem:[#allocation2 + $0x110] sm:$0xf8]  ;;  %v4153_v40 = vrot.slane %v13769_v28, 4  ;;  %v4157_v62 = vrot.slane %v13663_v44, 4 }
 0x1c8   : > { %11722 = vmatprep.subr.bf16.mxu0 %v12819_v15  ;;  %v3795_v10 = vor.u32 %v3794_v39, %v3791_v59  ;;  %v3815_v3 = vshrl.u32 %v3557_v47, 16  ;;  %v3818_v36 = vshll.u32 %v3557_v47, 16  ;;  %v4159_v49 = vrot.slane %v13777_v20, 4  ;;  %v12822_v39 = vld [vmem:[%s15398_s1 + $0x210] sm:$0xff]   ;;  %v13807_v47 = vld [vmem:[#allocation2 + $0x80] sm:$0xf0] }
 0x1c9   : > { %v3800_v30 = vrot.slane %v3798_v51, 3  ;;  %v4155_v12 = vsel %vm954_vm0, %v4153_v40, %v4154_v37  ;;  %v4160_v51 = vrot.slane %v13665_v4, 4  ;;  %v4158_v45 = vsel %vm954_vm0, %v4156_v48, %v4157_v62  ;;  %v4475_v48 = vld [vmem:[#allocation2 + $0x28] sm:$0x1f]  ;;  %v13859_v62 = vld [vmem:[#allocation2 + $0x100] sm:$0xf0] }
 0x1ca   : > { %v3796_v54 = vsel %vm514_vm4, %v3787_v14, %v3795_v10  ;;  %v3817_v25 = vrot.slane %v3815_v3, 3  ;;  %v3820_v56 = vrot.slane %v3818_v36, 4  ;;  %v4162_v44 = vrot.slane %v13785_v60, 4  ;;  %v13818_v10 = vld [vmem:[#allocation2 + $0x90] sm:$0xf0] }
 0x1cb   : > { %11723 = vmatpush3.bf16.msra.mxu0 %v12819_v15  ;;  %v3803_v15 = vrot.slane %v3801_v8, 4  ;;  %v4161_v8 = vsel %vm954_vm0, %v4159_v49, %v4160_v51  ;;  %v4163_v4 = vrot.slane %v13673_v50, 4  ;;  %v4166_v59 = vrot.slane %v13675_v0, 4  ;;  %v12823_v50 = vld [vmem:[%s15398_s1 + $0x218] sm:$0xff]  }
 0x1cc   : > { %11756 = vmatprep.subr.bf16.mxu0 %v13746_v17  ;;  %v3821_v5 = vor.u32 %v3820_v56, %v3817_v25  ;;  %v4175_v3 = vrot.slane %v13699_v52, 4  ;;  %v4177_v36 = vrot.slane %v13823_v35, 4  ;;  %v12827_v52 = vld [vmem:[%s15398_s1 + $0x238] sm:$0xff]   ;;  %v4184_v56 = vrot.slane %v13718_v31, 4 }
 0x1cd   : > { %v3804_v18 = vor.u32 %v3803_v15, %v3800_v30  ;;  %v4171_v30 = vrot.slane %v13807_v47, 4  ;;  %v4172_v15 = vrot.slane %v13688_v32, 4  ;;  %v4174_v32 = vrot.slane %v13818_v10, 4 }
 0x1ce   : > { %11693 = vmatmul.mubr.bf16.gmra.mrb[16].mxu0 %v3728_v58  ;;  %v3812_v58 = vor.u32 %v3811_v1, %v3808_v11  ;;  %v12824_v11 = vld [vmem:[%s15398_s1 + $0x220] sm:$0xff]   ;;  %v4190_v31 = vrot.slane %v13734_v6, 4  ;;  %v4193_v51 = vrot.slane %v13749_v33, 4  ;;  %v4500_v6 = vshrl.u32 %v4475_v48, 16 }
 0x1cf   : > { %11696 = vmatprep.mubr.bf16.mxu0 %v3745_v43  ;;  %v3829_v43 = vor.u32 %v3828_v27, %v3825_v7  ;;  %v4173_v14 = vsel %vm954_vm0, %v4171_v30, %v4172_v15  ;;  %v4176_v16 = vsel %vm954_vm0, %v4174_v32, %v4175_v3  ;;  %v4477_v15 = vld [vmem:[#allocation2 + $0x48] sm:$0x1f]  ;;  %v4529_v32 = vshll.u32 %v13777_v20, 16 }
 0x1d0   : > { %v3813_v55 = vsel %vm514_vm4, %v3804_v18, %v3812_v58  ;;  %v4179_v18 = vsel %vm954_vm0, %v4177_v36, %v4178_v13  ;;  %v13834_v58 = vld [vmem:[#allocation2 + $0xb0] sm:$0xf0]  ;;  %v4534_v3 = vshrl.u32 %v4477_v15, 16  ;;  %v4537_v36 = vshll.u32 %v4477_v15, 16 }
 0x1d1   : > { %v3830_v57 = vsel %vm514_vm4, %v3821_v5, %v3829_v43  ;;  %v4180_v63 = vrot.slane %v13834_v58, 4  ;;  %v13849_v5 = vld [vmem:[#allocation2 + $0xe0] sm:$0xf0] }
 0x1d2   : > { %v4189_v40 = vrot.slane %v13849_v5, 4 }
 0x1d3   : > { %v4182_v7 = vsel %vm954_vm0, %v4180_v63, %v4181_v21  ;;  %v4478_v63 = vld [vmem:[#allocation2 + $0x58] sm:$0x1f] }
 0x1d6   : > { %11697 = vmatmul.mubr.bf16.gmra.mrb[20].mxu0 %v3762_v24  ;;  %v4164_v24 = vsel %vm954_vm0, %v4162_v44, %v4163_v4  ;;  %v4196_v44 = vrot.slane %v13753_v26, 4 }
 0x1d7   : > { %11700 = vmatprep.mubr.bf16.mxu0 %v3779_v22  ;;  %v4167_v22 = vsel %vm954_vm0, %v4165_v42, %v4166_v59  ;;  %v4476_v42 = vld [vmem:[#allocation2 + $0x38] sm:$0x1f]  ;;  %v4494_v59 = vrot.slane %v4492_v9, 4 }
 0x1d8   : > { %v4520_v30 = vshll.u32 %v4476_v42, 16 }
 0x1de   : > { %11701 = vmatmul.mubr.bf16.gmra.mrb[24].mxu0 %v3796_v54  ;;  %v13839_v54 = vld [vmem:[#allocation2 + $0xc0] sm:$0xf0] }
 0x1df   : > { %11704 = vmatprep.mubr.bf16.mxu0 %v3813_v55  ;;  %v4183_v25 = vrot.slane %v13839_v54, 4  ;;  %v13847_v55 = vld [vmem:[#allocation2 + $0xd0] sm:$0xf0] }
 0x1e0   : > { %v4186_v43 = vrot.slane %v13847_v55, 4 }
 0x1e1   : > { %v4185_v27 = vsel %vm954_vm0, %v4183_v25, %v4184_v56  ;;  %v4531_v25 = vrot.slane %v4529_v32, 5  ;;  %v4539_v56 = vrot.slane %v4537_v36, 5 }
 0x1e2   : > { %v4188_v37 = vsel %vm954_vm0, %v4186_v43, %v4187_v19  ;;  %v4546_v19 = vshll.u32 %v13785_v60, 16 }
 0x1e6   : > { %11705 = vmatmul.mubr.bf16.gmra.mrb[28].mxu0 %v3830_v57  ;;  %v13856_v57 = vld [vmem:[#allocation2 + $0xf0] sm:$0xf0] }
 0x1e7   : > { %11724 = vmatprep.mubr.bf16.mxu0 %v4155_v12  ;;  %v4191_v12 = vsel %vm954_vm0, %v4189_v40, %v4190_v31  ;;  %v4192_v49 = vrot.slane %v13856_v57, 4  ;;  %v4551_v40 = vshrl.u32 %v4478_v63, 16  ;;  %v4554_v31 = vshll.u32 %v4478_v63, 16 }
 0x1e9   : > { %v4194_v4 = vsel %vm954_vm0, %v4192_v49, %v4193_v51 }
 0x1ee   : > { %11725 = vmatmul.mubr.bf16.vlgmr.msra.gmra.mrb[0].mxu0 %v4158_v45  ;;  %v4495_v45 = vshll.u32 %v13769_v28, 16  ;;  %v4512_v28 = vshll.u32 %v13775_v23, 16 }
 0x1ef   : > { %11757 = vmatpush3.bf16.msra.mxu0 %v13746_v17  ;;  %11728 = vmatprep.mubr.bf16.mxu0 %v4161_v8  ;;  %v13802_v17 = vld [vmem:[#allocation2 + $0x70] sm:$0xf0]  ;;  %v4503_v8 = vshll.u32 %v4475_v48, 16 }
 0x1f0   : > { %11758 = vmatprep.subr.bf16.mxu0 %v12821_v41  ;;  %v4168_v0 = vrot.slane %v13802_v17, 4 }
 0x1f2   : > { %v4170_v1 = vsel %vm954_vm0, %v4168_v0, %v4169_v61  ;;  %v4509_v0 = vshrl.u32 %v13775_v23, 16  ;;  %v4517_v61 = vshrl.u32 %v4476_v42, 16 }
 0x1f3   : > { %11759 = vmatpush3.bf16.msra.mxu0 %v12821_v41  ;;  %v4195_v41 = vrot.slane %v13859_v62, 4 }
 0x1f4   : > { %11760 = vmatprep.subr.bf16.mxu0 %v12822_v39  ;;  %v4511_v13 = vrot.slane %v4509_v0, 4  ;;  %v4519_v23 = vrot.slane %v4517_v61, 4 }
 0x1f5   : > { %v4197_v33 = vsel %vm954_vm0, %v4195_v41, %v4196_v44  ;;  %v4553_v41 = vrot.slane %v4551_v40, 4  ;;  %v4556_v44 = vrot.slane %v4554_v31, 5 }
 0x1f6   : > { %11729 = vmatmul.mubr.bf16.gmra.mrb[4].mxu0 %v4164_v24  ;;  %v4502_v24 = vrot.slane %v4500_v6, 4 }
 0x1f7   : > { %11732 = vmatprep.mubr.bf16.mxu0 %v4167_v22  ;;  %11761 = vmatpush3.bf16.msra.mxu0 %v12822_v39  ;;  %v4497_v39 = vrot.slane %v4495_v45, 5  ;;  %v4505_v22 = vrot.slane %v4503_v8, 5  ;;  %v4548_v8 = vrot.slane %v4546_v19, 5 }
 0x1f8   : > { %11762 = vmatprep.subr.bf16.mxu0 %v12823_v50 }
 0x1fb   : > { %11763 = vmatpush3.bf16.msra.mxu0 %v12823_v50  ;;  %v13869_v50 = vld [vmem:[#allocation2 + $0x110] sm:$0xf0] }
 0x1fc   : > { %11764 = vmatprep.subr.bf16.mxu0 %v12824_v11  ;;  %v4198_v26 = vrot.slane %v13869_v50, 4 }
 0x1fe   : > { %11733 = vmatmul.mubr.bf16.gmra.mrb[8].mxu0 %v4170_v1  ;;  %v4498_v1 = vor.u32 %v4497_v39, %v4494_v59 }
 0x1ff   : > { %11736 = vmatprep.mubr.bf16.mxu0 %v4173_v14  ;;  %11765 = vmatpush3.bf16.msra.mxu0 %v12824_v11  ;;  %v4199_v11 = vrot.slane %v13761_v2, 4  ;;  %v4506_v14 = vor.u32 %v4505_v22, %v4502_v24  ;;  %v4536_v2 = vrot.slane %v4534_v3, 4  ;;  %v4577_v22 = vshrl.u32 %v13802_v17, 16 }
 0x200   : > { %11766 = vmatprep.subr.bf16.mxu0 %v12825_v34 }
 0x201   : > { %v4540_v9 = vor.u32 %v4539_v56, %v4536_v2  ;;  %v4579_v32 = vrot.slane %v4577_v22, 4  ;;  %v4614_v56 = vshll.u32 %v13818_v10, 16 }
 0x203   : > { %11767 = vmatpush3.bf16.msra.mxu0 %v12825_v34  ;;  %v4526_v34 = vshrl.u32 %v13777_v20, 16  ;;  %v4543_v20 = vshrl.u32 %v13785_v60, 16 }
 0x204   : > { %11768 = vmatprep.subr.bf16.mxu0 %v12826_v53 }
 0x205   : > { %v4528_v21 = vrot.slane %v4526_v34, 4  ;;  %v4545_v6 = vrot.slane %v4543_v20, 4  ;;  %v4631_v20 = vshll.u32 %v13823_v35, 16 }
 0x206   : > { %11737 = vmatmul.mubr.bf16.gmra.mrb[12].mxu0 %v4176_v16  ;;  %v4522_v16 = vrot.slane %v4520_v30, 5  ;;  %v4557_v30 = vor.u32 %v4556_v44, %v4553_v41 }
 0x207   : > { %11740 = vmatprep.mubr.bf16.mxu0 %v4179_v18  ;;  %11769 = vmatpush3.bf16.msra.mxu0 %v12826_v53  ;;  %v4514_v53 = vrot.slane %v4512_v28, 5  ;;  %v4200_v18 = vsel %vm954_vm0, %v4198_v26, %v4199_v11  ;;  %v4532_v51 = vor.u32 %v4531_v25, %v4528_v21  ;;  %v4481_v28 = vld [vmem:[#allocation2 + $0x88] sm:$0x1f]  ;;  %v4549_v61 = vor.u32 %v4548_v8, %v4545_v6 }
 0x208   : > { %11770 = vmatprep.subr.bf16.mxu0 %v12827_v52  ;;  %v4523_v43 = vor.u32 %v4522_v16, %v4519_v23  ;;  %v4594_v11 = vshrl.u32 %v13807_v47, 16  ;;  %v4605_v34 = vshll.u32 %v4481_v28, 16  ;;  %v4482_v23 = vld [vmem:[#allocation2 + $0x98] sm:$0x1f]  ;;  %v4483_v21 = vld [vmem:[#allocation2 + $0xa8] sm:$0x1f] }
 0x209   : > { %v4541_v24 = vsel %vm1470_vm7, %v4532_v51, %v4540_v9  ;;  %v4636_v19 = vshrl.u32 %v4483_v21, 16  ;;  %v4639_v40 = vshll.u32 %v4483_v21, 16 }
 0x20a   : > { %v4596_v16 = vrot.slane %v4594_v11, 4  ;;  %v4607_v63 = vrot.slane %v4605_v34, 5 }
 0x20b   : > { %11771 = vmatpush3.bf16.msra.mxu0 %v12827_v52  ;;  %v4507_v52 = vsel %vm1470_vm7, %v4498_v1, %v4506_v14  ;;  %v4597_v1 = vshll.u32 %v13807_v47, 16  ;;  %v4602_v14 = vshrl.u32 %v4481_v28, 16  ;;  %v4611_v47 = vshrl.u32 %v13818_v10, 16 }
 0x20c   : > { %v4633_v10 = vrot.slane %v4631_v20, 5  ;;  %v4638_v8 = vrot.slane %v4636_v19, 4  ;;  %v4641_v41 = vrot.slane %v4639_v40, 5 }
 0x20e   : > { %11741 = vmatmul.mubr.bf16.gmra.mrb[16].mxu0 %v4182_v7  ;;  %v4479_v7 = vld [vmem:[#allocation2 + $0x68] sm:$0x1f] }
 0x20f   : > { %11744 = vmatprep.mubr.bf16.mxu0 %v4185_v27  ;;  %v4515_v27 = vor.u32 %v4514_v53, %v4511_v13  ;;  %v4568_v48 = vshrl.u32 %v4479_v7, 16  ;;  %v4571_v49 = vshll.u32 %v4479_v7, 16  ;;  %v4619_v7 = vshrl.u32 %v4482_v23, 16 }
 0x211   : > { %v4524_v45 = vsel %vm1470_vm7, %v4515_v27, %v4523_v43  ;;  %v4570_v59 = vrot.slane %v4568_v48, 4  ;;  %v4573_v39 = vrot.slane %v4571_v49, 5  ;;  %v4622_v27 = vshll.u32 %v4482_v23, 16 }
 0x212   : > { %v4628_v43 = vshrl.u32 %v13823_v35, 16  ;;  %v4613_v48 = vrot.slane %v4611_v47, 4  ;;  %v4616_v49 = vrot.slane %v4614_v56, 5  ;;  %v4621_v51 = vrot.slane %v4619_v7, 4 }
 0x213   : > { %v4574_v26 = vor.u32 %v4573_v39, %v4570_v59  ;;  %v4624_v9 = vrot.slane %v4622_v27, 5  ;;  %v4648_v35 = vshll.u32 %v13834_v58, 16  ;;  %v4485_v59 = vld [vmem:[#allocation2 + $0xc8] sm:$0x1f]  ;;  %v4682_v23 = vshll.u32 %v13847_v55, 16 }
 0x214   : > { %v4630_v6 = vrot.slane %v4628_v43, 4  ;;  %v4617_v39 = vor.u32 %v4616_v49, %v4613_v48  ;;  %v4670_v28 = vshrl.u32 %v4485_v59, 16  ;;  %v4489_v48 = vld [vmem:[#allocation2 + $0x108] sm:$0x1f]  ;;  %v4716_v49 = vshll.u32 %v13856_v57, 16 }
 0x215   : > { %v4684_v27 = vrot.slane %v4682_v23, 5  ;;  %v12829_v23 = vld [vmem:[%s15399_s2 + $0x48] sm:$0xff]  }
 0x216   : > { %11745 = vmatmul.mubr.bf16.gmra.mrb[20].mxu0 %v4188_v37  ;;  %v4560_v37 = vshrl.u32 %v13790_v46, 16  ;;  %v4634_v22 = vor.u32 %v4633_v10, %v4630_v6 }
 0x217   : > { %11748 = vmatprep.mubr.bf16.mxu0 %v4191_v12  ;;  %v4563_v12 = vshll.u32 %v13790_v46, 16  ;;  %v4580_v46 = vshll.u32 %v13802_v17, 16  ;;  %v4558_v17 = vsel %vm1470_vm7, %v4549_v61, %v4557_v30  ;;  %v4673_v61 = vshll.u32 %v4485_v59, 16 }
 0x218   : > { %v4562_v42 = vrot.slane %v4560_v37, 4 }
 0x219   : > { %v4565_v60 = vrot.slane %v4563_v12, 5  ;;  %v4582_v3 = vrot.slane %v4580_v46, 5  ;;  %v4642_v46 = vor.u32 %v4641_v41, %v4638_v8  ;;  %v4730_v41 = vshrl.u32 %v13859_v62, 16 }
 0x21b   : > { %v4566_v15 = vor.u32 %v4565_v60, %v4562_v42  ;;  %v4583_v25 = vor.u32 %v4582_v3, %v4579_v32  ;;  %v4672_v3 = vrot.slane %v4670_v28, 4  ;;  %v4490_v28 = vld [vmem:[#allocation2 + $0x118] sm:$0x1f] }
 0x21d   : > { %v4575_v53 = vsel %vm1470_vm7, %v4566_v15, %v4574_v26  ;;  %v4650_v15 = vrot.slane %v4648_v35, 5  ;;  %v4741_v35 = vshll.u32 %v4489_v48, 16 }
 0x21e   : > { %11749 = vmatmul.mubr.bf16.gmra.mrb[24].mxu0 %v4194_v4  ;;  %v4480_v4 = vld [vmem:[#allocation2 + $0x78] sm:$0x1f] }
 0x21f   : > { %11752 = vmatprep.mubr.bf16.mxu0 %v4197_v33  ;;  %v4585_v33 = vshrl.u32 %v4480_v4, 16  ;;  %v4588_v0 = vshll.u32 %v4480_v4, 16  ;;  %v4645_v4 = vshrl.u32 %v13834_v58, 16 }
 0x221   : > { %v4587_v36 = vrot.slane %v4585_v33, 4  ;;  %v4590_v13 = vrot.slane %v4588_v0, 5  ;;  %v4662_v33 = vshrl.u32 %v13839_v54, 16  ;;  %v4665_v0 = vshll.u32 %v13839_v54, 16 }
 0x222   : > { %v4647_v30 = vrot.slane %v4645_v4, 4  ;;  %v4679_v54 = vshrl.u32 %v13847_v55, 16  ;;  %v4738_v4 = vshrl.u32 %v4489_v48, 16 }
 0x223   : > { %v4591_v2 = vor.u32 %v4590_v13, %v4587_v36  ;;  %v4664_v34 = vrot.slane %v4662_v33, 4  ;;  %v4667_v32 = vrot.slane %v4665_v0, 5  ;;  %v4675_v36 = vrot.slane %v4673_v61, 5  ;;  %v4487_v13 = vld [vmem:[#allocation2 + $0xe8] sm:$0x1f] }
 0x224   : > { %v4704_v21 = vshrl.u32 %v4487_v13, 16  ;;  %v4681_v7 = vrot.slane %v4679_v54, 4  ;;  %v4740_v33 = vrot.slane %v4738_v4, 4  ;;  %v4743_v0 = vrot.slane %v4741_v35, 5 }
 0x225   : > { %v4592_v12 = vsel %vm1470_vm7, %v4583_v25, %v4591_v2  ;;  %v4707_v25 = vshll.u32 %v4487_v13, 16  ;;  %v4668_v2 = vor.u32 %v4667_v32, %v4664_v34  ;;  %v4676_v47 = vor.u32 %v4675_v36, %v4672_v3 }
 0x226   : > { %11753 = vmatmul.mubr.bf16.gmra.mrb[28].mxu0 %v4200_v18  ;;  %v4599_v18 = vrot.slane %v4597_v1, 5  ;;  %v4643_v1 = vsel %vm1470_vm7, %v4634_v22, %v4642_v46  ;;  %v4706_v55 = vrot.slane %v4704_v21, 4  ;;  %v4732_v22 = vrot.slane %v4730_v41, 4 }
 0x227   : > { %11772 = vmatprep.mubr.bf16.mxu0 %v4507_v52  ;;  %v4604_v52 = vrot.slane %v4602_v14, 4  ;;  %v4486_v14 = vld [vmem:[#allocation2 + $0xd8] sm:$0x1f] }
 0x228   : > { %v4600_v31 = vor.u32 %v4599_v18, %v4596_v16  ;;  %v4687_v16 = vshrl.u32 %v4486_v14, 16  ;;  %v4690_v18 = vshll.u32 %v4486_v14, 16 }
 0x229   : > { %v4608_v37 = vor.u32 %v4607_v63, %v4604_v52  ;;  %v4696_v52 = vshrl.u32 %v13849_v5, 16  ;;  %v4699_v63 = vshll.u32 %v13849_v5, 16  ;;  %v4713_v5 = vshrl.u32 %v13856_v57, 16 }
 0x22a   : > { %v4689_v43 = vrot.slane %v4687_v16, 4  ;;  %v4692_v20 = vrot.slane %v4690_v18, 5  ;;  %v12830_v16 = vld [vmem:[%s15399_s2 + $0x50] sm:$0xff]   ;;  %v12831_v18 = vld [vmem:[%s15399_s2 + $0x58] sm:$0xff]  }
 0x22b   : > { %v4609_v44 = vsel %vm1470_vm7, %v4600_v31, %v4608_v37  ;;  %v4698_v19 = vrot.slane %v4696_v52, 4  ;;  %v4701_v40 = vrot.slane %v4699_v63, 5  ;;  %v4709_v31 = vrot.slane %v4707_v25, 5  ;;  %v4488_v37 = vld [vmem:[#allocation2 + $0xf8] sm:$0x1f]  ;;  %v12832_v52 = vld [vmem:[%s15399_s2 + $0x60] sm:$0xff]  }
 0x22c   : > { %v4693_v6 = vor.u32 %v4692_v20, %v4689_v43  ;;  %v12833_v63 = vld [vmem:[%s15399_s2 + $0x68] sm:$0xff]  }
 0x22d   : > { %v4702_v10 = vor.u32 %v4701_v40, %v4698_v19  ;;  %v4710_v8 = vor.u32 %v4709_v31, %v4706_v55  ;;  %v12835_v55 = vld [vmem:[%s15399_s2 + $0x78] sm:$0xff]  }
 0x22e   : > { %11773 = vmatmul.mubr.bf16.vlgmr.msra.gmra.mrb[0].mxu0 %v4524_v45  ;;  %v4484_v45 = vld [vmem:[#allocation2 + $0xb8] sm:$0x1f] }
 0x22f   : > { %11776 = vmatprep.mubr.bf16.mxu0 %v4541_v24  ;;  %v4653_v42 = vshrl.u32 %v4484_v45, 16  ;;  %v4656_v60 = vshll.u32 %v4484_v45, 16  ;;  %v4625_v24 = vor.u32 %v4624_v9, %v4621_v51  ;;  %v4721_v51 = vshrl.u32 %v4488_v37, 16 }
 0x230   : > { %v4724_v9 = vshll.u32 %v4488_v37, 16  ;;  %v4685_v45 = vor.u32 %v4684_v27, %v4681_v7  ;;  %v4711_v57 = vsel %vm1470_vm7, %v4702_v10, %v4710_v8 }
 0x231   : > { %v4655_v26 = vrot.slane %v4653_v42, 4  ;;  %v4658_v11 = vrot.slane %v4656_v60, 5  ;;  %v4626_v58 = vsel %vm1470_vm7, %v4617_v39, %v4625_v24  ;;  %v4715_v42 = vrot.slane %v4713_v5, 4 }
 0x232   : > { %v4718_v60 = vrot.slane %v4716_v49, 5  ;;  %v4723_v59 = vrot.slane %v4721_v51, 4  ;;  %v4726_v39 = vrot.slane %v4724_v9, 5  ;;  %v4694_v24 = vsel %vm1470_vm7, %v4685_v45, %v4693_v6 }
 0x234   : > { %v4719_v61 = vor.u32 %v4718_v60, %v4715_v42 }
 0x236   : > { %11777 = vmatmul.mubr.bf16.gmra.mrb[4].mxu0 %v4558_v17  ;;  %v4651_v17 = vor.u32 %v4650_v15, %v4647_v30  ;;  %v4727_v30 = vor.u32 %v4726_v39, %v4723_v59  ;;  %v4750_v15 = vshll.u32 %v13869_v50, 16 }
 0x237   : > { %11780 = vmatprep.mubr.bf16.mxu0 %v4575_v53  ;;  %v4659_v53 = vor.u32 %v4658_v11, %v4655_v26  ;;  %v4755_v26 = vshrl.u32 %v4490_v28, 16  ;;  %v4758_v11 = vshll.u32 %v4490_v28, 16 }
 0x238   : > { %v4728_v14 = vsel %vm1470_vm7, %v4719_v61, %v4727_v30  ;;  %v4752_v32 = vrot.slane %v4750_v15, 5 }
 0x239   : > { %v4660_v56 = vsel %vm1470_vm7, %v4651_v17, %v4659_v53  ;;  %v4757_v3 = vrot.slane %v4755_v26, 4  ;;  %v4760_v36 = vrot.slane %v4758_v11, 5 }
 0x23b   : > { %v4761_v53 = vor.u32 %v4760_v36, %v4757_v3 }
 0x23e   : > { %11781 = vmatmul.mubr.bf16.gmra.mrb[8].mxu0 %v4592_v12  ;;  %v4677_v12 = vsel %vm1470_vm7, %v4668_v2, %v4676_v47  ;;  %v12834_v47 = vld [vmem:[%s15399_s2 + $0x70] sm:$0xff]  }
 0x23f   : > { %11784 = vmatprep.mubr.bf16.mxu0 %v4609_v44  ;;  %v4733_v44 = vshll.u32 %v13859_v62, 16  ;;  %v4747_v62 = vshrl.u32 %v13869_v50, 16  ;;  %v12828_v50 = vld [vmem:[%s15399_s2 + $0x40] sm:$0xff]  }
 0x240   : > { %11804 = vmatprep.subr.bf16.mxu1 %v12828_v50 }
 0x241   : > { %v4735_v46 = vrot.slane %v4733_v44, 5  ;;  %v4749_v34 = vrot.slane %v4747_v62, 4  ;;  %11805 = vmatpush3.bf16.msra.mxu1 %v12828_v50  ;;  %v13981_v44 = vld [vmem:[%s15399_s2] sm:$0xff]  }
 0x242   : > { %11806 = vmatprep.subr.bf16.mxu1 %v12829_v23 }
 0x243   : > { %v4753_v17 = vor.u32 %v4752_v32, %v4749_v34 }
 0x245   : > { %v4762_v54 = vsel %vm1470_vm7, %v4753_v17, %v4761_v53  ;;  %11807 = vmatpush3.bf16.msra.mxu1 %v12829_v23 }
 0x246   : > { %11785 = vmatmul.mubr.bf16.gmra.mrb[12].mxu0 %v4626_v58  ;;  %v4736_v58 = vor.u32 %v4735_v46, %v4732_v22  ;;  %11808 = vmatprep.subr.bf16.mxu1 %v12830_v16 }
 0x247   : > { %11788 = vmatprep.mubr.bf16.mxu0 %v4643_v1  ;;  %v4744_v1 = vor.u32 %v4743_v0, %v4740_v33 }
 0x249   : > { %v4745_v13 = vsel %vm1470_vm7, %v4736_v58, %v4744_v1  ;;  %11809 = vmatpush3.bf16.msra.mxu1 %v12830_v16 }
 0x24a   : > { %11810 = vmatprep.subr.bf16.mxu1 %v12831_v18 }
 0x24d   : > { %11811 = vmatpush3.bf16.msra.mxu1 %v12831_v18 }
 0x24e   : > { %11789 = vmatmul.mubr.bf16.gmra.mrb[16].mxu0 %v4660_v56  ;;  %11812 = vmatprep.subr.bf16.mxu1 %v12832_v52 }
 0x24f   : > { %11792 = vmatprep.mubr.bf16.mxu0 %v4677_v12 }
 0x251   : > { %11813 = vmatpush3.bf16.msra.mxu1 %v12832_v52 }
 0x252   : > { %11814 = vmatprep.subr.bf16.mxu1 %v12833_v63 }
 0x255   : > { %11815 = vmatpush3.bf16.msra.mxu1 %v12833_v63 }
 0x256   : > { %11793 = vmatmul.mubr.bf16.gmra.mrb[20].mxu0 %v4694_v24  ;;  %11816 = vmatprep.subr.bf16.mxu1 %v12834_v47 }
 0x257   : > { %11796 = vmatprep.mubr.bf16.mxu0 %v4711_v57 }
 0x259   : > { %11817 = vmatpush3.bf16.msra.mxu1 %v12834_v47 }
 0x25a   : > { %11818 = vmatprep.subr.bf16.mxu1 %v12835_v55 }
 0x25d   : > { %11819 = vmatpush3.bf16.msra.mxu1 %v12835_v55 }
 0x25e   : > { %11797 = vmatmul.mubr.bf16.gmra.mrb[24].mxu0 %v4728_v14  ;;  %11852 = vmatprep.subr.bf16.mxu1 %v13981_v44 }
 0x25f   : > { %11800 = vmatprep.mubr.bf16.mxu0 %v4745_v13 }
 0x266   : > { %11801 = vmatmul.mubr.bf16.gmra.mrb[28].mxu0 %v4762_v54 }
 0x301   : > { %v13938_v21 = vpop.f32.mrb[0].mxu0 }
 0x302   : > { %v13940_v25 = vpop.f32.mrb[1].mxu0  ;;  %v5109_v20 = vmul.f32 %v13938_v21, %v13938_v21 }
 0x303   : > { %v13942_v2 = vpop.f32.mrb[2].mxu0  ;;  %v5107_v7 = vmul.f32 %v13940_v25, %v13940_v25 }
 0x304   : > { %v13947_v56 = vpop.f32.mrb[3].mxu0  ;;  %v5110_v31 = vmul.f32 %v13942_v2, %v13942_v2 }
 0x305   : > { %v5069_v27 = vadd.f32 %v13947_v56, %v13940_v25  ;;  %v5108_v43 = vmul.f32 %v13947_v56, %v13947_v56 }
 0x307   : > { %v5070_v19 = vadd.f32 %v13938_v21, %v5069_v27  ;;  %v5139_v40 = vadd.f32 %v5108_v43, %v5107_v7 }
 0x309   : > { %v5140_v37 = vadd.f32 %v5139_v40, %v5109_v20  ;;  %v13963_v12 = vpop.f32.mrb[4].mxu0  ;;  %v5071_v48 = vadd.f32 %v13942_v2, %v5070_v19 }
 0x30a   : > { %v13966_v5 = vpop.f32.mrb[5].mxu0  ;;  %v5113_v4 = vmul.f32 %v13963_v12, %v13963_v12 }
 0x30b   : > { %v5072_v49 = vadd.f32 %v5071_v48, %v13966_v5  ;;  %v5111_v51 = vmul.f32 %v13966_v5, %v13966_v5  ;;  %v5141_v9 = vadd.f32 %v5140_v37, %v5110_v31  ;;  %v13971_v45 = vpop.f32.mrb[6].mxu0 }
 0x30c   : > { %v13973_v6 = vpop.f32.mrb[7].mxu0  ;;  %v5114_v60 = vmul.f32 %v13971_v45, %v13971_v45 }
 0x30d   : > { %v5142_v10 = vadd.f32 %v5141_v9, %v5111_v51  ;;  %v5073_v8 = vadd.f32 %v5072_v49, %v13973_v6  ;;  %v5112_v41 = vmul.f32 %v13973_v6, %v13973_v6 }
 0x30f   : > { %v5074_v35 = vadd.f32 %v13963_v12, %v5073_v8  ;;  %v5143_v42 = vadd.f32 %v5142_v10, %v5112_v41 }
 0x311   : > { %v5144_v59 = vadd.f32 %v5143_v42, %v5113_v4  ;;  %v13989_v39 = vpop.f32.mrb[8].mxu0  ;;  %v5075_v24 = vadd.f32 %v13971_v45, %v5074_v35 }
 0x312   : > { %v13992_v57 = vpop.f32.mrb[9].mxu0  ;;  %v5117_v15 = vmul.f32 %v13989_v39, %v13989_v39 }
 0x313   : > { %v5076_v22 = vadd.f32 %v5075_v24, %v13992_v57  ;;  %v5115_v46 = vmul.f32 %v13992_v57, %v13992_v57  ;;  %v5145_v33 = vadd.f32 %v5144_v59, %v5114_v60  ;;  %v13997_v0 = vpop.f32.mrb[10].mxu0 }
 0x314   : > { %v13999_v28 = vpop.f32.mrb[11].mxu0  ;;  %v5118_v58 = vmul.f32 %v13997_v0, %v13997_v0 }
 0x315   : > { %v5146_v61 = vadd.f32 %v5145_v33, %v5115_v46  ;;  %v5077_v30 = vadd.f32 %v5076_v22, %v13999_v28  ;;  %v5116_v62 = vmul.f32 %v13999_v28, %v13999_v28 }
 0x317   : > { %v5078_v26 = vadd.f32 %v13989_v39, %v5077_v30  ;;  %v5147_v11 = vadd.f32 %v5146_v61, %v5116_v62 }
 0x319   : > { %v5148_v1 = vadd.f32 %v5147_v11, %v5117_v15  ;;  %v14009_v14 = vpop.f32.mrb[12].mxu0  ;;  %v5079_v34 = vadd.f32 %v13997_v0, %v5078_v26 }
 0x31a   : > { %v14012_v32 = vpop.f32.mrb[13].mxu0  ;;  %v5121_v16 = vmul.f32 %v14009_v14, %v14009_v14 }
 0x31b   : > { %v5080_v3 = vadd.f32 %v5079_v34, %v14012_v32  ;;  %v5119_v36 = vmul.f32 %v14012_v32, %v14012_v32  ;;  %v5149_v13 = vadd.f32 %v5148_v1, %v5118_v58  ;;  %v14017_v17 = vpop.f32.mrb[14].mxu0 }
 0x31c   : > { %v14019_v53 = vpop.f32.mrb[15].mxu0  ;;  %v5122_v63 = vmul.f32 %v14017_v17, %v14017_v17 }
 0x31d   : > { %v5150_v54 = vadd.f32 %v5149_v13, %v5119_v36  ;;  %v5081_v50 = vadd.f32 %v5080_v3, %v14019_v53  ;;  %v5120_v23 = vmul.f32 %v14019_v53, %v14019_v53 }
 0x31f   : > { %v5082_v18 = vadd.f32 %v14009_v14, %v5081_v50  ;;  %v5151_v52 = vadd.f32 %v5150_v54, %v5120_v23 }
 0x321   : > { %v5152_v47 = vadd.f32 %v5151_v52, %v5121_v16  ;;  %v14029_v7 = vpop.f32.mrb[16].mxu0  ;;  %v5083_v27 = vadd.f32 %v14017_v17, %v5082_v18 }
 0x322   : > { %v14032_v43 = vpop.f32.mrb[17].mxu0  ;;  %v5125_v51 = vmul.f32 %v14029_v7, %v14029_v7 }
 0x323   : > { %v5084_v20 = vadd.f32 %v5083_v27, %v14032_v43  ;;  %v5123_v19 = vmul.f32 %v14032_v43, %v14032_v43  ;;  %v5153_v40 = vadd.f32 %v5152_v47, %v5122_v63  ;;  %v14037_v55 = vpop.f32.mrb[18].mxu0 }
 0x324   : > { %v14039_v31 = vpop.f32.mrb[19].mxu0  ;;  %v5126_v8 = vmul.f32 %v14037_v55, %v14037_v55 }
 0x325   : > { %v5154_v37 = vadd.f32 %v5153_v40, %v5123_v19  ;;  %v5085_v48 = vadd.f32 %v5084_v20, %v14039_v31  ;;  %v5124_v49 = vmul.f32 %v14039_v31, %v14039_v31 }
 0x327   : > { %v5086_v9 = vadd.f32 %v14029_v7, %v5085_v48  ;;  %v5155_v10 = vadd.f32 %v5154_v37, %v5124_v49 }
 0x329   : > { %v5156_v41 = vadd.f32 %v5155_v10, %v5125_v51  ;;  %v14049_v4 = vpop.f32.mrb[20].mxu0  ;;  %v5087_v35 = vadd.f32 %v14037_v55, %v5086_v9 }
 0x32a   : > { %v14052_v42 = vpop.f32.mrb[21].mxu0  ;;  %v5129_v62 = vmul.f32 %v14049_v4, %v14049_v4 }
 0x32b   : > { %v5088_v60 = vadd.f32 %v5087_v35, %v14052_v42  ;;  %v5127_v59 = vmul.f32 %v14052_v42, %v14052_v42  ;;  %v5157_v24 = vadd.f32 %v5156_v41, %v5126_v8  ;;  %v14057_v22 = vpop.f32.mrb[22].mxu0 }
 0x32c   : > { %v14059_v46 = vpop.f32.mrb[23].mxu0  ;;  %v5130_v11 = vmul.f32 %v14057_v22, %v14057_v22 }
 0x32d   : > { %v5158_v33 = vadd.f32 %v5157_v24, %v5127_v59  ;;  %v5089_v61 = vadd.f32 %v5088_v60, %v14059_v46  ;;  %v5128_v30 = vmul.f32 %v14059_v46, %v14059_v46 }
 0x32f   : > { %v5090_v15 = vadd.f32 %v14049_v4, %v5089_v61  ;;  %v5159_v26 = vadd.f32 %v5158_v33, %v5128_v30 }
 0x331   : > { %v5160_v58 = vadd.f32 %v5159_v26, %v5129_v62  ;;  %v14069_v1 = vpop.f32.mrb[24].mxu0  ;;  %v5091_v34 = vadd.f32 %v14057_v22, %v5090_v15 }
 0x332   : > { %v14072_v3 = vpop.f32.mrb[25].mxu0  ;;  %v5133_v63 = vmul.f32 %v14069_v1, %v14069_v1 }
 0x333   : > { %v5092_v36 = vadd.f32 %v5091_v34, %v14072_v3  ;;  %v5131_v13 = vmul.f32 %v14072_v3, %v14072_v3  ;;  %v5161_v54 = vadd.f32 %v5160_v58, %v5130_v11  ;;  %v14077_v50 = vpop.f32.mrb[26].mxu0 }
 0x334   : > { %v14079_v23 = vpop.f32.mrb[27].mxu0  ;;  %v5134_v20 = vmul.f32 %v14077_v50, %v14077_v50 }
 0x335   : > { %v5162_v16 = vadd.f32 %v5161_v54, %v5131_v13  ;;  %v5093_v18 = vadd.f32 %v5092_v36, %v14079_v23  ;;  %v5132_v52 = vmul.f32 %v14079_v23, %v14079_v23 }
 0x337   : > { %v5094_v47 = vadd.f32 %v14069_v1, %v5093_v18  ;;  %v5163_v27 = vadd.f32 %v5162_v16, %v5132_v52 }
 0x339   : > { %v5164_v19 = vadd.f32 %v5163_v27, %v5133_v63  ;;  %v14089_v40 = vpop.f32.mrb[28].mxu0  ;;  %v5095_v37 = vadd.f32 %v14077_v50, %v5094_v47 }
 0x33a   : > { %v14092_v48 = vpop.f32.mrb[29].mxu0  ;;  %v5137_v59 = vmul.f32 %v14089_v40, %v14089_v40 }
 0x33b   : > { %v5096_v49 = vadd.f32 %v5095_v37, %v14092_v48  ;;  %v5135_v51 = vmul.f32 %v14092_v48, %v14092_v48  ;;  %v5165_v9 = vadd.f32 %v5164_v19, %v5134_v20  ;;  %v14097_v10 = vpop.f32.mrb[30].mxu0 }
 0x33c   : > { %v14099_v8 = vpop.f32.mrb[31].mxu0  ;;  %v5138_v61 = vmul.f32 %v14097_v10, %v14097_v10 }
 0x33d   : > { %v5166_v41 = vadd.f32 %v5165_v9, %v5135_v51  ;;  %v5097_v35 = vadd.f32 %v5096_v49, %v14099_v8  ;;  %v5136_v60 = vmul.f32 %v14099_v8, %v14099_v8 }
 0x33f   : > { %v5098_v24 = vadd.f32 %v14089_v40, %v5097_v35  ;;  %v5167_v33 = vadd.f32 %v5166_v41, %v5136_v60 }
 0x341   : > { %v5099_v30 = vadd.f32 %v14097_v10, %v5098_v24  ;;  %v5168_v62 = vadd.f32 %v5167_v33, %v5137_v59 }
 0x343   : > { %v5100_v15 = vrot.slane %v5099_v30, 4  ;;  %v5169_v26 = vadd.f32 %v5168_v62, %v5138_v61 }
 0x345   : > { %v5101_v11 = vadd.f32 %v5100_v15, %v5099_v30  ;;  %v5170_v58 = vrot.slane %v5169_v26, 4 }
 0x347   : > { %v5102_v34 = vrot.slane %v5101_v11, 2  ;;  %v5171_v36 = vadd.f32 %v5170_v58, %v5169_v26 }
 0x349   : > { %v5103_v13 = vadd.f32 %v5102_v34, %v5101_v11  ;;  %v5172_v54 = vrot.slane %v5171_v36, 2 }
 0x34b   : > { %v5104_v16 = vrot.slane %v5103_v13, 1  ;;  %v5173_v18 = vadd.f32 %v5172_v54, %v5171_v36 }
 0x34d   : > { %v5105_v52 = vadd.f32 %v5104_v16, %v5103_v13  ;;  %v5174_v63 = vrot.slane %v5173_v18, 1 }
 0x34f   : > { %v5175_v47 = vadd.f32 %v5174_v63, %v5173_v18  ;;  %v14110_v27 = vmul.f32 0.00390625, %v5105_v52 }
 0x351   : > { %v5178_v20 = vmul.f32 0.00390625, %v5175_v47  ;;  %v5179_v19 = vmul.f32 %v14110_v27, %v14110_v27  ;;  %v5244_v37 = vsub.f32 %v14092_v48, %v14110_v27  ;;  %v5245_v49 = vsub.f32 %v14099_v8, %v14110_v27 }
 0x352   : > { %v5216_v51 = vsub.f32 %v13940_v25, %v14110_v27  ;;  %v5217_v9 = vsub.f32 %v13947_v56, %v14110_v27  ;;  %v5218_v41 = vsub.f32 %v13938_v21, %v14110_v27  ;;  %v5219_v35 = vsub.f32 %v13942_v2, %v14110_v27 }
 0x353   : > { %v5180_v60 = vsub.f32 %v5178_v20, %v5179_v19  ;;  %v5220_v59 = vsub.f32 %v13966_v5, %v14110_v27  ;;  %v5221_v48 = vsub.f32 %v13973_v6, %v14110_v27  ;;  %v5222_v8 = vsub.f32 %v13963_v12, %v14110_v27 }
 0x354   : > { %v5223_v25 = vsub.f32 %v13971_v45, %v14110_v27  ;;  %v5224_v56 = vsub.f32 %v13992_v57, %v14110_v27  ;;  %v5225_v21 = vsub.f32 %v13999_v28, %v14110_v27  ;;  %v5226_v2 = vsub.f32 %v13989_v39, %v14110_v27 }
 0x355   : > { %v5181_v24 = vmax.f32 %v5180_v60, 0.0  ;;  %v5227_v5 = vsub.f32 %v13997_v0, %v14110_v27  ;;  %v5228_v6 = vsub.f32 %v14012_v32, %v14110_v27  ;;  %v5229_v12 = vsub.f32 %v14019_v53, %v14110_v27 }
 0x356   : > { %v5230_v45 = vsub.f32 %v14009_v14, %v14110_v27  ;;  %v5231_v57 = vsub.f32 %v14017_v17, %v14110_v27  ;;  %v5232_v28 = vsub.f32 %v14032_v43, %v14110_v27  ;;  %v5233_v39 = vsub.f32 %v14039_v31, %v14110_v27 }
 0x357   : > { %v5182_v33 = vadd.f32 1e-05, %v5181_v24  ;;  %v5234_v0 = vsub.f32 %v14029_v7, %v14110_v27  ;;  %v5235_v32 = vsub.f32 %v14037_v55, %v14110_v27  ;;  %v5236_v53 = vsub.f32 %v14052_v42, %v14110_v27 }
 0x358   : > { %v5237_v14 = vsub.f32 %v14059_v46, %v14110_v27  ;;  %v5238_v17 = vsub.f32 %v14049_v4, %v14110_v27  ;;  %v5239_v43 = vsub.f32 %v14057_v22, %v14110_v27  ;;  %v5240_v31 = vsub.f32 %v14072_v3, %v14110_v27 }
 0x359   : > { %12900 = vrsqrt.f32 %v5182_v33  ;;  %v5241_v7 = vsub.f32 %v14079_v23, %v14110_v27  ;;  %v5242_v55 = vsub.f32 %v14069_v1, %v14110_v27  ;;  %v5243_v42 = vsub.f32 %v14077_v50, %v14110_v27 }
 0x35a   : > { %v5246_v46 = vsub.f32 %v14089_v40, %v14110_v27  ;;  %v5247_v4 = vsub.f32 %v14097_v10, %v14110_v27 }
 0x363   : > { %v12901_v22 = vpop.eup %12900 }
 0x364   : > { %v5276_v61 = vmul.f32 %v12901_v22, %v5244_v37  ;;  %v5277_v30 = vmul.f32 %v12901_v22, %v5245_v49  ;;  %v14178_v3 = vmul.f32 %v12901_v22, %v5216_v51  ;;  %v14180_v62 = vmul.f32 %v12901_v22, %v5217_v9 }
 0x365   : > { %v14182_v23 = vmul.f32 %v12901_v22, %v5218_v41  ;;  %v14184_v15 = vmul.f32 %v12901_v22, %v5219_v35  ;;  %v14186_v1 = vmul.f32 %v12901_v22, %v5220_v59  ;;  %v14188_v50 = vmul.f32 %v12901_v22, %v5221_v48 }
 0x366   : > { %v5308_v26 = vmax.f32 %v5276_v61, 0.0  ;;  %v5309_v40 = vmax.f32 %v5277_v30, 0.0  ;;  %v5254_v11 = vmul.f32 %v12901_v22, %v5222_v8  ;;  %v5255_v58 = vmul.f32 %v12901_v22, %v5223_v25 }
 0x367   : > { %v5256_v10 = vmul.f32 %v12901_v22, %v5224_v56  ;;  %v5257_v34 = vmul.f32 %v12901_v22, %v5225_v21  ;;  %v5258_v36 = vmul.f32 %v12901_v22, %v5226_v2  ;;  %v5259_v13 = vmul.f32 %v12901_v22, %v5227_v5 }
 0x368   : > { %v5326_v54 = vpack.c.bf16 %v5309_v40, %v5308_v26  ;;  %v5260_v16 = vmul.f32 %v12901_v22, %v5228_v6  ;;  %v5261_v18 = vmul.f32 %v12901_v22, %v5229_v12  ;;  %v5262_v52 = vmul.f32 %v12901_v22, %v5230_v45 }
 0x369   : > { %v5263_v63 = vmul.f32 %v12901_v22, %v5231_v57  ;;  %v5264_v47 = vmul.f32 %v12901_v22, %v5232_v28  ;;  %v5265_v27 = vmul.f32 %v12901_v22, %v5233_v39  ;;  %v5266_v20 = vmul.f32 %v12901_v22, %v5234_v0 }
 0x36a   : > { %v5358_v19 = vrot.slane %v5326_v54, 4  ;;  %v5267_v37 = vmul.f32 %v12901_v22, %v5235_v32  ;;  %v5268_v49 = vmul.f32 %v12901_v22, %v5236_v53  ;;  %v5269_v51 = vmul.f32 %v12901_v22, %v5237_v14 }
 0x36b   : > { %v5270_v9 = vmul.f32 %v12901_v22, %v5238_v17  ;;  %v5271_v41 = vmul.f32 %v12901_v22, %v5239_v43  ;;  %v5272_v35 = vmul.f32 %v12901_v22, %v5240_v31  ;;  %v5273_v60 = vmul.f32 %v12901_v22, %v5241_v7 }
 0x36c   : > { %5404 = vst [vmem:[#allocation2 + $0xf8] ss:$-4 sps:$4 sm:$0xff] %v5358_v19   ;;  %v5274_v59 = vmul.f32 %v12901_v22, %v5242_v55  ;;  %v5275_v48 = vmul.f32 %v12901_v22, %v5243_v42  ;;  %v5278_v8 = vmul.f32 %v12901_v22, %v5246_v46  ;;  %v5279_v25 = vmul.f32 %v12901_v22, %v5247_v4 }
 0x36d   : > { %v5280_v56 = vmax.f32 %v14178_v3, 0.0  ;;  %v5281_v21 = vmax.f32 %v14180_v62, 0.0  ;;  %v5282_v2 = vmax.f32 %v14182_v23, 0.0  ;;  %v5283_v24 = vmax.f32 %v14184_v15, 0.0 }
 0x36e   : > { %v5284_v5 = vmax.f32 %v14186_v1, 0.0  ;;  %v5285_v6 = vmax.f32 %v14188_v50, 0.0  ;;  %v5286_v12 = vmax.f32 %v5254_v11, 0.0  ;;  %v5287_v45 = vmax.f32 %v5255_v58, 0.0 }
 0x36f   : > { %v5288_v57 = vmax.f32 %v5256_v10, 0.0  ;;  %v5289_v28 = vmax.f32 %v5257_v34, 0.0  ;;  %v5290_v39 = vmax.f32 %v5258_v36, 0.0  ;;  %v5291_v33 = vmax.f32 %v5259_v13, 0.0 }
 0x370   : > { %v5292_v0 = vmax.f32 %v5260_v16, 0.0  ;;  %v5293_v32 = vmax.f32 %v5261_v18, 0.0  ;;  %v5294_v53 = vmax.f32 %v5262_v52, 0.0  ;;  %v5295_v14 = vmax.f32 %v5263_v63, 0.0 }
 0x371   : > { %v5296_v17 = vmax.f32 %v5264_v47, 0.0  ;;  %v5297_v43 = vmax.f32 %v5265_v27, 0.0  ;;  %v5298_v31 = vmax.f32 %v5266_v20, 0.0  ;;  %v5299_v7 = vmax.f32 %v5267_v37, 0.0 }
 0x372   : > { %v5300_v55 = vmax.f32 %v5268_v49, 0.0  ;;  %v5301_v42 = vmax.f32 %v5269_v51, 0.0  ;;  %v5302_v46 = vmax.f32 %v5270_v9, 0.0  ;;  %v5303_v4 = vmax.f32 %v5271_v41, 0.0 }
 0x373   : > { %v5304_v22 = vmax.f32 %v5272_v35, 0.0  ;;  %v5305_v61 = vmax.f32 %v5273_v60, 0.0  ;;  %v5306_v30 = vmax.f32 %v5274_v59, 0.0  ;;  %v5307_v3 = vmax.f32 %v5275_v48, 0.0  ;;  %v5431_v51 = vld [vmem:[#allocation2 + $0xf0] sm:$0x10] }
 0x374   : > { %v5310_v62 = vmax.f32 %v5278_v8, 0.0  ;;  %v5311_v23 = vmax.f32 %v5279_v25, 0.0  ;;  %v5312_v15 = vpack.c.bf16 %v5281_v21, %v5280_v56  ;;  %v5313_v1 = vpack.c.bf16 %v5283_v24, %v5282_v2  ;;  %v5557_v59 = vld [vmem:[#allocation2 + $0xf8] sm:$0x8]  ;;  %v5533_v21 = vld [vmem:[#allocation2 + $0xf0] sm:$0x8] }
 0x375   : > { %v5314_v50 = vpack.c.bf16 %v5285_v6, %v5284_v5  ;;  %v5315_v26 = vpack.c.bf16 %v5287_v45, %v5286_v12  ;;  %v5316_v40 = vpack.c.bf16 %v5289_v28, %v5288_v57  ;;  %v5317_v11 = vpack.c.bf16 %v5291_v33, %v5290_v39  ;;  %v5659_v24 = vld [vmem:[#allocation2 + $0xf8] sm:$0x10] }
 0x376   : > { %v5318_v58 = vpack.c.bf16 %v5293_v32, %v5292_v0  ;;  %v5319_v10 = vpack.c.bf16 %v5295_v14, %v5294_v53  ;;  %v5320_v34 = vpack.c.bf16 %v5297_v43, %v5296_v17  ;;  %v5321_v36 = vpack.c.bf16 %v5299_v7, %v5298_v31 }
 0x377   : > { %v5322_v13 = vpack.c.bf16 %v5301_v42, %v5300_v55  ;;  %v5323_v54 = vpack.c.bf16 %v5303_v4, %v5302_v46  ;;  %v5324_v16 = vpack.c.bf16 %v5305_v61, %v5304_v22  ;;  %v5325_v18 = vpack.c.bf16 %v5307_v3, %v5306_v30  ;;  %v12837_v46 = vld [vmem:[%s15399_s2 + $0x8] sm:$0xff]  }
 0x378   : > { %v5327_v52 = vpack.c.bf16 %v5311_v23, %v5310_v62  ;;  %v5344_v63 = vrot.slane %v5312_v15, 4  ;;  %v5345_v47 = vrot.slane %v5313_v1, 4  ;;  %v5346_v27 = vrot.slane %v5314_v50, 4  ;;  %v12838_v23 = vld [vmem:[%s15399_s2 + $0x10] sm:$0xff]  }
 0x379   : > { %v5347_v20 = vrot.slane %v5315_v26, 4  ;;  %v5348_v19 = vrot.slane %v5316_v40, 4  ;;  %v5349_v37 = vrot.slane %v5317_v11, 4  ;;  %v5350_v49 = vrot.slane %v5318_v58, 4  ;;  %v5491_v50 = vld [vmem:[#allocation2 + $0x10] sm:$0x8] }
 0x37a   : > { %v5351_v9 = vrot.slane %v5319_v10, 4  ;;  %v5352_v41 = vrot.slane %v5320_v34, 4  ;;  %v5353_v35 = vrot.slane %v5321_v36, 4  ;;  %v5354_v60 = vrot.slane %v5322_v13, 4  ;;  %5376 = vst [vmem:[#allocation2 + $0x18] ss:$-4 sps:$4 sm:$0xff] %v5344_v63  }
 0x37b   : > { %5378 = vst [vmem:[#allocation2 + $0x28] ss:$-4 sps:$4 sm:$0xff] %v5345_v47   ;;  %5380 = vst [vmem:[#allocation2 + $0x38] ss:$-4 sps:$4 sm:$0xff] %v5346_v27   ;;  %v5355_v48 = vrot.slane %v5323_v54, 4  ;;  %v5356_v8 = vrot.slane %v5324_v16, 4 }
 0x37c   : > { %v5357_v25 = vrot.slane %v5325_v18, 4  ;;  %v5359_v56 = vrot.slane %v5327_v52, 4  ;;  %5382 = vst [vmem:[#allocation2 + $0x48] ss:$-4 sps:$4 sm:$0xff] %v5347_v20   ;;  %5384 = vst [vmem:[#allocation2 + $0x58] ss:$-4 sps:$4 sm:$0xff] %v5348_v19  }
 0x37d   : > { %5386 = vst [vmem:[#allocation2 + $0x68] ss:$-4 sps:$4 sm:$0xff] %v5349_v37   ;;  %5388 = vst [vmem:[#allocation2 + $0x78] ss:$-4 sps:$4 sm:$0xff] %v5350_v49   ;;  %v5467_v2 = vrot.slane %v5431_v51, 1  ;;  %v5593_v5 = vrot.slane %v5557_v59, 7 }
 0x37e   : > { %5390 = vst [vmem:[#allocation2 + $0x88] ss:$-4 sps:$4 sm:$0xff] %v5351_v9   ;;  %5392 = vst [vmem:[#allocation2 + $0x98] ss:$-4 sps:$4 sm:$0xff] %v5352_v41   ;;  %v5488_v58 = vld [vmem:[#allocation2] sm:$0x8] }
 0x37f   : > { %5394 = vst [vmem:[#allocation2 + $0xa8] ss:$-4 sps:$4 sm:$0xff] %v5353_v35   ;;  %5396 = vst [vmem:[#allocation2 + $0xb8] ss:$-4 sps:$4 sm:$0xff] %v5354_v60   ;;  %v5534_v6 = vsel %vm13068_vm3, %v5467_v2, %v5533_v21  ;;  %v5660_v12 = vsel %vm13177_vm6, %v5593_v5, %v5659_v24  ;;  %v5494_v10 = vld [vmem:[#allocation2 + $0x20] sm:$0x8] }
 0x380   : > { %5406 = vst [vmem:[#allocation2 + $0x108] ss:$-4 sps:$4 sm:$0xff] %v5359_v56   ;;  %5398 = vst [vmem:[#allocation2 + $0xc8] ss:$-4 sps:$4 sm:$0xff] %v5355_v48   ;;  %v5497_v36 = vld [vmem:[#allocation2 + $0x30] sm:$0x8] }
 0x381   : > { %5400 = vst [vmem:[#allocation2 + $0xd8] ss:$-4 sps:$4 sm:$0xff] %v5356_v8   ;;  %5402 = vst [vmem:[#allocation2 + $0xe8] ss:$-4 sps:$4 sm:$0xff] %v5357_v25   ;;  %v14200_v28 = vld [vmem:[#allocation2 + $0x18] sm:$0xf] }
 0x382   : > { %5535 = vst [vmem:[#allocation2 + $0xf0] sm:$0x8] %v5534_v6  ;;  %5661 = vst [vmem:[#allocation2 + $0xf8] sm:$0x10] %v5660_v12  ;;  %v5408_v45 = vld [vmem:[#allocation2 + $0x20] sm:$0xf0] }
 0x383   : > { %v5409_v57 = vld [vmem:[#allocation2 + $0x28] sm:$0xf]  ;;  %5410 = vst [vmem:[#allocation2] sm:$0xf0] %v5408_v45  ;;  %v6005_v39 = vld [vmem:[#allocation2 + $0x10] sm:$0xf0] }
 0x384   : > { %5411 = vst [vmem:[#allocation2 + $0x8] sm:$0xf] %v5409_v57  ;;  %v14202_v33 = vld [vmem:[#allocation2 + $0x28] sm:$0xf]  ;;  %v6006_v0 = vld [vmem:[#allocation2 + $0x20] sm:$0xf0] }
 0x385   : > { %v6055_v14 = vrot.slane %v6005_v39, 4  ;;  %v6056_v17 = vrot.slane %v14200_v28, 4  ;;  %v6058_v7 = vrot.slane %v6006_v0, 4  ;;  %v6059_v55 = vrot.slane %v14202_v33, 4  ;;  %v14218_v61 = vld [vmem:[#allocation2 + $0x38] sm:$0xf] }
 0x386   : > { %v6007_v30 = vld [vmem:[#allocation2 + $0x30] sm:$0xf0]  ;;  %v14221_v3 = vld [vmem:[#allocation2 + $0x48] sm:$0xf]  ;;  %v6008_v62 = vld [vmem:[#allocation2 + $0x40] sm:$0xf0] }
 0x387   : > { %v6057_v4 = vsel %vm954_vm0, %v6055_v14, %v6056_v17  ;;  %v6060_v22 = vsel %vm954_vm0, %v6058_v7, %v6059_v55  ;;  %v6061_v15 = vrot.slane %v6007_v30, 4  ;;  %v6062_v1 = vrot.slane %v14218_v61, 4  ;;  %v5417_v34 = vld [vmem:[#allocation2 + $0x10] sm:$0x10]  ;;  %v14228_v13 = vld [vmem:[#allocation2 + $0x58] sm:$0xf] }
 0x388   : > { %v6064_v26 = vrot.slane %v6008_v62, 4  ;;  %v6065_v40 = vrot.slane %v14221_v3, 4  ;;  %v12839_v54 = vld [vmem:[%s15399_s2 + $0x18] sm:$0xff]   ;;  %v5453_v16 = vrot.slane %v5417_v34, 1  ;;  %v5418_v18 = vld [vmem:[#allocation2 + $0x20] sm:$0x10] }
 0x389   : > { %v5500_v52 = vld [vmem:[#allocation2 + $0x40] sm:$0x8]  ;;  %v6063_v63 = vsel %vm954_vm0, %v6061_v15, %v6062_v1  ;;  %v5454_v27 = vrot.slane %v5418_v18, 1  ;;  %v5419_v20 = vld [vmem:[#allocation2 + $0x30] sm:$0x10]  ;;  %v6068_v2 = vrot.slane %v14228_v13, 4 }
 0x38a   : > { %v14206_v53 = vld [vmem:[#allocation2] sm:$0xf0]  ;;  %v6066_v37 = vsel %vm954_vm0, %v6064_v26, %v6065_v40  ;;  %v6009_v49 = vld [vmem:[#allocation2 + $0x50] sm:$0xf0]  ;;  %v14237_v51 = vld [vmem:[#allocation2 + $0x68] sm:$0xf]  ;;  %v5492_v9 = vsel %vm13068_vm3, %v5453_v16, %v5491_v50 }
 0x38b   : > { %v14204_v32 = vld [vmem:[#allocation2 + $0x8] sm:$0xf]  ;;  %v6052_v43 = vrot.slane %v14206_v53, 4  ;;  %v5416_v11 = vld [vmem:[#allocation2] sm:$0x10]  ;;  %v5455_v41 = vrot.slane %v5419_v20, 1  ;;  %v5495_v60 = vsel %vm13068_vm3, %v5454_v27, %v5494_v10 }
 0x38c   : > { %v6053_v31 = vrot.slane %v14204_v32, 4  ;;  %v5420_v19 = vld [vmem:[#allocation2 + $0x40] sm:$0x10]  ;;  %5493 = vst [vmem:[#allocation2 + $0x10] sm:$0x8] %v5492_v9  ;;  %v6067_v21 = vrot.slane %v6009_v49, 4 }
 0x38d   : > { %v6010_v35 = vld [vmem:[#allocation2 + $0x60] sm:$0xf0]  ;;  %v5456_v59 = vrot.slane %v5420_v19, 1  ;;  %v5421_v48 = vld [vmem:[#allocation2 + $0x50] sm:$0x10]  ;;  %v5498_v25 = vsel %vm13068_vm3, %v5455_v41, %v5497_v36  ;;  %v6071_v45 = vrot.slane %v14237_v51, 4 }
 0x38e   : > { %v6054_v42 = vsel %vm954_vm0, %v6052_v43, %v6053_v31  ;;  %v12840_v8 = vld [vmem:[%s15399_s2 + $0x20] sm:$0xff]   ;;  %5496 = vst [vmem:[#allocation2 + $0x20] sm:$0x8] %v5495_v60  ;;  %5499 = vst [vmem:[#allocation2 + $0x30] sm:$0x8] %v5498_v25  ;;  %v6070_v12 = vrot.slane %v6010_v35, 4  ;;  %v6069_v31 = vsel %vm954_vm0, %v6067_v21, %v6068_v2 }
 0x38f   : > { %11820 = vmatprep.mubr.bf16.mxu1 %v6054_v42  ;;  %v5422_v56 = vld [vmem:[#allocation2 + $0x60] sm:$0x10]  ;;  %v5501_v24 = vsel %vm13068_vm3, %v5456_v59, %v5500_v52  ;;  %v5503_v5 = vld [vmem:[#allocation2 + $0x50] sm:$0x8]  ;;  %v5506_v6 = vld [vmem:[#allocation2 + $0x60] sm:$0x8] }
 0x390   : > { %11821 = vmatmul.mubr.bf16.vlgmr.msra.gmra.mrb[0].mxu1 %v6057_v4  ;;  %5502 = vst [vmem:[#allocation2 + $0x40] sm:$0x8] %v5501_v24  ;;  %v5457_v57 = vrot.slane %v5421_v48, 1  ;;  %v5423_v39 = vld [vmem:[#allocation2 + $0x70] sm:$0x10]  ;;  %v5458_v0 = vrot.slane %v5422_v56, 1  ;;  %v6072_v42 = vsel %vm954_vm0, %v6070_v12, %v6071_v45 }
 0x391   : > { %11824 = vmatprep.mubr.bf16.mxu1 %v6060_v22  ;;  %11853 = vmatpush3.bf16.msra.mxu1 %v13981_v44  ;;  %v5452_v44 = vrot.slane %v5416_v11, 1  ;;  %v12841_v14 = vld [vmem:[%s15399_s2 + $0x28] sm:$0xff]   ;;  %v5509_v43 = vld [vmem:[#allocation2 + $0x70] sm:$0x8]  ;;  %v5459_v55 = vrot.slane %v5423_v39, 1  ;;  %v12843_v40 = vld [vmem:[%s15399_s2 + $0x38] sm:$0xff]  }
 0x392   : > { %11854 = vmatprep.subr.bf16.mxu1 %v12837_v46  ;;  %v5504_v17 = vsel %vm13068_vm3, %v5457_v57, %v5503_v5  ;;  %v5507_v7 = vsel %vm13068_vm3, %v5458_v0, %v5506_v6  ;;  %v6011_v4 = vld [vmem:[#allocation2 + $0x70] sm:$0xf0]  ;;  %v14263_v22 = vld [vmem:[#allocation2 + $0x88] sm:$0xf]  ;;  %v6012_v30 = vld [vmem:[#allocation2 + $0x80] sm:$0xf0] }
 0x393   : > { %v5489_v47 = vsel %vm13068_vm3, %v5452_v44, %v5488_v58  ;;  %5505 = vst [vmem:[#allocation2 + $0x50] sm:$0x8] %v5504_v17  ;;  %5508 = vst [vmem:[#allocation2 + $0x60] sm:$0x8] %v5507_v7  ;;  %v5510_v62 = vsel %vm13068_vm3, %v5459_v55, %v5509_v43  ;;  %v6073_v15 = vrot.slane %v6011_v4, 4  ;;  %v6076_v50 = vrot.slane %v6012_v30, 4 }
 0x394   : > { %5490 = vst [vmem:[#allocation2] sm:$0x8] %v5489_v47  ;;  %5511 = vst [vmem:[#allocation2 + $0x70] sm:$0x8] %v5510_v62  ;;  %v6077_v26 = vrot.slane %v14263_v22, 4  ;;  %v14284_v16 = vld [vmem:[%s15399_s2 + $0x80] sm:$0xff]  }
 0x395   : > { %11855 = vmatpush3.bf16.msra.mxu1 %v12837_v46  ;;  %v14261_v46 = vld [vmem:[#allocation2 + $0x78] sm:$0xf]  ;;  %v6013_v44 = vld [vmem:[#allocation2 + $0x90] sm:$0xf0]  ;;  %v5424_v34 = vld [vmem:[#allocation2 + $0x80] sm:$0x10] }
 0x396   : > { %11856 = vmatprep.subr.bf16.mxu1 %v12838_v23  ;;  %v6074_v1 = vrot.slane %v14261_v46, 4  ;;  %v6078_v58 = vsel %vm954_vm0, %v6076_v50, %v6077_v26  ;;  %v14277_v10 = vld [vmem:[#allocation2 + $0x98] sm:$0xf]  ;;  %v14279_v36 = vld [vmem:[#allocation2 + $0xa8] sm:$0xf]  ;;  %v6079_v52 = vrot.slane %v6013_v44, 4 }
 0x397   : > { %v5512_v18 = vld [vmem:[#allocation2 + $0x80] sm:$0x8]  ;;  %v5460_v47 = vrot.slane %v5424_v34, 1  ;;  %v5425_v27 = vld [vmem:[#allocation2 + $0x90] sm:$0x10]  ;;  %v6083_v19 = vrot.slane %v14279_v36, 4 }
 0x398   : > { %11825 = vmatmul.mubr.bf16.gmra.mrb[4].mxu1 %v6063_v63  ;;  %v6075_v11 = vsel %vm954_vm0, %v6073_v15, %v6074_v1  ;;  %v6080_v63 = vrot.slane %v14277_v10, 4  ;;  %v5515_v49 = vld [vmem:[#allocation2 + $0x90] sm:$0x8]  ;;  %v5426_v9 = vld [vmem:[#allocation2 + $0xa0] sm:$0x10]  ;;  %v5461_v41 = vrot.slane %v5425_v27, 1 }
 0x399   : > { %11828 = vmatprep.mubr.bf16.mxu1 %v6066_v37  ;;  %11857 = vmatpush3.bf16.msra.mxu1 %v12838_v23  ;;  %v12842_v23 = vld [vmem:[%s15399_s2 + $0x30] sm:$0xff]   ;;  %v5513_v37 = vsel %vm13068_vm3, %v5460_v47, %v5512_v18  ;;  %v14292_v60 = vld [vmem:[#allocation2 + $0xb8] sm:$0xf]  ;;  %v5518_v59 = vld [vmem:[#allocation2 + $0xa0] sm:$0x8]  ;;  %v5462_v21 = vrot.slane %v5426_v9, 1 }
 0x39a   : > { %11858 = vmatprep.subr.bf16.mxu1 %v12839_v54  ;;  %5514 = vst [vmem:[#allocation2 + $0x80] sm:$0x8] %v5513_v37  ;;  %v6081_v35 = vsel %vm954_vm0, %v6079_v52, %v6080_v63  ;;  %v5427_v48 = vld [vmem:[#allocation2 + $0xb0] sm:$0x10]  ;;  %v5516_v56 = vsel %vm13068_vm3, %v5461_v41, %v5515_v49  ;;  %v5428_v2 = vld [vmem:[#allocation2 + $0xc0] sm:$0x10] }
 0x39b   : > { %v6015_v25 = vld [vmem:[#allocation2 + $0xb0] sm:$0xf0]  ;;  %v14297_v24 = vld [vmem:[#allocation2 + $0xc8] sm:$0xf]  ;;  %v6016_v5 = vld [vmem:[#allocation2 + $0xc0] sm:$0xf0]  ;;  %v5519_v12 = vsel %vm13068_vm3, %v5462_v21, %v5518_v59 }
 0x39c   : > { %5517 = vst [vmem:[#allocation2 + $0x90] sm:$0x8] %v5516_v56  ;;  %v5521_v6 = vld [vmem:[#allocation2 + $0xb0] sm:$0x8]  ;;  %v5463_v45 = vrot.slane %v5427_v48, 1  ;;  %v6085_v39 = vrot.slane %v6015_v25, 4 }
 0x39d   : > { %11859 = vmatpush3.bf16.msra.mxu1 %v12839_v54  ;;  %v6014_v54 = vld [vmem:[#allocation2 + $0xa0] sm:$0xf0]  ;;  %v5524_v57 = vld [vmem:[#allocation2 + $0xc0] sm:$0x8]  ;;  %v6086_v0 = vrot.slane %v14292_v60, 4  ;;  %v6088_v17 = vrot.slane %v6016_v5, 4 }
 0x39e   : > { %11860 = vmatprep.subr.bf16.mxu1 %v12840_v8  ;;  %v6082_v20 = vrot.slane %v6014_v54, 4  ;;  %5520 = vst [vmem:[#allocation2 + $0xa0] sm:$0x8] %v5519_v12  ;;  %v6089_v43 = vrot.slane %v14297_v24, 4  ;;  %v5429_v7 = vld [vmem:[#allocation2 + $0xd0] sm:$0x10] }
 0x39f   : > { %v5527_v4 = vld [vmem:[#allocation2 + $0xd0] sm:$0x8]  ;;  %v6087_v30 = vsel %vm954_vm0, %v6085_v39, %v6086_v0  ;;  %v5465_v62 = vrot.slane %v5429_v7, 1  ;;  %v14309_v1 = vld [vmem:[#allocation2 + $0xd8] sm:$0xf]  ;;  %v5712_v37 = vshll.u32 %v14204_v32, 16 }
 0x3a0   : > { %11829 = vmatmul.mubr.bf16.gmra.mrb[8].mxu1 %v6069_v31  ;;  %v5522_v31 = vsel %vm13068_vm3, %v5463_v45, %v5521_v6  ;;  %v6090_v15 = vsel %vm954_vm0, %v6088_v17, %v6089_v43  ;;  %v6017_v50 = vld [vmem:[#allocation2 + $0xd0] sm:$0xf0]  ;;  %v6092_v18 = vrot.slane %v14309_v1, 4  ;;  %v5542_v49 = vld [vmem:[#allocation2 + $0x8] sm:$0x8]  ;;  %v5726_v7 = vshrl.u32 %v14200_v28, 16 }
 0x3a1   : > { %11832 = vmatprep.mubr.bf16.mxu1 %v6072_v42  ;;  %11861 = vmatpush3.bf16.msra.mxu1 %v12840_v8  ;;  %v6084_v8 = vsel %vm954_vm0, %v6082_v20, %v6083_v19  ;;  %5523 = vst [vmem:[#allocation2 + $0xb0] sm:$0x8] %v5522_v31  ;;  %v5430_v42 = vld [vmem:[#allocation2 + $0xe0] sm:$0x10]  ;;  %v5528_v44 = vsel %vm13068_vm3, %v5465_v62, %v5527_v4  ;;  %v6091_v54 = vrot.slane %v6017_v50, 4  ;;  %v5709_v19 = vshrl.u32 %v14204_v32, 16 }
 0x3a2   : > { %11862 = vmatprep.subr.bf16.mxu1 %v12841_v14  ;;  %v5466_v26 = vrot.slane %v5430_v42, 1  ;;  %5529 = vst [vmem:[#allocation2 + $0xd0] sm:$0x8] %v5528_v44  ;;  %v6019_v20 = vld [vmem:[#allocation2 + $0xf0] sm:$0xf0]  ;;  %v5714_v32 = vrot.slane %v5712_v37, 4 }
 0x3a3   : > { %v6093_v9 = vsel %vm954_vm0, %v6091_v54, %v6092_v18  ;;  %v14322_v41 = vld [vmem:[#allocation2 + $0xf8] sm:$0xf]  ;;  %v5672_v25 = vld [vmem:[#allocation2 + $0x20] sm:$0xf8]  ;;  %v5614_v56 = vld [vmem:[#allocation2 + $0x8] sm:$0x10] }
 0x3a4   : > { %v6097_v21 = vrot.slane %v6019_v20, 4  ;;  %v6098_v5 = vrot.slane %v14322_v41, 4  ;;  %v5711_v6 = vrot.slane %v5709_v19, 3  ;;  %v5543_v0 = vld [vmem:[#allocation2 + $0x18] sm:$0x8]  ;;  %v5738_v43 = vshll.u32 %v5672_v25, 16 }
 0x3a5   : > { %11863 = vmatpush3.bf16.msra.mxu1 %v12841_v14  ;;  %v5464_v14 = vrot.slane %v5428_v2, 1  ;;  %v5578_v2 = vrot.slane %v5542_v49, 7  ;;  %v5617_v31 = vld [vmem:[#allocation2 + $0x18] sm:$0x10]  ;;  %v5743_v42 = vshrl.u32 %v14202_v33, 16  ;;  %v5746_v62 = vshll.u32 %v14202_v33, 16 }
 0x3a6   : > { %11864 = vmatprep.subr.bf16.mxu1 %v12842_v23  ;;  %v5620_v4 = vld [vmem:[#allocation2 + $0x28] sm:$0x10]  ;;  %v5545_v50 = vld [vmem:[#allocation2 + $0x38] sm:$0x8]  ;;  %v5740_v18 = vrot.slane %v5738_v43, 4  ;;  %v5780_v43 = vshll.u32 %v14221_v3, 16 }
 0x3a7   : > { %v5525_v55 = vsel %vm13068_vm3, %v5464_v14, %v5524_v57  ;;  %v5735_v57 = vshrl.u32 %v5672_v25, 16  ;;  %v5615_v39 = vsel %vm13177_vm6, %v5578_v2, %v5614_v56  ;;  %v5544_v14 = vld [vmem:[#allocation2 + $0x28] sm:$0x8]  ;;  %v5676_v20 = vld [vmem:[#allocation2 + $0x40] sm:$0xf8]  ;;  %v5581_v19 = vrot.slane %v5545_v50, 7 }
 0x3a8   : > { %11833 = vmatmul.mubr.bf16.gmra.mrb[12].mxu1 %v6075_v11  ;;  %5526 = vst [vmem:[#allocation2 + $0xc0] sm:$0x8] %v5525_v55  ;;  %v6018_v11 = vld [vmem:[#allocation2 + $0xe0] sm:$0xf0]  ;;  %5616 = vst [vmem:[#allocation2 + $0x8] sm:$0x10] %v5615_v39 }
 0x3a9   : > { %11836 = vmatprep.mubr.bf16.mxu1 %v6078_v58  ;;  %11865 = vmatpush3.bf16.msra.mxu1 %v12842_v23  ;;  %v5530_v23 = vld [vmem:[#allocation2 + $0xe0] sm:$0x8]  ;;  %v6094_v52 = vrot.slane %v6018_v11, 4  ;;  %v5729_v55 = vshll.u32 %v14200_v28, 16  ;;  %v5737_v44 = vrot.slane %v5735_v57, 3  ;;  %v5745_v37 = vrot.slane %v5743_v42, 3 }
 0x3aa   : > { %11866 = vmatprep.subr.bf16.mxu1 %v12843_v40  ;;  %v5668_v58 = vld [vmem:[#allocation2] sm:$0xf8]  ;;  %v5531_v34 = vsel %vm13068_vm3, %v5466_v26, %v5530_v23  ;;  %v5579_v23 = vrot.slane %v5543_v0, 7  ;;  %v6099_v26 = vsel %vm954_vm0, %v6097_v21, %v6098_v5  ;;  %v5674_v28 = vld [vmem:[#allocation2 + $0x30] sm:$0xf8]  ;;  %v5748_v49 = vrot.slane %v5746_v62, 4 }
 0x3ab   : > { %5532 = vst [vmem:[#allocation2 + $0xe0] sm:$0x8] %v5531_v34  ;;  %v5701_v47 = vshrl.u32 %v5668_v58, 16  ;;  %v5704_v27 = vshll.u32 %v5668_v58, 16  ;;  %v5546_v34 = vld [vmem:[#allocation2 + $0x48] sm:$0x8]  ;;  %v5741_v21 = vor.u32 %v5740_v18, %v5737_v44 }
 0x3ac   : > { %v5547_v56 = vld [vmem:[#allocation2 + $0x58] sm:$0x8]  ;;  %v5769_v2 = vshrl.u32 %v5676_v20, 16  ;;  %v5772_v5 = vshll.u32 %v5676_v20, 16  ;;  %v5629_v39 = vld [vmem:[#allocation2 + $0x58] sm:$0x10]  ;;  %v5749_v0 = vor.u32 %v5748_v49, %v5745_v37 }
 0x3ad   : > { %11867 = vmatpush3.bf16.msra.mxu1 %v12843_v40  ;;  %v14311_v40 = vld [vmem:[#allocation2 + $0xe8] sm:$0xf]  ;;  %v5703_v48 = vrot.slane %v5701_v47, 3  ;;  %v5728_v47 = vrot.slane %v5726_v7, 3  ;;  %v5782_v44 = vrot.slane %v5780_v43, 4  ;;  %v5797_v37 = vshll.u32 %v14228_v13, 16 }
 0x3ae   : > { %11900 = vmatprep.subr.bf16.mxu1 %v14284_v16  ;;  %v6095_v63 = vrot.slane %v14311_v40, 4  ;;  %v5771_v62 = vrot.slane %v5769_v2, 3  ;;  %v5549_v18 = vld [vmem:[#allocation2 + $0x78] sm:$0x8] }
 0x3af   : > { %v5585_v49 = vrot.slane %v5549_v18, 7 }
 0x3b0   : > { %11837 = vmatmul.mubr.bf16.gmra.mrb[16].mxu1 %v6081_v35  ;;  %v5670_v35 = vld [vmem:[#allocation2 + $0x10] sm:$0xf8]  ;;  %v6096_v59 = vsel %vm954_vm0, %v6094_v52, %v6095_v63  ;;  %v5618_v52 = vsel %vm13177_vm6, %v5579_v23, %v5617_v31  ;;  %v5623_v63 = vld [vmem:[#allocation2 + $0x38] sm:$0x10]  ;;  %v5583_v31 = vrot.slane %v5547_v56, 7  ;;  %v5774_v23 = vrot.slane %v5772_v5, 4 }
 0x3b1   : > { %11840 = vmatprep.mubr.bf16.mxu1 %v6084_v8  ;;  %v5706_v8 = vrot.slane %v5704_v27, 4  ;;  %v5718_v12 = vshrl.u32 %v5670_v35, 16  ;;  %v5721_v45 = vshll.u32 %v5670_v35, 16  ;;  %v5731_v27 = vrot.slane %v5729_v55, 4  ;;  %5619 = vst [vmem:[#allocation2 + $0x18] sm:$0x10] %v5618_v52 }
 0x3b2   : > { %v5626_v35 = vld [vmem:[#allocation2 + $0x48] sm:$0x10]  ;;  %v5624_v25 = vsel %vm13177_vm6, %v5581_v19, %v5623_v63  ;;  %v5630_v50 = vsel %vm13177_vm6, %v5583_v31, %v5629_v39  ;;  %v5794_v19 = vshrl.u32 %v14228_v13, 16 }
 0x3b3   : > { %v5707_v17 = vor.u32 %v5706_v8, %v5703_v48  ;;  %v5720_v11 = vrot.slane %v5718_v12, 3  ;;  %v5723_v58 = vrot.slane %v5721_v45, 4  ;;  %v5752_v48 = vshrl.u32 %v5674_v28, 16  ;;  %5625 = vst [vmem:[#allocation2 + $0x38] sm:$0x10] %v5624_v25 }
 0x3b4   : > { %v5755_v8 = vshll.u32 %v5674_v28, 16  ;;  %v5760_v12 = vshrl.u32 %v14218_v61, 16  ;;  %v5763_v45 = vshll.u32 %v14218_v61, 16  ;;  %5631 = vst [vmem:[#allocation2 + $0x58] sm:$0x10] %v5630_v50  ;;  %v5831_v50 = vshll.u32 %v14261_v46, 16 }
 0x3b5   : > { %v5754_v55 = vrot.slane %v5752_v48, 3  ;;  %v12847_v48 = vld [vmem:[%s15399_s2 + $0x98] sm:$0xff]  }
 0x3b6   : > { %v5757_v42 = vrot.slane %v5755_v8, 4  ;;  %v5550_v8 = vld [vmem:[#allocation2 + $0x88] sm:$0x8] }
 0x3b7   : > { %v5586_v39 = vrot.slane %v5550_v8, 7  ;;  %v5647_v8 = vld [vmem:[#allocation2 + $0xb8] sm:$0x10] }
 0x3b8   : > { %11841 = vmatmul.mubr.bf16.gmra.mrb[20].mxu1 %v6087_v30  ;;  %v5715_v30 = vor.u32 %v5714_v32, %v5711_v6  ;;  %v5548_v6 = vld [vmem:[#allocation2 + $0x68] sm:$0x8]  ;;  %v5732_v32 = vor.u32 %v5731_v27, %v5728_v47  ;;  %v5758_v28 = vor.u32 %v5757_v42, %v5754_v55  ;;  %v5635_v27 = vld [vmem:[#allocation2 + $0x78] sm:$0x10]  ;;  %v5551_v55 = vld [vmem:[#allocation2 + $0x98] sm:$0x8] }
 0x3b9   : > { %11844 = vmatprep.mubr.bf16.mxu1 %v6090_v15  ;;  %v5580_v15 = vrot.slane %v5544_v14, 7  ;;  %v12845_v14 = vld [vmem:[%s15399_s2 + $0x88] sm:$0xff]   ;;  %v5584_v61 = vrot.slane %v5548_v6, 7  ;;  %v5636_v2 = vsel %vm13177_vm6, %v5585_v49, %v5635_v27  ;;  %v5553_v27 = vld [vmem:[#allocation2 + $0xb8] sm:$0x8] }
 0x3ba   : > { %v5716_v54 = vsel %vm514_vm4, %v5707_v17, %v5715_v30  ;;  %v5777_v17 = vshrl.u32 %v14221_v3, 16  ;;  %v5750_v30 = vsel %vm514_vm4, %v5741_v21, %v5749_v0  ;;  %v5762_v3 = vrot.slane %v5760_v12, 3  ;;  %5637 = vst [vmem:[#allocation2 + $0x78] sm:$0x10] %v5636_v2 }
 0x3bb   : > { %v5621_v33 = vsel %vm13177_vm6, %v5580_v15, %v5620_v4  ;;  %v5632_v4 = vld [vmem:[#allocation2 + $0x68] sm:$0x10]  ;;  %v5678_v15 = vld [vmem:[#allocation2 + $0x50] sm:$0xf8]  ;;  %v5796_v12 = vrot.slane %v5794_v19, 3  ;;  %v5833_v19 = vrot.slane %v5831_v50, 4 }
 0x3bc   : > { %5622 = vst [vmem:[#allocation2 + $0x28] sm:$0x10] %v5621_v33  ;;  %v5786_v52 = vshrl.u32 %v5678_v15, 16  ;;  %v5789_v33 = vshll.u32 %v5678_v15, 16  ;;  %v5828_v15 = vshrl.u32 %v14261_v46, 16  ;;  %v5589_v2 = vrot.slane %v5553_v27, 7 }
 0x3be   : > { %v5788_v56 = vrot.slane %v5786_v52, 3  ;;  %v5791_v21 = vrot.slane %v5789_v33, 4 }
 0x3c0   : > { %11845 = vmatmul.mubr.bf16.gmra.mrb[24].mxu1 %v6093_v9  ;;  %v5582_v9 = vrot.slane %v5546_v34, 7  ;;  %v12846_v34 = vld [vmem:[%s15399_s2 + $0x90] sm:$0xff]   ;;  %v5792_v43 = vor.u32 %v5791_v21, %v5788_v56 }
 0x3c1   : > { %11848 = vmatprep.mubr.bf16.mxu1 %v6096_v59  ;;  %v5724_v59 = vor.u32 %v5723_v58, %v5720_v11  ;;  %v5680_v11 = vld [vmem:[#allocation2 + $0x60] sm:$0xf8]  ;;  %v5779_v58 = vrot.slane %v5777_v17, 3 }
 0x3c2   : > { %v5627_v57 = vsel %vm13177_vm6, %v5582_v9, %v5626_v35  ;;  %v5803_v63 = vshrl.u32 %v5680_v11, 16  ;;  %v5806_v47 = vshll.u32 %v5680_v11, 16  ;;  %v5811_v35 = vshrl.u32 %v14237_v51, 16  ;;  %v12848_v17 = vld [vmem:[%s15399_s2 + $0xa0] sm:$0xff]  }
 0x3c3   : > { %5628 = vst [vmem:[#allocation2 + $0x48] sm:$0x10] %v5627_v57  ;;  %v5733_v7 = vsel %vm514_vm4, %v5724_v59, %v5732_v32  ;;  %v5783_v9 = vor.u32 %v5782_v44, %v5779_v58  ;;  %v5814_v59 = vshll.u32 %v14237_v51, 16  ;;  %v5682_v32 = vld [vmem:[#allocation2 + $0x70] sm:$0xf8]  ;;  %v5845_v11 = vshrl.u32 %v14263_v22, 16 }
 0x3c4   : > { %v5805_v5 = vrot.slane %v5803_v63, 3  ;;  %v5808_v6 = vrot.slane %v5806_v47, 4  ;;  %v5638_v51 = vld [vmem:[#allocation2 + $0x88] sm:$0x10]  ;;  %v5684_v57 = vld [vmem:[#allocation2 + $0x80] sm:$0xf8] }
 0x3c5   : > { %v5813_v0 = vrot.slane %v5811_v35, 3  ;;  %v5820_v31 = vshrl.u32 %v5682_v32, 16  ;;  %v5848_v58 = vshll.u32 %v14263_v22, 16  ;;  %v12849_v44 = vld [vmem:[%s15399_s2 + $0xa8] sm:$0xff]   ;;  %v5686_v47 = vld [vmem:[#allocation2 + $0x90] sm:$0xf8] }
 0x3c6   : > { %v5809_v42 = vor.u32 %v5808_v6, %v5805_v5  ;;  %v5847_v35 = vrot.slane %v5845_v11, 3  ;;  %v5854_v56 = vshrl.u32 %v5686_v47, 16  ;;  %v5857_v21 = vshll.u32 %v5686_v47, 16 }
 0x3c7   : > { %v5896_v47 = vshrl.u32 %v14292_v60, 16 }
 0x3c8   : > { %11849 = vmatmul.mubr.bf16.gmra.mrb[28].mxu1 %v6099_v26  ;;  %v5765_v26 = vrot.slane %v5763_v45, 4  ;;  %v5799_v45 = vrot.slane %v5797_v37, 4  ;;  %v5688_v37 = vld [vmem:[#allocation2 + $0xa0] sm:$0xf8] }
 0x3c9   : > { %11868 = vmatprep.mubr.bf16.mxu1 %v5716_v54  ;;  %v5633_v54 = vsel %vm13177_vm6, %v5584_v61, %v5632_v4  ;;  %v5837_v61 = vshrl.u32 %v5684_v57, 16  ;;  %v5840_v4 = vshll.u32 %v5684_v57, 16  ;;  %v5871_v6 = vshrl.u32 %v5688_v37, 16 }
 0x3ca   : > { %5634 = vst [vmem:[#allocation2 + $0x68] sm:$0x10] %v5633_v54  ;;  %v5766_v20 = vor.u32 %v5765_v26, %v5762_v3  ;;  %v5641_v3 = vld [vmem:[#allocation2 + $0x98] sm:$0x10]  ;;  %v5644_v54 = vld [vmem:[#allocation2 + $0xa8] sm:$0x10] }
 0x3cb   : > { %v5842_v63 = vrot.slane %v5840_v4, 4  ;;  %v5865_v57 = vshll.u32 %v14277_v10, 16 }
 0x3cc   : > { %v5767_v25 = vsel %vm514_vm4, %v5758_v28, %v5766_v20  ;;  %v5822_v28 = vrot.slane %v5820_v31, 3  ;;  %v5830_v20 = vrot.slane %v5828_v15, 3  ;;  %v12851_v31 = vld [vmem:[%s15399_s2 + $0xb8] sm:$0xff]  }
 0x3cd   : > { %v5867_v50 = vrot.slane %v5865_v57, 4 }
 0x3d0   : > { %11869 = vmatmul.mubr.bf16.vlgmr.msra.gmra.mrb[0].mxu1 %v5733_v7  ;;  %v5823_v7 = vshll.u32 %v5682_v32, 16  ;;  %v5874_v32 = vshll.u32 %v5688_v37, 16  ;;  %v5916_v37 = vshll.u32 %v14297_v24, 16 }
 0x3d1   : > { %11872 = vmatprep.mubr.bf16.mxu1 %v5750_v30  ;;  %11901 = vmatpush3.bf16.msra.mxu1 %v14284_v16  ;;  %v5775_v16 = vor.u32 %v5774_v23, %v5771_v62  ;;  %v5639_v30 = vsel %vm13177_vm6, %v5586_v39, %v5638_v51  ;;  %v5552_v62 = vld [vmem:[#allocation2 + $0xa8] sm:$0x8]  ;;  %v5800_v23 = vor.u32 %v5799_v45, %v5796_v12  ;;  %v5862_v45 = vshrl.u32 %v14277_v10, 16 }
 0x3d2   : > { %11902 = vmatprep.subr.bf16.mxu1 %v12845_v14  ;;  %5640 = vst [vmem:[#allocation2 + $0x88] sm:$0x10] %v5639_v30  ;;  %v5825_v52 = vrot.slane %v5823_v7, 4  ;;  %v5588_v46 = vrot.slane %v5552_v62, 7  ;;  %v5834_v12 = vor.u32 %v5833_v19, %v5830_v20  ;;  %v5648_v39 = vsel %vm13177_vm6, %v5589_v2, %v5647_v8  ;;  %v5690_v62 = vld [vmem:[#allocation2 + $0xb0] sm:$0xf8] }
 0x3d3   : > { %v5784_v13 = vsel %vm514_vm4, %v5775_v16, %v5783_v9  ;;  %v5801_v18 = vsel %vm514_vm4, %v5792_v43, %v5800_v23  ;;  %v5839_v16 = vrot.slane %v5837_v61, 3  ;;  %v5554_v9 = vld [vmem:[#allocation2 + $0xc8] sm:$0x8]  ;;  %v5882_v43 = vshll.u32 %v14279_v36, 16  ;;  %5649 = vst [vmem:[#allocation2 + $0xb8] sm:$0x10] %v5648_v39 }
 0x3d4   : > { %v5645_v49 = vsel %vm13177_vm6, %v5588_v46, %v5644_v54  ;;  %v5590_v51 = vrot.slane %v5554_v9, 7  ;;  %v5653_v61 = vld [vmem:[#allocation2 + $0xd8] sm:$0x10]  ;;  %v5873_v30 = vrot.slane %v5871_v6, 3  ;;  %v5864_v15 = vrot.slane %v5862_v45, 3 }
 0x3d5   : > { %11903 = vmatpush3.bf16.msra.mxu1 %v12845_v14  ;;  %v5816_v14 = vrot.slane %v5814_v59, 4  ;;  %v5850_v59 = vrot.slane %v5848_v58, 4  ;;  %5646 = vst [vmem:[#allocation2 + $0xa8] sm:$0x10] %v5645_v49  ;;  %v5843_v5 = vor.u32 %v5842_v63, %v5839_v16  ;;  %v5884_v11 = vrot.slane %v5882_v43, 4  ;;  %v14407_v58 = vld [vmem:[%s15399_s2 + $0xc0] sm:$0xff]  }
 0x3d6   : > { %11904 = vmatprep.subr.bf16.mxu1 %v12846_v34  ;;  %v5656_v16 = vld [vmem:[#allocation2 + $0xe8] sm:$0x10]  ;;  %v5868_v63 = vor.u32 %v5867_v50, %v5864_v15  ;;  %v5913_v19 = vshrl.u32 %v14297_v24, 16  ;;  %v5696_v24 = vld [vmem:[#allocation2 + $0xe0] sm:$0xf8]  ;;  %v5930_v39 = vshrl.u32 %v14309_v1, 16 }
 0x3d7   : > { %v5817_v26 = vor.u32 %v5816_v14, %v5813_v0  ;;  %v5555_v0 = vld [vmem:[#allocation2 + $0xd8] sm:$0x8]  ;;  %v5851_v14 = vor.u32 %v5850_v59, %v5847_v35  ;;  %v5942_v45 = vshll.u32 %v5696_v24, 16  ;;  %v5950_v43 = vshll.u32 %v14311_v40, 16 }
 0x3d8   : > { %11873 = vmatmul.mubr.bf16.gmra.mrb[4].mxu1 %v5767_v25  ;;  %v5826_v25 = vor.u32 %v5825_v52, %v5822_v28  ;;  %v5591_v23 = vrot.slane %v5555_v0, 7  ;;  %v5891_v28 = vshll.u32 %v5690_v62, 16  ;;  %v5915_v2 = vrot.slane %v5913_v19, 3 }
 0x3d9   : > { %11876 = vmatprep.mubr.bf16.mxu1 %v5784_v13  ;;  %11905 = vmatpush3.bf16.msra.mxu1 %v12846_v34  ;;  %v5587_v34 = vrot.slane %v5551_v55, 7  ;;  %v5818_v33 = vsel %vm514_vm4, %v5809_v42, %v5817_v26  ;;  %v5650_v13 = vld [vmem:[#allocation2 + $0xc8] sm:$0x10]  ;;  %v5856_v55 = vrot.slane %v5854_v56, 3  ;;  %v5859_v42 = vrot.slane %v5857_v21, 4 }
 0x3da   : > { %11906 = vmatprep.subr.bf16.mxu1 %v12847_v48  ;;  %v5651_v7 = vsel %vm13177_vm6, %v5590_v51, %v5650_v13  ;;  %v5835_v10 = vsel %vm514_vm4, %v5826_v25, %v5834_v12  ;;  %v5852_v4 = vsel %vm514_vm4, %v5843_v5, %v5851_v14  ;;  %v5893_v35 = vrot.slane %v5891_v28, 4  ;;  %v5694_v25 = vld [vmem:[#allocation2 + $0xd0] sm:$0xf8] }
 0x3db   : > { %v5642_v22 = vsel %vm13177_vm6, %v5587_v34, %v5641_v3  ;;  %5652 = vst [vmem:[#allocation2 + $0xc8] sm:$0x10] %v5651_v7  ;;  %v5692_v3 = vld [vmem:[#allocation2 + $0xc0] sm:$0xf8]  ;;  %v5556_v34 = vld [vmem:[#allocation2 + $0xe8] sm:$0x8]  ;;  %v5860_v54 = vor.u32 %v5859_v42, %v5856_v55 }
 0x3dc   : > { %5643 = vst [vmem:[#allocation2 + $0x98] sm:$0x10] %v5642_v22  ;;  %v5905_v46 = vshrl.u32 %v5692_v3, 16  ;;  %v5899_v22 = vshll.u32 %v14292_v60, 16  ;;  %v5592_v27 = vrot.slane %v5556_v34, 7  ;;  %v5898_v56 = vrot.slane %v5896_v47, 3 }
 0x3dd   : > { %11907 = vmatpush3.bf16.msra.mxu1 %v12847_v48  ;;  %v12850_v48 = vld [vmem:[%s15399_s2 + $0xb0] sm:$0xff]   ;;  %v5869_v49 = vsel %vm514_vm4, %v5860_v54, %v5868_v63  ;;  %v5918_v13 = vrot.slane %v5916_v37, 4  ;;  %v5922_v6 = vshrl.u32 %v5694_v25, 16  ;;  %v5939_v12 = vshrl.u32 %v5696_v24, 16  ;;  %v6553_v37 = vld [vmem:[#allocation2 + $0x28] sm:$0x1f] }
 0x3de   : > { %11908 = vmatprep.subr.bf16.mxu1 %v12848_v17  ;;  %v5657_v59 = vsel %vm13177_vm6, %v5592_v27, %v5656_v16  ;;  %v5907_v60 = vrot.slane %v5905_v46, 3  ;;  %v5901_v21 = vrot.slane %v5899_v22, 4  ;;  %v5933_v0 = vshll.u32 %v14309_v1, 16  ;;  %v6552_v27 = vld [vmem:[#allocation2 + $0x18] sm:$0x1f] }
 0x3df   : > { %5658 = vst [vmem:[#allocation2 + $0xe8] sm:$0x10] %v5657_v59  ;;  %v5919_v14 = vor.u32 %v5918_v13, %v5915_v2  ;;  %v5924_v7 = vrot.slane %v5922_v6, 3  ;;  %v5941_v42 = vrot.slane %v5939_v12, 3  ;;  %v5964_v34 = vshrl.u32 %v14322_v41, 16 }
 0x3e0   : > { %11877 = vmatmul.mubr.bf16.gmra.mrb[8].mxu1 %v5801_v18  ;;  %v5888_v18 = vshrl.u32 %v5690_v62, 16  ;;  %v5902_v57 = vor.u32 %v5901_v21, %v5898_v56  ;;  %v6551_v62 = vld [vmem:[#allocation2 + $0x8] sm:$0x1f]  ;;  %v5967_v54 = vshll.u32 %v14322_v41, 16  ;;  %v6568_v28 = vshrl.u32 %v14206_v53, 16 }
 0x3e1   : > { %11880 = vmatprep.mubr.bf16.mxu1 %v5818_v33  ;;  %11909 = vmatpush3.bf16.msra.mxu1 %v12848_v17  ;;  %v5879_v17 = vshrl.u32 %v14279_v36, 16  ;;  %v5876_v36 = vrot.slane %v5874_v32, 4  ;;  %v5908_v33 = vshll.u32 %v5692_v3, 16  ;;  %v5925_v32 = vshll.u32 %v5694_v25, 16  ;;  %v12921_v2 = vld [vmem:[#allocation2 + $0x20] sm:$0xf0] }
 0x3e2   : > { %11910 = vmatprep.subr.bf16.mxu1 %v12849_v44  ;;  %v5890_v9 = vrot.slane %v5888_v18, 3  ;;  %v5969_v19 = vrot.slane %v5967_v54, 4  ;;  %v6570_v41 = vrot.slane %v6568_v28, 4  ;;  %v6596_v59 = vshll.u32 %v6552_v27, 16 }
 0x3e3   : > { %v5881_v26 = vrot.slane %v5879_v17, 3  ;;  %v5877_v52 = vor.u32 %v5876_v36, %v5873_v30  ;;  %v5910_v8 = vrot.slane %v5908_v33, 4  ;;  %v5947_v17 = vshrl.u32 %v14311_v40, 16 }
 0x3e4   : > { %v5894_v5 = vor.u32 %v5893_v35, %v5890_v9  ;;  %v5932_v30 = vrot.slane %v5930_v39, 3  ;;  %v5935_v36 = vrot.slane %v5933_v0, 4  ;;  %v6593_v35 = vshrl.u32 %v6552_v27, 16  ;;  %v6554_v39 = vld [vmem:[#allocation2 + $0x38] sm:$0x1f]  ;;  %v12854_v27 = vld [vmem:[%s15399_s2 + $0xd0] sm:$0xff]  }
 0x3e5   : > { %11911 = vmatpush3.bf16.msra.mxu1 %v12849_v44  ;;  %v5654_v44 = vsel %vm13177_vm6, %v5591_v23, %v5653_v61  ;;  %v5885_v20 = vor.u32 %v5884_v11, %v5881_v26  ;;  %v5911_v51 = vor.u32 %v5910_v8, %v5907_v60  ;;  %v5944_v61 = vrot.slane %v5942_v45, 4  ;;  %v12920_v8 = vld [vmem:[#allocation2 + $0x10] sm:$0xf0] }
 0x3e6   : > { %11912 = vmatprep.subr.bf16.mxu1 %v12850_v48  ;;  %5655 = vst [vmem:[#allocation2 + $0xd8] sm:$0x10] %v5654_v44  ;;  %v5949_v1 = vrot.slane %v5947_v17, 3  ;;  %v5952_v23 = vrot.slane %v5950_v43, 4  ;;  %v6576_v26 = vshrl.u32 %v6551_v62, 16  ;;  %v6579_v11 = vshll.u32 %v6551_v62, 16 }
 0x3e7   : > { %v5920_v55 = vsel %vm514_vm4, %v5911_v51, %v5919_v14  ;;  %v5945_v40 = vor.u32 %v5944_v61, %v5941_v42  ;;  %v5936_v44 = vor.u32 %v5935_v36, %v5932_v30  ;;  %v6613_v60 = vshll.u32 %v6553_v37, 16  ;;  %v6555_v17 = vld [vmem:[#allocation2 + $0x48] sm:$0x1f]  ;;  %v5412_v30 = vld [vmem:[#allocation2 + $0xf0] sm:$0xf0] }
 0x3e8   : > { %11881 = vmatmul.mubr.bf16.gmra.mrb[12].mxu1 %v5835_v10  ;;  %v5927_v10 = vrot.slane %v5925_v32, 4  ;;  %v5953_v18 = vor.u32 %v5952_v23, %v5949_v1  ;;  %v6578_v47 = vrot.slane %v6576_v26, 4  ;;  %v6581_v22 = vrot.slane %v6579_v11, 5  ;;  %v12922_v62 = vld [vmem:[#allocation2 + $0x30] sm:$0xf0] }
 0x3e9   : > { %11884 = vmatprep.mubr.bf16.mxu1 %v5852_v4  ;;  %11913 = vmatpush3.bf16.msra.mxu1 %v12850_v48  ;;  %v5886_v48 = vsel %vm514_vm4, %v5877_v52, %v5885_v20  ;;  %v5698_v4 = vld [vmem:[#allocation2 + $0xf0] sm:$0xf8]  ;;  %v6571_v52 = vshll.u32 %v14206_v53, 16  ;;  %v5966_v20 = vrot.slane %v5964_v34, 3  ;;  %v6585_v25 = vshrl.u32 %v12920_v8, 16 }
 0x3ea   : > { %11914 = vmatprep.subr.bf16.mxu1 %v12851_v31  ;;  %v5928_v15 = vor.u32 %v5927_v10, %v5924_v7  ;;  %v5956_v50 = vshrl.u32 %v5698_v4, 16  ;;  %v5959_v3 = vshll.u32 %v5698_v4, 16  ;;  %v5954_v63 = vsel %vm514_vm4, %v5945_v40, %v5953_v18  ;;  %5414 = vst [vmem:[#allocation2 + $0x110] sm:$0xf0] %v5412_v30  ;;  %v12923_v40 = vld [vmem:[#allocation2 + $0x40] sm:$0xf0] }
 0x3eb   : > { %v6582_v53 = vor.u32 %v6581_v22, %v6578_v47  ;;  %v6588_v56 = vshll.u32 %v12920_v8, 16  ;;  %v5970_v21 = vor.u32 %v5969_v19, %v5966_v20  ;;  %v6602_v13 = vshrl.u32 %v12921_v2, 16 }
 0x3ec   : > { %v5937_v46 = vsel %vm514_vm4, %v5928_v15, %v5936_v44  ;;  %v5958_v33 = vrot.slane %v5956_v50, 3  ;;  %v5961_v16 = vrot.slane %v5959_v3, 4  ;;  %v6595_v32 = vrot.slane %v6593_v35, 4  ;;  %v5413_v15 = vld [vmem:[#allocation2 + $0xf8] sm:$0xf]  ;;  %v12853_v3 = vld [vmem:[%s15399_s2 + $0xc8] sm:$0xff]  }
 0x3ed   : > { %11915 = vmatpush3.bf16.msra.mxu1 %v12851_v31  ;;  %v5903_v31 = vsel %vm514_vm4, %v5894_v5, %v5902_v57  ;;  %v6605_v5 = vshll.u32 %v12921_v2, 16  ;;  %v6598_v51 = vrot.slane %v6596_v59, 5  ;;  %v6615_v57 = vrot.slane %v6613_v60, 5  ;;  %5415 = vst [vmem:[#allocation2 + $0x118] sm:$0xf] %v5413_v15 }
 0x3ee   : > { %11948 = vmatprep.subr.bf16.mxu1 %v14407_v58  ;;  %v5962_v9 = vor.u32 %v5961_v16, %v5958_v33  ;;  %v6587_v0 = vrot.slane %v6585_v25, 4  ;;  %v6590_v14 = vrot.slane %v6588_v56, 5  ;;  %v6604_v43 = vrot.slane %v6602_v13, 4  ;;  %v12924_v59 = vld [vmem:[#allocation2 + $0x50] sm:$0xf0]  ;;  %v12855_v56 = vld [vmem:[%s15399_s2 + $0xd8] sm:$0xff]  }
 0x3ef   : > { %v6599_v7 = vor.u32 %v6598_v51, %v6595_v32  ;;  %v6627_v10 = vshrl.u32 %v6554_v39, 16  ;;  %v6644_v61 = vshrl.u32 %v6555_v17, 16  ;;  %v6647_v4 = vshll.u32 %v6555_v17, 16  ;;  %v12925_v60 = vld [vmem:[#allocation2 + $0x60] sm:$0xf0] }
 0x3f0   : > { %11885 = vmatmul.mubr.bf16.gmra.mrb[16].mxu1 %v5869_v49  ;;  %v6573_v49 = vrot.slane %v6571_v52, 5  ;;  %v5971_v6 = vsel %vm514_vm4, %v5962_v9, %v5970_v21  ;;  %v6591_v36 = vor.u32 %v6590_v14, %v6587_v0  ;;  %v6619_v1 = vshrl.u32 %v12922_v62, 16  ;;  %v6558_v32 = vld [vmem:[#allocation2 + $0x78] sm:$0x1f]  ;;  %v12856_v0 = vld [vmem:[%s15399_s2 + $0xe0] sm:$0xff]  }
 0x3f1   : > { %11888 = vmatprep.mubr.bf16.mxu1 %v5886_v48  ;;  %v6610_v48 = vshrl.u32 %v6553_v37, 16  ;;  %v6622_v23 = vshll.u32 %v12922_v62, 16  ;;  %v6636_v26 = vshrl.u32 %v12923_v40, 16  ;;  %v6639_v11 = vshll.u32 %v12923_v40, 16 }
 0x3f2   : > { %v6574_v24 = vor.u32 %v6573_v49, %v6570_v41  ;;  %v6600_v44 = vsel %vm1470_vm7, %v6591_v36, %v6599_v7  ;;  %v6629_v34 = vrot.slane %v6627_v10, 4  ;;  %v6646_v28 = vrot.slane %v6644_v61, 4  ;;  %v12926_v61 = vld [vmem:[#allocation2 + $0x70] sm:$0xf0]  ;;  %v5536_v36 = vld [vmem:[#allocation2 + $0x100] sm:$0x8] }
 0x3f3   : > { %v6612_v45 = vrot.slane %v6610_v48, 4  ;;  %v6649_v52 = vrot.slane %v6647_v4, 5  ;;  %v6621_v33 = vrot.slane %v6619_v1, 4  ;;  %v6624_v16 = vrot.slane %v6622_v23, 5  ;;  %v12927_v1 = vld [vmem:[#allocation2 + $0x80] sm:$0xf0] }
 0x3f4   : > { %v6583_v12 = vsel %vm1470_vm7, %v6574_v24, %v6582_v53  ;;  %v6638_v47 = vrot.slane %v6636_v26, 4  ;;  %v6641_v22 = vrot.slane %v6639_v11, 5  ;;  %v6656_v53 = vshll.u32 %v12924_v59, 16 }
 0x3f5   : > { %v6616_v42 = vor.u32 %v6615_v57, %v6612_v45  ;;  %v6650_v41 = vor.u32 %v6649_v52, %v6646_v28  ;;  %v6625_v35 = vor.u32 %v6624_v16, %v6621_v33  ;;  %v6670_v8 = vshrl.u32 %v12925_v60, 16  ;;  %v6559_v45 = vld [vmem:[#allocation2 + $0x88] sm:$0x1f] }
 0x3f6   : > { %v6642_v48 = vor.u32 %v6641_v22, %v6638_v47  ;;  %v6673_v25 = vshll.u32 %v12925_v60, 16  ;;  %v6695_v17 = vshrl.u32 %v6558_v32, 16  ;;  %v6712_v10 = vshrl.u32 %v6559_v45, 16  ;;  %v6561_v33 = vld [vmem:[#allocation2 + $0xa8] sm:$0x1f]  ;;  %v12858_v47 = vld [vmem:[%s15399_s2 + $0xf0] sm:$0xff]  }
 0x3f7   : > { %v6672_v57 = vrot.slane %v6670_v8, 4  ;;  %v6687_v4 = vshrl.u32 %v12926_v61, 16  ;;  %v6690_v30 = vshll.u32 %v12926_v61, 16  ;;  %v6704_v23 = vshrl.u32 %v12927_v1, 16  ;;  %v12859_v8 = vld [vmem:[%s15399_s2 + $0xf8] sm:$0xff]  }
 0x3f8   : > { %11889 = vmatmul.mubr.bf16.gmra.mrb[20].mxu1 %v5903_v31  ;;  %v6607_v31 = vrot.slane %v6605_v5, 5  ;;  %v6651_v13 = vsel %vm1470_vm7, %v6642_v48, %v6650_v41  ;;  %v6707_v15 = vshll.u32 %v12927_v1, 16  ;;  %v6697_v26 = vrot.slane %v6695_v17, 4 }
 0x3f9   : > { %11892 = vmatprep.mubr.bf16.mxu1 %v5920_v55  ;;  %v6630_v55 = vshll.u32 %v6554_v39, 16  ;;  %v6675_v39 = vrot.slane %v6673_v25, 5  ;;  %v6689_v52 = vrot.slane %v6687_v4, 4  ;;  %v6706_v16 = vrot.slane %v6704_v23, 4  ;;  %v12931_v4 = vld [vmem:[#allocation2 + $0xc0] sm:$0xf0] }
 0x3fa   : > { %v6608_v50 = vor.u32 %v6607_v31, %v6604_v43  ;;  %v6698_v43 = vshll.u32 %v6558_v32, 16  ;;  %v5432_v31 = vld [vmem:[#allocation2 + $0x100] sm:$0x10]  ;;  %v6749_v41 = vshll.u32 %v6561_v33, 16 }
 0x3fb   : > { %v6632_v54 = vrot.slane %v6630_v55, 5  ;;  %v6715_v55 = vshll.u32 %v6559_v45, 16  ;;  %v6676_v62 = vor.u32 %v6675_v39, %v6672_v57  ;;  %v14469_v57 = vld [vmem:[%s15399_s2 + $0x100] sm:$0xff]  }
 0x3fc   : > { %v6617_v18 = vsel %vm1470_vm7, %v6608_v50, %v6616_v42  ;;  %v12857_v50 = vld [vmem:[%s15399_s2 + $0xe8] sm:$0xff]   ;;  %v6700_v11 = vrot.slane %v6698_v43, 5 }
 0x3fd   : > { %v6633_v20 = vor.u32 %v6632_v54, %v6629_v34  ;;  %v6714_v34 = vrot.slane %v6712_v10, 4  ;;  %v6717_v54 = vrot.slane %v6715_v55, 5  ;;  %v12930_v10 = vld [vmem:[#allocation2 + $0xb0] sm:$0xf0] }
 0x3fe   : > { %v6701_v22 = vor.u32 %v6700_v11, %v6697_v26  ;;  %v6755_v55 = vshrl.u32 %v12930_v10, 16 }
 0x3ff   : > { %v6634_v21 = vsel %vm1470_vm7, %v6625_v35, %v6633_v20 }
 0x400   : > { %11893 = vmatmul.mubr.bf16.gmra.mrb[24].mxu1 %v5937_v46  ;;  %v6556_v46 = vld [vmem:[#allocation2 + $0x58] sm:$0x1f]  ;;  %v6757_v26 = vrot.slane %v6755_v55, 4 }
 0x401   : > { %11896 = vmatprep.mubr.bf16.mxu1 %v5954_v63  ;;  %v6557_v63 = vld [vmem:[#allocation2 + $0x68] sm:$0x1f]  ;;  %v6661_v19 = vshrl.u32 %v6556_v46, 16  ;;  %v6664_v37 = vshll.u32 %v6556_v46, 16  ;;  %v6692_v46 = vrot.slane %v6690_v30, 5  ;;  %v6772_v30 = vshrl.u32 %v12931_v4, 16 }
 0x402   : > { %v6678_v49 = vshrl.u32 %v6557_v63, 16  ;;  %v6681_v9 = vshll.u32 %v6557_v63, 16  ;;  %v6709_v63 = vrot.slane %v6707_v15, 5 }
 0x403   : > { %v6663_v24 = vrot.slane %v6661_v19, 4  ;;  %v6666_v2 = vrot.slane %v6664_v37, 5  ;;  %v6718_v19 = vor.u32 %v6717_v54, %v6714_v34  ;;  %v6746_v37 = vshrl.u32 %v6561_v33, 16 }
 0x404   : > { %v6680_v5 = vrot.slane %v6678_v49, 4  ;;  %v6693_v49 = vor.u32 %v6692_v46, %v6689_v52  ;;  %v6774_v34 = vrot.slane %v6772_v30, 4 }
 0x405   : > { %v6667_v14 = vor.u32 %v6666_v2, %v6663_v24  ;;  %v6748_v2 = vrot.slane %v6746_v37, 4 }
 0x406   : > { %v6702_v25 = vsel %vm1470_vm7, %v6693_v49, %v6701_v22 }
 0x408   : > { %11897 = vmatmul.mubr.bf16.gmra.mrb[28].mxu1 %v5971_v6  ;;  %v6683_v6 = vrot.slane %v6681_v9, 5  ;;  %v12928_v9 = vld [vmem:[#allocation2 + $0x90] sm:$0xf0] }
 0x409   : > { %11916 = vmatprep.mubr.bf16.mxu1 %v6583_v12  ;;  %v6658_v12 = vrot.slane %v6656_v53, 5  ;;  %v6721_v35 = vshrl.u32 %v12928_v9, 16  ;;  %v12929_v53 = vld [vmem:[#allocation2 + $0xa0] sm:$0xf0] }
 0x40a   : > { %v6684_v7 = vor.u32 %v6683_v6, %v6680_v5  ;;  %v6738_v48 = vshrl.u32 %v12929_v53, 16  ;;  %v6741_v60 = vshll.u32 %v12929_v53, 16  ;;  %v6562_v5 = vld [vmem:[#allocation2 + $0xb8] sm:$0x1f] }
 0x40b   : > { %v6723_v6 = vrot.slane %v6721_v35, 4 }
 0x40c   : > { %v6743_v45 = vrot.slane %v6741_v60, 5 }
 0x410   : > { %11917 = vmatmul.mubr.bf16.vlgmr.msra.gmra.mrb[0].mxu1 %v6600_v44  ;;  %v6685_v44 = vsel %vm1470_vm7, %v6676_v62, %v6684_v7 }
 0x411   : > { %11920 = vmatprep.mubr.bf16.mxu1 %v6617_v18  ;;  %11949 = vmatpush3.bf16.msra.mxu1 %v14407_v58  ;;  %v6653_v58 = vshrl.u32 %v12924_v59, 16  ;;  %v6560_v18 = vld [vmem:[#allocation2 + $0x98] sm:$0x1f]  ;;  %v6724_v59 = vshll.u32 %v12928_v9, 16 }
 0x412   : > { %11950 = vmatprep.subr.bf16.mxu1 %v12853_v3  ;;  %v6732_v20 = vshll.u32 %v6560_v18, 16 }
 0x413   : > { %v6655_v51 = vrot.slane %v6653_v58, 4  ;;  %v6710_v58 = vor.u32 %v6709_v63, %v6706_v16  ;;  %v6726_v32 = vrot.slane %v6724_v59, 5 }
 0x415   : > { %11951 = vmatpush3.bf16.msra.mxu1 %v12853_v3  ;;  %v6659_v42 = vor.u32 %v6658_v12, %v6655_v51  ;;  %v5468_v3 = vrot.slane %v5432_v31, 1  ;;  %v6719_v24 = vsel %vm1470_vm7, %v6710_v58, %v6718_v19  ;;  %v6563_v51 = vld [vmem:[#allocation2 + $0xc8] sm:$0x1f]  ;;  %v6740_v12 = vrot.slane %v6738_v48, 4  ;;  %v12933_v19 = vld [vmem:[#allocation2 + $0xe0] sm:$0xf0] }
 0x416   : > { %11952 = vmatprep.subr.bf16.mxu1 %v12854_v27  ;;  %v6780_v43 = vshrl.u32 %v6563_v51, 16  ;;  %v6783_v31 = vshll.u32 %v6563_v51, 16  ;;  %v6727_v7 = vor.u32 %v6726_v32, %v6723_v6  ;;  %v6806_v37 = vshrl.u32 %v12933_v19, 16  ;;  %v6566_v48 = vld [vmem:[#allocation2 + $0xf8] sm:$0x1f] }
 0x417   : > { %v6668_v40 = vsel %vm1470_vm7, %v6659_v42, %v6667_v14  ;;  %v5537_v28 = vsel %vm13068_vm3, %v5468_v3, %v5536_v36  ;;  %v6766_v14 = vshll.u32 %v6562_v5, 16  ;;  %v6758_v42 = vshll.u32 %v12930_v10, 16 }
 0x418   : > { %11921 = vmatmul.mubr.bf16.gmra.mrb[4].mxu1 %v6634_v21  ;;  %5538 = vst [vmem:[#allocation2 + $0x100] sm:$0x8] %v5537_v28  ;;  %v6734_v21 = vrot.slane %v6732_v20, 5  ;;  %v6744_v61 = vor.u32 %v6743_v45, %v6740_v12  ;;  %v6775_v36 = vshll.u32 %v12931_v4, 16  ;;  %v6785_v3 = vrot.slane %v6783_v31, 5 }
 0x419   : > { %11924 = vmatprep.mubr.bf16.mxu1 %v6651_v13  ;;  %11953 = vmatpush3.bf16.msra.mxu1 %v12854_v27  ;;  %v6729_v27 = vshrl.u32 %v6560_v18, 16  ;;  %v6751_v13 = vrot.slane %v6749_v41, 5  ;;  %v6768_v23 = vrot.slane %v6766_v14, 5  ;;  %v6760_v11 = vrot.slane %v6758_v42, 5  ;;  %v12934_v45 = vld [vmem:[#allocation2 + $0xf0] sm:$0xf0] }
 0x41a   : > { %11954 = vmatprep.subr.bf16.mxu1 %v12855_v56  ;;  %v6777_v54 = vrot.slane %v6775_v36, 5  ;;  %v6809_v41 = vshll.u32 %v12933_v19, 16  ;;  %v7115_v4 = vld [vmem:[#allocation2 + $0x20] sm:$0xf8] }
 0x41b   : > { %v6752_v17 = vor.u32 %v6751_v13, %v6748_v2  ;;  %v6761_v63 = vor.u32 %v6760_v11, %v6757_v26  ;;  %v6831_v2 = vshrl.u32 %v6566_v48, 16  ;;  %v6834_v13 = vshll.u32 %v6566_v48, 16  ;;  %v14484_v26 = vld [vmem:[#allocation2 + $0x38] sm:$0xf]  ;;  %v7119_v19 = vld [vmem:[#allocation2 + $0x40] sm:$0xf8] }
 0x41c   : > { %v6778_v20 = vor.u32 %v6777_v54, %v6774_v34  ;;  %v7200_v48 = vshll.u32 %v7119_v19, 16  ;;  %v7746_v38 = vrot.slane %v14484_v26, 4 }
 0x41d   : > { %11955 = vmatpush3.bf16.msra.mxu1 %v12855_v56  ;;  %v6731_v56 = vrot.slane %v6729_v27, 4  ;;  %v6753_v15 = vsel %vm1470_vm7, %v6744_v61, %v6752_v17  ;;  %v6836_v10 = vrot.slane %v6834_v13, 5 }
 0x41e   : > { %11956 = vmatprep.subr.bf16.mxu1 %v12856_v0 }
 0x41f   : > { %v6735_v39 = vor.u32 %v6734_v21, %v6731_v56  ;;  %v6808_v56 = vrot.slane %v6806_v37, 4  ;;  %v6811_v21 = vrot.slane %v6809_v41, 5 }
 0x420   : > { %11925 = vmatmul.mubr.bf16.gmra.mrb[8].mxu1 %v6668_v40  ;;  %v6564_v40 = vld [vmem:[#allocation2 + $0xd8] sm:$0x1f] }
 0x421   : > { %11928 = vmatprep.mubr.bf16.mxu1 %v6685_v44  ;;  %11957 = vmatpush3.bf16.msra.mxu1 %v12856_v0  ;;  %v6763_v0 = vshrl.u32 %v6562_v5, 16  ;;  %v6736_v62 = vsel %vm1470_vm7, %v6727_v7, %v6735_v39  ;;  %v6565_v44 = vld [vmem:[#allocation2 + $0xe8] sm:$0x1f]  ;;  %v6797_v28 = vshrl.u32 %v6564_v40, 16  ;;  %v6800_v52 = vshll.u32 %v6564_v40, 16 }
 0x422   : > { %11958 = vmatprep.subr.bf16.mxu1 %v12857_v50  ;;  %v6814_v33 = vshrl.u32 %v6565_v44, 16  ;;  %v6817_v16 = vshll.u32 %v6565_v44, 16  ;;  %v14476_v5 = vld [vmem:[#allocation2 + $0x18] sm:$0xf]  ;;  %v6823_v39 = vshrl.u32 %v12934_v45, 16  ;;  %v6812_v14 = vor.u32 %v6811_v21, %v6808_v56 }
 0x423   : > { %v6765_v1 = vrot.slane %v6763_v0, 4  ;;  %v6799_v9 = vrot.slane %v6797_v28, 4  ;;  %v6802_v35 = vrot.slane %v6800_v52, 5  ;;  %v6826_v0 = vshll.u32 %v12934_v45, 16 }
 0x424   : > { %v6816_v58 = vrot.slane %v6814_v33, 4  ;;  %v6819_v53 = vrot.slane %v6817_v16, 5  ;;  %v7154_v17 = vshrl.u32 %v14476_v5, 16  ;;  %v6833_v7 = vrot.slane %v6831_v2, 4 }
 0x425   : > { %11959 = vmatpush3.bf16.msra.mxu1 %v12857_v50  ;;  %v6782_v50 = vrot.slane %v6780_v43, 4  ;;  %v6769_v18 = vor.u32 %v6768_v23, %v6765_v1  ;;  %v7157_v43 = vshll.u32 %v14476_v5, 16  ;;  %v6825_v30 = vrot.slane %v6823_v39, 4 }
 0x426   : > { %11960 = vmatprep.subr.bf16.mxu1 %v12858_v47  ;;  %v6820_v6 = vor.u32 %v6819_v53, %v6816_v58  ;;  %v6828_v36 = vrot.slane %v6826_v0, 5  ;;  %v7156_v1 = vrot.slane %v7154_v17, 3  ;;  %v7166_v40 = vshll.u32 %v7115_v4, 16 }
 0x427   : > { %v6786_v46 = vor.u32 %v6785_v3, %v6782_v50  ;;  %v6770_v49 = vsel %vm1470_vm7, %v6761_v63, %v6769_v18  ;;  %v7159_v23 = vrot.slane %v7157_v43, 4  ;;  %v6837_v50 = vor.u32 %v6836_v10, %v6833_v7  ;;  %v7123_v43 = vld [vmem:[#allocation2 + $0x60] sm:$0xf8]  ;;  %v7125_v10 = vld [vmem:[#allocation2 + $0x70] sm:$0xf8] }
 0x428   : > { %11929 = vmatmul.mubr.bf16.gmra.mrb[12].mxu1 %v6702_v25  ;;  %v7113_v25 = vld [vmem:[#allocation2 + $0x10] sm:$0xf8]  ;;  %v6821_v55 = vsel %vm1470_vm7, %v6812_v14, %v6820_v6  ;;  %v7163_v3 = vshrl.u32 %v7115_v4, 16  ;;  %v6829_v54 = vor.u32 %v6828_v36, %v6825_v30  ;;  %v7191_v33 = vshll.u32 %v14484_v26, 16  ;;  %v12861_v6 = vld [vmem:[%s15399_s2 + $0x108] sm:$0xff]  }
 0x429   : > { %11932 = vmatprep.mubr.bf16.mxu1 %v6719_v24  ;;  %11961 = vmatpush3.bf16.msra.mxu1 %v12858_v47  ;;  %v12932_v47 = vld [vmem:[#allocation2 + $0xd0] sm:$0xf0]  ;;  %v6787_v59 = vsel %vm1470_vm7, %v6778_v20, %v6786_v46  ;;  %v6803_v24 = vor.u32 %v6802_v35, %v6799_v9  ;;  %v7146_v32 = vshrl.u32 %v7113_v25, 16  ;;  %v7149_v51 = vshll.u32 %v7113_v25, 16 }
 0x42a   : > { %11962 = vmatprep.subr.bf16.mxu1 %v12859_v8  ;;  %v6789_v22 = vshrl.u32 %v12932_v47, 16  ;;  %v6792_v27 = vshll.u32 %v12932_v47, 16  ;;  %v7160_v52 = vor.u32 %v7159_v23, %v7156_v1  ;;  %v7188_v46 = vshrl.u32 %v14484_v26, 16  ;;  %v12862_v4 = vld [vmem:[%s15399_s2 + $0x110] sm:$0xff]   ;;  %v14511_v1 = vld [vmem:[#allocation2 + $0x78] sm:$0xf] }
 0x42b   : > { %v7148_v42 = vrot.slane %v7146_v32, 3  ;;  %v7151_v61 = vrot.slane %v7149_v51, 4  ;;  %v6838_v16 = vsel %vm1470_vm7, %v6829_v54, %v6837_v50  ;;  %v7165_v63 = vrot.slane %v7163_v3, 3  ;;  %v5558_v3 = vld [vmem:[#allocation2 + $0x108] sm:$0x8] }
 0x42c   : > { %v6791_v60 = vrot.slane %v6789_v22, 4  ;;  %v7168_v47 = vrot.slane %v7166_v40, 4  ;;  %v7190_v9 = vrot.slane %v7188_v46, 3  ;;  %v7193_v35 = vrot.slane %v7191_v33, 4 }
 0x42d   : > { %11963 = vmatpush3.bf16.msra.mxu1 %v12859_v8  ;;  %v6794_v8 = vrot.slane %v6792_v27, 5  ;;  %v7152_v11 = vor.u32 %v7151_v61, %v7148_v42  ;;  %v7197_v53 = vshrl.u32 %v7119_v19, 16  ;;  %v7202_v39 = vrot.slane %v7200_v48, 4  ;;  %v14506_v61 = vld [vmem:[#allocation2 + $0x68] sm:$0xf] }
 0x42e   : > { %11996 = vmatprep.subr.bf16.mxu1 %v14469_v57  ;;  %v7169_v58 = vor.u32 %v7168_v47, %v7165_v63  ;;  %v7194_v13 = vor.u32 %v7193_v35, %v7190_v9  ;;  %v7231_v36 = vshrl.u32 %v7123_v43, 16  ;;  %v7248_v50 = vshrl.u32 %v7125_v10, 16 }
 0x42f   : > { %v6795_v12 = vor.u32 %v6794_v8, %v6791_v60  ;;  %v7161_v22 = vsel %vm514_vm4, %v7152_v11, %v7160_v52  ;;  %v14494_v60 = vld [vmem:[#allocation2 + $0x58] sm:$0xf]  ;;  %v7199_v45 = vrot.slane %v7197_v53, 3  ;;  %v7239_v11 = vshrl.u32 %v14506_v61, 16  ;;  %v5662_v52 = vld [vmem:[#allocation2 + $0x108] sm:$0x10] }
 0x430   : > { %11933 = vmatmul.mubr.bf16.gmra.mrb[16].mxu1 %v6736_v62  ;;  %v7117_v62 = vld [vmem:[#allocation2 + $0x30] sm:$0xf8]  ;;  %v7222_v32 = vshrl.u32 %v14494_v60, 16  ;;  %v7225_v51 = vshll.u32 %v14494_v60, 16  ;;  %v7256_v54 = vshrl.u32 %v14511_v1, 16  ;;  %v7233_v33 = vrot.slane %v7231_v36, 3 }
 0x431   : > { %11936 = vmatprep.mubr.bf16.mxu1 %v6753_v15  ;;  %v6804_v31 = vsel %vm1470_vm7, %v6795_v12, %v6803_v24  ;;  %v14482_v15 = vld [vmem:[#allocation2 + $0x28] sm:$0xf]  ;;  %v7180_v44 = vshrl.u32 %v7117_v62, 16  ;;  %v7183_v34 = vshll.u32 %v7117_v62, 16  ;;  %v7203_v30 = vor.u32 %v7202_v39, %v7199_v45  ;;  %v12864_v53 = vld [vmem:[%s15399_s2 + $0x120] sm:$0xff]  }
 0x432   : > { %v7171_v18 = vshrl.u32 %v14482_v15, 16  ;;  %v7174_v28 = vshll.u32 %v14482_v15, 16  ;;  %v7227_v42 = vrot.slane %v7225_v51, 4  ;;  %v7234_v62 = vshll.u32 %v7123_v43, 16  ;;  %v12865_v39 = vld [vmem:[%s15399_s2 + $0x128] sm:$0xff]  }
 0x433   : > { %v7182_v27 = vrot.slane %v7180_v44, 3  ;;  %v7185_v20 = vrot.slane %v7183_v34, 4  ;;  %v7242_v44 = vshll.u32 %v14506_v61, 16  ;;  %v5594_v63 = vrot.slane %v5558_v3, 7 }
 0x434   : > { %v7173_v37 = vrot.slane %v7171_v18, 3  ;;  %v7176_v41 = vrot.slane %v7174_v28, 4  ;;  %v7259_v18 = vshll.u32 %v14511_v1, 16  ;;  %v12863_v28 = vld [vmem:[%s15399_s2 + $0x118] sm:$0xff]   ;;  %v7241_v19 = vrot.slane %v7239_v11, 3 }
 0x435   : > { %v7186_v8 = vor.u32 %v7185_v20, %v7182_v27  ;;  %v7127_v20 = vld [vmem:[#allocation2 + $0x80] sm:$0xf8]  ;;  %v7258_v9 = vrot.slane %v7256_v54, 3 }
 0x436   : > { %v7177_v21 = vor.u32 %v7176_v41, %v7173_v37  ;;  %v7244_v37 = vrot.slane %v7242_v44, 4  ;;  %v7129_v41 = vld [vmem:[#allocation2 + $0x90] sm:$0xf8]  ;;  %v7261_v35 = vrot.slane %v7259_v18, 4 }
 0x437   : > { %v7195_v0 = vsel %vm514_vm4, %v7186_v8, %v7194_v13  ;;  %v7265_v8 = vshrl.u32 %v7127_v20, 16 }
 0x438   : > { %11937 = vmatmul.mubr.bf16.gmra.mrb[20].mxu1 %v6770_v49  ;;  %v7121_v49 = vld [vmem:[#allocation2 + $0x50] sm:$0xf8]  ;;  %v7178_v12 = vsel %vm514_vm4, %v7169_v58, %v7177_v21  ;;  %v14524_v58 = vld [vmem:[#allocation2 + $0x88] sm:$0xf]  ;;  %v7245_v13 = vor.u32 %v7244_v37, %v7241_v19  ;;  %v7262_v51 = vor.u32 %v7261_v35, %v7258_v9  ;;  %v7135_v37 = vld [vmem:[#allocation2 + $0xc0] sm:$0xf8] }
 0x439   : > { %11940 = vmatprep.mubr.bf16.mxu1 %v6787_v59  ;;  %v14492_v59 = vld [vmem:[#allocation2 + $0x48] sm:$0xf]  ;;  %v7214_v25 = vshrl.u32 %v7121_v49, 16  ;;  %v7217_v56 = vshll.u32 %v7121_v49, 16  ;;  %v5663_v49 = vsel %vm13177_vm6, %v5594_v63, %v5662_v52  ;;  %v7137_v9 = vld [vmem:[#allocation2 + $0xd0] sm:$0xf8] }
 0x43a   : > { %v7205_v24 = vshrl.u32 %v14492_v59, 16  ;;  %v7208_v2 = vshll.u32 %v14492_v59, 16  ;;  %5664 = vst [vmem:[#allocation2 + $0x108] sm:$0x10] %v5663_v49 }
 0x43b   : > { %v7216_v14 = vrot.slane %v7214_v25, 3  ;;  %v7219_v17 = vrot.slane %v7217_v56, 4  ;;  %v7268_v25 = vshll.u32 %v7127_v20, 16  ;;  %v14529_v56 = vld [vmem:[#allocation2 + $0x98] sm:$0xf] }
 0x43c   : > { %v7210_v7 = vrot.slane %v7208_v2, 4  ;;  %v7285_v2 = vshll.u32 %v7129_v41, 16  ;;  %v7293_v45 = vshll.u32 %v14529_v56, 16 }
 0x43d   : > { %v7220_v23 = vor.u32 %v7219_v17, %v7216_v14  ;;  %v7267_v14 = vrot.slane %v7265_v8, 3  ;;  %v7270_v17 = vrot.slane %v7268_v25, 4  ;;  %v14561_v8 = vld [vmem:[%s15399_s2 + $0x140] sm:$0xff]  }
 0x43e   : > { %v7295_v36 = vrot.slane %v7293_v45, 4 }
 0x440   : > { %11941 = vmatmul.mubr.bf16.gmra.mrb[24].mxu1 %v6804_v31  ;;  %v7207_v31 = vrot.slane %v7205_v24, 3  ;;  %v7282_v24 = vshrl.u32 %v7129_v41, 16 }
 0x441   : > { %11944 = vmatprep.mubr.bf16.mxu1 %v6821_v55  ;;  %v7224_v55 = vrot.slane %v7222_v32, 3  ;;  %v7276_v32 = vshll.u32 %v14524_v58, 16 }
 0x442   : > { %v7211_v40 = vor.u32 %v7210_v7, %v7207_v31  ;;  %v7284_v31 = vrot.slane %v7282_v24, 3  ;;  %v7287_v7 = vrot.slane %v7285_v2, 4  ;;  %v7336_v24 = vshll.u32 %v7135_v37, 16  ;;  %v14563_v2 = vld [vmem:[#allocation2 + $0xd8] sm:$0xf] }
 0x443   : > { %v7228_v34 = vor.u32 %v7227_v42, %v7224_v55  ;;  %v7278_v42 = vrot.slane %v7276_v32, 4  ;;  %v7353_v32 = vshll.u32 %v7137_v9, 16 }
 0x444   : > { %v7212_v46 = vsel %vm514_vm4, %v7203_v30, %v7211_v40  ;;  %v14545_v40 = vld [vmem:[#allocation2 + $0xb8] sm:$0xf]  ;;  %v7288_v11 = vor.u32 %v7287_v7, %v7284_v31  ;;  %v7338_v31 = vrot.slane %v7336_v24, 4 }
 0x445   : > { %v7229_v47 = vsel %vm514_vm4, %v7220_v23, %v7228_v34  ;;  %v12866_v23 = vld [vmem:[%s15399_s2 + $0x130] sm:$0xff]  }
 0x448   : > { %11945 = vmatmul.mubr.bf16.gmra.mrb[28].mxu1 %v6838_v16  ;;  %v7236_v16 = vrot.slane %v7234_v62, 4  ;;  %v14540_v62 = vld [vmem:[#allocation2 + $0xa8] sm:$0xf] }
 0x449   : > { %11964 = vmatprep.mubr.bf16.mxu1 %v7161_v22  ;;  %v7250_v22 = vrot.slane %v7248_v50, 3  ;;  %v7271_v50 = vor.u32 %v7270_v17, %v7267_v14  ;;  %v7307_v18 = vshrl.u32 %v14540_v62, 16  ;;  %v7361_v14 = vshll.u32 %v14563_v2, 16 }
 0x44a   : > { %v7237_v48 = vor.u32 %v7236_v16, %v7233_v33  ;;  %v7327_v33 = vshll.u32 %v14545_v40, 16  ;;  %v12867_v16 = vld [vmem:[%s15399_s2 + $0x138] sm:$0xff]  }
 0x44b   : > { %v7309_v41 = vrot.slane %v7307_v18, 3 }
 0x450   : > { %11965 = vmatmul.mubr.bf16.vlgmr.msra.gmra.mrb[0].mxu1 %v7178_v12  ;;  %v7290_v12 = vshrl.u32 %v14529_v56, 16 }
 0x451   : > { %11968 = vmatprep.mubr.bf16.mxu1 %v7195_v0  ;;  %11997 = vmatpush3.bf16.msra.mxu1 %v14469_v57  ;;  %v7251_v57 = vshll.u32 %v7125_v10, 16  ;;  %v7246_v0 = vsel %vm514_vm4, %v7237_v48, %v7245_v13  ;;  %v7131_v10 = vld [vmem:[#allocation2 + $0xa0] sm:$0xf8]  ;;  %v14556_v48 = vld [vmem:[#allocation2 + $0xc8] sm:$0xf] }
 0x452   : > { %11998 = vmatprep.subr.bf16.mxu1 %v12861_v6  ;;  %v7292_v30 = vrot.slane %v7290_v12, 3  ;;  %v7302_v3 = vshll.u32 %v7131_v10, 16  ;;  %v7341_v12 = vshrl.u32 %v14556_v48, 16  ;;  %v7344_v45 = vshll.u32 %v14556_v48, 16 }
 0x453   : > { %v7253_v27 = vrot.slane %v7251_v57, 4  ;;  %v7299_v57 = vshrl.u32 %v7131_v10, 16 }
 0x454   : > { %v7296_v52 = vor.u32 %v7295_v36, %v7292_v30  ;;  %v7346_v30 = vrot.slane %v7344_v45, 4  ;;  %v7141_v36 = vld [vmem:[#allocation2 + $0xf0] sm:$0xf8] }
 0x455   : > { %11999 = vmatpush3.bf16.msra.mxu1 %v12861_v6  ;;  %v7254_v21 = vor.u32 %v7253_v27, %v7250_v22  ;;  %v7273_v6 = vshrl.u32 %v14524_v58, 16  ;;  %v7304_v22 = vrot.slane %v7302_v3, 4  ;;  %v7384_v18 = vshrl.u32 %v7141_v36, 16 }
 0x456   : > { %12000 = vmatprep.subr.bf16.mxu1 %v12862_v4  ;;  %v7297_v27 = vsel %vm514_vm4, %v7288_v11, %v7296_v52 }
 0x457   : > { %v7263_v43 = vsel %vm514_vm4, %v7254_v21, %v7262_v51  ;;  %v7275_v55 = vrot.slane %v7273_v6, 3  ;;  %v7333_v21 = vshrl.u32 %v7135_v37, 16  ;;  %v7350_v6 = vshrl.u32 %v7137_v9, 16 }
 0x458   : > { %11969 = vmatmul.mubr.bf16.gmra.mrb[4].mxu1 %v7212_v46  ;;  %v7324_v46 = vshrl.u32 %v14545_v40, 16  ;;  %v7386_v37 = vrot.slane %v7384_v18, 3  ;;  %v14598_v18 = vld [vmem:[#allocation2 + $0x30] sm:$0xf0] }
 0x459   : > { %11972 = vmatprep.mubr.bf16.mxu1 %v7229_v47  ;;  %12001 = vmatpush3.bf16.msra.mxu1 %v12862_v4  ;;  %v7133_v4 = vld [vmem:[#allocation2 + $0xb0] sm:$0xf8]  ;;  %v7279_v54 = vor.u32 %v7278_v42, %v7275_v55  ;;  %v7301_v47 = vrot.slane %v7299_v57, 3  ;;  %v7352_v10 = vrot.slane %v7350_v6, 3  ;;  %v7355_v55 = vrot.slane %v7353_v32, 4 }
 0x45a   : > { %12002 = vmatprep.subr.bf16.mxu1 %v12863_v28  ;;  %v7316_v44 = vshrl.u32 %v7133_v4, 16  ;;  %v7319_v34 = vshll.u32 %v7133_v4, 16  ;;  %v7326_v35 = vrot.slane %v7324_v46, 3  ;;  %v7139_v42 = vld [vmem:[#allocation2 + $0xe0] sm:$0xf8]  ;;  %v7343_v4 = vrot.slane %v7341_v12, 3 }
 0x45b   : > { %v7280_v63 = vsel %vm514_vm4, %v7271_v50, %v7279_v54  ;;  %v7305_v25 = vor.u32 %v7304_v22, %v7301_v47  ;;  %v7363_v50 = vrot.slane %v7361_v14, 4  ;;  %v14572_v57 = vld [vmem:[#allocation2 + $0xe8] sm:$0xf]  ;;  %v7367_v11 = vshrl.u32 %v7139_v42, 16 }
 0x45c   : > { %v7318_v20 = vrot.slane %v7316_v44, 3  ;;  %v7321_v19 = vrot.slane %v7319_v34, 4  ;;  %v7370_v44 = vshll.u32 %v7139_v42, 16  ;;  %v14574_v34 = vld [vmem:[#allocation2 + $0xf8] sm:$0xf]  ;;  %v7356_v54 = vor.u32 %v7355_v55, %v7352_v10 }
 0x45d   : > { %12003 = vmatpush3.bf16.msra.mxu1 %v12863_v28  ;;  %v7310_v28 = vshll.u32 %v14540_v62, 16  ;;  %v7347_v52 = vor.u32 %v7346_v30, %v7343_v4  ;;  %v7375_v46 = vshrl.u32 %v14572_v57, 16  ;;  %v7395_v47 = vshll.u32 %v14574_v34, 16  ;;  %v14588_v55 = vld [vmem:[#allocation2 + $0x10] sm:$0xf0] }
 0x45e   : > { %12004 = vmatprep.subr.bf16.mxu1 %v12864_v53  ;;  %v7322_v13 = vor.u32 %v7321_v19, %v7318_v20  ;;  %v7372_v20 = vrot.slane %v7370_v44, 4  ;;  %v5539_v42 = vld [vmem:[#allocation2 + $0x110] sm:$0x8] }
 0x45f   : > { %v7312_v49 = vrot.slane %v7310_v28, 4  ;;  %v7387_v28 = vshll.u32 %v7141_v36, 16  ;;  %v7377_v9 = vrot.slane %v7375_v46, 3  ;;  %v7739_v36 = vrot.slane %v14588_v55, 4  ;;  %v12869_v46 = vld [vmem:[%s15399_s2 + $0x148] sm:$0xff]  }
 0x460   : > { %11973 = vmatmul.mubr.bf16.gmra.mrb[8].mxu1 %v7246_v0  ;;  %v7358_v0 = vshrl.u32 %v14563_v2, 16 }
 0x461   : > { %11976 = vmatprep.mubr.bf16.mxu1 %v7263_v43  ;;  %12005 = vmatpush3.bf16.msra.mxu1 %v12864_v53  ;;  %v7329_v53 = vrot.slane %v7327_v33, 4  ;;  %v7313_v51 = vor.u32 %v7312_v49, %v7309_v41  ;;  %v7335_v43 = vrot.slane %v7333_v21, 3  ;;  %v7378_v33 = vshll.u32 %v14572_v57, 16  ;;  %v7143_v49 = vld [vmem:[#allocation2 + $0x100] sm:$0xf8] }
 0x462   : > { %12006 = vmatprep.subr.bf16.mxu1 %v12865_v39  ;;  %v7389_v41 = vrot.slane %v7387_v28, 4  ;;  %v14582_v21 = vld [vmem:[#allocation2 + $0x108] sm:$0xf]  ;;  %v7404_v6 = vshll.u32 %v7143_v49, 16 }
 0x463   : > { %v7314_v17 = vsel %vm514_vm4, %v7305_v25, %v7313_v51  ;;  %v7339_v3 = vor.u32 %v7338_v31, %v7335_v43  ;;  %v7397_v25 = vrot.slane %v7395_v47, 4  ;;  %v7409_v12 = vshrl.u32 %v14582_v21, 16  ;;  %v5433_v31 = vld [vmem:[#allocation2 + $0x110] sm:$0x10] }
 0x464   : > { %v7390_v32 = vor.u32 %v7389_v41, %v7386_v37  ;;  %v7412_v45 = vshll.u32 %v14582_v21, 16  ;;  %v5469_v30 = vrot.slane %v5433_v31, 1  ;;  %v14612_v47 = vld [vmem:[#allocation2 + $0x50] sm:$0xf0]  ;;  %v14626_v41 = vld [vmem:[#allocation2 + $0x60] sm:$0xf0] }
 0x465   : > { %12007 = vmatpush3.bf16.msra.mxu1 %v12865_v39  ;;  %v7330_v39 = vor.u32 %v7329_v53, %v7326_v35  ;;  %v7348_v22 = vsel %vm514_vm4, %v7339_v3, %v7347_v52  ;;  %v7380_v35 = vrot.slane %v7378_v33, 4  ;;  %v7743_v52 = vrot.slane %v14482_v15, 4  ;;  %v12870_v15 = vld [vmem:[%s15399_s2 + $0x150] sm:$0xff]  }
 0x466   : > { %12008 = vmatprep.subr.bf16.mxu1 %v12866_v23  ;;  %v7414_v10 = vrot.slane %v7412_v45, 4  ;;  %v5540_v3 = vsel %vm13068_vm3, %v5469_v30, %v5539_v42  ;;  %v7764_v45 = vrot.slane %v14529_v56, 4  ;;  %v7767_v31 = vrot.slane %v14540_v62, 4  ;;  %v14674_v30 = vld [vmem:[#allocation2 + $0xc0] sm:$0xf0] }
 0x467   : > { %v7331_v7 = vsel %vm514_vm4, %v7322_v13, %v7330_v39  ;;  %v7401_v13 = vshrl.u32 %v7143_v49, 16  ;;  %v7381_v51 = vor.u32 %v7380_v35, %v7377_v9  ;;  %5541 = vst [vmem:[#allocation2 + $0x110] sm:$0x8] %v5540_v3  ;;  %v14628_v49 = vld [vmem:[#allocation2 + $0x70] sm:$0xf0]  ;;  %v7755_v9 = vrot.slane %v14506_v61, 4 }
 0x468   : > { %11977 = vmatmul.mubr.bf16.gmra.mrb[12].mxu1 %v7280_v63  ;;  %v7392_v63 = vshrl.u32 %v14574_v34, 16  ;;  %v7757_v35 = vrot.slane %v14628_v49, 4  ;;  %v12874_v61 = vld [vmem:[%s15399_s2 + $0x170] sm:$0xff]   ;;  %v7773_v62 = vrot.slane %v14556_v48, 4  ;;  %v7779_v48 = vrot.slane %v14572_v57, 4 }
 0x469   : > { %11980 = vmatprep.mubr.bf16.mxu1 %v7297_v27  ;;  %12009 = vmatpush3.bf16.msra.mxu1 %v12866_v23  ;;  %v7360_v23 = vrot.slane %v7358_v0, 3  ;;  %v7369_v27 = vrot.slane %v7367_v11, 3  ;;  %v7403_v14 = vrot.slane %v7401_v13, 3  ;;  %v7785_v29 = vrot.slane %v14582_v21, 4 }
 0x46a   : > { %12010 = vmatprep.subr.bf16.mxu1 %v12867_v16  ;;  %v7394_v53 = vrot.slane %v7392_v63, 3  ;;  %v14609_v63 = vld [vmem:[#allocation2 + $0x40] sm:$0xf0] }
 0x46b   : > { %v7373_v24 = vor.u32 %v7372_v20, %v7369_v27  ;;  %v7748_v26 = vrot.slane %v14609_v63, 4  ;;  %v7751_v27 = vrot.slane %v14612_v47, 4  ;;  %v7752_v20 = vrot.slane %v14494_v60, 4 }
 0x46c   : > { %v7398_v39 = vor.u32 %v7397_v25, %v7394_v53  ;;  %v7754_v60 = vrot.slane %v14626_v41, 4  ;;  %v7758_v53 = vrot.slane %v14511_v1, 4  ;;  %v12873_v25 = vld [vmem:[%s15399_s2 + $0x168] sm:$0xff]  }
 0x46d   : > { %12011 = vmatpush3.bf16.msra.mxu1 %v12867_v16  ;;  %v7364_v16 = vor.u32 %v7363_v50, %v7360_v23  ;;  %v7382_v0 = vsel %vm514_vm4, %v7373_v24, %v7381_v51  ;;  %v7740_v23 = vrot.slane %v14476_v5, 4  ;;  %v7745_v5 = vrot.slane %v14598_v18, 4 }
 0x46e   : > { %12044 = vmatprep.subr.bf16.mxu1 %v14561_v8  ;;  %v7399_v43 = vsel %vm514_vm4, %v7390_v32, %v7398_v39  ;;  %v7753_v37 = vsel %vm954_vm0, %v7751_v27, %v7752_v20  ;;  %v7756_v24 = vsel %vm954_vm0, %v7754_v60, %v7755_v9  ;;  %v7759_v13 = vsel %vm954_vm0, %v7757_v35, %v7758_v53  ;;  %v14644_v32 = vld [vmem:[#allocation2 + $0x90] sm:$0xf0]  ;;  %v12875_v39 = vld [vmem:[%s15399_s2 + $0x178] sm:$0xff]  }
 0x46f   : > { %v7365_v19 = vsel %vm514_vm4, %v7356_v54, %v7364_v16  ;;  %v7741_v44 = vsel %vm954_vm0, %v7739_v36, %v7740_v23  ;;  %v14596_v54 = vld [vmem:[#allocation2 + $0x20] sm:$0xf0]  ;;  %v7747_v16 = vsel %vm954_vm0, %v7745_v5, %v7746_v38  ;;  %v7761_v51 = vrot.slane %v14524_v58, 4  ;;  %v14676_v36 = vld [vmem:[#allocation2 + $0xd0] sm:$0xf0] }
 0x470   : > { %11981 = vmatmul.mubr.bf16.gmra.mrb[16].mxu1 %v7314_v17  ;;  %v7406_v17 = vrot.slane %v7404_v6, 4  ;;  %v7742_v28 = vrot.slane %v14596_v54, 4  ;;  %v14642_v6 = vld [vmem:[#allocation2 + $0x80] sm:$0xf0]  ;;  %v7772_v23 = vrot.slane %v14674_v30, 4  ;;  %v8081_v27 = vshll.u32 %v14588_v55, 16 }
 0x471   : > { %11984 = vmatprep.mubr.bf16.mxu1 %v7331_v7  ;;  %v7411_v7 = vrot.slane %v7409_v12, 3  ;;  %v7760_v1 = vrot.slane %v14642_v6, 4  ;;  %v7763_v12 = vrot.slane %v14644_v32, 4  ;;  %v14665_v58 = vld [vmem:[%s15399_s2 + $0x180] sm:$0xff]   ;;  %v5559_v5 = vld [vmem:[#allocation2 + $0x118] sm:$0x8] }
 0x472   : > { %v7407_v4 = vor.u32 %v7406_v17, %v7403_v14  ;;  %v7744_v33 = vsel %vm954_vm0, %v7742_v28, %v7743_v52  ;;  %v14658_v17 = vld [vmem:[#allocation2 + $0xa0] sm:$0xf0]  ;;  %v7774_v3 = vsel %vm954_vm0, %v7772_v23, %v7773_v62  ;;  %v14686_v28 = vld [vmem:[#allocation2 + $0xf0] sm:$0xf0]  ;;  %v8061_v52 = vld [vmem:[#allocation2 + $0x18] sm:$0x1f] }
 0x473   : > { %v7415_v50 = vor.u32 %v7414_v10, %v7411_v7  ;;  %v7765_v14 = vsel %vm954_vm0, %v7763_v12, %v7764_v45  ;;  %v7766_v56 = vrot.slane %v14658_v17, 4  ;;  %v7770_v10 = vrot.slane %v14545_v40, 4  ;;  %v8063_v60 = vld [vmem:[#allocation2 + $0x38] sm:$0x1f] }
 0x474   : > { %v7776_v40 = vrot.slane %v14563_v2, 4  ;;  %v7782_v2 = vrot.slane %v14574_v34, 4  ;;  %v8083_v35 = vrot.slane %v8081_v27, 5  ;;  %v8112_v45 = vshrl.u32 %v14598_v18, 16  ;;  %v8065_v23 = vld [vmem:[#allocation2 + $0x58] sm:$0x1f] }
 0x475   : > { %v7416_v11 = vsel %vm514_vm4, %v7407_v4, %v7415_v50  ;;  %v7768_v42 = vsel %vm954_vm0, %v7766_v56, %v7767_v31  ;;  %v7775_v50 = vrot.slane %v14676_v36, 4 }
 0x478   : > { %11985 = vmatmul.mubr.bf16.gmra.mrb[20].mxu1 %v7348_v22  ;;  %v7749_v22 = vrot.slane %v14492_v59, 4  ;;  %v12872_v59 = vld [vmem:[%s15399_s2 + $0x160] sm:$0xff]  }
 0x479   : > { %11988 = vmatprep.mubr.bf16.mxu1 %v7365_v19 }
 0x47a   : > { %v7750_v19 = vsel %vm954_vm0, %v7748_v26, %v7749_v22  ;;  %v5595_v26 = vrot.slane %v5559_v5, 7  ;;  %v8078_v22 = vshrl.u32 %v14588_v55, 16 }
 0x47c   : > { %v8080_v9 = vrot.slane %v8078_v22, 4 }
 0x47e   : > { %v8084_v12 = vor.u32 %v8083_v35, %v8080_v9 }
 0x480   : > { %11989 = vmatmul.mubr.bf16.gmra.mrb[24].mxu1 %v7382_v0  ;;  %v7762_v0 = vsel %vm954_vm0, %v7760_v1, %v7761_v51  ;;  %v8095_v1 = vshrl.u32 %v14596_v54, 16  ;;  %v8098_v51 = vshll.u32 %v14596_v54, 16  ;;  %v8114_v54 = vrot.slane %v8112_v45, 4 }
 0x481   : > { %11992 = vmatprep.mubr.bf16.mxu1 %v7399_v43  ;;  %v14660_v43 = vld [vmem:[#allocation2 + $0xb0] sm:$0xf0] }
 0x482   : > { %v7769_v7 = vrot.slane %v14660_v43, 4 }
 0x484   : > { %v7771_v4 = vsel %vm954_vm0, %v7769_v7, %v7770_v10  ;;  %v8064_v10 = vld [vmem:[#allocation2 + $0x48] sm:$0x1f] }
 0x488   : > { %11993 = vmatmul.mubr.bf16.gmra.mrb[28].mxu1 %v7416_v11  ;;  %v7777_v11 = vsel %vm954_vm0, %v7775_v50, %v7776_v40  ;;  %v8137_v40 = vshrl.u32 %v8064_v10, 16 }
 0x489   : > { %12012 = vmatprep.mubr.bf16.mxu1 %v7741_v44  ;;  %v14684_v44 = vld [vmem:[#allocation2 + $0xe0] sm:$0xf0] }
 0x48a   : > { %v7778_v38 = vrot.slane %v14684_v44, 4 }
 0x490   : > { %12013 = vmatmul.mubr.bf16.vlgmr.msra.gmra.mrb[0].mxu1 %v7744_v33  ;;  %v5665_v33 = vld [vmem:[#allocation2 + $0x118] sm:$0x10] }
 0x491   : > { %12016 = vmatprep.mubr.bf16.mxu1 %v7747_v16  ;;  %12045 = vmatpush3.bf16.msra.mxu1 %v14561_v8  ;;  %v12871_v8 = vld [vmem:[%s15399_s2 + $0x158] sm:$0xff]   ;;  %v8086_v16 = vshrl.u32 %v8061_v52, 16  ;;  %v5666_v20 = vsel %vm13177_vm6, %v5595_v26, %v5665_v33  ;;  %v12877_v33 = vld [vmem:[%s15399_s2 + $0x188] sm:$0xff]   ;;  %v8139_v26 = vrot.slane %v8137_v40, 4 }
 0x492   : > { %12046 = vmatprep.subr.bf16.mxu1 %v12869_v46  ;;  %5667 = vst [vmem:[#allocation2 + $0x118] sm:$0x10] %v5666_v20 }
 0x495   : > { %12047 = vmatpush3.bf16.msra.mxu1 %v12869_v46  ;;  %v7781_v46 = vrot.slane %v14686_v28, 4 }
 0x496   : > { %12048 = vmatprep.subr.bf16.mxu1 %v12870_v15 }
 0x497   : > { %v7783_v57 = vsel %vm954_vm0, %v7781_v46, %v7782_v2  ;;  %v8146_v2 = vshrl.u32 %v14612_v47, 16 }
 0x498   : > { %12017 = vmatmul.mubr.bf16.gmra.mrb[4].mxu1 %v7750_v19  ;;  %v14698_v19 = vld [vmem:[#allocation2 + $0x100] sm:$0xf0] }
 0x499   : > { %12020 = vmatprep.mubr.bf16.mxu1 %v7753_v37  ;;  %12049 = vmatpush3.bf16.msra.mxu1 %v12870_v15  ;;  %v8089_v15 = vshll.u32 %v8061_v52, 16  ;;  %v8088_v37 = vrot.slane %v8086_v16, 4  ;;  %v7784_v55 = vrot.slane %v14698_v19, 4  ;;  %v8157_v52 = vshll.u32 %v8065_v23, 16 }
 0x49a   : > { %12050 = vmatprep.subr.bf16.mxu1 %v12871_v8  ;;  %v8149_v16 = vshll.u32 %v14612_v47, 16  ;;  %v12878_v47 = vld [vmem:[%s15399_s2 + $0x190] sm:$0xff]  }
 0x49b   : > { %v8091_v34 = vrot.slane %v8089_v15, 5 }
 0x49d   : > { %12051 = vmatpush3.bf16.msra.mxu1 %v12871_v8  ;;  %v7780_v8 = vsel %vm954_vm0, %v7778_v38, %v7779_v48  ;;  %v8129_v38 = vshrl.u32 %v14609_v63, 16  ;;  %v8132_v48 = vshll.u32 %v14609_v63, 16 }
 0x49e   : > { %12052 = vmatprep.subr.bf16.mxu1 %v12872_v59 }
 0x49f   : > { %v8131_v63 = vrot.slane %v8129_v38, 4  ;;  %v8214_v38 = vshrl.u32 %v14644_v32, 16 }
 0x4a0   : > { %12021 = vmatmul.mubr.bf16.gmra.mrb[8].mxu1 %v7756_v24  ;;  %v8092_v24 = vor.u32 %v8091_v34, %v8088_v37  ;;  %v8134_v37 = vrot.slane %v8132_v48, 5  ;;  %v8067_v34 = vld [vmem:[#allocation2 + $0x78] sm:$0x1f]  ;;  %v8217_v48 = vshll.u32 %v14644_v32, 16 }
 0x4a1   : > { %12024 = vmatprep.mubr.bf16.mxu1 %v7759_v13  ;;  %12053 = vmatpush3.bf16.msra.mxu1 %v12872_v59  ;;  %v8062_v59 = vld [vmem:[#allocation2 + $0x28] sm:$0x1f]  ;;  %v8120_v13 = vshrl.u32 %v8063_v60, 16  ;;  %v8216_v32 = vrot.slane %v8214_v38, 4 }
 0x4a2   : > { %12054 = vmatprep.subr.bf16.mxu1 %v12873_v25  ;;  %v8103_v53 = vshrl.u32 %v8062_v59, 16  ;;  %v8093_v21 = vsel %vm1470_vm7, %v8084_v12, %v8092_v24  ;;  %v8135_v24 = vor.u32 %v8134_v37, %v8131_v63  ;;  %v12879_v12 = vld [vmem:[%s15399_s2 + $0x198] sm:$0xff]   ;;  %v12882_v63 = vld [vmem:[%s15399_s2 + $0x1b0] sm:$0xff]  }
 0x4a3   : > { %v8122_v31 = vrot.slane %v8120_v13, 4  ;;  %v8166_v13 = vshll.u32 %v14626_v41, 16 }
 0x4a5   : > { %12055 = vmatpush3.bf16.msra.mxu1 %v12873_v25  ;;  %v8106_v25 = vshll.u32 %v8062_v59, 16  ;;  %v8148_v59 = vrot.slane %v8146_v2, 4 }
 0x4a6   : > { %12056 = vmatprep.subr.bf16.mxu1 %v12874_v61 }
 0x4a7   : > { %v8108_v56 = vrot.slane %v8106_v25, 5  ;;  %v8191_v25 = vshll.u32 %v8067_v34, 16 }
 0x4a8   : > { %12025 = vmatmul.mubr.bf16.gmra.mrb[12].mxu1 %v7762_v0  ;;  %v7786_v0 = vsel %vm954_vm0, %v7784_v55, %v7785_v29 }
 0x4a9   : > { %12028 = vmatprep.mubr.bf16.mxu1 %v7765_v14  ;;  %12057 = vmatpush3.bf16.msra.mxu1 %v12874_v61  ;;  %v8123_v61 = vshll.u32 %v8063_v60, 16  ;;  %v8105_v14 = vrot.slane %v8103_v53, 4  ;;  %v8151_v60 = vrot.slane %v8149_v16, 5  ;;  %v8188_v53 = vshrl.u32 %v8067_v34, 16 }
 0x4aa   : > { %12058 = vmatprep.subr.bf16.mxu1 %v12875_v39 }
 0x4ab   : > { %v8125_v7 = vrot.slane %v8123_v61, 5  ;;  %v8109_v50 = vor.u32 %v8108_v56, %v8105_v14  ;;  %v8152_v61 = vor.u32 %v8151_v60, %v8148_v59  ;;  %v8190_v56 = vrot.slane %v8188_v53, 4 }
 0x4ad   : > { %12059 = vmatpush3.bf16.msra.mxu1 %v12875_v39  ;;  %v8115_v39 = vshll.u32 %v14598_v18, 16  ;;  %v8126_v18 = vor.u32 %v8125_v7, %v8122_v31  ;;  %v8168_v7 = vrot.slane %v8166_v13, 5 }
 0x4ae   : > { %12092 = vmatprep.subr.bf16.mxu1 %v14665_v58 }
 0x4af   : > { %v8117_v62 = vrot.slane %v8115_v39, 5 }
 0x4b0   : > { %12029 = vmatmul.mubr.bf16.gmra.mrb[16].mxu1 %v7768_v42  ;;  %v8097_v42 = vrot.slane %v8095_v1, 4  ;;  %v8180_v1 = vshrl.u32 %v14628_v49, 16 }
 0x4b1   : > { %12032 = vmatprep.mubr.bf16.mxu1 %v7771_v4  ;;  %v8100_v4 = vrot.slane %v8098_v51, 5  ;;  %v8118_v46 = vor.u32 %v8117_v62, %v8114_v54  ;;  %v8183_v51 = vshll.u32 %v14628_v49, 16 }
 0x4b2   : > { %v8182_v49 = vrot.slane %v8180_v1, 4 }
 0x4b3   : > { %v8101_v5 = vor.u32 %v8100_v4, %v8097_v42  ;;  %v8127_v27 = vsel %vm1470_vm7, %v8118_v46, %v8126_v18  ;;  %v8185_v42 = vrot.slane %v8183_v51, 5  ;;  %v12880_v4 = vld [vmem:[%s15399_s2 + $0x1a0] sm:$0xff]   ;;  %v12881_v46 = vld [vmem:[%s15399_s2 + $0x1a8] sm:$0xff]  }
 0x4b5   : > { %v8110_v15 = vsel %vm1470_vm7, %v8101_v5, %v8109_v50  ;;  %v8186_v5 = vor.u32 %v8185_v42, %v8182_v49 }
 0x4b8   : > { %12033 = vmatmul.mubr.bf16.gmra.mrb[20].mxu1 %v7774_v3  ;;  %v8140_v3 = vshll.u32 %v8064_v10, 16  ;;  %v8069_v10 = vld [vmem:[#allocation2 + $0x98] sm:$0x1f] }
 0x4b9   : > { %12036 = vmatprep.mubr.bf16.mxu1 %v7777_v11  ;;  %v8154_v11 = vshrl.u32 %v8065_v23, 16  ;;  %v8222_v40 = vshrl.u32 %v8069_v10, 16 }
 0x4ba   : > { %v8142_v22 = vrot.slane %v8140_v3, 5  ;;  %v8225_v3 = vshll.u32 %v8069_v10, 16 }
 0x4bb   : > { %v8156_v20 = vrot.slane %v8154_v11, 4  ;;  %v8197_v11 = vshrl.u32 %v14642_v6, 16 }
 0x4bc   : > { %v8143_v9 = vor.u32 %v8142_v22, %v8139_v26  ;;  %v8224_v26 = vrot.slane %v8222_v40, 4  ;;  %v8070_v22 = vld [vmem:[#allocation2 + $0xa8] sm:$0x1f]  ;;  %v8285_v40 = vshll.u32 %v14676_v36, 16 }
 0x4bd   : > { %v8239_v34 = vshrl.u32 %v8070_v22, 16  ;;  %v8242_v59 = vshll.u32 %v8070_v22, 16 }
 0x4be   : > { %v8144_v45 = vsel %vm1470_vm7, %v8135_v24, %v8143_v9  ;;  %v8251_v24 = vshll.u32 %v14660_v43, 16 }
 0x4bf   : > { %v8244_v1 = vrot.slane %v8242_v59, 5 }
 0x4c0   : > { %12037 = vmatmul.mubr.bf16.gmra.mrb[24].mxu1 %v7780_v8  ;;  %v8159_v8 = vrot.slane %v8157_v52, 5  ;;  %v8200_v52 = vshll.u32 %v14642_v6, 16  ;;  %v8227_v6 = vrot.slane %v8225_v3, 5 }
 0x4c1   : > { %12040 = vmatprep.mubr.bf16.mxu1 %v7783_v57  ;;  %v8066_v57 = vld [vmem:[#allocation2 + $0x68] sm:$0x1f] }
 0x4c2   : > { %v8171_v35 = vshrl.u32 %v8066_v57, 16  ;;  %v8174_v55 = vshll.u32 %v8066_v57, 16  ;;  %v8160_v29 = vor.u32 %v8159_v8, %v8156_v20  ;;  %v8202_v20 = vrot.slane %v8200_v52, 5  ;;  %v8071_v8 = vld [vmem:[#allocation2 + $0xb8] sm:$0x1f] }
 0x4c3   : > { %v8219_v57 = vrot.slane %v8217_v48, 5  ;;  %v8228_v60 = vor.u32 %v8227_v6, %v8224_v26  ;;  %v8259_v9 = vshll.u32 %v8071_v8, 16  ;;  %v8074_v48 = vld [vmem:[#allocation2 + $0xe8] sm:$0x1f] }
 0x4c4   : > { %v8173_v39 = vrot.slane %v8171_v35, 4  ;;  %v8161_v14 = vsel %vm1470_vm7, %v8152_v61, %v8160_v29  ;;  %v8234_v29 = vshll.u32 %v14658_v17, 16  ;;  %v8241_v61 = vrot.slane %v8239_v34, 4 }
 0x4c5   : > { %v8220_v53 = vor.u32 %v8219_v57, %v8216_v32  ;;  %v8310_v26 = vshll.u32 %v8074_v48, 16  ;;  %v8302_v32 = vshll.u32 %v14684_v44, 16 }
 0x4c7   : > { %v8229_v51 = vsel %vm1470_vm7, %v8220_v53, %v8228_v60  ;;  %v8312_v60 = vrot.slane %v8310_v26, 5  ;;  %v8304_v53 = vrot.slane %v8302_v32, 5 }
 0x4c8   : > { %12041 = vmatmul.mubr.bf16.gmra.mrb[28].mxu1 %v7786_v0  ;;  %v8176_v0 = vrot.slane %v8174_v55, 5  ;;  %v8231_v55 = vshrl.u32 %v14658_v17, 16  ;;  %v8261_v17 = vrot.slane %v8259_v9, 5 }
 0x4c9   : > { %12060 = vmatprep.mubr.bf16.mxu1 %v8093_v21  ;;  %v8193_v21 = vrot.slane %v8191_v25, 5  ;;  %v8248_v25 = vshrl.u32 %v14660_v43, 16 }
 0x4ca   : > { %v8177_v23 = vor.u32 %v8176_v0, %v8173_v39  ;;  %v8233_v39 = vrot.slane %v8231_v55, 4  ;;  %v8236_v0 = vrot.slane %v8234_v29, 5  ;;  %v8076_v55 = vld [vmem:[#allocation2 + $0x108] sm:$0x1f] }
 0x4cb   : > { %v8194_v50 = vor.u32 %v8193_v21, %v8190_v56  ;;  %v8250_v43 = vrot.slane %v8248_v25, 4  ;;  %v8253_v56 = vrot.slane %v8251_v24, 5  ;;  %v14757_v21 = vld [vmem:[%s15399_s2 + $0x1c0] sm:$0xff]  }
 0x4cc   : > { %v8623_v25 = vld [vmem:[#allocation2 + $0x20] sm:$0xf8] }
 0x4d0   : > { %12061 = vmatmul.mubr.bf16.vlgmr.msra.gmra.mrb[0].mxu1 %v8110_v15  ;;  %v8195_v15 = vsel %vm1470_vm7, %v8186_v5, %v8194_v50  ;;  %v8282_v50 = vshrl.u32 %v14676_v36, 16  ;;  %v8307_v36 = vshrl.u32 %v8074_v48, 16 }
 0x4d1   : > { %12064 = vmatprep.mubr.bf16.mxu1 %v8127_v27  ;;  %12093 = vmatpush3.bf16.msra.mxu1 %v14665_v58  ;;  %v8163_v58 = vshrl.u32 %v14626_v41, 16  ;;  %v8068_v41 = vld [vmem:[#allocation2 + $0x88] sm:$0x1f]  ;;  %v8199_v27 = vrot.slane %v8197_v11, 4 }
 0x4d2   : > { %12094 = vmatprep.subr.bf16.mxu1 %v12877_v33  ;;  %v8205_v54 = vshrl.u32 %v8068_v41, 16  ;;  %v8208_v62 = vshll.u32 %v8068_v41, 16  ;;  %v8245_v41 = vor.u32 %v8244_v1, %v8241_v61  ;;  %v8309_v59 = vrot.slane %v8307_v36, 4 }
 0x4d3   : > { %v8165_v31 = vrot.slane %v8163_v58, 4  ;;  %v8203_v35 = vor.u32 %v8202_v20, %v8199_v27  ;;  %v12883_v58 = vld [vmem:[%s15399_s2 + $0x1b8] sm:$0xff]   ;;  %v8344_v61 = vshll.u32 %v8076_v55, 16 }
 0x4d4   : > { %v8207_v2 = vrot.slane %v8205_v54, 4  ;;  %v8210_v16 = vrot.slane %v8208_v62, 5  ;;  %v8268_v54 = vshll.u32 %v14674_v30, 16  ;;  %v8254_v62 = vor.u32 %v8253_v56, %v8250_v43 }
 0x4d5   : > { %12095 = vmatpush3.bf16.msra.mxu1 %v12877_v33  ;;  %v8169_v18 = vor.u32 %v8168_v7, %v8165_v31 }
 0x4d6   : > { %12096 = vmatprep.subr.bf16.mxu1 %v12878_v47  ;;  %v8211_v37 = vor.u32 %v8210_v16, %v8207_v2  ;;  %v8284_v2 = vrot.slane %v8282_v50, 4  ;;  %v8287_v16 = vrot.slane %v8285_v40, 5  ;;  %v14780_v50 = vld [vmem:[#allocation2 + $0x38] sm:$0xf] }
 0x4d7   : > { %v8178_v33 = vsel %vm1470_vm7, %v8169_v18, %v8177_v23  ;;  %v8265_v23 = vshrl.u32 %v14674_v30, 16 }
 0x4d8   : > { %12065 = vmatmul.mubr.bf16.gmra.mrb[4].mxu1 %v8144_v45  ;;  %v8212_v13 = vsel %vm1470_vm7, %v8203_v35, %v8211_v37  ;;  %v8072_v45 = vld [vmem:[#allocation2 + $0xc8] sm:$0x1f]  ;;  %v8288_v57 = vor.u32 %v8287_v16, %v8284_v2  ;;  %v8319_v37 = vshll.u32 %v14686_v28, 16 }
 0x4d9   : > { %12068 = vmatprep.mubr.bf16.mxu1 %v8161_v14  ;;  %12097 = vmatpush3.bf16.msra.mxu1 %v12878_v47  ;;  %v8256_v47 = vshrl.u32 %v8071_v8, 16  ;;  %v8073_v14 = vld [vmem:[#allocation2 + $0xd8] sm:$0x1f]  ;;  %v8273_v31 = vshrl.u32 %v8072_v45, 16  ;;  %v8276_v7 = vshll.u32 %v8072_v45, 16  ;;  %v8267_v30 = vrot.slane %v8265_v23, 4 }
 0x4da   : > { %12098 = vmatprep.subr.bf16.mxu1 %v12879_v12  ;;  %v8290_v49 = vshrl.u32 %v8073_v14, 16  ;;  %v8293_v42 = vshll.u32 %v8073_v14, 16  ;;  %v8299_v8 = vshrl.u32 %v14684_v44, 16  ;;  %v8321_v24 = vrot.slane %v8319_v37, 5 }
 0x4db   : > { %v8275_v18 = vrot.slane %v8273_v31, 4  ;;  %v8278_v11 = vrot.slane %v8276_v7, 5  ;;  %v8333_v45 = vshrl.u32 %v14698_v19, 16  ;;  %v8346_v31 = vrot.slane %v8344_v61, 5 }
 0x4dc   : > { %v8292_v5 = vrot.slane %v8290_v49, 4  ;;  %v8295_v38 = vrot.slane %v8293_v42, 5  ;;  %v8301_v29 = vrot.slane %v8299_v8, 4  ;;  %v8625_v42 = vld [vmem:[#allocation2 + $0x30] sm:$0xf8] }
 0x4dd   : > { %12099 = vmatpush3.bf16.msra.mxu1 %v12879_v12  ;;  %v8258_v12 = vrot.slane %v8256_v47, 4 }
 0x4de   : > { %12100 = vmatprep.subr.bf16.mxu1 %v12880_v4  ;;  %v8296_v6 = vor.u32 %v8295_v38, %v8292_v5 }
 0x4df   : > { %v8262_v10 = vor.u32 %v8261_v17, %v8258_v12  ;;  %v8659_v12 = vshll.u32 %v8623_v25, 16  ;;  %v8305_v17 = vor.u32 %v8304_v53, %v8301_v29 }
 0x4e0   : > { %12069 = vmatmul.mubr.bf16.gmra.mrb[8].mxu1 %v8178_v33  ;;  %v8075_v33 = vld [vmem:[#allocation2 + $0xf8] sm:$0x1f]  ;;  %v8297_v47 = vsel %vm1470_vm7, %v8288_v57, %v8296_v6  ;;  %v8631_v57 = vld [vmem:[#allocation2 + $0x60] sm:$0xf8] }
 0x4e1   : > { %12072 = vmatprep.mubr.bf16.mxu1 %v8195_v15  ;;  %12101 = vmatpush3.bf16.msra.mxu1 %v12880_v4  ;;  %v8237_v4 = vor.u32 %v8236_v0, %v8233_v39  ;;  %v8263_v52 = vsel %vm1470_vm7, %v8254_v62, %v8262_v10  ;;  %v8279_v15 = vor.u32 %v8278_v11, %v8275_v18  ;;  %v8324_v22 = vshrl.u32 %v8075_v33, 16  ;;  %v14782_v11 = vld [vmem:[#allocation2 + $0x48] sm:$0xf] }
 0x4e2   : > { %12102 = vmatprep.subr.bf16.mxu1 %v12881_v46  ;;  %v8327_v27 = vshll.u32 %v8075_v33, 16  ;;  %v8336_v39 = vshll.u32 %v14698_v19, 16  ;;  %v8661_v49 = vrot.slane %v8659_v12, 4  ;;  %v8676_v18 = vshll.u32 %v8625_v42, 16 }
 0x4e3   : > { %v8246_v3 = vsel %vm1470_vm7, %v8237_v4, %v8245_v41  ;;  %v8326_v9 = vrot.slane %v8324_v22, 4  ;;  %v8335_v4 = vrot.slane %v8333_v45, 4  ;;  %v8698_v2 = vshrl.u32 %v14782_v11, 16 }
 0x4e4   : > { %v8329_v35 = vrot.slane %v8327_v27, 5  ;;  %v8338_v23 = vrot.slane %v8336_v39, 5  ;;  %v8701_v16 = vshll.u32 %v14782_v11, 16  ;;  %v8678_v26 = vrot.slane %v8676_v18, 4 }
 0x4e5   : > { %12103 = vmatpush3.bf16.msra.mxu1 %v12881_v46  ;;  %v8270_v46 = vrot.slane %v8268_v54, 5  ;;  %v8627_v54 = vld [vmem:[#allocation2 + $0x40] sm:$0xf8]  ;;  %v8727_v29 = vshll.u32 %v8631_v57, 16 }
 0x4e6   : > { %12104 = vmatprep.subr.bf16.mxu1 %v12882_v63  ;;  %v8330_v1 = vor.u32 %v8329_v35, %v8326_v9  ;;  %v8690_v5 = vshrl.u32 %v8627_v54, 16  ;;  %v8693_v38 = vshll.u32 %v8627_v54, 16  ;;  %v8339_v48 = vor.u32 %v8338_v23, %v8335_v4  ;;  %v14792_v9 = vld [vmem:[#allocation2 + $0x68] sm:$0xf] }
 0x4e7   : > { %v8271_v20 = vor.u32 %v8270_v46, %v8267_v30  ;;  %v8681_v30 = vshrl.u32 %v14780_v50, 16  ;;  %v8684_v46 = vshll.u32 %v14780_v50, 16  ;;  %v8703_v37 = vrot.slane %v8701_v16, 4  ;;  %v14809_v23 = vld [vmem:[#allocation2 + $0x88] sm:$0xf] }
 0x4e8   : > { %12073 = vmatmul.mubr.bf16.gmra.mrb[12].mxu1 %v8212_v13  ;;  %v8341_v13 = vshrl.u32 %v8076_v55, 16  ;;  %v8692_v22 = vrot.slane %v8690_v5, 3  ;;  %v8695_v27 = vrot.slane %v8693_v38, 4  ;;  %v8724_v55 = vshrl.u32 %v8631_v57, 16  ;;  %v12887_v38 = vld [vmem:[%s15399_s2 + $0x1d8] sm:$0xff]  }
 0x4e9   : > { %12076 = vmatprep.mubr.bf16.mxu1 %v8229_v51  ;;  %12105 = vmatpush3.bf16.msra.mxu1 %v12882_v63  ;;  %v8316_v63 = vshrl.u32 %v14686_v28, 16  ;;  %v8280_v34 = vsel %vm1470_vm7, %v8271_v20, %v8279_v15  ;;  %v14772_v28 = vld [vmem:[#allocation2 + $0x28] sm:$0xf]  ;;  %v8656_v51 = vshrl.u32 %v8623_v25, 16  ;;  %v8629_v20 = vld [vmem:[#allocation2 + $0x50] sm:$0xf8] }
 0x4ea   : > { %12106 = vmatprep.subr.bf16.mxu1 %v12883_v58  ;;  %v8664_v14 = vshrl.u32 %v14772_v28, 16  ;;  %v8667_v43 = vshll.u32 %v14772_v28, 16  ;;  %v8343_v41 = vrot.slane %v8341_v13, 4  ;;  %v8683_v8 = vrot.slane %v8681_v30, 3 }
 0x4eb   : > { %v8318_v44 = vrot.slane %v8316_v63, 4  ;;  %v8658_v10 = vrot.slane %v8656_v51, 3  ;;  %v8686_v32 = vrot.slane %v8684_v46, 4  ;;  %v8700_v63 = vrot.slane %v8698_v2, 3 }
 0x4ec   : > { %v8666_v19 = vrot.slane %v8664_v14, 3  ;;  %v8669_v62 = vrot.slane %v8667_v43, 4  ;;  %v8347_v40 = vor.u32 %v8346_v31, %v8343_v41  ;;  %v8696_v35 = vor.u32 %v8695_v27, %v8692_v22 }
 0x4ed   : > { %12107 = vmatpush3.bf16.msra.mxu1 %v12883_v58  ;;  %v8313_v58 = vor.u32 %v8312_v60, %v8309_v59  ;;  %v8322_v0 = vor.u32 %v8321_v24, %v8318_v44  ;;  %v8707_v60 = vshrl.u32 %v8629_v20, 16  ;;  %v8687_v53 = vor.u32 %v8686_v32, %v8683_v8  ;;  %v12888_v8 = vld [vmem:[%s15399_s2 + $0x1e0] sm:$0xff]  }
 0x4ee   : > { %12140 = vmatprep.subr.bf16.mxu1 %v14757_v21  ;;  %v8670_v33 = vor.u32 %v8669_v62, %v8666_v19  ;;  %v8348_v15 = vsel %vm1470_vm7, %v8339_v48, %v8347_v40  ;;  %v8704_v24 = vor.u32 %v8703_v37, %v8700_v63  ;;  %v8732_v13 = vshrl.u32 %v14792_v9, 16  ;;  %v14825_v37 = vld [vmem:[#allocation2 + $0xa8] sm:$0xf] }
 0x4ef   : > { %v8314_v56 = vsel %vm1470_vm7, %v8305_v17, %v8313_v58  ;;  %v8331_v7 = vsel %vm1470_vm7, %v8322_v0, %v8330_v1  ;;  %v12885_v58 = vld [vmem:[%s15399_s2 + $0x1c8] sm:$0xff]   ;;  %v8735_v61 = vshll.u32 %v14792_v9, 16  ;;  %v8709_v51 = vrot.slane %v8707_v60, 3  ;;  %v8633_v0 = vld [vmem:[#allocation2 + $0x70] sm:$0xf8] }
 0x4f0   : > { %12077 = vmatmul.mubr.bf16.gmra.mrb[16].mxu1 %v8246_v3  ;;  %v8673_v3 = vshrl.u32 %v8625_v42, 16  ;;  %v8705_v17 = vsel %vm514_vm4, %v8696_v35, %v8704_v24  ;;  %v8726_v45 = vrot.slane %v8724_v55, 3  ;;  %v8729_v39 = vrot.slane %v8727_v29, 4  ;;  %v12889_v24 = vld [vmem:[%s15399_s2 + $0x1e8] sm:$0xff]  }
 0x4f1   : > { %12080 = vmatprep.mubr.bf16.mxu1 %v8263_v52  ;;  %v8662_v52 = vor.u32 %v8661_v49, %v8658_v10  ;;  %v8734_v41 = vrot.slane %v8732_v13, 3  ;;  %v8737_v31 = vrot.slane %v8735_v61, 4  ;;  %v12886_v10 = vld [vmem:[%s15399_s2 + $0x1d0] sm:$0xff]   ;;  %v8741_v42 = vshrl.u32 %v8633_v0, 16 }
 0x4f2   : > { %v8675_v36 = vrot.slane %v8673_v3, 3  ;;  %v8744_v4 = vshll.u32 %v8633_v0, 16  ;;  %v8730_v54 = vor.u32 %v8729_v39, %v8726_v45  ;;  %v8769_v5 = vshll.u32 %v14809_v23, 16  ;;  %v8643_v0 = vld [vmem:[#allocation2 + $0xc0] sm:$0xf8] }
 0x4f3   : > { %v8671_v6 = vsel %vm514_vm4, %v8662_v52, %v8670_v33  ;;  %v8738_v18 = vor.u32 %v8737_v31, %v8734_v41  ;;  %v8766_v52 = vshrl.u32 %v14809_v23, 16  ;;  %v8743_v30 = vrot.slane %v8741_v42, 3  ;;  %v12890_v41 = vld [vmem:[%s15399_s2 + $0x1f0] sm:$0xff]   ;;  %v14841_v42 = vld [vmem:[#allocation2 + $0xc8] sm:$0xf] }
 0x4f4   : > { %v8679_v59 = vor.u32 %v8678_v26, %v8675_v36  ;;  %v8746_v46 = vrot.slane %v8744_v4, 4  ;;  %v8771_v27 = vrot.slane %v8769_v5, 4  ;;  %v12891_v5 = vld [vmem:[%s15399_s2 + $0x1f8] sm:$0xff]  }
 0x4f5   : > { %v8739_v33 = vsel %vm514_vm4, %v8730_v54, %v8738_v18  ;;  %v8768_v22 = vrot.slane %v8766_v52, 3  ;;  %v8826_v54 = vshrl.u32 %v8643_v0, 16  ;;  %v8834_v18 = vshrl.u32 %v14841_v42, 16 }
 0x4f6   : > { %v8688_v1 = vsel %vm514_vm4, %v8679_v59, %v8687_v53  ;;  %v8747_v32 = vor.u32 %v8746_v46, %v8743_v30  ;;  %v8837_v52 = vshll.u32 %v14841_v42, 16 }
 0x4f7   : > { %v8772_v53 = vor.u32 %v8771_v27, %v8768_v22  ;;  %v14852_v27 = vld [vmem:[#allocation2 + $0xd8] sm:$0xf] }
 0x4f8   : > { %12081 = vmatmul.mubr.bf16.gmra.mrb[20].mxu1 %v8280_v34  ;;  %v14790_v34 = vld [vmem:[#allocation2 + $0x58] sm:$0xf]  ;;  %v8839_v22 = vrot.slane %v8837_v52, 4 }
 0x4f9   : > { %12084 = vmatprep.mubr.bf16.mxu1 %v8297_v47  ;;  %v8710_v47 = vshll.u32 %v8629_v20, 16  ;;  %v8715_v25 = vshrl.u32 %v14790_v34, 16  ;;  %v8718_v44 = vshll.u32 %v14790_v34, 16  ;;  %v14820_v20 = vld [vmem:[#allocation2 + $0x98] sm:$0xf] }
 0x4fa   : > { %v8783_v55 = vshrl.u32 %v14820_v20, 16  ;;  %v8786_v29 = vshll.u32 %v14820_v20, 16 }
 0x4fb   : > { %v8712_v12 = vrot.slane %v8710_v47, 4  ;;  %v8717_v14 = vrot.slane %v8715_v25, 3  ;;  %v8720_v43 = vrot.slane %v8718_v44, 4  ;;  %v8800_v25 = vshrl.u32 %v14825_v37, 16 }
 0x4fc   : > { %v8803_v44 = vshll.u32 %v14825_v37, 16  ;;  %v8785_v45 = vrot.slane %v8783_v55, 3  ;;  %v8788_v39 = vrot.slane %v8786_v29, 4  ;;  %v8851_v29 = vshrl.u32 %v14852_v27, 16 }
 0x4fd   : > { %v8713_v49 = vor.u32 %v8712_v12, %v8709_v51  ;;  %v8721_v62 = vor.u32 %v8720_v43, %v8717_v14  ;;  %v8802_v14 = vrot.slane %v8800_v25, 3 }
 0x4fe   : > { %v8805_v43 = vrot.slane %v8803_v44, 4 }
 0x4ff   : > { %v8722_v48 = vsel %vm514_vm4, %v8713_v49, %v8721_v62 }
 0x500   : > { %12085 = vmatmul.mubr.bf16.gmra.mrb[24].mxu1 %v8314_v56  ;;  %v8635_v56 = vld [vmem:[#allocation2 + $0x80] sm:$0xf8] }
 0x501   : > { %12088 = vmatprep.mubr.bf16.mxu1 %v8331_v7  ;;  %v14804_v7 = vld [vmem:[#allocation2 + $0x78] sm:$0xf]  ;;  %v8758_v19 = vshrl.u32 %v8635_v56, 16 }
 0x502   : > { %v8749_v40 = vshrl.u32 %v14804_v7, 16  ;;  %v8752_v3 = vshll.u32 %v14804_v7, 16 }
 0x503   : > { %v8760_v2 = vrot.slane %v8758_v19, 3  ;;  %v8829_v19 = vshll.u32 %v8643_v0, 16  ;;  %v8651_v0 = vld [vmem:[#allocation2 + $0x100] sm:$0xf8] }
 0x504   : > { %v8751_v36 = vrot.slane %v8749_v40, 3  ;;  %v8754_v26 = vrot.slane %v8752_v3, 4  ;;  %v8806_v3 = vor.u32 %v8805_v43, %v8802_v14 }
 0x506   : > { %v8755_v35 = vor.u32 %v8754_v26, %v8751_v36  ;;  %v8647_v26 = vld [vmem:[#allocation2 + $0xe0] sm:$0xf8] }
 0x508   : > { %12089 = vmatmul.mubr.bf16.gmra.mrb[28].mxu1 %v8348_v15  ;;  %v8637_v15 = vld [vmem:[#allocation2 + $0x90] sm:$0xf8] }
 0x509   : > { %12108 = vmatprep.mubr.bf16.mxu1 %v8671_v6  ;;  %v8639_v6 = vld [vmem:[#allocation2 + $0xa0] sm:$0xf8]  ;;  %v8775_v57 = vshrl.u32 %v8637_v15, 16  ;;  %v8778_v63 = vshll.u32 %v8637_v15, 16 }
 0x50a   : > { %v8792_v60 = vshrl.u32 %v8639_v6, 16  ;;  %v8795_v47 = vshll.u32 %v8639_v6, 16  ;;  %v8836_v6 = vrot.slane %v8834_v18, 3 }
 0x50b   : > { %v8777_v13 = vrot.slane %v8775_v57, 3  ;;  %v8780_v61 = vrot.slane %v8778_v63, 4 }
 0x50c   : > { %v8794_v51 = vrot.slane %v8792_v60, 3  ;;  %v8797_v12 = vrot.slane %v8795_v47, 4  ;;  %v8860_v47 = vshrl.u32 %v8647_v26, 16  ;;  %v8840_v25 = vor.u32 %v8839_v22, %v8836_v6  ;;  %v14878_v22 = vld [vmem:[#allocation2 + $0x118] sm:$0xf] }
 0x50d   : > { %v8781_v31 = vor.u32 %v8780_v61, %v8777_v13 }
 0x50e   : > { %v8798_v4 = vor.u32 %v8797_v12, %v8794_v51  ;;  %v8862_v51 = vrot.slane %v8860_v47, 3 }
 0x510   : > { %12109 = vmatmul.mubr.bf16.vlgmr.msra.gmra.mrb[0].mxu1 %v8688_v1  ;;  %v8807_v46 = vsel %vm514_vm4, %v8798_v4, %v8806_v3  ;;  %v14870_v4 = vld [vmem:[#allocation2 + $0x108] sm:$0xf] }
 0x511   : > { %12112 = vmatprep.mubr.bf16.mxu1 %v8705_v17  ;;  %12141 = vmatpush3.bf16.msra.mxu1 %v14757_v21  ;;  %v8761_v21 = vshll.u32 %v8635_v56, 16  ;;  %v8641_v17 = vld [vmem:[#allocation2 + $0xb0] sm:$0xf8]  ;;  %v14836_v56 = vld [vmem:[#allocation2 + $0xb8] sm:$0xf]  ;;  %v8902_v52 = vshrl.u32 %v14870_v4, 16 }
 0x512   : > { %12142 = vmatprep.subr.bf16.mxu1 %v12885_v58  ;;  %v8812_v49 = vshll.u32 %v8641_v17, 16  ;;  %v8817_v62 = vshrl.u32 %v14836_v56, 16  ;;  %v8820_v40 = vshll.u32 %v14836_v56, 16 }
 0x513   : > { %v8763_v16 = vrot.slane %v8761_v21, 4  ;;  %v8789_v21 = vor.u32 %v8788_v39, %v8785_v45  ;;  %v8853_v45 = vrot.slane %v8851_v29, 3 }
 0x514   : > { %v8814_v30 = vrot.slane %v8812_v49, 4  ;;  %v8819_v15 = vrot.slane %v8817_v62, 3  ;;  %v8822_v36 = vrot.slane %v8820_v40, 4 }
 0x515   : > { %12143 = vmatpush3.bf16.msra.mxu1 %v12885_v58  ;;  %v8764_v59 = vor.u32 %v8763_v16, %v8760_v2  ;;  %v8756_v58 = vsel %vm514_vm4, %v8747_v32, %v8755_v35  ;;  %v8831_v2 = vrot.slane %v8829_v19, 4  ;;  %v8645_v16 = vld [vmem:[#allocation2 + $0xd0] sm:$0xf8]  ;;  %v8863_v35 = vshll.u32 %v8647_v26, 16 }
 0x516   : > { %12144 = vmatprep.subr.bf16.mxu1 %v12886_v10  ;;  %v8843_v57 = vshrl.u32 %v8645_v16, 16  ;;  %v8846_v63 = vshll.u32 %v8645_v16, 16  ;;  %v8823_v55 = vor.u32 %v8822_v36, %v8819_v15  ;;  %v8894_v19 = vshrl.u32 %v8651_v0, 16  ;;  %v8653_v16 = vld [vmem:[#allocation2 + $0x110] sm:$0xf8] }
 0x517   : > { %v8773_v1 = vsel %vm514_vm4, %v8764_v59, %v8772_v53  ;;  %v14859_v59 = vld [vmem:[#allocation2 + $0xe8] sm:$0xf]  ;;  %v8854_v53 = vshll.u32 %v14852_v27, 16  ;;  %v8865_v12 = vrot.slane %v8863_v35, 4  ;;  %v8904_v26 = vrot.slane %v8902_v52, 3 }
 0x518   : > { %12113 = vmatmul.mubr.bf16.gmra.mrb[4].mxu1 %v8722_v48  ;;  %v8868_v44 = vshrl.u32 %v14859_v59, 16  ;;  %v8845_v13 = vrot.slane %v8843_v57, 3  ;;  %v8848_v61 = vrot.slane %v8846_v63, 4  ;;  %v8911_v57 = vshrl.u32 %v8653_v16, 16 }
 0x519   : > { %12116 = vmatprep.mubr.bf16.mxu1 %v8739_v33  ;;  %12145 = vmatpush3.bf16.msra.mxu1 %v12886_v10  ;;  %v8809_v10 = vshrl.u32 %v8641_v17, 16  ;;  %v8828_v33 = vrot.slane %v8826_v54, 3  ;;  %v8649_v17 = vld [vmem:[#allocation2 + $0xf0] sm:$0xf8]  ;;  %v8856_v39 = vrot.slane %v8854_v53, 4  ;;  %v8866_v54 = vor.u32 %v8865_v12, %v8862_v51 }
 0x51a   : > { %12146 = vmatprep.subr.bf16.mxu1 %v12887_v38  ;;  %v8870_v14 = vrot.slane %v8868_v44, 3  ;;  %v8880_v49 = vshll.u32 %v8649_v17, 16  ;;  %v8914_v63 = vshll.u32 %v8653_v16, 16  ;;  %v8919_v35 = vshrl.u32 %v14878_v22, 16 }
 0x51b   : > { %v8811_v48 = vrot.slane %v8809_v10, 3  ;;  %v8832_v60 = vor.u32 %v8831_v2, %v8828_v33  ;;  %v8877_v10 = vshrl.u32 %v8649_v17, 16  ;;  %v8857_v62 = vor.u32 %v8856_v39, %v8853_v45 }
 0x51c   : > { %v8896_v33 = vrot.slane %v8894_v19, 3  ;;  %v8916_v44 = vrot.slane %v8914_v63, 4  ;;  %v9250_v12 = vrot.slane %v14772_v28, 4  ;;  %v12893_v28 = vld [vmem:[%s15399_s2 + $0x208] sm:$0xff]   ;;  %v12899_v63 = vld [vmem:[%s15399_s2 + $0x238] sm:$0xff]  }
 0x51d   : > { %12147 = vmatpush3.bf16.msra.mxu1 %v12887_v38  ;;  %v8790_v38 = vsel %vm514_vm4, %v8781_v31, %v8789_v21  ;;  %v8815_v32 = vor.u32 %v8814_v30, %v8811_v48  ;;  %v8849_v31 = vor.u32 %v8848_v61, %v8845_v13  ;;  %v8897_v21 = vshll.u32 %v8651_v0, 16  ;;  %v14884_v61 = vld [vmem:[#allocation2 + $0x20] sm:$0xf0]  ;;  %v14890_v0 = vld [vmem:[#allocation2 + $0x30] sm:$0xf0] }
 0x51e   : > { %12148 = vmatprep.subr.bf16.mxu1 %v12888_v8  ;;  %v8879_v48 = vrot.slane %v8877_v10, 3  ;;  %v8882_v30 = vrot.slane %v8880_v49, 4  ;;  %v9249_v51 = vrot.slane %v14884_v61, 4  ;;  %v9256_v49 = vrot.slane %v14782_v11, 4 }
 0x51f   : > { %v8899_v2 = vrot.slane %v8897_v21, 4  ;;  %v14903_v21 = vld [vmem:[#allocation2 + $0x50] sm:$0xf0] }
 0x520   : > { %12117 = vmatmul.mubr.bf16.gmra.mrb[8].mxu1 %v8756_v58  ;;  %v8824_v58 = vsel %vm514_vm4, %v8815_v32, %v8823_v55  ;;  %v8883_v32 = vor.u32 %v8882_v30, %v8879_v48  ;;  %v8922_v55 = vshll.u32 %v14878_v22, 16  ;;  %v9251_v39 = vsel %vm954_vm0, %v9249_v51, %v9250_v12  ;;  %v14922_v48 = vld [vmem:[#allocation2 + $0x80] sm:$0xf0] }
 0x521   : > { %12120 = vmatprep.mubr.bf16.mxu1 %v8773_v1  ;;  %12149 = vmatpush3.bf16.msra.mxu1 %v12888_v8  ;;  %v14857_v8 = vld [vmem:[%s15399_s2 + $0x200] sm:$0xff]   ;;  %v8841_v1 = vsel %vm514_vm4, %v8832_v60, %v8840_v25  ;;  %v8900_v60 = vor.u32 %v8899_v2, %v8896_v33  ;;  %v8913_v25 = vrot.slane %v8911_v57, 3  ;;  %v9258_v11 = vrot.slane %v14903_v21, 4  ;;  %v12897_v2 = vld [vmem:[%s15399_s2 + $0x228] sm:$0xff]  }
 0x522   : > { %12150 = vmatprep.subr.bf16.mxu1 %v12889_v24  ;;  %v8924_v13 = vrot.slane %v8922_v55, 4  ;;  %v9265_v30 = vrot.slane %v14804_v7, 4  ;;  %v9268_v33 = vrot.slane %v14809_v23, 4  ;;  %v12898_v7 = vld [vmem:[%s15399_s2 + $0x230] sm:$0xff]   ;;  %v9274_v57 = vrot.slane %v14825_v37, 4 }
 0x523   : > { %v14954_v55 = vld [vmem:[#allocation2 + $0xc0] sm:$0xf0]  ;;  %v9277_v37 = vrot.slane %v14836_v56, 4  ;;  %v9286_v51 = vrot.slane %v14859_v59, 4 }
 0x525   : > { %12151 = vmatpush3.bf16.msra.mxu1 %v12889_v24  ;;  %v8871_v24 = vshll.u32 %v14859_v59, 16 }
 0x526   : > { %12152 = vmatprep.subr.bf16.mxu1 %v12890_v41 }
 0x527   : > { %v8873_v43 = vrot.slane %v8871_v24, 4 }
 0x528   : > { %12121 = vmatmul.mubr.bf16.gmra.mrb[12].mxu1 %v8790_v38  ;;  %v8858_v38 = vsel %vm514_vm4, %v8849_v31, %v8857_v62  ;;  %v9253_v31 = vrot.slane %v14780_v50, 4  ;;  %v14906_v62 = vld [vmem:[#allocation2 + $0x60] sm:$0xf0]  ;;  %v12894_v50 = vld [vmem:[%s15399_s2 + $0x210] sm:$0xff]  }
 0x529   : > { %12124 = vmatprep.mubr.bf16.mxu1 %v8807_v46  ;;  %12153 = vmatpush3.bf16.msra.mxu1 %v12890_v41  ;;  %v14868_v41 = vld [vmem:[#allocation2 + $0xf8] sm:$0xf]  ;;  %v8874_v18 = vor.u32 %v8873_v43, %v8870_v14  ;;  %v14892_v14 = vld [vmem:[#allocation2 + $0x40] sm:$0xf0]  ;;  %v9252_v43 = vrot.slane %v14890_v0, 4 }
 0x52a   : > { %12154 = vmatprep.subr.bf16.mxu1 %v12891_v5  ;;  %v8885_v40 = vshrl.u32 %v14868_v41, 16  ;;  %v8888_v3 = vshll.u32 %v14868_v41, 16  ;;  %v9255_v10 = vrot.slane %v14892_v14, 4 }
 0x52b   : > { %v8875_v46 = vsel %vm514_vm4, %v8866_v54, %v8874_v18  ;;  %v9254_v54 = vsel %vm954_vm0, %v9252_v43, %v9253_v31  ;;  %v9262_v18 = vrot.slane %v14792_v9, 4  ;;  %v9289_v31 = vrot.slane %v14868_v41, 4  ;;  %v9572_v41 = vld [vmem:[#allocation2 + $0x38] sm:$0x1f] }
 0x52c   : > { %v8887_v15 = vrot.slane %v8885_v40, 3  ;;  %v8890_v36 = vrot.slane %v8888_v3, 4  ;;  %v9257_v19 = vsel %vm954_vm0, %v9255_v10, %v9256_v49  ;;  %v9259_v40 = vrot.slane %v14790_v34, 4  ;;  %v12896_v34 = vld [vmem:[%s15399_s2 + $0x220] sm:$0xff]  }
 0x52d   : > { %12155 = vmatpush3.bf16.msra.mxu1 %v12891_v5  ;;  %v8905_v5 = vshll.u32 %v14870_v4, 16  ;;  %v9261_v3 = vrot.slane %v14906_v62, 4  ;;  %v9292_v10 = vrot.slane %v14870_v4, 4 }
 0x52e   : > { %12188 = vmatprep.subr.bf16.mxu1 %v14857_v8  ;;  %v8891_v47 = vor.u32 %v8890_v36, %v8887_v15  ;;  %v9260_v52 = vsel %vm954_vm0, %v9258_v11, %v9259_v40  ;;  %v14936_v36 = vld [vmem:[#allocation2 + $0x90] sm:$0xf0] }
 0x52f   : > { %v8907_v6 = vrot.slane %v8905_v5, 4  ;;  %v9263_v5 = vsel %vm954_vm0, %v9261_v3, %v9262_v18  ;;  %v9270_v23 = vrot.slane %v14936_v36, 4  ;;  %v14984_v11 = vld [vmem:[#allocation2 + $0x110] sm:$0xf0]  ;;  %v9573_v18 = vld [vmem:[#allocation2 + $0x48] sm:$0x1f] }
 0x530   : > { %12125 = vmatmul.mubr.bf16.gmra.mrb[16].mxu1 %v8824_v58  ;;  %v8892_v53 = vsel %vm514_vm4, %v8883_v32, %v8891_v47  ;;  %v8921_v58 = vrot.slane %v8919_v35, 3  ;;  %v14952_v35 = vld [vmem:[#allocation2 + $0xb0] sm:$0xf0] }
 0x531   : > { %12128 = vmatprep.mubr.bf16.mxu1 %v8841_v1  ;;  %v8908_v29 = vor.u32 %v8907_v6, %v8904_v26  ;;  %v8917_v1 = vor.u32 %v8916_v44, %v8913_v25  ;;  %v14938_v26 = vld [vmem:[#allocation2 + $0xa0] sm:$0xf0]  ;;  %v9271_v6 = vrot.slane %v14820_v20, 4  ;;  %v9276_v20 = vrot.slane %v14952_v35, 4 }
 0x532   : > { %v8925_v17 = vor.u32 %v8924_v13, %v8921_v58  ;;  %v9273_v32 = vrot.slane %v14938_v26, 4  ;;  %v14964_v58 = vld [vmem:[#allocation2 + $0xe0] sm:$0xf0] }
 0x533   : > { %v8909_v24 = vsel %vm514_vm4, %v8900_v60, %v8908_v29  ;;  %v9272_v60 = vsel %vm954_vm0, %v9270_v23, %v9271_v6  ;;  %v9279_v29 = vrot.slane %v14954_v55, 4  ;;  %v9278_v25 = vsel %vm954_vm0, %v9276_v20, %v9277_v37  ;;  %v9575_v37 = vld [vmem:[#allocation2 + $0x68] sm:$0x1f] }
 0x534   : > { %v8926_v45 = vsel %vm514_vm4, %v8917_v1, %v8925_v17  ;;  %v9275_v47 = vsel %vm954_vm0, %v9273_v32, %v9274_v57  ;;  %v9283_v1 = vrot.slane %v14852_v27, 4  ;;  %v9285_v56 = vrot.slane %v14964_v58, 4  ;;  %v14972_v17 = vld [vmem:[#allocation2 + $0xf0] sm:$0xf0] }
 0x535   : > { %v9288_v43 = vrot.slane %v14972_v17, 4 }
 0x536   : > { %v9287_v12 = vsel %vm954_vm0, %v9285_v56, %v9286_v51  ;;  %v9639_v51 = vshrl.u32 %v14903_v21, 16 }
 0x538   : > { %12129 = vmatmul.mubr.bf16.gmra.mrb[20].mxu1 %v8858_v38  ;;  %v14920_v38 = vld [vmem:[#allocation2 + $0x70] sm:$0xf0] }
 0x539   : > { %12132 = vmatprep.mubr.bf16.mxu1 %v8875_v46  ;;  %v9264_v9 = vrot.slane %v14920_v38, 4  ;;  %v9267_v46 = vrot.slane %v14922_v48, 4 }
 0x53b   : > { %v9266_v16 = vsel %vm954_vm0, %v9264_v9, %v9265_v30  ;;  %v9269_v15 = vsel %vm954_vm0, %v9267_v46, %v9268_v33  ;;  %v9630_v30 = vshrl.u32 %v9573_v18, 16  ;;  %v9633_v46 = vshll.u32 %v9573_v18, 16 }
 0x53c   : > { %v9605_v33 = vshrl.u32 %v14890_v0, 16 }
 0x53d   : > { %v9632_v57 = vrot.slane %v9630_v30, 4  ;;  %v9690_v30 = vshrl.u32 %v14922_v48, 16 }
 0x540   : > { %12133 = vmatmul.mubr.bf16.gmra.mrb[24].mxu1 %v8892_v53  ;;  %v9280_v53 = vrot.slane %v14841_v42, 4 }
 0x541   : > { %12136 = vmatprep.mubr.bf16.mxu1 %v8909_v24  ;;  %v14962_v24 = vld [vmem:[#allocation2 + $0xd0] sm:$0xf0] }
 0x542   : > { %v9281_v44 = vsel %vm954_vm0, %v9279_v29, %v9280_v53  ;;  %v9282_v13 = vrot.slane %v14962_v24, 4 }
 0x544   : > { %v9284_v42 = vsel %vm954_vm0, %v9282_v13, %v9283_v1  ;;  %v9664_v13 = vshrl.u32 %v9575_v37, 16  ;;  %v9667_v1 = vshll.u32 %v9575_v37, 16 }
 0x548   : > { %12137 = vmatmul.mubr.bf16.gmra.mrb[28].mxu1 %v8926_v45  ;;  %v14974_v45 = vld [vmem:[#allocation2 + $0x100] sm:$0xf0] }
 0x549   : > { %12156 = vmatprep.mubr.bf16.mxu1 %v9251_v39  ;;  %v9571_v39 = vld [vmem:[#allocation2 + $0x28] sm:$0x1f]  ;;  %v9291_v27 = vrot.slane %v14974_v45, 4 }
 0x54a   : > { %v9596_v59 = vshrl.u32 %v9571_v39, 16  ;;  %v9599_v49 = vshll.u32 %v9571_v39, 16  ;;  %v9656_v39 = vshrl.u32 %v14906_v62, 16 }
 0x54c   : > { %v9598_v40 = vrot.slane %v9596_v59, 4  ;;  %v9601_v3 = vrot.slane %v9599_v49, 5  ;;  %v9666_v49 = vrot.slane %v9664_v13, 4  ;;  %v9727_v13 = vshll.u32 %v14938_v26, 16 }
 0x54e   : > { %v9602_v9 = vor.u32 %v9601_v3, %v9598_v40  ;;  %v9577_v40 = vld [vmem:[#allocation2 + $0x88] sm:$0x1f] }
 0x550   : > { %12157 = vmatmul.mubr.bf16.vlgmr.msra.gmra.mrb[0].mxu1 %v9254_v54  ;;  %v9591_v54 = vshll.u32 %v14884_v61, 16 }
 0x551   : > { %12160 = vmatprep.mubr.bf16.mxu1 %v9257_v19  ;;  %12189 = vmatpush3.bf16.msra.mxu1 %v14857_v8  ;;  %v12895_v8 = vld [vmem:[%s15399_s2 + $0x218] sm:$0xff]   ;;  %v9290_v19 = vsel %vm954_vm0, %v9288_v43, %v9289_v31  ;;  %v9659_v43 = vshll.u32 %v14906_v62, 16 }
 0x552   : > { %12190 = vmatprep.subr.bf16.mxu1 %v12893_v28  ;;  %v9593_v4 = vrot.slane %v9591_v54, 5  ;;  %v9576_v54 = vld [vmem:[#allocation2 + $0x78] sm:$0x1f] }
 0x553   : > { %v9661_v3 = vrot.slane %v9659_v43, 5  ;;  %v9681_v18 = vshrl.u32 %v9576_v54, 16  ;;  %v9580_v43 = vld [vmem:[#allocation2 + $0xb8] sm:$0x1f] }
 0x555   : > { %12191 = vmatpush3.bf16.msra.mxu1 %v12893_v28  ;;  %v9588_v28 = vshrl.u32 %v14884_v61, 16  ;;  %v9616_v61 = vshll.u32 %v9572_v41, 16 }
 0x556   : > { %12192 = vmatprep.subr.bf16.mxu1 %v12894_v50 }
 0x557   : > { %v9618_v32 = vrot.slane %v9616_v61, 5  ;;  %v9676_v61 = vshll.u32 %v14920_v38, 16 }
 0x558   : > { %12161 = vmatmul.mubr.bf16.gmra.mrb[4].mxu1 %v9260_v52  ;;  %v9294_v52 = vrot.slane %v14984_v11, 4 }
 0x559   : > { %12164 = vmatprep.mubr.bf16.mxu1 %v9263_v5  ;;  %12193 = vmatpush3.bf16.msra.mxu1 %v12894_v50  ;;  %v9293_v50 = vsel %vm954_vm0, %v9291_v27, %v9292_v10  ;;  %v9295_v5 = vrot.slane %v14878_v22, 4 }
 0x55a   : > { %12194 = vmatprep.subr.bf16.mxu1 %v12895_v8 }
 0x55b   : > { %v9296_v23 = vsel %vm954_vm0, %v9294_v52, %v9295_v5  ;;  %v9701_v52 = vshll.u32 %v9577_v40, 16 }
 0x55d   : > { %12195 = vmatpush3.bf16.msra.mxu1 %v12895_v8  ;;  %v9590_v8 = vrot.slane %v9588_v28, 4  ;;  %v9669_v28 = vrot.slane %v9667_v1, 5 }
 0x55e   : > { %12196 = vmatprep.subr.bf16.mxu1 %v12896_v34 }
 0x55f   : > { %v9670_v62 = vor.u32 %v9669_v28, %v9666_v49  ;;  %v9749_v28 = vshrl.u32 %v9580_v43, 16 }
 0x560   : > { %12165 = vmatmul.mubr.bf16.gmra.mrb[8].mxu1 %v9266_v16  ;;  %v9594_v16 = vor.u32 %v9593_v4, %v9590_v8  ;;  %v9684_v8 = vshll.u32 %v9576_v54, 16  ;;  %v9698_v4 = vshrl.u32 %v9577_v40, 16  ;;  %v9752_v54 = vshll.u32 %v9580_v43, 16 }
 0x561   : > { %12168 = vmatprep.mubr.bf16.mxu1 %v9269_v15  ;;  %12197 = vmatpush3.bf16.msra.mxu1 %v12896_v34  ;;  %v9613_v34 = vshrl.u32 %v9572_v41, 16  ;;  %v9622_v15 = vshrl.u32 %v14892_v14, 16  ;;  %v9809_v43 = vshrl.u32 %v14972_v17, 16 }
 0x562   : > { %12198 = vmatprep.subr.bf16.mxu1 %v12897_v2  ;;  %v9603_v22 = vsel %vm1470_vm7, %v9594_v16, %v9602_v9  ;;  %v9686_v16 = vrot.slane %v9684_v8, 5  ;;  %v9761_v8 = vshll.u32 %v14954_v55, 16 }
 0x563   : > { %v9615_v6 = vrot.slane %v9613_v34, 4  ;;  %v9673_v34 = vshrl.u32 %v14920_v38, 16  ;;  %v9692_v38 = vrot.slane %v9690_v30, 4 }
 0x565   : > { %12199 = vmatpush3.bf16.msra.mxu1 %v12897_v2  ;;  %v9608_v2 = vshll.u32 %v14890_v0, 16  ;;  %v9624_v0 = vrot.slane %v9622_v15, 4  ;;  %v9619_v53 = vor.u32 %v9618_v32, %v9615_v6  ;;  %v9578_v6 = vld [vmem:[#allocation2 + $0x98] sm:$0x1f]  ;;  %v9675_v32 = vrot.slane %v9673_v34, 4 }
 0x566   : > { %12200 = vmatprep.subr.bf16.mxu1 %v12898_v7 }
 0x567   : > { %v9610_v20 = vrot.slane %v9608_v2, 5  ;;  %v9683_v2 = vrot.slane %v9681_v18, 4  ;;  %v9758_v18 = vshrl.u32 %v14954_v55, 16 }
 0x568   : > { %12169 = vmatmul.mubr.bf16.gmra.mrb[12].mxu1 %v9272_v60  ;;  %v9574_v60 = vld [vmem:[#allocation2 + $0x58] sm:$0x1f] }
 0x569   : > { %12172 = vmatprep.mubr.bf16.mxu1 %v9275_v47  ;;  %12201 = vmatpush3.bf16.msra.mxu1 %v12898_v7  ;;  %v9625_v7 = vshll.u32 %v14892_v14, 16  ;;  %v9607_v47 = vrot.slane %v9605_v33, 4 }
 0x56a   : > { %12202 = vmatprep.subr.bf16.mxu1 %v12899_v63 }
 0x56b   : > { %v9627_v29 = vrot.slane %v9625_v7, 5  ;;  %v9611_v56 = vor.u32 %v9610_v20, %v9607_v47  ;;  %v9700_v7 = vrot.slane %v9698_v4, 4  ;;  %v9715_v47 = vshrl.u32 %v9578_v6, 16 }
 0x56c   : > { %v9718_v20 = vshll.u32 %v9578_v6, 16  ;;  %v9751_v4 = vrot.slane %v9749_v28, 4 }
 0x56d   : > { %12203 = vmatpush3.bf16.msra.mxu1 %v12899_v63  ;;  %v9635_v63 = vrot.slane %v9633_v46, 5  ;;  %v9620_v31 = vsel %vm1470_vm7, %v9611_v56, %v9619_v53  ;;  %v9693_v46 = vshll.u32 %v14922_v48, 16  ;;  %v9707_v53 = vshrl.u32 %v14936_v36, 16 }
 0x56e   : > { %v9717_v56 = vrot.slane %v9715_v47, 4 }
 0x56f   : > { %v9636_v14 = vor.u32 %v9635_v63, %v9632_v57  ;;  %v9579_v57 = vld [vmem:[#allocation2 + $0xa8] sm:$0x1f]  ;;  %v9695_v63 = vrot.slane %v9693_v46, 5 }
 0x570   : > { %12173 = vmatmul.mubr.bf16.gmra.mrb[16].mxu1 %v9278_v25  ;;  %v9647_v25 = vshrl.u32 %v9574_v60, 16  ;;  %v9732_v37 = vshrl.u32 %v9579_v57, 16 }
 0x571   : > { %12176 = vmatprep.mubr.bf16.mxu1 %v9281_v44  ;;  %v9650_v44 = vshll.u32 %v9574_v60, 16  ;;  %v9687_v60 = vor.u32 %v9686_v16, %v9683_v2  ;;  %v9763_v2 = vrot.slane %v9761_v8, 5 }
 0x572   : > { %v9649_v27 = vrot.slane %v9647_v25, 4  ;;  %v9710_v25 = vshll.u32 %v14936_v36, 16 }
 0x573   : > { %v9652_v10 = vrot.slane %v9650_v44, 5  ;;  %v9696_v44 = vor.u32 %v9695_v63, %v9692_v38  ;;  %v9792_v63 = vshrl.u32 %v14964_v58, 16 }
 0x575   : > { %v9653_v41 = vor.u32 %v9652_v10, %v9649_v27  ;;  %v9712_v27 = vrot.slane %v9710_v25, 5  ;;  %v9581_v10 = vld [vmem:[#allocation2 + $0xc8] sm:$0x1f] }
 0x578   : > { %12177 = vmatmul.mubr.bf16.gmra.mrb[20].mxu1 %v9284_v42  ;;  %v9642_v42 = vshll.u32 %v14903_v21, 16  ;;  %v9658_v21 = vrot.slane %v9656_v39, 4 }
 0x579   : > { %12180 = vmatprep.mubr.bf16.mxu1 %v9287_v12  ;;  %v9628_v12 = vor.u32 %v9627_v29, %v9624_v0  ;;  %v9735_v0 = vshll.u32 %v9579_v57, 16  ;;  %v9778_v57 = vshll.u32 %v14962_v24, 16 }
 0x57a   : > { %v9662_v9 = vor.u32 %v9661_v3, %v9658_v21  ;;  %v9741_v21 = vshrl.u32 %v14952_v35, 16  ;;  %v9744_v3 = vshll.u32 %v14952_v35, 16  ;;  %v9760_v35 = vrot.slane %v9758_v18, 4 }
 0x57b   : > { %v9637_v59 = vsel %vm1470_vm7, %v9628_v12, %v9636_v14  ;;  %v9724_v14 = vshrl.u32 %v14938_v26, 16  ;;  %v9734_v12 = vrot.slane %v9732_v37, 4  ;;  %v9737_v39 = vrot.slane %v9735_v0, 5 }
 0x57c   : > { %v9671_v15 = vsel %vm1470_vm7, %v9662_v9, %v9670_v62  ;;  %v9582_v9 = vld [vmem:[#allocation2 + $0xd8] sm:$0x1f]  ;;  %v9743_v30 = vrot.slane %v9741_v21, 4  ;;  %v9746_v46 = vrot.slane %v9744_v3, 5  ;;  %v9764_v38 = vor.u32 %v9763_v2, %v9760_v35 }
 0x57d   : > { %v9726_v36 = vrot.slane %v9724_v14, 4  ;;  %v9738_v26 = vor.u32 %v9737_v39, %v9734_v12  ;;  %v9585_v14 = vld [vmem:[#allocation2 + $0x108] sm:$0x1f] }
 0x57e   : > { %v9837_v12 = vshll.u32 %v9585_v14, 16 }
 0x580   : > { %12181 = vmatmul.mubr.bf16.gmra.mrb[24].mxu1 %v9290_v19  ;;  %v9641_v19 = vrot.slane %v9639_v51, 4  ;;  %v9720_v51 = vrot.slane %v9718_v20, 5 }
 0x581   : > { %12184 = vmatprep.mubr.bf16.mxu1 %v9293_v50  ;;  %v9644_v50 = vrot.slane %v9642_v42, 5 }
 0x582   : > { %v9721_v49 = vor.u32 %v9720_v51, %v9717_v56 }
 0x583   : > { %v9645_v5 = vor.u32 %v9644_v50, %v9641_v19  ;;  %v9766_v19 = vshrl.u32 %v9581_v10, 16  ;;  %v9769_v50 = vshll.u32 %v9581_v10, 16  ;;  %v9826_v10 = vshrl.u32 %v14974_v45, 16 }
 0x585   : > { %v9654_v33 = vsel %vm1470_vm7, %v9645_v5, %v9653_v41  ;;  %v9768_v34 = vrot.slane %v9766_v19, 4  ;;  %v9839_v19 = vrot.slane %v9837_v12, 5  ;;  %v9828_v3 = vrot.slane %v9826_v10, 4 }
 0x588   : > { %12185 = vmatmul.mubr.bf16.gmra.mrb[28].mxu1 %v9296_v23  ;;  %v9703_v23 = vrot.slane %v9701_v52, 5  ;;  %v9754_v52 = vrot.slane %v9752_v54, 5 }
 0x589   : > { %12204 = vmatprep.mubr.bf16.mxu1 %v9603_v22  ;;  %v9678_v22 = vrot.slane %v9676_v61, 5  ;;  %v9771_v61 = vrot.slane %v9769_v50, 5  ;;  %v9586_v50 = vld [vmem:[#allocation2 + $0x118] sm:$0x1f] }
 0x58a   : > { %v9704_v48 = vor.u32 %v9703_v23, %v9700_v7  ;;  %v9755_v16 = vor.u32 %v9754_v52, %v9751_v4  ;;  %v9786_v7 = vshll.u32 %v9582_v9, 16  ;;  %v9851_v18 = vshrl.u32 %v9586_v50, 16 }
 0x58b   : > { %v9679_v29 = vor.u32 %v9678_v22, %v9675_v32  ;;  %v9772_v55 = vor.u32 %v9771_v61, %v9768_v34  ;;  %v9747_v32 = vor.u32 %v9746_v46, %v9743_v30  ;;  %v9775_v22 = vshrl.u32 %v14962_v24, 16 }
 0x58c   : > { %v9705_v42 = vsel %vm1470_vm7, %v9696_v44, %v9704_v48  ;;  %v9788_v48 = vrot.slane %v9786_v7, 5  ;;  %v9780_v44 = vrot.slane %v9778_v57, 5  ;;  %v9794_v24 = vrot.slane %v9792_v63, 4 }
 0x58d   : > { %v9688_v1 = vsel %vm1470_vm7, %v9679_v29, %v9687_v60  ;;  %v9795_v60 = vshll.u32 %v14964_v58, 16  ;;  %v9756_v47 = vsel %vm1470_vm7, %v9747_v32, %v9755_v16  ;;  %v9773_v37 = vsel %vm1470_vm7, %v9764_v38, %v9772_v55 }
 0x58e   : > { %v9777_v25 = vrot.slane %v9775_v22, 4  ;;  %v9854_v8 = vshll.u32 %v9586_v50, 16  ;;  %v9843_v4 = vshrl.u32 %v14984_v11, 16  ;;  %v9846_v52 = vshll.u32 %v14984_v11, 16 }
 0x58f   : > { %v9853_v61 = vrot.slane %v9851_v18, 4 }
 0x590   : > { %12205 = vmatmul.mubr.bf16.vlgmr.msra.gmra.mrb[0].mxu1 %v9620_v31  ;;  %v9709_v31 = vrot.slane %v9707_v53, 4  ;;  %v9584_v53 = vld [vmem:[#allocation2 + $0xf8] sm:$0x1f]  ;;  %v9781_v39 = vor.u32 %v9780_v44, %v9777_v25  ;;  %v9845_v46 = vrot.slane %v9843_v4, 4 }
 0x591   : > { %12208 = vmatprep.mubr.bf16.mxu1 %v9637_v59  ;;  %v9729_v59 = vrot.slane %v9727_v13, 5  ;;  %v9797_v13 = vrot.slane %v9795_v60, 5  ;;  %v9817_v56 = vshrl.u32 %v9584_v53, 16  ;;  %v9820_v51 = vshll.u32 %v9584_v53, 16 }
 0x592   : > { %v9713_v40 = vor.u32 %v9712_v27, %v9709_v31  ;;  %v9812_v31 = vshll.u32 %v14972_v17, 16 }
 0x593   : > { %v9730_v41 = vor.u32 %v9729_v59, %v9726_v36  ;;  %v9798_v27 = vor.u32 %v9797_v13, %v9794_v24  ;;  %v9829_v36 = vshll.u32 %v14974_v45, 16  ;;  %v9822_v28 = vrot.slane %v9820_v51, 5 }
 0x594   : > { %v9722_v62 = vsel %vm1470_vm7, %v9713_v40, %v9721_v49  ;;  %v9819_v49 = vrot.slane %v9817_v56, 4  ;;  %v9811_v40 = vrot.slane %v9809_v43, 4  ;;  %v9814_v21 = vrot.slane %v9812_v31, 5 }
 0x595   : > { %v9739_v5 = vsel %vm1470_vm7, %v9730_v41, %v9738_v26  ;;  %v9831_v17 = vrot.slane %v9829_v36, 5 }
 0x596   : > { %v9823_v41 = vor.u32 %v9822_v28, %v9819_v49  ;;  %v9815_v45 = vor.u32 %v9814_v21, %v9811_v40 }
 0x598   : > { %12209 = vmatmul.mubr.bf16.gmra.mrb[4].mxu1 %v9654_v33  ;;  %v9583_v33 = vld [vmem:[#allocation2 + $0xe8] sm:$0x1f]  ;;  %v9824_v34 = vsel %vm1470_vm7, %v9815_v45, %v9823_v41 }
 0x599   : > { %12212 = vmatprep.mubr.bf16.mxu1 %v9671_v15  ;;  %v9783_v15 = vshrl.u32 %v9582_v9, 16  ;;  %v9800_v23 = vshrl.u32 %v9583_v33, 16  ;;  %v9803_v6 = vshll.u32 %v9583_v33, 16  ;;  %v9856_v9 = vrot.slane %v9854_v8, 5 }
 0x59a   : > { %v9848_v33 = vrot.slane %v9846_v52, 5 }
 0x59b   : > { %v9785_v20 = vrot.slane %v9783_v15, 4  ;;  %v9802_v0 = vrot.slane %v9800_v23, 4  ;;  %v9805_v29 = vrot.slane %v9803_v6, 5  ;;  %v9857_v35 = vor.u32 %v9856_v9, %v9853_v61 }
 0x59c   : > { %v9849_v2 = vor.u32 %v9848_v33, %v9845_v46 }
 0x59d   : > { %v9806_v58 = vor.u32 %v9805_v29, %v9802_v0 }
 0x59e   : > { %v9858_v16 = vsel %vm1470_vm7, %v9849_v2, %v9857_v35 }
 0x59f   : > { %v9807_v54 = vsel %vm1470_vm7, %v9798_v27, %v9806_v58 }
 0x5a0   : > { %12213 = vmatmul.mubr.bf16.gmra.mrb[8].mxu1 %v9688_v1  ;;  %v9789_v1 = vor.u32 %v9788_v48, %v9785_v20 }
 0x5a1   : > { %12216 = vmatprep.mubr.bf16.mxu1 %v9705_v42  ;;  %v9834_v42 = vshrl.u32 %v9585_v14, 16 }
 0x5a2   : > { %v9790_v59 = vsel %vm1470_vm7, %v9781_v39, %v9789_v1 }
 0x5a3   : > { %v9836_v26 = vrot.slane %v9834_v42, 4 }
 0x5a8   : > { %12217 = vmatmul.mubr.bf16.gmra.mrb[12].mxu1 %v9722_v62  ;;  %v9840_v62 = vor.u32 %v9839_v19, %v9836_v26 }
 0x5a9   : > { %12220 = vmatprep.mubr.bf16.mxu1 %v9739_v5  ;;  %v9832_v5 = vor.u32 %v9831_v17, %v9828_v3 }
 0x5ab   : > { %v9841_v30 = vsel %vm1470_vm7, %v9832_v5, %v9840_v62 }
 0x5b0   : > { %12221 = vmatmul.mubr.bf16.gmra.mrb[16].mxu1 %v9756_v47 }
 0x5b1   : > { %12224 = vmatprep.mubr.bf16.mxu1 %v9773_v37 }
 0x5b8   : > { %12225 = vmatmul.mubr.bf16.gmra.mrb[20].mxu1 %v9790_v59 }
 0x5b9   : > { %12228 = vmatprep.mubr.bf16.mxu1 %v9807_v54 }
 0x5c0   : > { %12229 = vmatmul.mubr.bf16.gmra.mrb[24].mxu1 %v9824_v34 }
 0x5c1   : > { %12232 = vmatprep.mubr.bf16.mxu1 %v9841_v30 }
 0x5c8   : > { %12233 = vmatmul.mubr.bf16.gmra.mrb[28].mxu1 %v9858_v16 }
 0x663   : > { %v15035_v15 = vpop.f32.mrb[0].mxu1 }
 0x664   : > { %v15037_v7 = vpop.f32.mrb[1].mxu1  ;;  %v10205_v22 = vmul.f32 %v15035_v15, %v15035_v15 }
 0x665   : > { %v15039_v11 = vpop.f32.mrb[2].mxu1  ;;  %v10203_v23 = vmul.f32 %v15037_v7, %v15037_v7 }
 0x666   : > { %v15041_v55 = vpop.f32.mrb[3].mxu1  ;;  %v10206_v63 = vmul.f32 %v15039_v11, %v15039_v11 }
 0x667   : > { %v10165_v6 = vadd.f32 %v15041_v55, %v15037_v7  ;;  %v10204_v32 = vmul.f32 %v15041_v55, %v15041_v55 }
 0x669   : > { %v10166_v57 = vadd.f32 %v15035_v15, %v10165_v6  ;;  %v10235_v38 = vadd.f32 %v10204_v32, %v10203_v23 }
 0x66b   : > { %v10236_v60 = vadd.f32 %v10235_v38, %v10205_v22  ;;  %v15054_v47 = vpop.f32.mrb[4].mxu1  ;;  %v10167_v20 = vadd.f32 %v15039_v11, %v10166_v57 }
 0x66c   : > { %v15057_v48 = vpop.f32.mrb[5].mxu1  ;;  %v10209_v13 = vmul.f32 %v15054_v47, %v15054_v47 }
 0x66d   : > { %v10168_v37 = vadd.f32 %v10167_v20, %v15057_v48  ;;  %v10207_v0 = vmul.f32 %v15057_v48, %v15057_v48  ;;  %v10237_v29 = vadd.f32 %v10236_v60, %v10206_v63  ;;  %v15062_v53 = vpop.f32.mrb[6].mxu1 }
 0x66e   : > { %v15064_v25 = vpop.f32.mrb[7].mxu1  ;;  %v10210_v51 = vmul.f32 %v15062_v53, %v15062_v53 }
 0x66f   : > { %v10238_v44 = vadd.f32 %v10237_v29, %v10207_v0  ;;  %v10169_v14 = vadd.f32 %v10168_v37, %v15064_v25  ;;  %v10208_v24 = vmul.f32 %v15064_v25, %v15064_v25 }
 0x671   : > { %v10170_v1 = vadd.f32 %v15054_v47, %v10169_v14  ;;  %v10239_v56 = vadd.f32 %v10238_v44, %v10208_v24 }
 0x673   : > { %v10240_v58 = vadd.f32 %v10239_v56, %v10209_v13  ;;  %v15074_v42 = vpop.f32.mrb[8].mxu1  ;;  %v10171_v12 = vadd.f32 %v15062_v53, %v10170_v1 }
 0x674   : > { %v15077_v39 = vpop.f32.mrb[9].mxu1  ;;  %v10213_v54 = vmul.f32 %v15074_v42, %v15074_v42 }
 0x675   : > { %v10172_v43 = vadd.f32 %v10171_v12, %v15077_v39  ;;  %v10211_v31 = vmul.f32 %v15077_v39, %v15077_v39  ;;  %v10241_v27 = vadd.f32 %v10240_v58, %v10210_v51  ;;  %v15082_v10 = vpop.f32.mrb[10].mxu1 }
 0x676   : > { %v15084_v36 = vpop.f32.mrb[11].mxu1  ;;  %v10214_v50 = vmul.f32 %v15082_v10, %v15082_v10 }
 0x677   : > { %v10242_v59 = vadd.f32 %v10241_v27, %v10211_v31  ;;  %v10173_v49 = vadd.f32 %v10172_v43, %v15084_v36  ;;  %v10212_v28 = vmul.f32 %v15084_v36, %v15084_v36 }
 0x679   : > { %v10174_v26 = vadd.f32 %v15074_v42, %v10173_v49  ;;  %v10243_v19 = vadd.f32 %v10242_v59, %v10212_v28 }
 0x67b   : > { %v10244_v40 = vadd.f32 %v10243_v19, %v10213_v54  ;;  %v15094_v21 = vpop.f32.mrb[12].mxu1  ;;  %v10175_v3 = vadd.f32 %v15082_v10, %v10174_v26 }
 0x67c   : > { %v15097_v17 = vpop.f32.mrb[13].mxu1  ;;  %v10217_v34 = vmul.f32 %v15094_v21, %v15094_v21 }
 0x67d   : > { %v10176_v41 = vadd.f32 %v10175_v3, %v15097_v17  ;;  %v10215_v18 = vmul.f32 %v15097_v17, %v15097_v17  ;;  %v10245_v8 = vadd.f32 %v10244_v40, %v10214_v50  ;;  %v15102_v62 = vpop.f32.mrb[14].mxu1 }
 0x67e   : > { %v15104_v45 = vpop.f32.mrb[15].mxu1  ;;  %v10218_v30 = vmul.f32 %v15102_v62, %v15102_v62 }
 0x67f   : > { %v10246_v4 = vadd.f32 %v10245_v8, %v10215_v18  ;;  %v10177_v52 = vadd.f32 %v10176_v41, %v15104_v45  ;;  %v10216_v5 = vmul.f32 %v15104_v45, %v15104_v45 }
 0x681   : > { %v10178_v61 = vadd.f32 %v15094_v21, %v10177_v52  ;;  %v10247_v9 = vadd.f32 %v10246_v4, %v10216_v5 }
 0x683   : > { %v10248_v46 = vadd.f32 %v10247_v9, %v10217_v34  ;;  %v15114_v33 = vpop.f32.mrb[16].mxu1  ;;  %v10179_v35 = vadd.f32 %v15102_v62, %v10178_v61 }
 0x684   : > { %v15117_v2 = vpop.f32.mrb[17].mxu1  ;;  %v10221_v60 = vmul.f32 %v15114_v33, %v15114_v33 }
 0x685   : > { %v10180_v16 = vadd.f32 %v10179_v35, %v15117_v2  ;;  %v10219_v23 = vmul.f32 %v15117_v2, %v15117_v2  ;;  %v10249_v6 = vadd.f32 %v10248_v46, %v10218_v30  ;;  %v15122_v32 = vpop.f32.mrb[18].mxu1 }
 0x686   : > { %v15124_v22 = vpop.f32.mrb[19].mxu1  ;;  %v10222_v0 = vmul.f32 %v15122_v32, %v15122_v32 }
 0x687   : > { %v10250_v57 = vadd.f32 %v10249_v6, %v10219_v23  ;;  %v10181_v38 = vadd.f32 %v10180_v16, %v15124_v22  ;;  %v10220_v63 = vmul.f32 %v15124_v22, %v15124_v22 }
 0x689   : > { %v10182_v20 = vadd.f32 %v15114_v33, %v10181_v38  ;;  %v10251_v37 = vadd.f32 %v10250_v57, %v10220_v63 }
 0x68b   : > { %v10252_v29 = vadd.f32 %v10251_v37, %v10221_v60  ;;  %v15134_v44 = vpop.f32.mrb[20].mxu1  ;;  %v10183_v14 = vadd.f32 %v15122_v32, %v10182_v20 }
 0x68c   : > { %v15137_v24 = vpop.f32.mrb[21].mxu1  ;;  %v10225_v27 = vmul.f32 %v15134_v44, %v15134_v44 }
 0x68d   : > { %v10184_v13 = vadd.f32 %v10183_v14, %v15137_v24  ;;  %v10223_v1 = vmul.f32 %v15137_v24, %v15137_v24  ;;  %v10253_v56 = vadd.f32 %v10252_v29, %v10222_v0  ;;  %v15142_v51 = vpop.f32.mrb[22].mxu1 }
 0x68e   : > { %v15144_v58 = vpop.f32.mrb[23].mxu1  ;;  %v10226_v28 = vmul.f32 %v15142_v51, %v15142_v51 }
 0x68f   : > { %v10254_v12 = vadd.f32 %v10253_v56, %v10223_v1  ;;  %v10185_v43 = vadd.f32 %v10184_v13, %v15144_v58  ;;  %v10224_v31 = vmul.f32 %v15144_v58, %v15144_v58 }
 0x691   : > { %v10186_v59 = vadd.f32 %v15134_v44, %v10185_v43  ;;  %v10255_v49 = vadd.f32 %v10254_v12, %v10224_v31 }
 0x693   : > { %v10256_v54 = vadd.f32 %v10255_v49, %v10225_v27  ;;  %v15154_v26 = vpop.f32.mrb[24].mxu1  ;;  %v10187_v19 = vadd.f32 %v15142_v51, %v10186_v59 }
 0x694   : > { %v15157_v50 = vpop.f32.mrb[25].mxu1  ;;  %v10229_v34 = vmul.f32 %v15154_v26, %v15154_v26 }
 0x695   : > { %v10188_v40 = vadd.f32 %v10187_v19, %v15157_v50  ;;  %v10227_v3 = vmul.f32 %v15157_v50, %v15157_v50  ;;  %v10257_v41 = vadd.f32 %v10256_v54, %v10226_v28  ;;  %v15162_v18 = vpop.f32.mrb[26].mxu1 }
 0x696   : > { %v15164_v8 = vpop.f32.mrb[27].mxu1  ;;  %v10230_v30 = vmul.f32 %v15162_v18, %v15162_v18 }
 0x697   : > { %v10258_v4 = vadd.f32 %v10257_v41, %v10227_v3  ;;  %v10189_v52 = vadd.f32 %v10188_v40, %v15164_v8  ;;  %v10228_v5 = vmul.f32 %v15164_v8, %v15164_v8 }
 0x699   : > { %v10190_v61 = vadd.f32 %v15154_v26, %v10189_v52  ;;  %v10259_v9 = vadd.f32 %v10258_v4, %v10228_v5 }
 0x69b   : > { %v10260_v46 = vadd.f32 %v10259_v9, %v10229_v34  ;;  %v15174_v35 = vpop.f32.mrb[28].mxu1  ;;  %v10191_v16 = vadd.f32 %v15162_v18, %v10190_v61 }
 0x69c   : > { %v15177_v23 = vpop.f32.mrb[29].mxu1  ;;  %v10233_v29 = vmul.f32 %v15174_v35, %v15174_v35 }
 0x69d   : > { %v10192_v6 = vadd.f32 %v10191_v16, %v15177_v23  ;;  %v10231_v57 = vmul.f32 %v15177_v23, %v15177_v23  ;;  %v10261_v38 = vadd.f32 %v10260_v46, %v10230_v30  ;;  %v15182_v63 = vpop.f32.mrb[30].mxu1 }
 0x69e   : > { %v15184_v60 = vpop.f32.mrb[31].mxu1  ;;  %v10234_v1 = vmul.f32 %v15182_v63, %v15182_v63 }
 0x69f   : > { %v10262_v20 = vadd.f32 %v10261_v38, %v10231_v57  ;;  %v10193_v37 = vadd.f32 %v10192_v6, %v15184_v60  ;;  %v10232_v0 = vmul.f32 %v15184_v60, %v15184_v60 }
 0x6a1   : > { %v10194_v14 = vadd.f32 %v15174_v35, %v10193_v37  ;;  %v10263_v13 = vadd.f32 %v10262_v20, %v10232_v0 }
 0x6a3   : > { %v10195_v56 = vadd.f32 %v15182_v63, %v10194_v14  ;;  %v10264_v12 = vadd.f32 %v10263_v13, %v10233_v29 }
 0x6a5   : > { %v10196_v43 = vrot.slane %v10195_v56, 4  ;;  %v10265_v31 = vadd.f32 %v10264_v12, %v10234_v1 }
 0x6a7   : > { %v10197_v27 = vadd.f32 %v10196_v43, %v10195_v56  ;;  %v10266_v59 = vrot.slane %v10265_v31, 4 }
 0x6a9   : > { %v10198_v49 = vrot.slane %v10197_v27, 2  ;;  %v10267_v28 = vadd.f32 %v10266_v59, %v10265_v31 }
 0x6ab   : > { %v10199_v54 = vadd.f32 %v10198_v49, %v10197_v27  ;;  %v10268_v19 = vrot.slane %v10267_v28, 2  ;;  %v10376_v49 = vld [vmem:[%s12988_s23] sm:$0xff] }
 0x6ad   : > { %v10200_v40 = vrot.slane %v10199_v54, 1  ;;  %v10269_v3 = vadd.f32 %v10268_v19, %v10267_v28  ;;  %v10377_v28 = vld [vmem:[%s12988_s23 + $0x8] sm:$0xff]  ;;  %v10379_v19 = vld [vmem:[%s12988_s23 + $0x18] sm:$0xff] }
 0x6af   : > { %v10201_v41 = vadd.f32 %v10200_v40, %v10199_v54  ;;  %v10270_v4 = vrot.slane %v10269_v3, 1  ;;  %v10378_v54 = vld [vmem:[%s12988_s23 + $0x10] sm:$0xff] }
 0x6b1   : > { %v10271_v52 = vadd.f32 %v10270_v4, %v10269_v3  ;;  %v15195_v5 = vmul.f32 0.00390625, %v10201_v41 }
 0x6b3   : > { %v10274_v34 = vmul.f32 0.00390625, %v10271_v52  ;;  %v10275_v61 = vmul.f32 %v15195_v5, %v15195_v5  ;;  %v10312_v9 = vsub.f32 %v15037_v7, %v15195_v5  ;;  %v10313_v30 = vsub.f32 %v15041_v55, %v15195_v5  ;;  %v10380_v52 = vld [vmem:[%s12988_s23 + $0x20] sm:$0xff] }
 0x6b4   : > { %v10314_v46 = vsub.f32 %v15035_v15, %v15195_v5  ;;  %v10315_v16 = vsub.f32 %v15039_v11, %v15195_v5  ;;  %v10316_v6 = vsub.f32 %v15057_v48, %v15195_v5  ;;  %v10317_v57 = vsub.f32 %v15064_v25, %v15195_v5 }
 0x6b5   : > { %v10276_v38 = vsub.f32 %v10274_v34, %v10275_v61  ;;  %v10318_v20 = vsub.f32 %v15054_v47, %v15195_v5  ;;  %v10319_v7 = vsub.f32 %v15062_v53, %v15195_v5  ;;  %v10320_v55 = vsub.f32 %v15077_v39, %v15195_v5  ;;  %v10382_v34 = vld [vmem:[%s12988_s23 + $0x30] sm:$0xff]  ;;  %v10383_v61 = vld [vmem:[%s12988_s23 + $0x38] sm:$0xff] }
 0x6b6   : > { %v10321_v15 = vsub.f32 %v15084_v36, %v15195_v5  ;;  %v10322_v11 = vsub.f32 %v15074_v42, %v15195_v5  ;;  %v10323_v48 = vsub.f32 %v15082_v10, %v15195_v5  ;;  %v10324_v25 = vsub.f32 %v15097_v17, %v15195_v5 }
 0x6b7   : > { %v10277_v37 = vmax.f32 %v10276_v38, 0.0  ;;  %v10325_v47 = vsub.f32 %v15104_v45, %v15195_v5  ;;  %v10326_v53 = vsub.f32 %v15094_v21, %v15195_v5  ;;  %v10327_v39 = vsub.f32 %v15102_v62, %v15195_v5  ;;  %v10386_v38 = vld [vmem:[%s12988_s23 + $0x50] sm:$0xff] }
 0x6b8   : > { %v10328_v36 = vsub.f32 %v15117_v2, %v15195_v5  ;;  %v10329_v42 = vsub.f32 %v15124_v22, %v15195_v5  ;;  %v10330_v10 = vsub.f32 %v15114_v33, %v15195_v5  ;;  %v10331_v17 = vsub.f32 %v15122_v32, %v15195_v5 }
 0x6b9   : > { %v10278_v0 = vadd.f32 1e-05, %v10277_v37  ;;  %v10332_v45 = vsub.f32 %v15137_v24, %v15195_v5  ;;  %v10333_v21 = vsub.f32 %v15144_v58, %v15195_v5  ;;  %v10334_v62 = vsub.f32 %v15134_v44, %v15195_v5 }
 0x6ba   : > { %v10335_v2 = vsub.f32 %v15142_v51, %v15195_v5  ;;  %v10336_v22 = vsub.f32 %v15157_v50, %v15195_v5  ;;  %v10337_v33 = vsub.f32 %v15164_v8, %v15195_v5  ;;  %v10338_v32 = vsub.f32 %v15154_v26, %v15195_v5 }
 0x6bb   : > { %12902 = vrsqrt.f32 %v10278_v0  ;;  %v10339_v24 = vsub.f32 %v15162_v18, %v15195_v5  ;;  %v10340_v58 = vsub.f32 %v15177_v23, %v15195_v5  ;;  %v10341_v44 = vsub.f32 %v15184_v60, %v15195_v5  ;;  %v10394_v0 = vld [vmem:[%s12988_s23 + $0x90] sm:$0xff] }
 0x6bc   : > { %v10342_v51 = vsub.f32 %v15174_v35, %v15195_v5  ;;  %v10343_v50 = vsub.f32 %v15182_v63, %v15195_v5  ;;  %v10381_v5 = vld [vmem:[%s12988_s23 + $0x28] sm:$0xff] }
 0x6c5   : > { %v12903_v8 = vpop.eup %12902 }
 0x6c6   : > { %v10344_v29 = vmul.f32 %v12903_v8, %v10312_v9  ;;  %v10345_v26 = vmul.f32 %v12903_v8, %v10313_v30  ;;  %v10346_v14 = vmul.f32 %v12903_v8, %v10314_v46  ;;  %v10347_v18 = vmul.f32 %v12903_v8, %v10315_v16 }
 0x6c7   : > { %v10348_v13 = vmul.f32 %v12903_v8, %v10316_v6  ;;  %v10349_v23 = vmul.f32 %v12903_v8, %v10317_v57  ;;  %v10350_v1 = vmul.f32 %v12903_v8, %v10318_v20  ;;  %v10351_v56 = vmul.f32 %v12903_v8, %v10319_v7  ;;  %v10384_v6 = vld [vmem:[%s12988_s23 + $0x40] sm:$0xff]  ;;  %v10385_v57 = vld [vmem:[%s12988_s23 + $0x48] sm:$0xff] }
 0x6c8   : > { %v10352_v60 = vmul.f32 %v12903_v8, %v10320_v55  ;;  %v10353_v12 = vmul.f32 %v12903_v8, %v10321_v15  ;;  %v10354_v35 = vmul.f32 %v12903_v8, %v10322_v11  ;;  %v10355_v63 = vmul.f32 %v12903_v8, %v10323_v48  ;;  %v10387_v11 = vld [vmem:[%s12988_s23 + $0x58] sm:$0xff]  ;;  %v10388_v48 = vld [vmem:[%s12988_s23 + $0x60] sm:$0xff] }
 0x6c9   : > { %v15263_v43 = vmul.f32 %v12903_v8, %v10324_v25  ;;  %v15265_v31 = vmul.f32 %v12903_v8, %v10325_v47  ;;  %v15267_v27 = vmul.f32 %v12903_v8, %v10326_v53  ;;  %v15269_v59 = vmul.f32 %v12903_v8, %v10327_v39  ;;  %v10389_v25 = vld [vmem:[%s12988_s23 + $0x68] sm:$0xff] }
 0x6ca   : > { %v15275_v40 = vmul.f32 %v12903_v8, %v10328_v36  ;;  %v15277_v3 = vmul.f32 %v12903_v8, %v10329_v42  ;;  %v15279_v41 = vmul.f32 %v12903_v8, %v10330_v10  ;;  %v15281_v4 = vmul.f32 %v12903_v8, %v10331_v17  ;;  %v10390_v36 = vld [vmem:[%s12988_s23 + $0x70] sm:$0xff]  ;;  %v10391_v42 = vld [vmem:[%s12988_s23 + $0x78] sm:$0xff]  ;;  %v10392_v10 = vld [vmem:[%s12988_s23 + $0x80] sm:$0xff] }
 0x6cb   : > { %v15287_v9 = vmul.f32 %v12903_v8, %v10332_v45  ;;  %v15289_v30 = vmul.f32 %v12903_v8, %v10333_v21  ;;  %v15291_v46 = vmul.f32 %v12903_v8, %v10334_v62  ;;  %v15293_v16 = vmul.f32 %v12903_v8, %v10335_v2  ;;  %v10393_v17 = vld [vmem:[%s12988_s23 + $0x88] sm:$0xff]  ;;  %v10395_v45 = vld [vmem:[%s12988_s23 + $0x98] sm:$0xff] }
 0x6cc   : > { %v15298_v20 = vmul.f32 %v12903_v8, %v10336_v22  ;;  %v15300_v7 = vmul.f32 %v12903_v8, %v10337_v33  ;;  %v15302_v55 = vmul.f32 %v12903_v8, %v10338_v32  ;;  %v15304_v15 = vmul.f32 %v12903_v8, %v10339_v24  ;;  %v10396_v33 = vld [vmem:[%s12988_s23 + $0xa0] sm:$0xff]  ;;  %v10397_v32 = vld [vmem:[%s12988_s23 + $0xa8] sm:$0xff]  ;;  %v10398_v24 = vld [vmem:[%s12988_s23 + $0xb0] sm:$0xff] }
 0x6cd   : > { %v15316_v37 = vmul.f32 %v12903_v8, %v10340_v58  ;;  %v15318_v47 = vmul.f32 %v12903_v8, %v10341_v44  ;;  %v15320_v53 = vmul.f32 %v12903_v8, %v10342_v51  ;;  %v15322_v39 = vmul.f32 %v12903_v8, %v10343_v50  ;;  %v10399_v8 = vld [vmem:[%s12988_s23 + $0xb8] sm:$0xff] }
 0x6ce   : > { %v10408_v21 = vadd.f32 %v10376_v49, %v10344_v29  ;;  %v10409_v62 = vadd.f32 %v10377_v28, %v10345_v26  ;;  %v10410_v2 = vadd.f32 %v10378_v54, %v10346_v14  ;;  %v10411_v22 = vadd.f32 %v10379_v19, %v10347_v18  ;;  %v10401_v29 = vld [vmem:[%s12988_s23 + $0xc8] sm:$0xff]  ;;  %v10406_v28 = vld [vmem:[%s12988_s23 + $0xf0] sm:$0xff]  ;;  %v10407_v54 = vld [vmem:[%s12988_s23 + $0xf8] sm:$0xff] }
 0x6cf   : > { %15405 = vst [vmem:[#allocation4_spill] sm:$0xff] %v15322_v39  ;;  %v10412_v58 = vadd.f32 %v10380_v52, %v10348_v13  ;;  %v10413_v44 = vadd.f32 %v10381_v5, %v10349_v23  ;;  %v10414_v51 = vadd.f32 %v10382_v34, %v10350_v1  ;;  %v10415_v50 = vadd.f32 %v10383_v61, %v10351_v56  ;;  %v10400_v39 = vld [vmem:[%s12988_s23 + $0xc0] sm:$0xff]  ;;  %v10402_v13 = vld [vmem:[%s12988_s23 + $0xd0] sm:$0xff]  ;;  %v10403_v23 = vld [vmem:[%s12988_s23 + $0xd8] sm:$0xff] }
 0x6d0   : > { %v10416_v26 = vadd.f32 %v10384_v6, %v10352_v60  ;;  %v10417_v14 = vadd.f32 %v10385_v57, %v10353_v12  ;;  %v10418_v18 = vadd.f32 %v10386_v38, %v10354_v35  ;;  %v10419_v49 = vadd.f32 %v10387_v11, %v10355_v63  ;;  %10440 = vst [vmem:[%s15314_s5] sm:$0xff] %v10408_v21  ;;  %v10404_v1 = vld [vmem:[%s12988_s23 + $0xe0] sm:$0xff]  ;;  %v10405_v63 = vld [vmem:[%s12988_s23 + $0xe8] sm:$0xff] }
 0x6d1   : > { %10441 = vst [vmem:[%s15314_s5 + $0x8] sm:$0xff] %v10409_v62  ;;  %10442 = vst [vmem:[%s15314_s5 + $0x10] sm:$0xff] %v10410_v2  ;;  %v10420_v56 = vadd.f32 %v10388_v48, %v15263_v43  ;;  %v10421_v60 = vadd.f32 %v10389_v25, %v15265_v31  ;;  %v10422_v12 = vadd.f32 %v10390_v36, %v15267_v27 }
 0x6d2   : > { %10443 = vst [vmem:[%s15314_s5 + $0x18] sm:$0xff] %v10411_v22  ;;  %v10423_v35 = vadd.f32 %v10391_v42, %v15269_v59  ;;  %10444 = vst [vmem:[%s15314_s5 + $0x20] sm:$0xff] %v10412_v58  ;;  %v10424_v43 = vadd.f32 %v10392_v10, %v15275_v40  ;;  %v10425_v31 = vadd.f32 %v10393_v17, %v15277_v3 }
 0x6d3   : > { %10445 = vst [vmem:[%s15314_s5 + $0x28] sm:$0xff] %v10413_v44  ;;  %10446 = vst [vmem:[%s15314_s5 + $0x30] sm:$0xff] %v10414_v51  ;;  %v10426_v27 = vadd.f32 %v10394_v0, %v15279_v41  ;;  %v10427_v19 = vadd.f32 %v10395_v45, %v15281_v4  ;;  %v10428_v59 = vadd.f32 %v10396_v33, %v15287_v9 }
 0x6d4   : > { %10447 = vst [vmem:[%s15314_s5 + $0x38] sm:$0xff] %v10415_v50  ;;  %10448 = vst [vmem:[%s15314_s5 + $0x40] sm:$0xff] %v10416_v26  ;;  %v10429_v52 = vadd.f32 %v10397_v32, %v15289_v30  ;;  %v10430_v40 = vadd.f32 %v10398_v24, %v15291_v46  ;;  %v10431_v3 = vadd.f32 %v10399_v8, %v15293_v16 }
 0x6d5   : > { %10449 = vst [vmem:[%s15314_s5 + $0x48] sm:$0xff] %v10417_v14  ;;  %10450 = vst [vmem:[%s15314_s5 + $0x50] sm:$0xff] %v10418_v18  ;;  %v10432_v41 = vadd.f32 %v10400_v39, %v15298_v20  ;;  %v10433_v4 = vadd.f32 %v10401_v29, %v15300_v7  ;;  %v10434_v5 = vadd.f32 %v10402_v13, %v15302_v55 }
 0x6d6   : > { %10451 = vst [vmem:[%s15314_s5 + $0x58] sm:$0xff] %v10419_v49  ;;  %10452 = vst [vmem:[%s15314_s5 + $0x60] sm:$0xff] %v10420_v56  ;;  %v10435_v34 = vadd.f32 %v10403_v23, %v15304_v15  ;;  %v10436_v61 = vadd.f32 %v10404_v1, %v15316_v37  ;;  %v10437_v9 = vadd.f32 %v10405_v63, %v15318_v47  ;;  %v15406_v46 = vld [vmem:[#allocation4_spill] sm:$0xff] }
 0x6d7   : > { %10453 = vst [vmem:[%s15314_s5 + $0x68] sm:$0xff] %v10421_v60  ;;  %10454 = vst [vmem:[%s15314_s5 + $0x70] sm:$0xff] %v10422_v12  ;;  %v10438_v30 = vadd.f32 %v10406_v28, %v15320_v53  ;;  %v10439_v16 = vadd.f32 %v10407_v54, %v15406_v46 }
 0x6d8   : > { %10455 = vst [vmem:[%s15314_s5 + $0x78] sm:$0xff] %v10423_v35  ;;  %10456 = vst [vmem:[%s15314_s5 + $0x80] sm:$0xff] %v10424_v43 }
 0x6d9   : > { %10457 = vst [vmem:[%s15314_s5 + $0x88] sm:$0xff] %v10425_v31  ;;  %10458 = vst [vmem:[%s15314_s5 + $0x90] sm:$0xff] %v10426_v27 }
 0x6da   : > { %10459 = vst [vmem:[%s15314_s5 + $0x98] sm:$0xff] %v10427_v19  ;;  %10460 = vst [vmem:[%s15314_s5 + $0xa0] sm:$0xff] %v10428_v59 }
 0x6db   : > { %10461 = vst [vmem:[%s15314_s5 + $0xa8] sm:$0xff] %v10429_v52  ;;  %10462 = vst [vmem:[%s15314_s5 + $0xb0] sm:$0xff] %v10430_v40 }
 0x6dc   : > { %10463 = vst [vmem:[%s15314_s5 + $0xb8] sm:$0xff] %v10431_v3  ;;  %10464 = vst [vmem:[%s15314_s5 + $0xc0] sm:$0xff] %v10432_v41 }
 0x6dd   : > { %10465 = vst [vmem:[%s15314_s5 + $0xc8] sm:$0xff] %v10433_v4  ;;  %10466 = vst [vmem:[%s15314_s5 + $0xd0] sm:$0xff] %v10434_v5 }
 0x6de   : > { %10467 = vst [vmem:[%s15314_s5 + $0xd8] sm:$0xff] %v10435_v34  ;;  %10468 = vst [vmem:[%s15314_s5 + $0xe0] sm:$0xff] %v10436_v61 }
 0x6df   : > { %10469 = vst [vmem:[%s15314_s5 + $0xe8] sm:$0xff] %v10437_v9  ;;  %10470 = vst [vmem:[%s15314_s5 + $0xf0] sm:$0xff] %v10438_v30 }
 0x6e0   : > { %10471 = vst [vmem:[%s15314_s5 + $0xf8] sm:$0xff] %v10439_v16 }
 0x6e1 PF: > { %s13_s12 = sadd.s32 1, %s12941_s12  }
 0x6e2   : > { %p10_p4 = scmp.ge.s32.totalorder %s13_s12, 4  }
 0x6e4   :  { %12 = sbr.rel (!%p10_p4) target bundleno = 1 (0x1), region = 82 }

</bundles_post_ra>
